<compile_context>
chip_gen: v7x
topology: tpu7x:2x2x1
jax: 0.10.0
libtpu: 0.0.40
codegen_flags: <defaults>
</compile_context>

<pallas_src>
import math

import jax
import jax.numpy as jnp
from jax.experimental import pallas as pl
from jax.experimental.pallas import tpu as pltpu

C_IN = 3
C_OUT = 16
H = W = 224
HO = WO = 112
KSIZE = 3
NPOOL = HO * WO            # 12544 = 98 * 128  (lane-dense flattened spatial)
NTAP = C_IN * 16           # 48 de-duplicated polyphase taps (ci, s, t)
NPHASE = 4                 # 2x2 pooling phases
FC_IN = C_OUT * NPOOL      # 200704
FC_OUT = 4
TK = 50176                 # FC reduction tile: 200704 / 50176 = 4 grid steps
CW = 896                   # conv kernel column chunk (7*128); 12544 / 896 = 14


# ---------------------------------------------------------------------------
# Kernel 1: fused conv2d(3->16, k=3, s=1, p=1) + bias + ReLU + maxpool(2x2),
# computed on the MXU.  grid = (batch,), one invocation = one whole image.
# ---------------------------------------------------------------------------
def _conv_relu_pool_kernel(u_ref, w_ref, b_ref, o_ref):
    # u_ref : (1, 48, 12544) VMEM  polyphase im2col input for one image
    # w_ref : (64, 48)       VMEM  4 phases x 16 channels of conv weights
    # b_ref : (16, 1)        VMEM  conv bias
    # o_ref : (1, 16, 12544) VMEM  pooled output, flat (ho*112 + wo), lane-dense
    for c in range(NPOOL // CW):
        sl = slice(c * CW, (c + 1) * CW)
        blk = jnp.dot(w_ref[...], u_ref[0, :, sl],
                      preferred_element_type=jnp.float32)        # (64, CW) MXU
        # max over the 4 pooling phases (rows p*16 .. p*16+15)
        m = jnp.maximum(jnp.maximum(blk[0:16], blk[16:32]),
                        jnp.maximum(blk[32:48], blk[48:64]))      # (16, CW)
        # relu(conv + b) then max  ==  relu(max(conv) + b)  (b is per-channel)
        o_ref[0, :, sl] = jnp.maximum(m + b_ref[...], 0.0)


def _build_u(x):
    """(N,3,224,224) -> (N, 48, 12544) de-duplicated polyphase im2col."""
    n = x.shape[0]
    xp = jnp.pad(x, ((0, 0), (0, 0), (1, 1), (1, 1)))             # (N,3,226,226)
    slabs = [xp[:, :, s:s + 2 * HO - 1:2, t:t + 2 * WO - 1:2]     # (N,3,112,112)
             for s in range(4) for t in range(4)]
    u = jnp.stack(slabs, axis=2)                                  # (N,3,16,112,112)
    return u.reshape(n, NTAP, NPOOL)


def _build_wall(conv_w):
    """(16,3,3,3) -> (64, 48): row = (a*2+b)*16 + co, col = ci*16 + s*4 + t."""
    wp = jnp.zeros((2, 2, C_OUT, C_IN, 4, 4), conv_w.dtype)
    for a in range(2):
        for b in range(2):
            wp = wp.at[a, b, :, :, a:a + 3, b:b + 3].set(conv_w)
    return wp.reshape(NPHASE * C_OUT, NTAP)


def conv_relu_pool(x, conv_w, conv_b):
    n = x.shape[0]
    u = _build_u(x)                                   # (N, 48, 12544)
    w_all = _build_wall(conv_w)                       # (64, 48)
    b_col = conv_b.reshape(C_OUT, 1)                  # (16, 1)

    grid_spec = pltpu.PrefetchScalarGridSpec(
        num_scalar_prefetch=0,
        grid=(n,),
        in_specs=[
            pl.BlockSpec((1, NTAP, NPOOL), lambda i: (i, 0, 0)),
            pl.BlockSpec((NPHASE * C_OUT, NTAP), lambda i: (0, 0)),
            pl.BlockSpec((C_OUT, 1), lambda i: (0, 0)),
        ],
        out_specs=pl.BlockSpec((1, C_OUT, NPOOL), lambda i: (i, 0, 0)),
    )
    return pl.pallas_call(
        _conv_relu_pool_kernel,
        out_shape=jax.ShapeDtypeStruct((n, C_OUT, NPOOL), jnp.float32),
        grid_spec=grid_spec,
        compiler_params=pltpu.CompilerParams(
            dimension_semantics=("parallel",)),
    )(u, w_all, b_col)


# ---------------------------------------------------------------------------
# Kernel 2: fc1  (N, 200704) x (4, 200704)^T + bias, K-tiled with accumulator.
# ---------------------------------------------------------------------------
def _fc_kernel(x_ref, w_ref, b_ref, o_ref, acc_ref):
    k = pl.program_id(0)

    @pl.when(k == 0)
    def _():
        acc_ref[...] = jnp.zeros_like(acc_ref)

    # (N, TK) . (4, TK)^T  -> (N, 4); both operands stay lane-dense (TK % 128 == 0)
    acc_ref[...] += jax.lax.dot_general(
        x_ref[...], w_ref[...],
        dimension_numbers=(((1,), (1,)), ((), ())),
        preferred_element_type=jnp.float32)

    @pl.when(k == pl.num_programs(0) - 1)
    def _():
        o_ref[...] = (acc_ref[...] + b_ref[...]).astype(o_ref.dtype)


def fc(x_flat, fc_w, fc_b):
    n, kdim = x_flat.shape
    b2 = fc_b.reshape(1, FC_OUT)
    nsteps = kdim // TK                               # 4

    grid_spec = pltpu.PrefetchScalarGridSpec(
        num_scalar_prefetch=0,
        grid=(nsteps,),
        in_specs=[
            pl.BlockSpec((n, TK), lambda k: (0, k)),
            pl.BlockSpec((FC_OUT, TK), lambda k: (0, k)),   # fc_w NOT transposed
            pl.BlockSpec((1, FC_OUT), lambda k: (0, 0)),
        ],
        out_specs=pl.BlockSpec((n, FC_OUT), lambda k: (0, 0)),
        scratch_shapes=[pltpu.VMEM((n, FC_OUT), jnp.float32)],
    )
    return pl.pallas_call(
        _fc_kernel,
        out_shape=jax.ShapeDtypeStruct((n, FC_OUT), jnp.float32),
        grid_spec=grid_spec,
        compiler_params=pltpu.CompilerParams(
            dimension_semantics=("arbitrary",)),
    )(x_flat, fc_w, b2)


@jax.jit
def simple_cnn_brain_forward(x, conv_w, conv_b, fc_w, fc_b):
    pooled = conv_relu_pool(x, conv_w, conv_b)        # (N, 16, 12544), torch order
    flat = pooled.reshape(x.shape[0], FC_IN)          # free reshape, matches .view
    return fc(flat, fc_w, fc_b)                       # (N, 4)


# ---------------------------------------------------------------------------
# Pure-JAX reference for validation.
# ---------------------------------------------------------------------------
def reference_forward(x, conv_w, conv_b, fc_w, fc_b):
    y = jax.lax.conv_general_dilated(
        x, conv_w, window_strides=(1, 1), padding=((1, 1), (1, 1)),
        dimension_numbers=("NCHW", "OIHW", "NCHW"),
        precision=jax.lax.Precision.HIGHEST)
    y = jnp.maximum(y + conv_b.reshape(1, C_OUT, 1, 1), 0.0)
    y = jax.lax.reduce_window(y, -jnp.inf, jax.lax.max,
                              (1, 1, 2, 2), (1, 1, 2, 2), "VALID")
    flat = y.reshape(x.shape[0], -1)
    return jnp.dot(flat, fc_w.T, precision=jax.lax.Precision.HIGHEST) + fc_b


if __name__ == "__main__":
    key = jax.random.PRNGKey(0)
    kx, kw1, kb1, kw2, kb2 = jax.random.split(key, 5)

    batch = 2
    # Input spatial size is dictated by fc1's 16*112*112 flatten -> 3x224x224.
    x = jax.random.normal(kx, (batch, C_IN, H, W), dtype=jnp.float32)
    conv_w = 0.1 * jax.random.normal(kw1, (C_OUT, C_IN, KSIZE, KSIZE),
                                     dtype=jnp.float32)
    conv_b = 0.1 * jax.random.normal(kb1, (C_OUT,), dtype=jnp.float32)
    fc_w = jax.random.normal(kw2, (FC_OUT, FC_IN),
                             dtype=jnp.float32) / math.sqrt(FC_IN)
    fc_b = 0.1 * jax.random.normal(kb2, (FC_OUT,), dtype=jnp.float32)

    out = simple_cnn_brain_forward(x, conv_w, conv_b, fc_w, fc_b)
    out = jax.block_until_ready(out)

    ref = reference_forward(x, conv_w, conv_b, fc_w, fc_b)
    assert out.shape == (batch, FC_OUT)
    assert jnp.allclose(out, ref, rtol=2e-2, atol=2e-2), (out, ref)
    print("KERNEL_OK")
</pallas_src>

<mosaic_0001>
module attributes {stable_mosaic.version = 11 : i64} {
  func.func @_conv_relu_pool_kernel(%arg0: i32, %arg1: memref<1x48x12544xf32, #tpu.memory_space<vmem>>, %arg2: memref<64x48xf32, #tpu.memory_space<vmem>>, %arg3: memref<16x1xf32, #tpu.memory_space<vmem>>, %arg4: memref<1x16x12544xf32, #tpu.memory_space<vmem>>) attributes {dimension_semantics = [#tpu.dimension_semantics<parallel>], iteration_bounds = array<i64: 2>, scalar_prefetch = 0 : i64, scratch_operands = 0 : i64, tpu.core_type = #tpu.core_type<tc>, window_params = [{transform_indices = @transform_0, window_bounds = array<i64: 1, 48, 12544>}, {pipeline_mode = #tpu.pipeline_mode<synchronous>, transform_indices = @transform_1, window_bounds = array<i64: 64, 48>}, {pipeline_mode = #tpu.pipeline_mode<synchronous>, transform_indices = @transform_2, window_bounds = array<i64: 16, 1>}, {transform_indices = @transform_3, window_bounds = array<i64: 1, 16, 12544>}]} {
    %c0 = arith.constant 0 : index
    %c0_0 = arith.constant 0 : index
    %0 = vector.load %arg2[%c0, %c0_0] : memref<64x48xf32, #tpu.memory_space<vmem>>, vector<64x48xf32>
    %c0_1 = arith.constant 0 : index
    %c0_2 = arith.constant 0 : index
    %c0_3 = arith.constant 0 : index
    %1 = vector.load %arg1[%c0_1, %c0_2, %c0_3] : memref<1x48x12544xf32, #tpu.memory_space<vmem>>, vector<1x48x896xf32>
    %2 = vector.shape_cast %1 : vector<1x48x896xf32> to vector<48x896xf32>
    %cst = arith.constant dense<0.000000e+00> : vector<64x896xf32>
    %3 = tpu.matmul %0, %2, %cst {dimension_numbers = #tpu.dot_dimension_numbers<[1], [0], [0], [1], [0, 0, 1, 1], [], []>} : vector<64x48xf32>, vector<48x896xf32>, vector<64x896xf32> -> vector<64x896xf32>
    %4 = vector.extract_strided_slice %3 {offsets = [0, 0], sizes = [16, 896], strides = [1, 1]} : vector<64x896xf32> to vector<16x896xf32>
    %5 = vector.extract_strided_slice %3 {offsets = [16, 0], sizes = [16, 896], strides = [1, 1]} : vector<64x896xf32> to vector<16x896xf32>
    %6 = arith.maximumf %4, %5 : vector<16x896xf32>
    %7 = vector.extract_strided_slice %3 {offsets = [32, 0], sizes = [16, 896], strides = [1, 1]} : vector<64x896xf32> to vector<16x896xf32>
    %8 = vector.extract_strided_slice %3 {offsets = [48, 0], sizes = [16, 896], strides = [1, 1]} : vector<64x896xf32> to vector<16x896xf32>
    %9 = arith.maximumf %7, %8 : vector<16x896xf32>
    %10 = arith.maximumf %6, %9 : vector<16x896xf32>
    %c0_4 = arith.constant 0 : index
    %c0_5 = arith.constant 0 : index
    %11 = vector.load %arg3[%c0_4, %c0_5] : memref<16x1xf32, #tpu.memory_space<vmem>>, vector<16x1xf32>
    %12 = vector.broadcast %11 : vector<16x1xf32> to vector<16x896xf32>
    %13 = arith.addf %10, %12 : vector<16x896xf32>
    %cst_6 = arith.constant 0.000000e+00 : f32
    %14 = vector.broadcast %cst_6 : f32 to vector<16x896xf32>
    %15 = arith.maximumf %13, %14 : vector<16x896xf32>
    %c0_7 = arith.constant 0 : index
    %c0_8 = arith.constant 0 : index
    %c0_9 = arith.constant 0 : index
    %16 = vector.load %arg4[%c0_7, %c0_8, %c0_9] : memref<1x16x12544xf32, #tpu.memory_space<vmem>>, vector<1x16x896xf32>
    %17 = vector.shape_cast %16 : vector<1x16x896xf32> to vector<16x896xf32>
    %18 = vector.shape_cast %15 : vector<16x896xf32> to vector<1x16x896xf32>
    tpu.vector_store %arg4[%c0_7, %c0_8, %c0_9], %18 {strides = array<i32>} : memref<1x16x12544xf32, #tpu.memory_space<vmem>>, vector<1x16x896xf32>,
    %c0_10 = arith.constant 0 : index
    %c0_11 = arith.constant 0 : index
    %19 = vector.load %arg2[%c0_10, %c0_11] : memref<64x48xf32, #tpu.memory_space<vmem>>, vector<64x48xf32>
    %c0_12 = arith.constant 0 : index
    %c0_13 = arith.constant 0 : index
    %c896 = arith.constant 896 : index
    %20 = vector.load %arg1[%c0_12, %c0_13, %c896] : memref<1x48x12544xf32, #tpu.memory_space<vmem>>, vector<1x48x896xf32>
    %21 = vector.shape_cast %20 : vector<1x48x896xf32> to vector<48x896xf32>
    %cst_14 = arith.constant dense<0.000000e+00> : vector<64x896xf32>
    %22 = tpu.matmul %19, %21, %cst_14 {dimension_numbers = #tpu.dot_dimension_numbers<[1], [0], [0], [1], [0, 0, 1, 1], [], []>} : vector<64x48xf32>, vector<48x896xf32>, vector<64x896xf32> -> vector<64x896xf32>
    %23 = vector.extract_strided_slice %22 {offsets = [0, 0], sizes = [16, 896], strides = [1, 1]} : vector<64x896xf32> to vector<16x896xf32>
    %24 = vector.extract_strided_slice %22 {offsets = [16, 0], sizes = [16, 896], strides = [1, 1]} : vector<64x896xf32> to vector<16x896xf32>
    %25 = arith.maximumf %23, %24 : vector<16x896xf32>
    %26 = vector.extract_strided_slice %22 {offsets = [32, 0], sizes = [16, 896], strides = [1, 1]} : vector<64x896xf32> to vector<16x896xf32>
    %27 = vector.extract_strided_slice %22 {offsets = [48, 0], sizes = [16, 896], strides = [1, 1]} : vector<64x896xf32> to vector<16x896xf32>
    %28 = arith.maximumf %26, %27 : vector<16x896xf32>
    %29 = arith.maximumf %25, %28 : vector<16x896xf32>
    %c0_15 = arith.constant 0 : index
    %c0_16 = arith.constant 0 : index
    %30 = vector.load %arg3[%c0_15, %c0_16] : memref<16x1xf32, #tpu.memory_space<vmem>>, vector<16x1xf32>
    %31 = vector.broadcast %30 : vector<16x1xf32> to vector<16x896xf32>
    %32 = arith.addf %29, %31 : vector<16x896xf32>
    %cst_17 = arith.constant 0.000000e+00 : f32
    %33 = vector.broadcast %cst_17 : f32 to vector<16x896xf32>
    %34 = arith.maximumf %32, %33 : vector<16x896xf32>
    %c0_18 = arith.constant 0 : index
    %c0_19 = arith.constant 0 : index
    %c896_20 = arith.constant 896 : index
    %35 = vector.load %arg4[%c0_18, %c0_19, %c896_20] : memref<1x16x12544xf32, #tpu.memory_space<vmem>>, vector<1x16x896xf32>
    %36 = vector.shape_cast %35 : vector<1x16x896xf32> to vector<16x896xf32>
    %37 = vector.shape_cast %34 : vector<16x896xf32> to vector<1x16x896xf32>
    tpu.vector_store %arg4[%c0_18, %c0_19, %c896_20], %37 {strides = array<i32>} : memref<1x16x12544xf32, #tpu.memory_space<vmem>>, vector<1x16x896xf32>,
    %c0_21 = arith.constant 0 : index
    %c0_22 = arith.constant 0 : index
    %38 = vector.load %arg2[%c0_21, %c0_22] : memref<64x48xf32, #tpu.memory_space<vmem>>, vector<64x48xf32>
    %c0_23 = arith.constant 0 : index
    %c0_24 = arith.constant 0 : index
    %c1792 = arith.constant 1792 : index
    %39 = vector.load %arg1[%c0_23, %c0_24, %c1792] : memref<1x48x12544xf32, #tpu.memory_space<vmem>>, vector<1x48x896xf32>
    %40 = vector.shape_cast %39 : vector<1x48x896xf32> to vector<48x896xf32>
    %cst_25 = arith.constant dense<0.000000e+00> : vector<64x896xf32>
    %41 = tpu.matmul %38, %40, %cst_25 {dimension_numbers = #tpu.dot_dimension_numbers<[1], [0], [0], [1], [0, 0, 1, 1], [], []>} : vector<64x48xf32>, vector<48x896xf32>, vector<64x896xf32> -> vector<64x896xf32>
    %42 = vector.extract_strided_slice %41 {offsets = [0, 0], sizes = [16, 896], strides = [1, 1]} : vector<64x896xf32> to vector<16x896xf32>
    %43 = vector.extract_strided_slice %41 {offsets = [16, 0], sizes = [16, 896], strides = [1, 1]} : vector<64x896xf32> to vector<16x896xf32>
    %44 = arith.maximumf %42, %43 : vector<16x896xf32>
    %45 = vector.extract_strided_slice %41 {offsets = [32, 0], sizes = [16, 896], strides = [1, 1]} : vector<64x896xf32> to vector<16x896xf32>
    %46 = vector.extract_strided_slice %41 {offsets = [48, 0], sizes = [16, 896], strides = [1, 1]} : vector<64x896xf32> to vector<16x896xf32>
    %47 = arith.maximumf %45, %46 : vector<16x896xf32>
    %48 = arith.maximumf %44, %47 : vector<16x896xf32>
    %c0_26 = arith.constant 0 : index
    %c0_27 = arith.constant 0 : index
    %49 = vector.load %arg3[%c0_26, %c0_27] : memref<16x1xf32, #tpu.memory_space<vmem>>, vector<16x1xf32>
    %50 = vector.broadcast %49 : vector<16x1xf32> to vector<16x896xf32>
    %51 = arith.addf %48, %50 : vector<16x896xf32>
    %cst_28 = arith.constant 0.000000e+00 : f32
    %52 = vector.broadcast %cst_28 : f32 to vector<16x896xf32>
    %53 = arith.maximumf %51, %52 : vector<16x896xf32>
    %c0_29 = arith.constant 0 : index
    %c0_30 = arith.constant 0 : index
    %c1792_31 = arith.constant 1792 : index
    %54 = vector.load %arg4[%c0_29, %c0_30, %c1792_31] : memref<1x16x12544xf32, #tpu.memory_space<vmem>>, vector<1x16x896xf32>
    %55 = vector.shape_cast %54 : vector<1x16x896xf32> to vector<16x896xf32>
    %56 = vector.shape_cast %53 : vector<16x896xf32> to vector<1x16x896xf32>
    tpu.vector_store %arg4[%c0_29, %c0_30, %c1792_31], %56 {strides = array<i32>} : memref<1x16x12544xf32, #tpu.memory_space<vmem>>, vector<1x16x896xf32>,
    %c0_32 = arith.constant 0 : index
    %c0_33 = arith.constant 0 : index
    %57 = vector.load %arg2[%c0_32, %c0_33] : memref<64x48xf32, #tpu.memory_space<vmem>>, vector<64x48xf32>
    %c0_34 = arith.constant 0 : index
    %c0_35 = arith.constant 0 : index
    %c2688 = arith.constant 2688 : index
    %58 = vector.load %arg1[%c0_34, %c0_35, %c2688] : memref<1x48x12544xf32, #tpu.memory_space<vmem>>, vector<1x48x896xf32>
    %59 = vector.shape_cast %58 : vector<1x48x896xf32> to vector<48x896xf32>
    %cst_36 = arith.constant dense<0.000000e+00> : vector<64x896xf32>
    %60 = tpu.matmul %57, %59, %cst_36 {dimension_numbers = #tpu.dot_dimension_numbers<[1], [0], [0], [1], [0, 0, 1, 1], [], []>} : vector<64x48xf32>, vector<48x896xf32>, vector<64x896xf32> -> vector<64x896xf32>
    %61 = vector.extract_strided_slice %60 {offsets = [0, 0], sizes = [16, 896], strides = [1, 1]} : vector<64x896xf32> to vector<16x896xf32>
    %62 = vector.extract_strided_slice %60 {offsets = [16, 0], sizes = [16, 896], strides = [1, 1]} : vector<64x896xf32> to vector<16x896xf32>
    %63 = arith.maximumf %61, %62 : vector<16x896xf32>
    %64 = vector.extract_strided_slice %60 {offsets = [32, 0], sizes = [16, 896], strides = [1, 1]} : vector<64x896xf32> to vector<16x896xf32>
    %65 = vector.extract_strided_slice %60 {offsets = [48, 0], sizes = [16, 896], strides = [1, 1]} : vector<64x896xf32> to vector<16x896xf32>
    %66 = arith.maximumf %64, %65 : vector<16x896xf32>
    %67 = arith.maximumf %63, %66 : vector<16x896xf32>
    %c0_37 = arith.constant 0 : index
    %c0_38 = arith.constant 0 : index
    %68 = vector.load %arg3[%c0_37, %c0_38] : memref<16x1xf32, #tpu.memory_space<vmem>>, vector<16x1xf32>
    %69 = vector.broadcast %68 : vector<16x1xf32> to vector<16x896xf32>
    %70 = arith.addf %67, %69 : vector<16x896xf32>
    %cst_39 = arith.constant 0.000000e+00 : f32
    %71 = vector.broadcast %cst_39 : f32 to vector<16x896xf32>
    %72 = arith.maximumf %70, %71 : vector<16x896xf32>
    %c0_40 = arith.constant 0 : index
    %c0_41 = arith.constant 0 : index
    %c2688_42 = arith.constant 2688 : index
    %73 = vector.load %arg4[%c0_40, %c0_41, %c2688_42] : memref<1x16x12544xf32, #tpu.memory_space<vmem>>, vector<1x16x896xf32>
    %74 = vector.shape_cast %73 : vector<1x16x896xf32> to vector<16x896xf32>
    %75 = vector.shape_cast %72 : vector<16x896xf32> to vector<1x16x896xf32>
    tpu.vector_store %arg4[%c0_40, %c0_41, %c2688_42], %75 {strides = array<i32>} : memref<1x16x12544xf32, #tpu.memory_space<vmem>>, vector<1x16x896xf32>,
    %c0_43 = arith.constant 0 : index
    %c0_44 = arith.constant 0 : index
    %76 = vector.load %arg2[%c0_43, %c0_44] : memref<64x48xf32, #tpu.memory_space<vmem>>, vector<64x48xf32>
    %c0_45 = arith.constant 0 : index
    %c0_46 = arith.constant 0 : index
    %c3584 = arith.constant 3584 : index
    %77 = vector.load %arg1[%c0_45, %c0_46, %c3584] : memref<1x48x12544xf32, #tpu.memory_space<vmem>>, vector<1x48x896xf32>
    %78 = vector.shape_cast %77 : vector<1x48x896xf32> to vector<48x896xf32>
    %cst_47 = arith.constant dense<0.000000e+00> : vector<64x896xf32>
    %79 = tpu.matmul %76, %78, %cst_47 {dimension_numbers = #tpu.dot_dimension_numbers<[1], [0], [0], [1], [0, 0, 1, 1], [], []>} : vector<64x48xf32>, vector<48x896xf32>, vector<64x896xf32> -> vector<64x896xf32>
    %80 = vector.extract_strided_slice %79 {offsets = [0, 0], sizes = [16, 896], strides = [1, 1]} : vector<64x896xf32> to vector<16x896xf32>
    %81 = vector.extract_strided_slice %79 {offsets = [16, 0], sizes = [16, 896], strides = [1, 1]} : vector<64x896xf32> to vector<16x896xf32>
    %82 = arith.maximumf %80, %81 : vector<16x896xf32>
    %83 = vector.extract_strided_slice %79 {offsets = [32, 0], sizes = [16, 896], strides = [1, 1]} : vector<64x896xf32> to vector<16x896xf32>
    %84 = vector.extract_strided_slice %79 {offsets = [48, 0], sizes = [16, 896], strides = [1, 1]} : vector<64x896xf32> to vector<16x896xf32>
    %85 = arith.maximumf %83, %84 : vector<16x896xf32>
    %86 = arith.maximumf %82, %85 : vector<16x896xf32>
    %c0_48 = arith.constant 0 : index
    %c0_49 = arith.constant 0 : index
    %87 = vector.load %arg3[%c0_48, %c0_49] : memref<16x1xf32, #tpu.memory_space<vmem>>, vector<16x1xf32>
    %88 = vector.broadcast %87 : vector<16x1xf32> to vector<16x896xf32>
    %89 = arith.addf %86, %88 : vector<16x896xf32>
    %cst_50 = arith.constant 0.000000e+00 : f32
    %90 = vector.broadcast %cst_50 : f32 to vector<16x896xf32>
    %91 = arith.maximumf %89, %90 : vector<16x896xf32>
    %c0_51 = arith.constant 0 : index
    %c0_52 = arith.constant 0 : index
    %c3584_53 = arith.constant 3584 : index
    %92 = vector.load %arg4[%c0_51, %c0_52, %c3584_53] : memref<1x16x12544xf32, #tpu.memory_space<vmem>>, vector<1x16x896xf32>
    %93 = vector.shape_cast %92 : vector<1x16x896xf32> to vector<16x896xf32>
    %94 = vector.shape_cast %91 : vector<16x896xf32> to vector<1x16x896xf32>
    tpu.vector_store %arg4[%c0_51, %c0_52, %c3584_53], %94 {strides = array<i32>} : memref<1x16x12544xf32, #tpu.memory_space<vmem>>, vector<1x16x896xf32>,
    %c0_54 = arith.constant 0 : index
    %c0_55 = arith.constant 0 : index
    %95 = vector.load %arg2[%c0_54, %c0_55] : memref<64x48xf32, #tpu.memory_space<vmem>>, vector<64x48xf32>
    %c0_56 = arith.constant 0 : index
    %c0_57 = arith.constant 0 : index
    %c4480 = arith.constant 4480 : index
    %96 = vector.load %arg1[%c0_56, %c0_57, %c4480] : memref<1x48x12544xf32, #tpu.memory_space<vmem>>, vector<1x48x896xf32>
    %97 = vector.shape_cast %96 : vector<1x48x896xf32> to vector<48x896xf32>
    %cst_58 = arith.constant dense<0.000000e+00> : vector<64x896xf32>
    %98 = tpu.matmul %95, %97, %cst_58 {dimension_numbers = #tpu.dot_dimension_numbers<[1], [0], [0], [1], [0, 0, 1, 1], [], []>} : vector<64x48xf32>, vector<48x896xf32>, vector<64x896xf32> -> vector<64x896xf32>
    %99 = vector.extract_strided_slice %98 {offsets = [0, 0], sizes = [16, 896], strides = [1, 1]} : vector<64x896xf32> to vector<16x896xf32>
    %100 = vector.extract_strided_slice %98 {offsets = [16, 0], sizes = [16, 896], strides = [1, 1]} : vector<64x896xf32> to vector<16x896xf32>
    %101 = arith.maximumf %99, %100 : vector<16x896xf32>
    %102 = vector.extract_strided_slice %98 {offsets = [32, 0], sizes = [16, 896], strides = [1, 1]} : vector<64x896xf32> to vector<16x896xf32>
    %103 = vector.extract_strided_slice %98 {offsets = [48, 0], sizes = [16, 896], strides = [1, 1]} : vector<64x896xf32> to vector<16x896xf32>
    %104 = arith.maximumf %102, %103 : vector<16x896xf32>
    %105 = arith.maximumf %101, %104 : vector<16x896xf32>
    %c0_59 = arith.constant 0 : index
    %c0_60 = arith.constant 0 : index
    %106 = vector.load %arg3[%c0_59, %c0_60] : memref<16x1xf32, #tpu.memory_space<vmem>>, vector<16x1xf32>
    %107 = vector.broadcast %106 : vector<16x1xf32> to vector<16x896xf32>
    %108 = arith.addf %105, %107 : vector<16x896xf32>
    %cst_61 = arith.constant 0.000000e+00 : f32
    %109 = vector.broadcast %cst_61 : f32 to vector<16x896xf32>
    %110 = arith.maximumf %108, %109 : vector<16x896xf32>
    %c0_62 = arith.constant 0 : index
    %c0_63 = arith.constant 0 : index
    %c4480_64 = arith.constant 4480 : index
    %111 = vector.load %arg4[%c0_62, %c0_63, %c4480_64] : memref<1x16x12544xf32, #tpu.memory_space<vmem>>, vector<1x16x896xf32>
    %112 = vector.shape_cast %111 : vector<1x16x896xf32> to vector<16x896xf32>
    %113 = vector.shape_cast %110 : vector<16x896xf32> to vector<1x16x896xf32>
    tpu.vector_store %arg4[%c0_62, %c0_63, %c4480_64], %113 {strides = array<i32>} : memref<1x16x12544xf32, #tpu.memory_space<vmem>>, vector<1x16x896xf32>,
    %c0_65 = arith.constant 0 : index
    %c0_66 = arith.constant 0 : index
    %114 = vector.load %arg2[%c0_65, %c0_66] : memref<64x48xf32, #tpu.memory_space<vmem>>, vector<64x48xf32>
    %c0_67 = arith.constant 0 : index
    %c0_68 = arith.constant 0 : index
    %c5376 = arith.constant 5376 : index
    %115 = vector.load %arg1[%c0_67, %c0_68, %c5376] : memref<1x48x12544xf32, #tpu.memory_space<vmem>>, vector<1x48x896xf32>
    %116 = vector.shape_cast %115 : vector<1x48x896xf32> to vector<48x896xf32>
    %cst_69 = arith.constant dense<0.000000e+00> : vector<64x896xf32>
    %117 = tpu.matmul %114, %116, %cst_69 {dimension_numbers = #tpu.dot_dimension_numbers<[1], [0], [0], [1], [0, 0, 1, 1], [], []>} : vector<64x48xf32>, vector<48x896xf32>, vector<64x896xf32> -> vector<64x896xf32>
    %118 = vector.extract_strided_slice %117 {offsets = [0, 0], sizes = [16, 896], strides = [1, 1]} : vector<64x896xf32> to vector<16x896xf32>
    %119 = vector.extract_strided_slice %117 {offsets = [16, 0], sizes = [16, 896], strides = [1, 1]} : vector<64x896xf32> to vector<16x896xf32>
    %120 = arith.maximumf %118, %119 : vector<16x896xf32>
    %121 = vector.extract_strided_slice %117 {offsets = [32, 0], sizes = [16, 896], strides = [1, 1]} : vector<64x896xf32> to vector<16x896xf32>
    %122 = vector.extract_strided_slice %117 {offsets = [48, 0], sizes = [16, 896], strides = [1, 1]} : vector<64x896xf32> to vector<16x896xf32>
    %123 = arith.maximumf %121, %122 : vector<16x896xf32>
    %124 = arith.maximumf %120, %123 : vector<16x896xf32>
    %c0_70 = arith.constant 0 : index
    %c0_71 = arith.constant 0 : index
    %125 = vector.load %arg3[%c0_70, %c0_71] : memref<16x1xf32, #tpu.memory_space<vmem>>, vector<16x1xf32>
    %126 = vector.broadcast %125 : vector<16x1xf32> to vector<16x896xf32>
    %127 = arith.addf %124, %126 : vector<16x896xf32>
    %cst_72 = arith.constant 0.000000e+00 : f32
    %128 = vector.broadcast %cst_72 : f32 to vector<16x896xf32>
    %129 = arith.maximumf %127, %128 : vector<16x896xf32>
    %c0_73 = arith.constant 0 : index
    %c0_74 = arith.constant 0 : index
    %c5376_75 = arith.constant 5376 : index
    %130 = vector.load %arg4[%c0_73, %c0_74, %c5376_75] : memref<1x16x12544xf32, #tpu.memory_space<vmem>>, vector<1x16x896xf32>
    %131 = vector.shape_cast %130 : vector<1x16x896xf32> to vector<16x896xf32>
    %132 = vector.shape_cast %129 : vector<16x896xf32> to vector<1x16x896xf32>
    tpu.vector_store %arg4[%c0_73, %c0_74, %c5376_75], %132 {strides = array<i32>} : memref<1x16x12544xf32, #tpu.memory_space<vmem>>, vector<1x16x896xf32>,
    %c0_76 = arith.constant 0 : index
    %c0_77 = arith.constant 0 : index
    %133 = vector.load %arg2[%c0_76, %c0_77] : memref<64x48xf32, #tpu.memory_space<vmem>>, vector<64x48xf32>
    %c0_78 = arith.constant 0 : index
    %c0_79 = arith.constant 0 : index
    %c6272 = arith.constant 6272 : index
    %134 = vector.load %arg1[%c0_78, %c0_79, %c6272] : memref<1x48x12544xf32, #tpu.memory_space<vmem>>, vector<1x48x896xf32>
    %135 = vector.shape_cast %134 : vector<1x48x896xf32> to vector<48x896xf32>
    %cst_80 = arith.constant dense<0.000000e+00> : vector<64x896xf32>
    %136 = tpu.matmul %133, %135, %cst_80 {dimension_numbers = #tpu.dot_dimension_numbers<[1], [0], [0], [1], [0, 0, 1, 1], [], []>} : vector<64x48xf32>, vector<48x896xf32>, vector<64x896xf32> -> vector<64x896xf32>
    %137 = vector.extract_strided_slice %136 {offsets = [0, 0], sizes = [16, 896], strides = [1, 1]} : vector<64x896xf32> to vector<16x896xf32>
    %138 = vector.extract_strided_slice %136 {offsets = [16, 0], sizes = [16, 896], strides = [1, 1]} : vector<64x896xf32> to vector<16x896xf32>
    %139 = arith.maximumf %137, %138 : vector<16x896xf32>
    %140 = vector.extract_strided_slice %136 {offsets = [32, 0], sizes = [16, 896], strides = [1, 1]} : vector<64x896xf32> to vector<16x896xf32>
    %141 = vector.extract_strided_slice %136 {offsets = [48, 0], sizes = [16, 896], strides = [1, 1]} : vector<64x896xf32> to vector<16x896xf32>
    %142 = arith.maximumf %140, %141 : vector<16x896xf32>
    %143 = arith.maximumf %139, %142 : vector<16x896xf32>
    %c0_81 = arith.constant 0 : index
    %c0_82 = arith.constant 0 : index
    %144 = vector.load %arg3[%c0_81, %c0_82] : memref<16x1xf32, #tpu.memory_space<vmem>>, vector<16x1xf32>
    %145 = vector.broadcast %144 : vector<16x1xf32> to vector<16x896xf32>
    %146 = arith.addf %143, %145 : vector<16x896xf32>
    %cst_83 = arith.constant 0.000000e+00 : f32
    %147 = vector.broadcast %cst_83 : f32 to vector<16x896xf32>
    %148 = arith.maximumf %146, %147 : vector<16x896xf32>
    %c0_84 = arith.constant 0 : index
    %c0_85 = arith.constant 0 : index
    %c6272_86 = arith.constant 6272 : index
    %149 = vector.load %arg4[%c0_84, %c0_85, %c6272_86] : memref<1x16x12544xf32, #tpu.memory_space<vmem>>, vector<1x16x896xf32>
    %150 = vector.shape_cast %149 : vector<1x16x896xf32> to vector<16x896xf32>
    %151 = vector.shape_cast %148 : vector<16x896xf32> to vector<1x16x896xf32>
    tpu.vector_store %arg4[%c0_84, %c0_85, %c6272_86], %151 {strides = array<i32>} : memref<1x16x12544xf32, #tpu.memory_space<vmem>>, vector<1x16x896xf32>,
    %c0_87 = arith.constant 0 : index
    %c0_88 = arith.constant 0 : index
    %152 = vector.load %arg2[%c0_87, %c0_88] : memref<64x48xf32, #tpu.memory_space<vmem>>, vector<64x48xf32>
    %c0_89 = arith.constant 0 : index
    %c0_90 = arith.constant 0 : index
    %c7168 = arith.constant 7168 : index
    %153 = vector.load %arg1[%c0_89, %c0_90, %c7168] : memref<1x48x12544xf32, #tpu.memory_space<vmem>>, vector<1x48x896xf32>
    %154 = vector.shape_cast %153 : vector<1x48x896xf32> to vector<48x896xf32>
    %cst_91 = arith.constant dense<0.000000e+00> : vector<64x896xf32>
    %155 = tpu.matmul %152, %154, %cst_91 {dimension_numbers = #tpu.dot_dimension_numbers<[1], [0], [0], [1], [0, 0, 1, 1], [], []>} : vector<64x48xf32>, vector<48x896xf32>, vector<64x896xf32> -> vector<64x896xf32>
    %156 = vector.extract_strided_slice %155 {offsets = [0, 0], sizes = [16, 896], strides = [1, 1]} : vector<64x896xf32> to vector<16x896xf32>
    %157 = vector.extract_strided_slice %155 {offsets = [16, 0], sizes = [16, 896], strides = [1, 1]} : vector<64x896xf32> to vector<16x896xf32>
    %158 = arith.maximumf %156, %157 : vector<16x896xf32>
    %159 = vector.extract_strided_slice %155 {offsets = [32, 0], sizes = [16, 896], strides = [1, 1]} : vector<64x896xf32> to vector<16x896xf32>
    %160 = vector.extract_strided_slice %155 {offsets = [48, 0], sizes = [16, 896], strides = [1, 1]} : vector<64x896xf32> to vector<16x896xf32>
    %161 = arith.maximumf %159, %160 : vector<16x896xf32>
    %162 = arith.maximumf %158, %161 : vector<16x896xf32>
    %c0_92 = arith.constant 0 : index
    %c0_93 = arith.constant 0 : index
    %163 = vector.load %arg3[%c0_92, %c0_93] : memref<16x1xf32, #tpu.memory_space<vmem>>, vector<16x1xf32>
    %164 = vector.broadcast %163 : vector<16x1xf32> to vector<16x896xf32>
    %165 = arith.addf %162, %164 : vector<16x896xf32>
    %cst_94 = arith.constant 0.000000e+00 : f32
    %166 = vector.broadcast %cst_94 : f32 to vector<16x896xf32>
    %167 = arith.maximumf %165, %166 : vector<16x896xf32>
    %c0_95 = arith.constant 0 : index
    %c0_96 = arith.constant 0 : index
    %c7168_97 = arith.constant 7168 : index
    %168 = vector.load %arg4[%c0_95, %c0_96, %c7168_97] : memref<1x16x12544xf32, #tpu.memory_space<vmem>>, vector<1x16x896xf32>
    %169 = vector.shape_cast %168 : vector<1x16x896xf32> to vector<16x896xf32>
    %170 = vector.shape_cast %167 : vector<16x896xf32> to vector<1x16x896xf32>
    tpu.vector_store %arg4[%c0_95, %c0_96, %c7168_97], %170 {strides = array<i32>} : memref<1x16x12544xf32, #tpu.memory_space<vmem>>, vector<1x16x896xf32>,
    %c0_98 = arith.constant 0 : index
    %c0_99 = arith.constant 0 : index
    %171 = vector.load %arg2[%c0_98, %c0_99] : memref<64x48xf32, #tpu.memory_space<vmem>>, vector<64x48xf32>
    %c0_100 = arith.constant 0 : index
    %c0_101 = arith.constant 0 : index
    %c8064 = arith.constant 8064 : index
    %172 = vector.load %arg1[%c0_100, %c0_101, %c8064] : memref<1x48x12544xf32, #tpu.memory_space<vmem>>, vector<1x48x896xf32>
    %173 = vector.shape_cast %172 : vector<1x48x896xf32> to vector<48x896xf32>
    %cst_102 = arith.constant dense<0.000000e+00> : vector<64x896xf32>
    %174 = tpu.matmul %171, %173, %cst_102 {dimension_numbers = #tpu.dot_dimension_numbers<[1], [0], [0], [1], [0, 0, 1, 1], [], []>} : vector<64x48xf32>, vector<48x896xf32>, vector<64x896xf32> -> vector<64x896xf32>
    %175 = vector.extract_strided_slice %174 {offsets = [0, 0], sizes = [16, 896], strides = [1, 1]} : vector<64x896xf32> to vector<16x896xf32>
    %176 = vector.extract_strided_slice %174 {offsets = [16, 0], sizes = [16, 896], strides = [1, 1]} : vector<64x896xf32> to vector<16x896xf32>
    %177 = arith.maximumf %175, %176 : vector<16x896xf32>
    %178 = vector.extract_strided_slice %174 {offsets = [32, 0], sizes = [16, 896], strides = [1, 1]} : vector<64x896xf32> to vector<16x896xf32>
    %179 = vector.extract_strided_slice %174 {offsets = [48, 0], sizes = [16, 896], strides = [1, 1]} : vector<64x896xf32> to vector<16x896xf32>
    %180 = arith.maximumf %178, %179 : vector<16x896xf32>
    %181 = arith.maximumf %177, %180 : vector<16x896xf32>
    %c0_103 = arith.constant 0 : index
    %c0_104 = arith.constant 0 : index
    %182 = vector.load %arg3[%c0_103, %c0_104] : memref<16x1xf32, #tpu.memory_space<vmem>>, vector<16x1xf32>
    %183 = vector.broadcast %182 : vector<16x1xf32> to vector<16x896xf32>
    %184 = arith.addf %181, %183 : vector<16x896xf32>
    %cst_105 = arith.constant 0.000000e+00 : f32
    %185 = vector.broadcast %cst_105 : f32 to vector<16x896xf32>
    %186 = arith.maximumf %184, %185 : vector<16x896xf32>
    %c0_106 = arith.constant 0 : index
    %c0_107 = arith.constant 0 : index
    %c8064_108 = arith.constant 8064 : index
    %187 = vector.load %arg4[%c0_106, %c0_107, %c8064_108] : memref<1x16x12544xf32, #tpu.memory_space<vmem>>, vector<1x16x896xf32>
    %188 = vector.shape_cast %187 : vector<1x16x896xf32> to vector<16x896xf32>
    %189 = vector.shape_cast %186 : vector<16x896xf32> to vector<1x16x896xf32>
    tpu.vector_store %arg4[%c0_106, %c0_107, %c8064_108], %189 {strides = array<i32>} : memref<1x16x12544xf32, #tpu.memory_space<vmem>>, vector<1x16x896xf32>,
    %c0_109 = arith.constant 0 : index
    %c0_110 = arith.constant 0 : index
    %190 = vector.load %arg2[%c0_109, %c0_110] : memref<64x48xf32, #tpu.memory_space<vmem>>, vector<64x48xf32>
    %c0_111 = arith.constant 0 : index
    %c0_112 = arith.constant 0 : index
    %c8960 = arith.constant 8960 : index
    %191 = vector.load %arg1[%c0_111, %c0_112, %c8960] : memref<1x48x12544xf32, #tpu.memory_space<vmem>>, vector<1x48x896xf32>
    %192 = vector.shape_cast %191 : vector<1x48x896xf32> to vector<48x896xf32>
    %cst_113 = arith.constant dense<0.000000e+00> : vector<64x896xf32>
    %193 = tpu.matmul %190, %192, %cst_113 {dimension_numbers = #tpu.dot_dimension_numbers<[1], [0], [0], [1], [0, 0, 1, 1], [], []>} : vector<64x48xf32>, vector<48x896xf32>, vector<64x896xf32> -> vector<64x896xf32>
    %194 = vector.extract_strided_slice %193 {offsets = [0, 0], sizes = [16, 896], strides = [1, 1]} : vector<64x896xf32> to vector<16x896xf32>
    %195 = vector.extract_strided_slice %193 {offsets = [16, 0], sizes = [16, 896], strides = [1, 1]} : vector<64x896xf32> to vector<16x896xf32>
    %196 = arith.maximumf %194, %195 : vector<16x896xf32>
    %197 = vector.extract_strided_slice %193 {offsets = [32, 0], sizes = [16, 896], strides = [1, 1]} : vector<64x896xf32> to vector<16x896xf32>
    %198 = vector.extract_strided_slice %193 {offsets = [48, 0], sizes = [16, 896], strides = [1, 1]} : vector<64x896xf32> to vector<16x896xf32>
    %199 = arith.maximumf %197, %198 : vector<16x896xf32>
    %200 = arith.maximumf %196, %199 : vector<16x896xf32>
    %c0_114 = arith.constant 0 : index
    %c0_115 = arith.constant 0 : index
    %201 = vector.load %arg3[%c0_114, %c0_115] : memref<16x1xf32, #tpu.memory_space<vmem>>, vector<16x1xf32>
    %202 = vector.broadcast %201 : vector<16x1xf32> to vector<16x896xf32>
    %203 = arith.addf %200, %202 : vector<16x896xf32>
    %cst_116 = arith.constant 0.000000e+00 : f32
    %204 = vector.broadcast %cst_116 : f32 to vector<16x896xf32>
    %205 = arith.maximumf %203, %204 : vector<16x896xf32>
    %c0_117 = arith.constant 0 : index
    %c0_118 = arith.constant 0 : index
    %c8960_119 = arith.constant 8960 : index
    %206 = vector.load %arg4[%c0_117, %c0_118, %c8960_119] : memref<1x16x12544xf32, #tpu.memory_space<vmem>>, vector<1x16x896xf32>
    %207 = vector.shape_cast %206 : vector<1x16x896xf32> to vector<16x896xf32>
    %208 = vector.shape_cast %205 : vector<16x896xf32> to vector<1x16x896xf32>
    tpu.vector_store %arg4[%c0_117, %c0_118, %c8960_119], %208 {strides = array<i32>} : memref<1x16x12544xf32, #tpu.memory_space<vmem>>, vector<1x16x896xf32>,
    %c0_120 = arith.constant 0 : index
    %c0_121 = arith.constant 0 : index
    %209 = vector.load %arg2[%c0_120, %c0_121] : memref<64x48xf32, #tpu.memory_space<vmem>>, vector<64x48xf32>
    %c0_122 = arith.constant 0 : index
    %c0_123 = arith.constant 0 : index
    %c9856 = arith.constant 9856 : index
    %210 = vector.load %arg1[%c0_122, %c0_123, %c9856] : memref<1x48x12544xf32, #tpu.memory_space<vmem>>, vector<1x48x896xf32>
    %211 = vector.shape_cast %210 : vector<1x48x896xf32> to vector<48x896xf32>
    %cst_124 = arith.constant dense<0.000000e+00> : vector<64x896xf32>
    %212 = tpu.matmul %209, %211, %cst_124 {dimension_numbers = #tpu.dot_dimension_numbers<[1], [0], [0], [1], [0, 0, 1, 1], [], []>} : vector<64x48xf32>, vector<48x896xf32>, vector<64x896xf32> -> vector<64x896xf32>
    %213 = vector.extract_strided_slice %212 {offsets = [0, 0], sizes = [16, 896], strides = [1, 1]} : vector<64x896xf32> to vector<16x896xf32>
    %214 = vector.extract_strided_slice %212 {offsets = [16, 0], sizes = [16, 896], strides = [1, 1]} : vector<64x896xf32> to vector<16x896xf32>
    %215 = arith.maximumf %213, %214 : vector<16x896xf32>
    %216 = vector.extract_strided_slice %212 {offsets = [32, 0], sizes = [16, 896], strides = [1, 1]} : vector<64x896xf32> to vector<16x896xf32>
    %217 = vector.extract_strided_slice %212 {offsets = [48, 0], sizes = [16, 896], strides = [1, 1]} : vector<64x896xf32> to vector<16x896xf32>
    %218 = arith.maximumf %216, %217 : vector<16x896xf32>
    %219 = arith.maximumf %215, %218 : vector<16x896xf32>
    %c0_125 = arith.constant 0 : index
    %c0_126 = arith.constant 0 : index
    %220 = vector.load %arg3[%c0_125, %c0_126] : memref<16x1xf32, #tpu.memory_space<vmem>>, vector<16x1xf32>
    %221 = vector.broadcast %220 : vector<16x1xf32> to vector<16x896xf32>
    %222 = arith.addf %219, %221 : vector<16x896xf32>
    %cst_127 = arith.constant 0.000000e+00 : f32
    %223 = vector.broadcast %cst_127 : f32 to vector<16x896xf32>
    %224 = arith.maximumf %222, %223 : vector<16x896xf32>
    %c0_128 = arith.constant 0 : index
    %c0_129 = arith.constant 0 : index
    %c9856_130 = arith.constant 9856 : index
    %225 = vector.load %arg4[%c0_128, %c0_129, %c9856_130] : memref<1x16x12544xf32, #tpu.memory_space<vmem>>, vector<1x16x896xf32>
    %226 = vector.shape_cast %225 : vector<1x16x896xf32> to vector<16x896xf32>
    %227 = vector.shape_cast %224 : vector<16x896xf32> to vector<1x16x896xf32>
    tpu.vector_store %arg4[%c0_128, %c0_129, %c9856_130], %227 {strides = array<i32>} : memref<1x16x12544xf32, #tpu.memory_space<vmem>>, vector<1x16x896xf32>,
    %c0_131 = arith.constant 0 : index
    %c0_132 = arith.constant 0 : index
    %228 = vector.load %arg2[%c0_131, %c0_132] : memref<64x48xf32, #tpu.memory_space<vmem>>, vector<64x48xf32>
    %c0_133 = arith.constant 0 : index
    %c0_134 = arith.constant 0 : index
    %c10752 = arith.constant 10752 : index
    %229 = vector.load %arg1[%c0_133, %c0_134, %c10752] : memref<1x48x12544xf32, #tpu.memory_space<vmem>>, vector<1x48x896xf32>
    %230 = vector.shape_cast %229 : vector<1x48x896xf32> to vector<48x896xf32>
    %cst_135 = arith.constant dense<0.000000e+00> : vector<64x896xf32>
    %231 = tpu.matmul %228, %230, %cst_135 {dimension_numbers = #tpu.dot_dimension_numbers<[1], [0], [0], [1], [0, 0, 1, 1], [], []>} : vector<64x48xf32>, vector<48x896xf32>, vector<64x896xf32> -> vector<64x896xf32>
    %232 = vector.extract_strided_slice %231 {offsets = [0, 0], sizes = [16, 896], strides = [1, 1]} : vector<64x896xf32> to vector<16x896xf32>
    %233 = vector.extract_strided_slice %231 {offsets = [16, 0], sizes = [16, 896], strides = [1, 1]} : vector<64x896xf32> to vector<16x896xf32>
    %234 = arith.maximumf %232, %233 : vector<16x896xf32>
    %235 = vector.extract_strided_slice %231 {offsets = [32, 0], sizes = [16, 896], strides = [1, 1]} : vector<64x896xf32> to vector<16x896xf32>
    %236 = vector.extract_strided_slice %231 {offsets = [48, 0], sizes = [16, 896], strides = [1, 1]} : vector<64x896xf32> to vector<16x896xf32>
    %237 = arith.maximumf %235, %236 : vector<16x896xf32>
    %238 = arith.maximumf %234, %237 : vector<16x896xf32>
    %c0_136 = arith.constant 0 : index
    %c0_137 = arith.constant 0 : index
    %239 = vector.load %arg3[%c0_136, %c0_137] : memref<16x1xf32, #tpu.memory_space<vmem>>, vector<16x1xf32>
    %240 = vector.broadcast %239 : vector<16x1xf32> to vector<16x896xf32>
    %241 = arith.addf %238, %240 : vector<16x896xf32>
    %cst_138 = arith.constant 0.000000e+00 : f32
    %242 = vector.broadcast %cst_138 : f32 to vector<16x896xf32>
    %243 = arith.maximumf %241, %242 : vector<16x896xf32>
    %c0_139 = arith.constant 0 : index
    %c0_140 = arith.constant 0 : index
    %c10752_141 = arith.constant 10752 : index
    %244 = vector.load %arg4[%c0_139, %c0_140, %c10752_141] : memref<1x16x12544xf32, #tpu.memory_space<vmem>>, vector<1x16x896xf32>
    %245 = vector.shape_cast %244 : vector<1x16x896xf32> to vector<16x896xf32>
    %246 = vector.shape_cast %243 : vector<16x896xf32> to vector<1x16x896xf32>
    tpu.vector_store %arg4[%c0_139, %c0_140, %c10752_141], %246 {strides = array<i32>} : memref<1x16x12544xf32, #tpu.memory_space<vmem>>, vector<1x16x896xf32>,
    %c0_142 = arith.constant 0 : index
    %c0_143 = arith.constant 0 : index
    %247 = vector.load %arg2[%c0_142, %c0_143] : memref<64x48xf32, #tpu.memory_space<vmem>>, vector<64x48xf32>
    %c0_144 = arith.constant 0 : index
    %c0_145 = arith.constant 0 : index
    %c11648 = arith.constant 11648 : index
    %248 = vector.load %arg1[%c0_144, %c0_145, %c11648] : memref<1x48x12544xf32, #tpu.memory_space<vmem>>, vector<1x48x896xf32>
    %249 = vector.shape_cast %248 : vector<1x48x896xf32> to vector<48x896xf32>
    %cst_146 = arith.constant dense<0.000000e+00> : vector<64x896xf32>
    %250 = tpu.matmul %247, %249, %cst_146 {dimension_numbers = #tpu.dot_dimension_numbers<[1], [0], [0], [1], [0, 0, 1, 1], [], []>} : vector<64x48xf32>, vector<48x896xf32>, vector<64x896xf32> -> vector<64x896xf32>
    %251 = vector.extract_strided_slice %250 {offsets = [0, 0], sizes = [16, 896], strides = [1, 1]} : vector<64x896xf32> to vector<16x896xf32>
    %252 = vector.extract_strided_slice %250 {offsets = [16, 0], sizes = [16, 896], strides = [1, 1]} : vector<64x896xf32> to vector<16x896xf32>
    %253 = arith.maximumf %251, %252 : vector<16x896xf32>
    %254 = vector.extract_strided_slice %250 {offsets = [32, 0], sizes = [16, 896], strides = [1, 1]} : vector<64x896xf32> to vector<16x896xf32>
    %255 = vector.extract_strided_slice %250 {offsets = [48, 0], sizes = [16, 896], strides = [1, 1]} : vector<64x896xf32> to vector<16x896xf32>
    %256 = arith.maximumf %254, %255 : vector<16x896xf32>
    %257 = arith.maximumf %253, %256 : vector<16x896xf32>
    %c0_147 = arith.constant 0 : index
    %c0_148 = arith.constant 0 : index
    %258 = vector.load %arg3[%c0_147, %c0_148] : memref<16x1xf32, #tpu.memory_space<vmem>>, vector<16x1xf32>
    %259 = vector.broadcast %258 : vector<16x1xf32> to vector<16x896xf32>
    %260 = arith.addf %257, %259 : vector<16x896xf32>
    %cst_149 = arith.constant 0.000000e+00 : f32
    %261 = vector.broadcast %cst_149 : f32 to vector<16x896xf32>
    %262 = arith.maximumf %260, %261 : vector<16x896xf32>
    %c0_150 = arith.constant 0 : index
    %c0_151 = arith.constant 0 : index
    %c11648_152 = arith.constant 11648 : index
    %263 = vector.load %arg4[%c0_150, %c0_151, %c11648_152] : memref<1x16x12544xf32, #tpu.memory_space<vmem>>, vector<1x16x896xf32>
    %264 = vector.shape_cast %263 : vector<1x16x896xf32> to vector<16x896xf32>
    %265 = vector.shape_cast %262 : vector<16x896xf32> to vector<1x16x896xf32>
    tpu.vector_store %arg4[%c0_150, %c0_151, %c11648_152], %265 {strides = array<i32>} : memref<1x16x12544xf32, #tpu.memory_space<vmem>>, vector<1x16x896xf32>,
    return
  }
  func.func @transform_0(%arg0: i32) -> (i32, i32, i32) {
    %c0_i32 = arith.constant 0 : i32
    %c0_i32_0 = arith.constant 0 : i32
    %c0_i32_1 = arith.constant 0 : i32
    return %arg0, %c0_i32, %c0_i32_0 : i32, i32, i32
  }
  func.func @transform_1(%arg0: i32) -> (i32, i32) {
    %c0_i32 = arith.constant 0 : i32
    %c0_i32_0 = arith.constant 0 : i32
    %c0_i32_1 = arith.constant 0 : i32
    return %c0_i32, %c0_i32_0 : i32, i32
  }
  func.func @transform_2(%arg0: i32) -> (i32, i32) {
    %c0_i32 = arith.constant 0 : i32
    %c0_i32_0 = arith.constant 0 : i32
    %c0_i32_1 = arith.constant 0 : i32
    return %c0_i32, %c0_i32_0 : i32, i32
  }
  func.func @transform_3(%arg0: i32) -> (i32, i32, i32) {
    %c0_i32 = arith.constant 0 : i32
    %c0_i32_0 = arith.constant 0 : i32
    %c0_i32_1 = arith.constant 0 : i32
    return %arg0, %c0_i32, %c0_i32_0 : i32, i32, i32
  }
}

module attributes {stable_mosaic.version = 11 : i64} {
  func.func @_fc_kernel(%arg0: i32, %arg1: memref<2x50176xf32, #tpu.memory_space<vmem>>, %arg2: memref<4x50176xf32, #tpu.memory_space<vmem>>, %arg3: memref<1x4xf32, #tpu.memory_space<vmem>>, %arg4: memref<2x4xf32, #tpu.memory_space<vmem>>, %arg5: memref<2x4xf32, #tpu.memory_space<vmem>>) attributes {dimension_semantics = [#tpu.dimension_semantics<arbitrary>], iteration_bounds = array<i64: 4>, scalar_prefetch = 0 : i64, scratch_operands = 1 : i64, tpu.core_type = #tpu.core_type<tc>, window_params = [{transform_indices = @transform_0, window_bounds = array<i64: 2, 50176>}, {transform_indices = @transform_1, window_bounds = array<i64: 4, 50176>}, {pipeline_mode = #tpu.pipeline_mode<synchronous>, transform_indices = @transform_2, window_bounds = array<i64: 1, 4>}, {pipeline_mode = #tpu.pipeline_mode<synchronous>, transform_indices = @transform_3, window_bounds = array<i64: 2, 4>}]} {
    %c0_i32 = arith.constant 0 : i32
    %0 = arith.cmpi eq, %arg0, %c0_i32 : i32
    %1 = arith.extui %0 : i1 to i32
    %c0_i32_0 = arith.constant 0 : i32
    %2 = arith.cmpi ne, %1, %c0_i32_0 : i32
    scf.if %2 {
      %cst_9 = arith.constant 0.000000e+00 : f32
      %12 = vector.broadcast %cst_9 : f32 to vector<2x4xf32>
      %c0_10 = arith.constant 0 : index
      %c0_11 = arith.constant 0 : index
      %13 = vector.load %arg5[%c0_10, %c0_11] : memref<2x4xf32, #tpu.memory_space<vmem>>, vector<2x4xf32>
      tpu.vector_store %arg5[%c0_10, %c0_11], %12 {strides = array<i32>} : memref<2x4xf32, #tpu.memory_space<vmem>>, vector<2x4xf32>,
    } else {
    }
    %c0 = arith.constant 0 : index
    %c0_1 = arith.constant 0 : index
    %3 = vector.load %arg5[%c0, %c0_1] : memref<2x4xf32, #tpu.memory_space<vmem>>, vector<2x4xf32>
    %c0_2 = arith.constant 0 : index
    %c0_3 = arith.constant 0 : index
    %4 = vector.load %arg1[%c0_2, %c0_3] : memref<2x50176xf32, #tpu.memory_space<vmem>>, vector<2x50176xf32>
    %c0_4 = arith.constant 0 : index
    %c0_5 = arith.constant 0 : index
    %5 = vector.load %arg2[%c0_4, %c0_5] : memref<4x50176xf32, #tpu.memory_space<vmem>>, vector<4x50176xf32>
    %cst = arith.constant dense<0.000000e+00> : vector<2x4xf32>
    %6 = tpu.matmul %4, %5, %cst {dimension_numbers = #tpu.dot_dimension_numbers<[1], [1], [0], [0], [0, 0, 1, 0], [], []>} : vector<2x50176xf32>, vector<4x50176xf32>, vector<2x4xf32> -> vector<2x4xf32>
    %7 = arith.addf %3, %6 : vector<2x4xf32>
    %c0_6 = arith.constant 0 : index
    %c0_7 = arith.constant 0 : index
    %8 = vector.load %arg5[%c0_6, %c0_7] : memref<2x4xf32, #tpu.memory_space<vmem>>, vector<2x4xf32>
    tpu.vector_store %arg5[%c0_6, %c0_7], %7 {strides = array<i32>} : memref<2x4xf32, #tpu.memory_space<vmem>>, vector<2x4xf32>,
    %c3_i32 = arith.constant 3 : i32
    %9 = arith.cmpi eq, %arg0, %c3_i32 : i32
    %10 = arith.extui %9 : i1 to i32
    %c0_i32_8 = arith.constant 0 : i32
    %11 = arith.cmpi ne, %10, %c0_i32_8 : i32
    scf.if %11 {
      %c0_9 = arith.constant 0 : index
      %c0_10 = arith.constant 0 : index
      %12 = vector.load %arg5[%c0_9, %c0_10] : memref<2x4xf32, #tpu.memory_space<vmem>>, vector<2x4xf32>
      %c0_11 = arith.constant 0 : index
      %c0_12 = arith.constant 0 : index
      %13 = vector.load %arg3[%c0_11, %c0_12] : memref<1x4xf32, #tpu.memory_space<vmem>>, vector<1x4xf32>
      %14 = vector.broadcast %13 : vector<1x4xf32> to vector<2x4xf32>
      %15 = arith.addf %12, %14 : vector<2x4xf32>
      %c0_13 = arith.constant 0 : index
      %c0_14 = arith.constant 0 : index
      %16 = vector.load %arg4[%c0_13, %c0_14] : memref<2x4xf32, #tpu.memory_space<vmem>>, vector<2x4xf32>
      tpu.vector_store %arg4[%c0_13, %c0_14], %15 {strides = array<i32>} : memref<2x4xf32, #tpu.memory_space<vmem>>, vector<2x4xf32>,
    } else {
    }
    return
  }
  func.func @transform_0(%arg0: i32) -> (i32, i32) {
    %c0_i32 = arith.constant 0 : i32
    %c0_i32_0 = arith.constant 0 : i32
    return %c0_i32, %arg0 : i32, i32
  }
  func.func @transform_1(%arg0: i32) -> (i32, i32) {
    %c0_i32 = arith.constant 0 : i32
    %c0_i32_0 = arith.constant 0 : i32
    return %c0_i32, %arg0 : i32, i32
  }
  func.func @transform_2(%arg0: i32) -> (i32, i32) {
    %c0_i32 = arith.constant 0 : i32
    %c0_i32_0 = arith.constant 0 : i32
    %c0_i32_1 = arith.constant 0 : i32
    return %c0_i32, %c0_i32_0 : i32, i32
  }
  func.func @transform_3(%arg0: i32) -> (i32, i32) {
    %c0_i32 = arith.constant 0 : i32
    %c0_i32_0 = arith.constant 0 : i32
    %c0_i32_1 = arith.constant 0 : i32
    return %c0_i32, %c0_i32_0 : i32, i32
  }
}

</mosaic_0001>

<bundles_post_ra>
// kernel: simple_cnn_brain_forward.2
= control target key start
LH: loop header
LB: loop body
LE: loop exit
PB: predicated region body
PF: predicated region fallthrough
CT: control target
= control target key end

     0   :  { %s10536_s12 = smov 0   ;;  %s14424_s0 = inlined_call_operand.vmem [shape: f32[2,48,12544], index: 0, kind: input, shape index: {}]   ;;  %s14425_s1 = inlined_call_operand.vmem [shape: f32[64,48], index: 1, kind: input, shape index: {}]   ;;  %s14426_s2 = inlined_call_operand.vmem [shape: f32[16,1], index: 2, kind: input, shape index: {}]   ;;  %s14427_s3 = inlined_call_operand.vmem [shape: f32[2,16,12544], index: 3, kind: output, shape index: {}]  }
   0x1 LB: > { %s8823_s13 = sadd.s32 4294967295, %s10512_s12   ;;  %p8827_p0 = scmp.ge.s32.totalorder %s10512_s12, 1  ;;  %s10512_s12 = sphi %s10536_s12, %s13_s12  }
   0x2   : > { %p137_p1 = scmp.lt.s32.totalorder %s10512_s12, 3 }
   0x4   : > { %p138_p2 = pnand %p8827_p0, %p137_p1 }
   0x5   : > { %p161_p3 = scmp.lt.s32.totalorder (!%p138_p2), %s8823_s13, 1  ;;  %v10514_v0 = vmov (!%p138_p2), 0.0   ;;  %v10515_v1 = vmov (!%p138_p2), 0   ;;  %v10552_v2 = vld [vmem:[%s14426_s2] sm:$0xff] (!%p138_p2)  ;;  %vm221_vm0 = vcmask (!%p138_p2), 392192   ;;  %v10611_v59 = vld [vmem:[%s14425_s1 + $0x8] sm:$0xff] (!%p138_p2) }
   0x6   : > { %141 = sbr.rel (%p138_p2) target bundleno = 1035 (0x40b), region = 32  ;;  %310 = vmatprep.mubr.f32.mxu0 (!%p138_p2), %v10514_v0  ;;  %423 = vmatprep.mubr.f32.mxu1 (!%p138_p2), %v10514_v0  ;;  %v10596_v49 = vld [vmem:[%s14425_s1] sm:$0xff] (!%p138_p2) }
   0x7   : > { %10496 = vset.pattern.permute.xlu0 (!%p138_p2), %v10515_v1  ;;  %10497 = vset.pattern.permute.xlu1 (!%p138_p2), %v10515_v1 }
   0x8   : > { %736 = vperm.xlu0 (!%p138_p2), %10496, %v10552_v2   ;;  %1350 = vperm.xlu1 (!%p138_p2), %10497, %v10552_v2  }
   0xd   : > { %s14429_s13 = smov (!%p161_p3, %s8823_s13), 1 }
   0xe   : > { %s10484_s14 = smul.u32 4704, %s14429_s13 }
   0xf   : > { %s10485_s17 = smul.u32 1568, %s14429_s13 }
  0x10   : > { %s10559_s19 = scalar_lea.vmem %s14424_s0, %s10484_s14 }
  0x11   : > { %v180_v3 = vld [vmem:[%s10559_s19 + $0x8] sm:$0xff]  ;;  %v187_v4 = vld [vmem:[%s10559_s19 + $0x318] sm:$0xff]  ;;  %v179_v8 = vld [vmem:[%s10559_s19] sm:$0xff]  ;;  %s11318_s22 = scalar_lea.vmem %s14427_s3, %s10485_s17 }
  0x12   : > { %v182_v5 = vld [vmem:[%s10559_s19 + $0x18] sm:$0xff]  ;;  %v9812_v6 = vpack.c.bf16 %v187_v4, %v180_v3  ;;  %v189_v7 = vld [vmem:[%s10559_s19 + $0x328] sm:$0xff]  ;;  %v186_v9 = vld [vmem:[%s10559_s19 + $0x310] sm:$0xff] }
  0x13   : > { %v9824_v10 = vpack.c.bf16 %v189_v7, %v182_v5  ;;  %v9814_v11 = vpack.c.bf16 %v186_v9, %v179_v8  ;;  %v181_v12 = vld [vmem:[%s10559_s19 + $0x10] sm:$0xff]  ;;  %v188_v13 = vld [vmem:[%s10559_s19 + $0x320] sm:$0xff]  ;;  %v194_v14 = vld [vmem:[%s10559_s19 + $0x628] sm:$0xff] }
  0x14   : > { %9813 = vmatprep.subr.bf16.mxu0 %v9812_v6  ;;  %v9826_v15 = vpack.c.bf16 %v188_v13, %v181_v12  ;;  %v201_v16 = vld [vmem:[%s10559_s19 + $0x938] sm:$0xff]  ;;  %v203_v18 = vld [vmem:[%s10559_s19 + $0x948] sm:$0xff]  ;;  %v193_v21 = vld [vmem:[%s10559_s19 + $0x620] sm:$0xff] }
  0x15   : > { %v196_v17 = vld [vmem:[%s10559_s19 + $0x638] sm:$0xff]  ;;  %9825 = vmatprep.subr.bf16.mxu1 %v9824_v10  ;;  %9815 = vmatpush1.bf16.msra.mxu0 %v9814_v11  ;;  %v9816_v19 = vpack.c.bf16 %v201_v16, %v194_v14  ;;  %v200_v22 = vld [vmem:[%s10559_s19 + $0x930] sm:$0xff]  ;;  %v202_v25 = vld [vmem:[%s10559_s19 + $0x940] sm:$0xff] }
  0x16   : > { %v9828_v20 = vpack.c.bf16 %v203_v18, %v196_v17  ;;  %v195_v23 = vld [vmem:[%s10559_s19 + $0x630] sm:$0xff]  ;;  %9827 = vmatpush1.bf16.msra.mxu1 %v9826_v15  ;;  %v9818_v24 = vpack.c.bf16 %v200_v22, %v193_v21  ;;  %v208_v26 = vld [vmem:[%s10559_s19 + $0xc48] sm:$0xff]  ;;  %v215_v27 = vld [vmem:[%s10559_s19 + $0xf58] sm:$0xff] }
  0x17   : > { %9817 = vmatprep.subr.bf16.mxu0 %v9816_v19  ;;  %v9830_v28 = vpack.c.bf16 %v202_v25, %v195_v23  ;;  %v9820_v29 = vpack.c.bf16 %v215_v27, %v208_v26  ;;  %v210_v30 = vld [vmem:[%s10559_s19 + $0xc58] sm:$0xff]  ;;  %v217_v31 = vld [vmem:[%s10559_s19 + $0xf68] sm:$0xff]  ;;  %v207_v32 = vld [vmem:[%s10559_s19 + $0xc40] sm:$0xff] }
  0x18   : > { %9829 = vmatprep.subr.bf16.mxu1 %v9828_v20  ;;  %v9832_v33 = vpack.c.bf16 %v217_v31, %v210_v30  ;;  %v214_v34 = vld [vmem:[%s10559_s19 + $0xf50] sm:$0xff]  ;;  %v216_v36 = vld [vmem:[%s10559_s19 + $0xf60] sm:$0xff]  ;;  %v184_v38 = vld [vmem:[%s10559_s19 + $0x28] sm:$0xff] }
  0x19   : > { %v209_v35 = vld [vmem:[%s10559_s19 + $0xc50] sm:$0xff]  ;;  %9819 = vmatpush1.bf16.msra.mxu0 %v9818_v24  ;;  %v9822_v37 = vpack.c.bf16 %v214_v34, %v207_v32  ;;  %v191_v39 = vld [vmem:[%s10559_s19 + $0x338] sm:$0xff]  ;;  %v192_v43 = vld [vmem:[%s10559_s19 + $0x340] sm:$0xff] }
  0x1a   : > { %v185_v40 = vld [vmem:[%s10559_s19 + $0x30] sm:$0xff]  ;;  %9831 = vmatpush1.bf16.msra.mxu1 %v9830_v28  ;;  %9821 = vmatprep.subr.bf16.mxu0 %v9820_v29  ;;  %v9834_v41 = vpack.c.bf16 %v216_v36, %v209_v35  ;;  %v9836_v42 = vpack.c.bf16 %v191_v39, %v184_v38  ;;  %v183_v44 = vld [vmem:[%s10559_s19 + $0x20] sm:$0xff]  ;;  %v198_v47 = vld [vmem:[%s10559_s19 + $0x648] sm:$0xff] }
  0x1b   : > { %v190_v45 = vld [vmem:[%s10559_s19 + $0x330] sm:$0xff]  ;;  %9833 = vmatprep.subr.bf16.mxu1 %v9832_v33  ;;  %v9848_v46 = vpack.c.bf16 %v192_v43, %v185_v40  ;;  %v205_v48 = vld [vmem:[%s10559_s19 + $0x958] sm:$0xff]  ;;  %v206_v52 = vld [vmem:[%s10559_s19 + $0x960] sm:$0xff] }
  0x1c   : > { %v9838_v50 = vpack.c.bf16 %v190_v45, %v183_v44  ;;  %v199_v51 = vld [vmem:[%s10559_s19 + $0x650] sm:$0xff]  ;;  %v9840_v53 = vpack.c.bf16 %v205_v48, %v198_v47  ;;  %v197_v54 = vld [vmem:[%s10559_s19 + $0x640] sm:$0xff]  ;;  %v212_v57 = vld [vmem:[%s10559_s19 + $0xc68] sm:$0xff] }
  0x1d   : > { %9823 = vmatpush1.bf16.msra.mxu0 %v9822_v37  ;;  %v204_v55 = vld [vmem:[%s10559_s19 + $0x950] sm:$0xff]  ;;  %v9852_v56 = vpack.c.bf16 %v206_v52, %v199_v51  ;;  %v219_v58 = vld [vmem:[%s10559_s19 + $0xf78] sm:$0xff]  ;;  %v220_v61 = vld [vmem:[%s10559_s19 + $0xf80] sm:$0xff] }
  0x1e   : > { %9835 = vmatpush1.bf16.msra.mxu1 %v9834_v41  ;;  %9837 = vmatprep.subr.bf16.mxu0 %v9836_v42  ;;  %v213_v60 = vld [vmem:[%s10559_s19 + $0xc70] sm:$0xff]  ;;  %v9842_v62 = vpack.c.bf16 %v204_v55, %v197_v54  ;;  %v9844_v63 = vpack.c.bf16 %v219_v58, %v212_v57  ;;  %v211_v1 = vld [vmem:[%s10559_s19 + $0xc60] sm:$0xff]  ;;  %v10642_v13 = vld [vmem:[%s14425_s1 + $0x18] sm:$0xff] }
  0x1f   : > { %9849 = vmatprep.subr.bf16.mxu1 %v9848_v46  ;;  %v218_v3 = vld [vmem:[%s10559_s19 + $0xf70] sm:$0xff]  ;;  %v9856_v4 = vpack.c.bf16 %v220_v61, %v213_v60  ;;  %v804_v6 = vld [vmem:[%s10559_s19 + $0x360] sm:$0xff]  ;;  %v10664_v15 = vld [vmem:[%s14425_s1 + $0x28] sm:$0xff] }
  0x20   : > { %8830 = vmatmul.mubr.msk.f32.vlgmr.msra.gmra.mrb[0].mxu0 %vm221_vm0, %v10596_v49  ;;  %v797_v5 = vld [vmem:[%s10559_s19 + $0x50] sm:$0xff]  ;;  %v795_v8 = vld [vmem:[%s10559_s19 + $0x40] sm:$0xff]  ;;  %v9846_v10 = vpack.c.bf16 %v218_v3, %v211_v1  ;;  %v733_v17 = vld [vmem:[%s14426_s2 + $0x8] sm:$0xff] }
  0x21   : > { %8838 = vmatmul.mubr.msk.f32.vlgmr.msra.gmra.mrb[0].mxu1 %vm221_vm0, %v10596_v49  ;;  %9839 = vmatpush1.bf16.msra.mxu0 %v9838_v50  ;;  %v10629_v7 = vld [vmem:[%s14425_s1 + $0x10] sm:$0xff]  ;;  %v9872_v11 = vpack.c.bf16 %v804_v6, %v797_v5  ;;  %v10653_v14 = vld [vmem:[%s14425_s1 + $0x20] sm:$0xff]  ;;  %v10689_v18 = vld [vmem:[%s14425_s1 + $0x38] sm:$0xff] }
  0x22   : > { %9851 = vmatpush3.bf16.msra.mxu1 %v9848_v46  ;;  %316 = vmatprep.mubr.f32.mxu0 %v10514_v0  ;;  %v802_v9 = vld [vmem:[%s10559_s19 + $0x350] sm:$0xff]  ;;  %v796_v19 = vld [vmem:[%s10559_s19 + $0x48] sm:$0xff]  ;;  %v803_v20 = vld [vmem:[%s10559_s19 + $0x358] sm:$0xff] }
  0x23   : > { %429 = vmatprep.mubr.f32.mxu1 %v10514_v0  ;;  %9841 = vmatprep.subr.bf16.mxu0 %v9840_v53  ;;  %v9860_v12 = vpack.c.bf16 %v802_v9, %v795_v8  ;;  %v10675_v16 = vld [vmem:[%s14425_s1 + $0x30] sm:$0xff]  ;;  %v794_v21 = vld [vmem:[%s10559_s19 + $0x38] sm:$0xff]  ;;  %v801_v22 = vld [vmem:[%s10559_s19 + $0x348] sm:$0xff]  ;;  %v9874_v25 = vpack.c.bf16 %v803_v20, %v796_v19 }
  0x24   : > { %8831 = vmatmul.mubr.msk.f32.gmra.mrb[2].mxu0 %vm221_vm0, %v10611_v59  ;;  %9853 = vmatprep.subr.bf16.mxu1 %v9852_v56  ;;  %v809_v23 = vld [vmem:[%s10559_s19 + $0x660] sm:$0xff]  ;;  %v816_v24 = vld [vmem:[%s10559_s19 + $0x970] sm:$0xff]  ;;  %v9862_v28 = vpack.c.bf16 %v801_v22, %v794_v21  ;;  %v808_v30 = vld [vmem:[%s10559_s19 + $0x658] sm:$0xff] }
  0x25   : > { %8839 = vmatmul.mubr.msk.f32.gmra.mrb[2].mxu1 %vm221_vm0, %v10611_v59  ;;  %322 = vmatprep.mubr.f32.mxu0 %v10514_v0  ;;  %v811_v26 = vld [vmem:[%s10559_s19 + $0x670] sm:$0xff]  ;;  %v818_v27 = vld [vmem:[%s10559_s19 + $0x980] sm:$0xff]  ;;  %v9864_v29 = vpack.c.bf16 %v816_v24, %v809_v23  ;;  %v810_v34 = vld [vmem:[%s10559_s19 + $0x668] sm:$0xff] }
  0x26   : > { %435 = vmatprep.mubr.f32.mxu1 %v10514_v0  ;;  %9843 = vmatpush1.bf16.msra.mxu0 %v9842_v62  ;;  %v823_v31 = vld [vmem:[%s10559_s19 + $0xc80] sm:$0xff]  ;;  %v830_v32 = vld [vmem:[%s10559_s19 + $0xf90] sm:$0xff]  ;;  %v9876_v33 = vpack.c.bf16 %v818_v27, %v811_v26  ;;  %v817_v35 = vld [vmem:[%s10559_s19 + $0x978] sm:$0xff] }
  0x27   : > { %9855 = vmatpush3.bf16.msra.mxu1 %v9852_v56  ;;  %9845 = vmatprep.subr.bf16.mxu0 %v9844_v63  ;;  %v825_v36 = vld [vmem:[%s10559_s19 + $0xc90] sm:$0xff]  ;;  %v832_v37 = vld [vmem:[%s10559_s19 + $0xfa0] sm:$0xff]  ;;  %v9868_v39 = vpack.c.bf16 %v830_v32, %v823_v31  ;;  %v822_v40 = vld [vmem:[%s10559_s19 + $0xc78] sm:$0xff]  ;;  %v9878_v42 = vpack.c.bf16 %v817_v35, %v810_v34 }
  0x28   : > { %8832 = vmatmul.mubr.msk.f32.gmra.mrb[4].mxu0 %vm221_vm0, %v10629_v7  ;;  %9857 = vmatprep.subr.bf16.mxu1 %v9856_v4  ;;  %v829_v41 = vld [vmem:[%s10559_s19 + $0xf88] sm:$0xff]  ;;  %v799_v43 = vld [vmem:[%s10559_s19 + $0x60] sm:$0xff]  ;;  %v806_v44 = vld [vmem:[%s10559_s19 + $0x370] sm:$0xff]  ;;  %v9880_v45 = vpack.c.bf16 %v832_v37, %v825_v36 }
  0x29   : > { %8840 = vmatmul.mubr.msk.f32.gmra.mrb[4].mxu1 %vm221_vm0, %v10629_v7  ;;  %328 = vmatprep.mubr.f32.mxu0 %v10514_v0  ;;  %v824_v46 = vld [vmem:[%s10559_s19 + $0xc88] sm:$0xff]  ;;  %v831_v47 = vld [vmem:[%s10559_s19 + $0xf98] sm:$0xff]  ;;  %v9870_v51 = vpack.c.bf16 %v829_v41, %v822_v40  ;;  %v9884_v52 = vpack.c.bf16 %v806_v44, %v799_v43  ;;  %v813_v57 = vld [vmem:[%s10559_s19 + $0x680] sm:$0xff] }
  0x2a   : > { %441 = vmatprep.mubr.f32.mxu1 %v10514_v0  ;;  %9847 = vmatpush1.bf16.msra.mxu0 %v9846_v10  ;;  %v800_v48 = vld [vmem:[%s10559_s19 + $0x68] sm:$0xff]  ;;  %v807_v50 = vld [vmem:[%s10559_s19 + $0x378] sm:$0xff]  ;;  %v9882_v53 = vpack.c.bf16 %v831_v47, %v824_v46  ;;  %v820_v58 = vld [vmem:[%s10559_s19 + $0x990] sm:$0xff] }
  0x2b   : > { %9859 = vmatpush3.bf16.msra.mxu1 %v9856_v4  ;;  %9873 = vmatprep.subr.bf16.mxu0 %v9872_v11  ;;  %v9896_v54 = vpack.c.bf16 %v807_v50, %v800_v48  ;;  %v798_v55 = vld [vmem:[%s10559_s19 + $0x58] sm:$0xff]  ;;  %v805_v56 = vld [vmem:[%s10559_s19 + $0x368] sm:$0xff]  ;;  %v9888_v61 = vpack.c.bf16 %v820_v58, %v813_v57  ;;  %v827_v1 = vld [vmem:[%s10559_s19 + $0xca0] sm:$0xff] }
  0x2c   : > { %8833 = vmatmul.mubr.msk.f32.gmra.mrb[6].mxu0 %vm221_vm0, %v10642_v13  ;;  %9861 = vmatprep.subr.bf16.mxu1 %v9860_v12  ;;  %v9886_v60 = vpack.c.bf16 %v805_v56, %v798_v55  ;;  %v812_v62 = vld [vmem:[%s10559_s19 + $0x678] sm:$0xff]  ;;  %v819_v63 = vld [vmem:[%s10559_s19 + $0x988] sm:$0xff]  ;;  %v834_v3 = vld [vmem:[%s10559_s19 + $0xfb0] sm:$0xff] }
  0x2d   : > { %8841 = vmatmul.mubr.msk.f32.gmra.mrb[6].mxu1 %vm221_vm0, %v10642_v13  ;;  %334 = vmatprep.mubr.f32.mxu0 %v10514_v0  ;;  %v9890_v4 = vpack.c.bf16 %v819_v63, %v812_v62  ;;  %v9892_v5 = vpack.c.bf16 %v834_v3, %v827_v1  ;;  %v826_v6 = vld [vmem:[%s10559_s19 + $0xc98] sm:$0xff]  ;;  %v833_v8 = vld [vmem:[%s10559_s19 + $0xfa8] sm:$0xff]  ;;  %v1410_v27 = vld [vmem:[%s10559_s19 + $0x80] sm:$0xff] }
  0x2e   : > { %447 = vmatprep.mubr.f32.mxu1 %v10514_v0  ;;  %741 = vperm.xlu0 %10496, %v733_v17   ;;  %v1411_v9 = vld [vmem:[%s10559_s19 + $0x88] sm:$0xff]  ;;  %v1418_v10 = vld [vmem:[%s10559_s19 + $0x398] sm:$0xff]  ;;  %v9894_v11 = vpack.c.bf16 %v833_v8, %v826_v6  ;;  %v1424_v32 = vld [vmem:[%s10559_s19 + $0x6a0] sm:$0xff] }
  0x2f   : > { %1355 = vperm.xlu1 %10497, %v733_v17   ;;  %v9920_v12 = vpack.c.bf16 %v1418_v10, %v1411_v9  ;;  %v821_v19 = vld [vmem:[%s10559_s19 + $0x998] sm:$0xff]  ;;  %v828_v21 = vld [vmem:[%s10559_s19 + $0xca8] sm:$0xff]  ;;  %v1414_v40 = vld [vmem:[%s10559_s19 + $0xa0] sm:$0xff] }
  0x30   : > { %8834 = vmatmul.mubr.msk.f32.gmra.mrb[8].mxu0 %vm221_vm0, %v10653_v14  ;;  %v835_v22 = vld [vmem:[%s10559_s19 + $0xfb8] sm:$0xff]  ;;  %v1439_v34 = vld [vmem:[%s10559_s19 + $0xcc8] sm:$0xff]  ;;  %v1421_v41 = vld [vmem:[%s10559_s19 + $0x3b0] sm:$0xff] }
  0x31   : > { %8842 = vmatmul.mubr.msk.f32.gmra.mrb[8].mxu1 %vm221_vm0, %v10653_v14  ;;  %340 = vmatprep.mubr.f32.mxu0 %v10514_v0  ;;  %v9904_v23 = vpack.c.bf16 %v835_v22, %v828_v21  ;;  %v1409_v24 = vld [vmem:[%s10559_s19 + $0x78] sm:$0xff]  ;;  %v10841_v43 = vpack.c.bf16 %v1421_v41, %v1414_v40  ;;  %v1408_v44 = vld [vmem:[%s10559_s19 + $0x70] sm:$0xff]  ;;  %v1430_v47 = vld [vmem:[%s10559_s19 + $0x9a8] sm:$0xff] }
  0x32   : > { %453 = vmatprep.mubr.f32.mxu1 %v10514_v0  ;;  %1964 = vperm.xlu0 %10496, %v10552_v2   ;;  %v815_v2 = vld [vmem:[%s10559_s19 + $0x968] sm:$0xff]  ;;  %v1446_v35 = vld [vmem:[%s10559_s19 + $0xfd8] sm:$0xff]  ;;  %v1436_v57 = vld [vmem:[%s10559_s19 + $0xcb0] sm:$0xff] }
  0x33   : > { %1969 = vperm.xlu1 %10497, %v733_v17   ;;  %v9866_v38 = vpack.c.bf16 %v815_v2, %v808_v30  ;;  %v814_v17 = vld [vmem:[%s10559_s19 + $0x688] sm:$0xff]  ;;  %v1432_v30 = vld [vmem:[%s10559_s19 + $0x9b8] sm:$0xff]  ;;  %v9928_v37 = vpack.c.bf16 %v1446_v35, %v1439_v34  ;;  %v1443_v58 = vld [vmem:[%s10559_s19 + $0xfc0] sm:$0xff] }
  0x34   : > { %8835 = vmatmul.mubr.msk.f32.gmra.mrb[10].mxu0 %vm221_vm0, %v10664_v15  ;;  %v9900_v20 = vpack.c.bf16 %v821_v19, %v814_v17  ;;  %v1423_v46 = vld [vmem:[%s10559_s19 + $0x698] sm:$0xff]  ;;  %v9918_v62 = vpack.c.bf16 %v1443_v58, %v1436_v57  ;;  %v1412_v1 = vld [vmem:[%s10559_s19 + $0x90] sm:$0xff]  ;;  %v1419_v3 = vld [vmem:[%s10559_s19 + $0x3a0] sm:$0xff] }
  0x35   : > { %8843 = vmatmul.mubr.msk.f32.gmra.mrb[10].mxu1 %vm221_vm0, %v10664_v15  ;;  %346 = vmatprep.mubr.f32.mxu0 %v10514_v0  ;;  %v9912_v50 = vpack.c.bf16 %v1430_v47, %v1423_v46  ;;  %v9934_v6 = vpack.c.bf16 %v1419_v3, %v1412_v1  ;;  %v1428_v8 = vld [vmem:[%s10559_s19 + $0x6c0] sm:$0xff]  ;;  %v1435_v9 = vld [vmem:[%s10559_s19 + $0x9d0] sm:$0xff]  ;;  %v1441_v19 = vld [vmem:[%s10559_s19 + $0xcd8] sm:$0xff] }
  0x36   : > { %459 = vmatprep.mubr.f32.mxu1 %v10514_v0  ;;  %v9948_v17 = vpack.c.bf16 %v1435_v9, %v1428_v8  ;;  %v1442_v21 = vld [vmem:[%s10559_s19 + $0xce0] sm:$0xff]  ;;  %v1449_v22 = vld [vmem:[%s10559_s19 + $0xff0] sm:$0xff]  ;;  %v2024_v34 = vld [vmem:[%s10559_s19 + $0xb8] sm:$0xff] }
  0x37   : > { %v2031_v35 = vld [vmem:[%s10559_s19 + $0x3c8] sm:$0xff]  ;;  %v2039_v41 = vld [vmem:[%s10559_s19 + $0x6e0] sm:$0xff]  ;;  %v2043_v46 = vld [vmem:[%s10559_s19 + $0x9d8] sm:$0xff] }
  0x38   : > { %8836 = vmatmul.mubr.msk.f32.gmra.mrb[12].mxu0 %vm221_vm0, %v10675_v16  ;;  %v9970_v40 = vpack.c.bf16 %v2031_v35, %v2024_v34  ;;  %v2051_v47 = vld [vmem:[%s10559_s19 + $0xcf0] sm:$0xff]  ;;  %v2050_v57 = vld [vmem:[%s10559_s19 + $0xce8] sm:$0xff]  ;;  %v2057_v58 = vld [vmem:[%s10559_s19 + $0xff8] sm:$0xff] }
  0x39   : > { %8844 = vmatmul.mubr.msk.f32.gmra.mrb[12].mxu1 %vm221_vm0, %v10675_v16  ;;  %352 = vmatprep.mubr.f32.mxu0 %v10514_v0  ;;  %v2052_v1 = vld [vmem:[%s10559_s19 + $0xcf8] sm:$0xff]  ;;  %v2059_v3 = vld [vmem:[%s10559_s19 + $0x1008] sm:$0xff] }
  0x3a   : > { %465 = vmatprep.mubr.f32.mxu1 %v10514_v0  ;;  %v9978_v9 = vpack.c.bf16 %v2059_v3, %v2052_v1  ;;  %v2042_v35 = vld [vmem:[%s10559_s19 + $0x6f8] sm:$0xff]  ;;  %v2643_v1 = vld [vmem:[%s10559_s19 + $0x3f0] sm:$0xff] }
  0x3b   : > { %v2658_v3 = vld [vmem:[%s10559_s19 + $0xa18] sm:$0xff] }
  0x3c   : > { %8837 = vmatmul.mubr.msk.f32.gmra.mrb[14].mxu0 %vm221_vm0, %v10689_v18 }
  0x3d   : > { %8845 = vmatmul.mubr.msk.f32.gmra.mrb[14].mxu1 %vm221_vm0, %v10689_v18  ;;  %536 = vmatprep.mubr.f32.mxu0 %v10514_v0 }
  0x3e   : > { %9488 = vmatprep.mubr.msk.f32.mxu1 %vm221_vm0, %v10596_v49 }
  0x40   : > { %8846 = vmatmul.mubr.msk.f32.vlgmr.msra.gmra.mrb[16].mxu0 %vm221_vm0, %v10596_v49 }
  0x41   : > { %9489 = vmatmul.mubr.msk.f32.vlgmr.msra.gmra.mrb[16].mxu1 %vm221_vm0, %v10611_v59  ;;  %9875 = vmatpush1.bf16.msra.mxu0 %v9874_v25  ;;  %v1416_v25 = vld [vmem:[%s10559_s19 + $0x388] sm:$0xff] }
  0x42   : > { %9863 = vmatpush1.bf16.msra.mxu1 %v9862_v28  ;;  %542 = vmatprep.mubr.f32.mxu0 %v10514_v0  ;;  %v9908_v26 = vpack.c.bf16 %v1416_v25, %v1409_v24  ;;  %v1417_v28 = vld [vmem:[%s10559_s19 + $0x390] sm:$0xff] }
  0x43   : > { %9491 = vmatprep.mubr.msk.f32.mxu1 %vm221_vm0, %v10629_v7  ;;  %9865 = vmatprep.subr.bf16.mxu1 %v9864_v29  ;;  %v1425_v29 = vld [vmem:[%s10559_s19 + $0x6a8] sm:$0xff]  ;;  %v9922_v2 = vpack.c.bf16 %v1417_v28, %v1410_v27  ;;  %v1440_v25 = vld [vmem:[%s10559_s19 + $0xcd0] sm:$0xff]  ;;  %v9952_v27 = vpack.c.bf16 %v1449_v22, %v1442_v21  ;;  %v2025_v28 = vld [vmem:[%s10559_s19 + $0xc0] sm:$0xff] }
  0x44   : > { %8847 = vmatmul.mubr.msk.f32.gmra.mrb[18].mxu0 %vm221_vm0, %v10611_v59  ;;  %9877 = vmatprep.subr.bf16.mxu0 %v9876_v33  ;;  %v9924_v31 = vpack.c.bf16 %v1432_v30, %v1425_v29  ;;  %v1431_v33 = vld [vmem:[%s10559_s19 + $0x9b0] sm:$0xff]  ;;  %v2575_v21 = vld [vmem:[%s14426_s2 + $0x8] sm:$0xff] }
  0x45   : > { %9492 = vmatmul.mubr.msk.f32.gmra.mrb[18].mxu1 %vm221_vm0, %v10642_v13  ;;  %548 = vmatprep.mubr.f32.mxu0 %v10514_v0  ;;  %v9926_v36 = vpack.c.bf16 %v1431_v33, %v1424_v32  ;;  %v2032_v29 = vld [vmem:[%s10559_s19 + $0x3d0] sm:$0xff] }
  0x46   : > { %9494 = vmatprep.mubr.msk.f32.mxu1 %vm221_vm0, %v10653_v14  ;;  %9867 = vmatpush1.bf16.msra.mxu1 %v9866_v38  ;;  %v1438_v38 = vld [vmem:[%s10559_s19 + $0xcc0] sm:$0xff]  ;;  %v2023_v30 = vld [vmem:[%s10559_s19 + $0xb0] sm:$0xff]  ;;  %v9968_v32 = vpack.c.bf16 %v2032_v29, %v2025_v28 }
  0x47   : > { %9869 = vmatprep.subr.bf16.mxu1 %v9868_v39  ;;  %9879 = vmatpush1.bf16.msra.mxu0 %v9878_v42  ;;  %v1445_v39 = vld [vmem:[%s10559_s19 + $0xfd0] sm:$0xff] }
  0x48   : > { %8848 = vmatmul.mubr.msk.f32.gmra.mrb[20].mxu0 %vm221_vm0, %v10629_v7  ;;  %9881 = vmatprep.subr.bf16.mxu0 %v9880_v45  ;;  %v9930_v42 = vpack.c.bf16 %v1445_v39, %v1438_v38  ;;  %v1415_v45 = vld [vmem:[%s10559_s19 + $0x380] sm:$0xff]  ;;  %v2037_v38 = vld [vmem:[%s10559_s19 + $0x6d0] sm:$0xff] }
  0x49   : > { %9495 = vmatmul.mubr.msk.f32.gmra.mrb[20].mxu1 %vm221_vm0, %v10664_v15  ;;  %554 = vmatprep.mubr.f32.mxu0 %v10514_v0  ;;  %v9910_v48 = vpack.c.bf16 %v1415_v45, %v1408_v44  ;;  %v2044_v39 = vld [vmem:[%s10559_s19 + $0x9e0] sm:$0xff]  ;;  %v2036_v45 = vld [vmem:[%s10559_s19 + $0x6c8] sm:$0xff] }
  0x4a   : > { %9497 = vmatprep.mubr.msk.f32.mxu1 %vm221_vm0, %v10675_v16  ;;  %9871 = vmatpush1.bf16.msra.mxu1 %v9870_v51  ;;  %v1422_v51 = vld [vmem:[%s10559_s19 + $0x690] sm:$0xff]  ;;  %v9960_v44 = vpack.c.bf16 %v2044_v39, %v2037_v38  ;;  %v2056_v38 = vld [vmem:[%s10559_s19 + $0xd18] sm:$0xff]  ;;  %v2063_v39 = vld [vmem:[%s10559_s19 + $0x1028] sm:$0xff] }
  0x4b   : > { %9885 = vmatprep.subr.bf16.mxu1 %v9884_v52  ;;  %9883 = vmatpush1.bf16.msra.mxu0 %v9882_v53  ;;  %v1429_v52 = vld [vmem:[%s10559_s19 + $0x9a0] sm:$0xff]  ;;  %v1437_v53 = vld [vmem:[%s10559_s19 + $0xcb8] sm:$0xff] }
  0x4c   : > { %8849 = vmatmul.mubr.msk.f32.gmra.mrb[22].mxu0 %vm221_vm0, %v10642_v13  ;;  %9897 = vmatprep.subr.bf16.mxu0 %v9896_v54  ;;  %v9914_v55 = vpack.c.bf16 %v1429_v52, %v1422_v51  ;;  %v2038_v51 = vld [vmem:[%s10559_s19 + $0x6d8] sm:$0xff]  ;;  %v2045_v52 = vld [vmem:[%s10559_s19 + $0x9e8] sm:$0xff] }
  0x4d   : > { %9498 = vmatmul.mubr.msk.f32.gmra.mrb[22].mxu1 %vm221_vm0, %v10689_v18  ;;  %560 = vmatprep.mubr.f32.mxu0 %v10514_v0 }
  0x4e   : > { %924 = vmatprep.mubr.f32.mxu1 %v10514_v0  ;;  %2583 = vperm.xlu1 %10497, %v2575_v21  }
  0x50   : > { %8850 = vmatmul.mubr.msk.f32.gmra.mrb[24].mxu0 %vm221_vm0, %v10653_v14 }
  0x51   : > { %8862 = vmatmul.mubr.msk.f32.vlgmr.msra.gmra.mrb[24].mxu1 %vm221_vm0, %v10596_v49  ;;  %566 = vmatprep.mubr.f32.mxu0 %v10514_v0 }
  0x52   : > { %9887 = vmatpush1.bf16.msra.mxu1 %v9886_v60  ;;  %930 = vmatprep.mubr.f32.mxu1 %v10514_v0  ;;  %v1413_v60 = vld [vmem:[%s10559_s19 + $0x98] sm:$0xff] }
  0x53   : > { %9889 = vmatprep.subr.bf16.mxu1 %v9888_v61  ;;  %v1420_v61 = vld [vmem:[%s10559_s19 + $0x3a8] sm:$0xff]  ;;  %3197 = vperm.xlu1 %10497, %v2575_v21  }
  0x54   : > { %8851 = vmatmul.mubr.msk.f32.gmra.mrb[26].mxu0 %vm221_vm0, %v10664_v15  ;;  %v9932_v63 = vpack.c.bf16 %v1420_v61, %v1413_v60  ;;  %v9974_v60 = vpack.c.bf16 %v2045_v52, %v2038_v51  ;;  %v2027_v61 = vld [vmem:[%s10559_s19 + $0xd0] sm:$0xff]  ;;  %v2667_v51 = vld [vmem:[%s10559_s19 + $0xd38] sm:$0xff]  ;;  %v2674_v52 = vld [vmem:[%s10559_s19 + $0x1048] sm:$0xff] }
  0x55   : > { %8863 = vmatmul.mubr.msk.f32.gmra.mrb[26].mxu1 %vm221_vm0, %v10611_v59  ;;  %572 = vmatprep.mubr.f32.mxu0 %v10514_v0  ;;  %v2641_v21 = vld [vmem:[%s10559_s19 + $0x108] sm:$0xff] }
  0x56   : > { %936 = vmatprep.mubr.f32.mxu1 %v10514_v0  ;;  %9891 = vmatpush1.bf16.msra.mxu1 %v9890_v4  ;;  %v1427_v4 = vld [vmem:[%s10559_s19 + $0x6b8] sm:$0xff] }
  0x57   : > { %9893 = vmatprep.subr.bf16.mxu1 %v9892_v5  ;;  %v1434_v5 = vld [vmem:[%s10559_s19 + $0x9c8] sm:$0xff] }
  0x58   : > { %8852 = vmatmul.mubr.msk.f32.gmra.mrb[28].mxu0 %vm221_vm0, %v10675_v16  ;;  %v9936_v10 = vpack.c.bf16 %v1434_v5, %v1427_v4  ;;  %v2028_v4 = vld [vmem:[%s10559_s19 + $0xd8] sm:$0xff]  ;;  %v2035_v5 = vld [vmem:[%s10559_s19 + $0x3e8] sm:$0xff] }
  0x59   : > { %8864 = vmatmul.mubr.msk.f32.gmra.mrb[28].mxu1 %vm221_vm0, %v10629_v7  ;;  %578 = vmatprep.mubr.f32.mxu0 %v10514_v0 }
  0x5a   : > { %942 = vmatprep.mubr.f32.mxu1 %v10514_v0  ;;  %9895 = vmatpush1.bf16.msra.mxu1 %v9894_v11  ;;  %v1426_v11 = vld [vmem:[%s10559_s19 + $0x6b0] sm:$0xff] }
  0x5b   : > { %9921 = vmatprep.subr.bf16.mxu1 %v9920_v12  ;;  %v1433_v12 = vld [vmem:[%s10559_s19 + $0x9c0] sm:$0xff] }
  0x5c   : > { %8853 = vmatmul.mubr.msk.f32.gmra.mrb[30].mxu0 %vm221_vm0, %v10689_v18 }
  0x5d   : > { %8865 = vmatmul.mubr.msk.f32.gmra.mrb[30].mxu1 %vm221_vm0, %v10642_v13  ;;  %1037 = vmatprep.mubr.f32.mxu0 %v10514_v0 }
  0x5e   : > { %948 = vmatprep.mubr.f32.mxu1 %v10514_v0 }
  0x60   : > { %8870 = vmatmul.mubr.msk.f32.vlgmr.msra.gmra.mrb[32].mxu0 %vm221_vm0, %v10596_v49 }
  0x61   : > { %8866 = vmatmul.mubr.msk.f32.gmra.mrb[32].mxu1 %vm221_vm0, %v10653_v14  ;;  %9899 = vmatpush3.bf16.msra.mxu0 %v9896_v54  ;;  %v1444_v54 = vld [vmem:[%s10559_s19 + $0xfc8] sm:$0xff] }
  0x62   : > { %954 = vmatprep.mubr.f32.mxu1 %v10514_v0  ;;  %1043 = vmatprep.mubr.f32.mxu0 %v10514_v0  ;;  %v9916_v56 = vpack.c.bf16 %v1444_v54, %v1437_v53  ;;  %v2053_v53 = vld [vmem:[%s10559_s19 + $0xd00] sm:$0xff]  ;;  %v2060_v54 = vld [vmem:[%s10559_s19 + $0x1010] sm:$0xff] }
  0x63   : > { %9901 = vmatprep.subr.bf16.mxu0 %v9900_v20 }
  0x64   : > { %8871 = vmatmul.mubr.msk.f32.gmra.mrb[34].mxu0 %vm221_vm0, %v10611_v59 }
  0x65   : > { %8867 = vmatmul.mubr.msk.f32.gmra.mrb[34].mxu1 %vm221_vm0, %v10664_v15  ;;  %1049 = vmatprep.mubr.f32.mxu0 %v10514_v0 }
  0x66   : > { %960 = vmatprep.mubr.f32.mxu1 %v10514_v0  ;;  %9903 = vmatpush3.bf16.msra.mxu0 %v9900_v20  ;;  %v1448_v20 = vld [vmem:[%s10559_s19 + $0xfe8] sm:$0xff] }
  0x67   : > { %9905 = vmatprep.subr.bf16.mxu0 %v9904_v23  ;;  %v9940_v24 = vpack.c.bf16 %v1448_v20, %v1441_v19  ;;  %v2041_v19 = vld [vmem:[%s10559_s19 + $0x6f0] sm:$0xff]  ;;  %v2048_v20 = vld [vmem:[%s10559_s19 + $0xa00] sm:$0xff] }
  0x68   : > { %8872 = vmatmul.mubr.msk.f32.gmra.mrb[36].mxu0 %vm221_vm0, %v10629_v7 }
  0x69   : > { %8868 = vmatmul.mubr.msk.f32.gmra.mrb[36].mxu1 %vm221_vm0, %v10675_v16  ;;  %1055 = vmatprep.mubr.f32.mxu0 %v10514_v0 }
  0x6a   : > { %966 = vmatprep.mubr.f32.mxu1 %v10514_v0  ;;  %9907 = vmatpush3.bf16.msra.mxu0 %v9904_v23  ;;  %v9938_v23 = vpack.c.bf16 %v1433_v12, %v1426_v11  ;;  %v2026_v11 = vld [vmem:[%s10559_s19 + $0xc8] sm:$0xff]  ;;  %v2033_v12 = vld [vmem:[%s10559_s19 + $0x3d8] sm:$0xff] }
  0x6b   : > { %9909 = vmatprep.subr.bf16.mxu0 %v9908_v26  ;;  %v1447_v26 = vld [vmem:[%s10559_s19 + $0xfe0] sm:$0xff]  ;;  %v9982_v22 = vpack.c.bf16 %v2033_v12, %v2026_v11 }
  0x6c   : > { %8873 = vmatmul.mubr.msk.f32.gmra.mrb[38].mxu0 %vm221_vm0, %v10642_v13  ;;  %v2664_v12 = vld [vmem:[%s10559_s19 + $0xd20] sm:$0xff] }
  0x6d   : > { %8869 = vmatmul.mubr.msk.f32.gmra.mrb[38].mxu1 %vm221_vm0, %v10689_v18  ;;  %1061 = vmatprep.mubr.f32.mxu0 %v10514_v0 }
  0x6e   : > { %1150 = vmatprep.mubr.f32.mxu1 %v10514_v0 }
  0x70   : > { %8874 = vmatmul.mubr.msk.f32.gmra.mrb[40].mxu0 %vm221_vm0, %v10653_v14 }
  0x71   : > { %8878 = vmatmul.mubr.msk.f32.vlgmr.msra.gmra.mrb[40].mxu1 %vm221_vm0, %v10596_v49  ;;  %1067 = vmatprep.mubr.f32.mxu0 %v10514_v0 }
  0x72   : > { %9923 = vmatpush1.bf16.msra.mxu1 %v9922_v2  ;;  %1156 = vmatprep.mubr.f32.mxu1 %v10514_v0  ;;  %v2030_v2 = vld [vmem:[%s10559_s19 + $0x3c0] sm:$0xff] }
  0x73   : > { %9925 = vmatprep.subr.bf16.mxu1 %v9924_v31  ;;  %v9942_v31 = vpack.c.bf16 %v1447_v26, %v1440_v25  ;;  %v9956_v33 = vpack.c.bf16 %v2030_v2, %v2023_v30  ;;  %v2047_v25 = vld [vmem:[%s10559_s19 + $0x9f8] sm:$0xff]  ;;  %v2055_v26 = vld [vmem:[%s10559_s19 + $0xd10] sm:$0xff]  ;;  %v2054_v30 = vld [vmem:[%s10559_s19 + $0xd08] sm:$0xff] }
  0x74   : > { %8875 = vmatmul.mubr.msk.f32.gmra.mrb[42].mxu0 %vm221_vm0, %v10664_v15  ;;  %v2061_v2 = vld [vmem:[%s10559_s19 + $0x1018] sm:$0xff] }
  0x75   : > { %8879 = vmatmul.mubr.msk.f32.gmra.mrb[42].mxu1 %vm221_vm0, %v10611_v59  ;;  %1073 = vmatprep.mubr.f32.mxu0 %v10514_v0 }
  0x76   : > { %1162 = vmatprep.mubr.f32.mxu1 %v10514_v0  ;;  %9927 = vmatpush1.bf16.msra.mxu1 %v9926_v36  ;;  %v2022_v36 = vld [vmem:[%s10559_s19 + $0xa8] sm:$0xff] }
  0x77   : > { %9929 = vmatprep.subr.bf16.mxu1 %v9928_v37  ;;  %v2029_v37 = vld [vmem:[%s10559_s19 + $0x3b8] sm:$0xff] }
  0x78   : > { %8876 = vmatmul.mubr.msk.f32.gmra.mrb[44].mxu0 %vm221_vm0, %v10675_v16 }
  0x79   : > { %8880 = vmatmul.mubr.msk.f32.gmra.mrb[44].mxu1 %vm221_vm0, %v10629_v7  ;;  %1079 = vmatprep.mubr.f32.mxu0 %v10514_v0 }
  0x7a   : > { %1168 = vmatprep.mubr.f32.mxu1 %v10514_v0  ;;  %9931 = vmatpush1.bf16.msra.mxu1 %v9930_v42  ;;  %v2046_v42 = vld [vmem:[%s10559_s19 + $0x9f0] sm:$0xff] }
  0x7b   : > { %9945 = vmatprep.subr.bf16.mxu1 %v10841_v43 }
  0x7c   : > { %8877 = vmatmul.mubr.msk.f32.gmra.mrb[46].mxu0 %vm221_vm0, %v10689_v18 }
  0x7d   : > { %8881 = vmatmul.mubr.msk.f32.gmra.mrb[46].mxu1 %vm221_vm0, %v10642_v13  ;;  %9512 = vmatprep.mubr.msk.f32.mxu0 %vm221_vm0, %v10596_v49 }
  0x7e   : > { %1174 = vmatprep.mubr.f32.mxu1 %v10514_v0 }
  0x80   : > { %9513 = vmatmul.mubr.msk.f32.vlgmr.msra.gmra.mrb[48].mxu0 %vm221_vm0, %v10611_v59 }
  0x81   : > { %8882 = vmatmul.mubr.msk.f32.gmra.mrb[48].mxu1 %vm221_vm0, %v10653_v14  ;;  %9911 = vmatpush1.bf16.msra.mxu0 %v9910_v48  ;;  %v2058_v48 = vld [vmem:[%s10559_s19 + $0x1000] sm:$0xff] }
  0x82   : > { %1180 = vmatprep.mubr.f32.mxu1 %v10514_v0  ;;  %9515 = vmatprep.mubr.msk.f32.mxu0 %vm221_vm0, %v10629_v7 }
  0x83   : > { %9913 = vmatprep.subr.bf16.mxu0 %v9912_v50  ;;  %v9972_v50 = vpack.c.bf16 %v2046_v42, %v2039_v41  ;;  %v2637_v41 = vld [vmem:[%s10559_s19 + $0xe8] sm:$0xff] }
  0x84   : > { %9516 = vmatmul.mubr.msk.f32.gmra.mrb[50].mxu0 %vm221_vm0, %v10642_v13 }
  0x85   : > { %8883 = vmatmul.mubr.msk.f32.gmra.mrb[50].mxu1 %vm221_vm0, %v10664_v15  ;;  %9518 = vmatprep.mubr.msk.f32.mxu0 %vm221_vm0, %v10653_v14 }
  0x86   : > { %1186 = vmatprep.mubr.f32.mxu1 %v10514_v0  ;;  %9915 = vmatpush1.bf16.msra.mxu0 %v9914_v55  ;;  %v9962_v55 = vpack.c.bf16 %v2043_v46, %v2036_v45  ;;  %v2660_v45 = vld [vmem:[%s10559_s19 + $0xa28] sm:$0xff] }
  0x87   : > { %9917 = vmatprep.subr.bf16.mxu0 %v9916_v56  ;;  %v9964_v56 = vpack.c.bf16 %v2058_v48, %v2051_v47  ;;  %v2652_v48 = vld [vmem:[%s10559_s19 + $0x710] sm:$0xff] }
  0x88   : > { %9519 = vmatmul.mubr.msk.f32.gmra.mrb[52].mxu0 %vm221_vm0, %v10664_v15 }
  0x89   : > { %8884 = vmatmul.mubr.msk.f32.gmra.mrb[52].mxu1 %vm221_vm0, %v10675_v16  ;;  %9521 = vmatprep.mubr.msk.f32.mxu0 %vm221_vm0, %v10675_v16 }
  0x8a   : > { %1192 = vmatprep.mubr.f32.mxu1 %v10514_v0  ;;  %9919 = vmatpush1.bf16.msra.mxu0 %v9918_v62  ;;  %v2034_v62 = vld [vmem:[%s10559_s19 + $0x3e0] sm:$0xff] }
  0x8b   : > { %9933 = vmatprep.subr.bf16.mxu0 %v9932_v63  ;;  %v9976_v63 = vpack.c.bf16 %v2060_v54, %v2053_v53  ;;  %v9980_v8 = vpack.c.bf16 %v2034_v62, %v2027_v61  ;;  %v10498_v53 = vld [vmem:[%s14425_s1] sm:$0xff]  ;;  %v10499_v61 = vld [vmem:[%s14425_s1 + $0x8] sm:$0xff] }
  0x8c   : > { %9522 = vmatmul.mubr.msk.f32.gmra.mrb[54].mxu0 %vm221_vm0, %v10689_v18 }
  0x8d   : > { %8885 = vmatmul.mubr.msk.f32.gmra.mrb[54].mxu1 %vm221_vm0, %v10689_v18  ;;  %1538 = vmatprep.mubr.f32.mxu0 %v10514_v0 }
  0x8e   : > { %1651 = vmatprep.mubr.f32.mxu1 %v10514_v0 }
  0x90   : > { %8894 = vmatmul.mubr.msk.f32.vlgmr.msra.gmra.mrb[56].mxu0 %vm221_vm0, %v10596_v49 }
  0x91   : > { %8902 = vmatmul.mubr.msk.f32.vlgmr.msra.gmra.mrb[56].mxu1 %vm221_vm0, %v10596_v49  ;;  %9935 = vmatpush1.bf16.msra.mxu0 %v9934_v6  ;;  %v9966_v6 = vpack.c.bf16 %v2057_v58, %v2050_v57  ;;  %v2673_v57 = vld [vmem:[%s10559_s19 + $0x1040] sm:$0xff]  ;;  %v2642_v58 = vld [vmem:[%s10559_s19 + $0x110] sm:$0xff] }
  0x92   : > { %9947 = vmatpush3.bf16.msra.mxu1 %v10841_v43  ;;  %1544 = vmatprep.mubr.f32.mxu0 %v10514_v0  ;;  %v9958_v43 = vpack.c.bf16 %v2029_v37, %v2022_v36  ;;  %v2049_v36 = vld [vmem:[%s10559_s19 + $0xa08] sm:$0xff] }
  0x93   : > { %1657 = vmatprep.mubr.f32.mxu1 %v10514_v0  ;;  %9937 = vmatprep.subr.bf16.mxu0 %v9936_v10  ;;  %v11004_v10 = vpack.c.bf16 %v2035_v5, %v2028_v4  ;;  %v9996_v37 = vpack.c.bf16 %v2049_v36, %v2042_v35  ;;  %v2650_v5 = vld [vmem:[%s10559_s19 + $0x700] sm:$0xff] }
  0x94   : > { %8895 = vmatmul.mubr.msk.f32.gmra.mrb[58].mxu0 %vm221_vm0, %v10611_v59  ;;  %9949 = vmatprep.subr.bf16.mxu1 %v9948_v17 }
  0x95   : > { %8903 = vmatmul.mubr.msk.f32.gmra.mrb[58].mxu1 %vm221_vm0, %v10611_v59  ;;  %1550 = vmatprep.mubr.f32.mxu0 %v10514_v0 }
  0x96   : > { %1663 = vmatprep.mubr.f32.mxu1 %v10514_v0  ;;  %9939 = vmatpush1.bf16.msra.mxu0 %v9938_v23  ;;  %v9984_v23 = vpack.c.bf16 %v2048_v20, %v2041_v19  ;;  %v10501_v20 = vld [vmem:[%s14425_s1 + $0x18] sm:$0xff] }
  0x97   : > { %9951 = vmatpush3.bf16.msra.mxu1 %v9948_v17  ;;  %9941 = vmatprep.subr.bf16.mxu0 %v9940_v24  ;;  %v2574_v17 = vld [vmem:[%s14426_s2] sm:$0xff]  ;;  %v2040_v24 = vld [vmem:[%s10559_s19 + $0x6e8] sm:$0xff] }
  0x98   : > { %8896 = vmatmul.mubr.msk.f32.gmra.mrb[60].mxu0 %vm221_vm0, %v10629_v7  ;;  %9953 = vmatprep.subr.bf16.mxu1 %v9952_v27  ;;  %v9986_v28 = vpack.c.bf16 %v2047_v25, %v2040_v24  ;;  %v10502_v24 = vld [vmem:[%s14425_s1 + $0x28] sm:$0xff]  ;;  %v10503_v25 = vld [vmem:[%s14425_s1 + $0x20] sm:$0xff] }
  0x99   : > { %8904 = vmatmul.mubr.msk.f32.gmra.mrb[60].mxu1 %vm221_vm0, %v10629_v7  ;;  %1556 = vmatprep.mubr.f32.mxu0 %v10514_v0 }
  0x9a   : > { %1669 = vmatprep.mubr.f32.mxu1 %v10514_v0  ;;  %9943 = vmatpush1.bf16.msra.mxu0 %v9942_v31  ;;  %v2639_v31 = vld [vmem:[%s10559_s19 + $0xf8] sm:$0xff] }
  0x9b   : > { %9955 = vmatpush3.bf16.msra.mxu1 %v9952_v27  ;;  %9969 = vmatprep.subr.bf16.mxu0 %v9968_v32  ;;  %v2062_v27 = vld [vmem:[%s10559_s19 + $0x1020] sm:$0xff]  ;;  %v2646_v32 = vld [vmem:[%s10559_s19 + $0x408] sm:$0xff] }
  0x9c   : > { %8897 = vmatmul.mubr.msk.f32.gmra.mrb[62].mxu0 %vm221_vm0, %v10642_v13  ;;  %9957 = vmatprep.subr.bf16.mxu1 %v9956_v33  ;;  %v9988_v29 = vpack.c.bf16 %v2062_v27, %v2055_v26  ;;  %v9990_v33 = vpack.c.bf16 %v2061_v2, %v2054_v30  ;;  %v10016_v34 = vpack.c.bf16 %v2646_v32, %v2639_v31  ;;  %v10504_v31 = vld [vmem:[%s14425_s1 + $0x30] sm:$0xff]  ;;  %v2640_v32 = vld [vmem:[%s10559_s19 + $0x100] sm:$0xff] }
  0x9d   : > { %8905 = vmatmul.mubr.msk.f32.gmra.mrb[62].mxu1 %vm221_vm0, %v10642_v13  ;;  %1562 = vmatprep.mubr.f32.mxu0 %v10514_v0 }
  0x9e   : > { %1675 = vmatprep.mubr.f32.mxu1 %v10514_v0  ;;  %2578 = vperm.xlu0 %10496, %v2574_v17  }
  0xa0   : > { %8898 = vmatmul.mubr.msk.f32.gmra.mrb[64].mxu0 %vm221_vm0, %v10653_v14 }
  0xa1   : > { %8906 = vmatmul.mubr.msk.f32.gmra.mrb[64].mxu1 %vm221_vm0, %v10653_v14  ;;  %1568 = vmatprep.mubr.f32.mxu0 %v10514_v0 }
  0xa2   : > { %1681 = vmatprep.mubr.f32.mxu1 %v10514_v0  ;;  %3192 = vperm.xlu0 %10496, %v2574_v17   ;;  %v2671_v17 = vld [vmem:[%s10559_s19 + $0x1030] sm:$0xff] }
  0xa3   : > { %v10014_v26 = vpack.c.bf16 %v2671_v17, %v2664_v12  ;;  %v11270_v12 = vld [vmem:[%s14425_s1 + $0x10] sm:$0xff]  ;;  %v3251_v17 = vld [vmem:[%s10559_s19 + $0x120] sm:$0xff] }
  0xa4   : > { %8899 = vmatmul.mubr.msk.f32.gmra.mrb[66].mxu0 %vm221_vm0, %v10664_v15 }
  0xa5   : > { %8907 = vmatmul.mubr.msk.f32.gmra.mrb[66].mxu1 %vm221_vm0, %v10664_v15  ;;  %1574 = vmatprep.mubr.f32.mxu0 %v10514_v0 }
  0xa6   : > { %1687 = vmatprep.mubr.f32.mxu1 %v10514_v0 }
  0xa8   : > { %8900 = vmatmul.mubr.msk.f32.gmra.mrb[68].mxu0 %vm221_vm0, %v10675_v16 }
  0xa9   : > { %8908 = vmatmul.mubr.msk.f32.gmra.mrb[68].mxu1 %vm221_vm0, %v10675_v16  ;;  %1580 = vmatprep.mubr.f32.mxu0 %v10514_v0 }
  0xaa   : > { %1693 = vmatprep.mubr.f32.mxu1 %v10514_v0 }
  0xac   : > { %8901 = vmatmul.mubr.msk.f32.gmra.mrb[70].mxu0 %vm221_vm0, %v10689_v18 }
  0xad   : > { %8909 = vmatmul.mubr.msk.f32.gmra.mrb[70].mxu1 %vm221_vm0, %v10689_v18  ;;  %1764 = vmatprep.mubr.f32.mxu0 %v10514_v0 }
  0xae   : > { %9536 = vmatprep.mubr.msk.f32.mxu1 %vm221_vm0, %v10596_v49 }
  0xb0   : > { %8910 = vmatmul.mubr.msk.f32.vlgmr.msra.gmra.mrb[72].mxu0 %vm221_vm0, %v10596_v49 }
  0xb1   : > { %9537 = vmatmul.mubr.msk.f32.vlgmr.msra.gmra.mrb[72].mxu1 %vm221_vm0, %v10611_v59  ;;  %9971 = vmatpush1.bf16.msra.mxu0 %v9970_v40  ;;  %v10000_v40 = vpack.c.bf16 %v2063_v39, %v2056_v38  ;;  %v10505_v38 = vld [vmem:[%s14425_s1 + $0x38] sm:$0xff]  ;;  %v2655_v39 = vld [vmem:[%s10559_s19 + $0x728] sm:$0xff] }
  0xb2   : > { %9959 = vmatpush1.bf16.msra.mxu1 %v9958_v43  ;;  %1770 = vmatprep.mubr.f32.mxu0 %v10514_v0  ;;  %v2645_v43 = vld [vmem:[%s10559_s19 + $0x400] sm:$0xff] }
  0xb3   : > { %9539 = vmatprep.mubr.msk.f32.mxu1 %vm221_vm0, %v10629_v7  ;;  %9961 = vmatprep.subr.bf16.mxu1 %v9960_v44  ;;  %v2653_v44 = vld [vmem:[%s10559_s19 + $0x718] sm:$0xff] }
  0xb4   : > { %8911 = vmatmul.mubr.msk.f32.gmra.mrb[74].mxu0 %vm221_vm0, %v10611_v59  ;;  %9973 = vmatprep.subr.bf16.mxu0 %v9972_v50  ;;  %v10020_v47 = vpack.c.bf16 %v2660_v45, %v2653_v44  ;;  %v2659_v50 = vld [vmem:[%s10559_s19 + $0xa20] sm:$0xff]  ;;  %v2656_v44 = vld [vmem:[%s10559_s19 + $0x730] sm:$0xff] }
  0xb5   : > { %9540 = vmatmul.mubr.msk.f32.gmra.mrb[74].mxu1 %vm221_vm0, %v10642_v13  ;;  %1776 = vmatprep.mubr.f32.mxu0 %v10514_v0  ;;  %v10022_v54 = vpack.c.bf16 %v2659_v50, %v2652_v48  ;;  %v2663_v45 = vld [vmem:[%s10559_s19 + $0xa40] sm:$0xff] }
  0xb6   : > { %9542 = vmatprep.mubr.msk.f32.mxu1 %vm221_vm0, %v10653_v14  ;;  %9963 = vmatpush1.bf16.msra.mxu1 %v9962_v55  ;;  %v10024_v55 = vpack.c.bf16 %v2674_v52, %v2667_v51  ;;  %v2654_v50 = vld [vmem:[%s10559_s19 + $0x720] sm:$0xff]  ;;  %v2661_v51 = vld [vmem:[%s10559_s19 + $0xa30] sm:$0xff] }
  0xb7   : > { %9965 = vmatprep.subr.bf16.mxu1 %v9964_v56  ;;  %9975 = vmatpush1.bf16.msra.mxu0 %v9974_v60  ;;  %v2666_v56 = vld [vmem:[%s10559_s19 + $0xd30] sm:$0xff]  ;;  %v2649_v60 = vld [vmem:[%s10559_s19 + $0x420] sm:$0xff] }
  0xb8   : > { %8912 = vmatmul.mubr.msk.f32.gmra.mrb[76].mxu0 %vm221_vm0, %v10629_v7  ;;  %9977 = vmatprep.subr.bf16.mxu0 %v9976_v63  ;;  %v10026_v62 = vpack.c.bf16 %v2673_v57, %v2666_v56  ;;  %v11119_v63 = vpack.c.bf16 %v2649_v60, %v2642_v58  ;;  %v2669_v56 = vld [vmem:[%s10559_s19 + $0xd48] sm:$0xff]  ;;  %v2676_v57 = vld [vmem:[%s10559_s19 + $0x1058] sm:$0xff] }
  0xb9   : > { %9543 = vmatmul.mubr.msk.f32.gmra.mrb[76].mxu1 %vm221_vm0, %v10664_v15  ;;  %1782 = vmatprep.mubr.f32.mxu0 %v10514_v0 }
  0xba   : > { %9545 = vmatprep.mubr.msk.f32.mxu1 %vm221_vm0, %v10675_v16  ;;  %9967 = vmatpush1.bf16.msra.mxu1 %v9966_v6  ;;  %v2657_v6 = vld [vmem:[%s10559_s19 + $0xa10] sm:$0xff] }
  0xbb   : > { %9981 = vmatprep.subr.bf16.mxu1 %v9980_v8  ;;  %9979 = vmatpush1.bf16.msra.mxu0 %v9978_v9  ;;  %v2665_v8 = vld [vmem:[%s10559_s19 + $0xd28] sm:$0xff]  ;;  %v2672_v9 = vld [vmem:[%s10559_s19 + $0x1038] sm:$0xff] }
  0xbc   : > { %8913 = vmatmul.mubr.msk.f32.gmra.mrb[78].mxu0 %vm221_vm0, %v10642_v13  ;;  %9993 = vmatprep.subr.bf16.mxu0 %v11004_v10  ;;  %v10012_v11 = vpack.c.bf16 %v2672_v9, %v2665_v8 }
  0xbd   : > { %9546 = vmatmul.mubr.msk.f32.gmra.mrb[78].mxu1 %vm221_vm0, %v10689_v18  ;;  %1788 = vmatprep.mubr.f32.mxu0 %v10514_v0 }
  0xbe   : > { %2152 = vmatprep.mubr.f32.mxu1 %v10514_v0 }
  0xc0   : > { %8914 = vmatmul.mubr.msk.f32.gmra.mrb[80].mxu0 %vm221_vm0, %v10653_v14 }
  0xc1   : > { %8926 = vmatmul.mubr.msk.f32.vlgmr.msra.gmra.mrb[80].mxu1 %vm221_vm0, %v10596_v49  ;;  %1794 = vmatprep.mubr.f32.mxu0 %v10514_v0 }
  0xc2   : > { %9983 = vmatpush1.bf16.msra.mxu1 %v9982_v22  ;;  %2158 = vmatprep.mubr.f32.mxu1 %v10514_v0  ;;  %v2648_v22 = vld [vmem:[%s10559_s19 + $0x418] sm:$0xff] }
  0xc3   : > { %9985 = vmatprep.subr.bf16.mxu1 %v9984_v23 }
  0xc4   : > { %8915 = vmatmul.mubr.msk.f32.gmra.mrb[82].mxu0 %vm221_vm0, %v10664_v15 }
  0xc5   : > { %8927 = vmatmul.mubr.msk.f32.gmra.mrb[82].mxu1 %vm221_vm0, %v10611_v59  ;;  %1800 = vmatprep.mubr.f32.mxu0 %v10514_v0 }
  0xc6   : > { %2164 = vmatprep.mubr.f32.mxu1 %v10514_v0  ;;  %9987 = vmatpush1.bf16.msra.mxu1 %v9986_v28  ;;  %v10028_v28 = vpack.c.bf16 %v2648_v22, %v2641_v21 }
  0xc7   : > { %9989 = vmatprep.subr.bf16.mxu1 %v9988_v29 }
  0xc8   : > { %8916 = vmatmul.mubr.msk.f32.gmra.mrb[84].mxu0 %vm221_vm0, %v10675_v16 }
  0xc9   : > { %8928 = vmatmul.mubr.msk.f32.gmra.mrb[84].mxu1 %vm221_vm0, %v10629_v7  ;;  %1806 = vmatprep.mubr.f32.mxu0 %v10514_v0 }
  0xca   : > { %2170 = vmatprep.mubr.f32.mxu1 %v10514_v0  ;;  %9991 = vmatpush1.bf16.msra.mxu1 %v9990_v33  ;;  %v2647_v33 = vld [vmem:[%s10559_s19 + $0x410] sm:$0xff] }
  0xcb   : > { %10017 = vmatprep.subr.bf16.mxu1 %v10016_v34 }
  0xcc   : > { %8917 = vmatmul.mubr.msk.f32.gmra.mrb[86].mxu0 %vm221_vm0, %v10689_v18 }
  0xcd   : > { %8929 = vmatmul.mubr.msk.f32.gmra.mrb[86].mxu1 %vm221_vm0, %v10642_v13  ;;  %2265 = vmatprep.mubr.f32.mxu0 %v10514_v0 }
  0xce   : > { %2176 = vmatprep.mubr.f32.mxu1 %v10514_v0 }
  0xd0   : > { %8934 = vmatmul.mubr.msk.f32.vlgmr.msra.gmra.mrb[88].mxu0 %vm221_vm0, %v10596_v49  ;;  %v2644_v49 = vld [vmem:[%s10559_s19 + $0x3f8] sm:$0xff] }
  0xd1   : > { %8930 = vmatmul.mubr.msk.f32.gmra.mrb[88].mxu1 %vm221_vm0, %v10653_v14  ;;  %9995 = vmatpush3.bf16.msra.mxu0 %v11004_v10  ;;  %v10004_v42 = vpack.c.bf16 %v2644_v49, %v2637_v41 }
  0xd2   : > { %2182 = vmatprep.mubr.f32.mxu1 %v10514_v0  ;;  %2271 = vmatprep.mubr.f32.mxu0 %v10514_v0 }
  0xd3   : > { %9997 = vmatprep.subr.bf16.mxu0 %v9996_v37 }
  0xd4   : > { %8935 = vmatmul.mubr.msk.f32.gmra.mrb[90].mxu0 %vm221_vm0, %v10611_v59  ;;  %v2638_v59 = vld [vmem:[%s10559_s19 + $0xf0] sm:$0xff] }
  0xd5   : > { %8931 = vmatmul.mubr.msk.f32.gmra.mrb[90].mxu1 %vm221_vm0, %v10664_v15  ;;  %2277 = vmatprep.mubr.f32.mxu0 %v10514_v0  ;;  %v10018_v46 = vpack.c.bf16 %v2645_v43, %v2638_v59  ;;  %v11217_v59 = vld [vmem:[%s14425_s1] sm:$0xff]  ;;  %v10030_v43 = vpack.c.bf16 %v2647_v33, %v2640_v32  ;;  %v11283_v32 = vld [vmem:[%s14425_s1 + $0x18] sm:$0xff] }
  0xd6   : > { %2188 = vmatprep.mubr.f32.mxu1 %v10514_v0  ;;  %9999 = vmatpush3.bf16.msra.mxu0 %v9996_v37 }
  0xd7   : > { %10001 = vmatprep.subr.bf16.mxu0 %v10000_v40 }
  0xd8   : > { %8936 = vmatmul.mubr.msk.f32.gmra.mrb[92].mxu0 %vm221_vm0, %v10629_v7 }
  0xd9   : > { %8932 = vmatmul.mubr.msk.f32.gmra.mrb[92].mxu1 %vm221_vm0, %v10675_v16  ;;  %2283 = vmatprep.mubr.f32.mxu0 %v10514_v0 }
  0xda   : > { %2194 = vmatprep.mubr.f32.mxu1 %v10514_v0  ;;  %10003 = vmatpush3.bf16.msra.mxu0 %v10000_v40  ;;  %v2662_v40 = vld [vmem:[%s10559_s19 + $0xa38] sm:$0xff] }
  0xdb   : > { %10005 = vmatprep.subr.bf16.mxu0 %v10004_v42  ;;  %v10032_v48 = vpack.c.bf16 %v2662_v40, %v2655_v39 }
  0xdc   : > { %8937 = vmatmul.mubr.msk.f32.gmra.mrb[94].mxu0 %vm221_vm0, %v10642_v13 }
  0xdd   : > { %8933 = vmatmul.mubr.msk.f32.gmra.mrb[94].mxu1 %vm221_vm0, %v10689_v18  ;;  %2289 = vmatprep.mubr.f32.mxu0 %v10514_v0 }
  0xde   : > { %2378 = vmatprep.mubr.f32.mxu1 %v10514_v0 }
  0xe0   : > { %8938 = vmatmul.mubr.msk.f32.gmra.mrb[96].mxu0 %vm221_vm0, %v10653_v14 }
  0xe1   : > { %8942 = vmatmul.mubr.msk.f32.vlgmr.msra.gmra.mrb[96].mxu1 %vm221_vm0, %v10498_v53  ;;  %2295 = vmatprep.mubr.f32.mxu0 %v10514_v0 }
  0xe2   : > { %10019 = vmatpush1.bf16.msra.mxu1 %v10018_v46  ;;  %2384 = vmatprep.mubr.f32.mxu1 %v10514_v0 }
  0xe3   : > { %10021 = vmatprep.subr.bf16.mxu1 %v10020_v47 }
  0xe4   : > { %8939 = vmatmul.mubr.msk.f32.gmra.mrb[98].mxu0 %vm221_vm0, %v10664_v15  ;;  %v2636_v15 = vld [vmem:[%s10559_s19 + $0xe0] sm:$0xff] }
  0xe5   : > { %8943 = vmatmul.mubr.msk.f32.gmra.mrb[98].mxu1 %vm221_vm0, %v10499_v61  ;;  %2301 = vmatprep.mubr.f32.mxu0 %v10514_v0 }
  0xe6   : > { %2390 = vmatprep.mubr.f32.mxu1 %v10514_v0  ;;  %10023 = vmatpush1.bf16.msra.mxu1 %v10022_v54 }
  0xe7   : > { %10025 = vmatprep.subr.bf16.mxu1 %v10024_v55  ;;  %v10044_v55 = vpack.c.bf16 %v2663_v45, %v2656_v44 }
  0xe8   : > { %8940 = vmatmul.mubr.msk.f32.gmra.mrb[100].mxu0 %vm221_vm0, %v10675_v16  ;;  %v2651_v16 = vld [vmem:[%s10559_s19 + $0x708] sm:$0xff] }
  0xe9   : > { %8944 = vmatmul.mubr.msk.f32.gmra.mrb[100].mxu1 %vm221_vm0, %v10629_v7  ;;  %2307 = vmatprep.mubr.f32.mxu0 %v10514_v0  ;;  %v10006_v7 = vpack.c.bf16 %v2643_v1, %v2636_v15  ;;  %v10008_v4 = vpack.c.bf16 %v2658_v3, %v2651_v16  ;;  %v2670_v15 = vld [vmem:[%s10559_s19 + $0xd50] sm:$0xff]  ;;  %v2677_v1 = vld [vmem:[%s10559_s19 + $0x1060] sm:$0xff]  ;;  %v10034_v3 = vpack.c.bf16 %v2661_v51, %v2654_v50 }
  0xea   : > { %2396 = vmatprep.mubr.f32.mxu1 %v10514_v0  ;;  %10027 = vmatpush1.bf16.msra.mxu1 %v10026_v62  ;;  %v11249_v62 = vld [vmem:[%s14425_s1 + $0x8] sm:$0xff]  ;;  %v11297_v50 = vld [vmem:[%s14425_s1 + $0x20] sm:$0xff] }
  0xeb   : > { %10041 = vmatprep.subr.bf16.mxu1 %v11119_v63 }
  0xec   : > { %8941 = vmatmul.mubr.msk.f32.gmra.mrb[102].mxu0 %vm221_vm0, %v10689_v18  ;;  %v10010_v18 = vpack.c.bf16 %v2657_v6, %v2650_v5  ;;  %v2668_v5 = vld [vmem:[%s10559_s19 + $0xd40] sm:$0xff]  ;;  %v2675_v6 = vld [vmem:[%s10559_s19 + $0x1050] sm:$0xff] }
  0xed   : > { %8945 = vmatmul.mubr.msk.f32.gmra.mrb[102].mxu1 %vm221_vm0, %v10642_v13  ;;  %9560 = vmatprep.mubr.msk.f32.mxu0 %vm221_vm0, %v10498_v53  ;;  %v10500_v13 = vld [vmem:[%s14425_s1 + $0x10] sm:$0xff]  ;;  %v10038_v21 = vpack.c.bf16 %v2675_v6, %v2668_v5 }
  0xee   : > { %2402 = vmatprep.mubr.f32.mxu1 %v10514_v0 }
  0xf0   : > { %9561 = vmatmul.mubr.msk.f32.vlgmr.msra.gmra.mrb[104].mxu0 %vm221_vm0, %v10499_v61 }
  0xf1   : > { %8946 = vmatmul.mubr.msk.f32.gmra.mrb[104].mxu1 %vm221_vm0, %v10653_v14  ;;  %10007 = vmatpush1.bf16.msra.mxu0 %v10006_v7 }
  0xf2   : > { %2408 = vmatprep.mubr.f32.mxu1 %v10514_v0  ;;  %9563 = vmatprep.mubr.msk.f32.mxu0 %vm221_vm0, %v10500_v13  ;;  %v10048_v13 = vpack.c.bf16 %v2677_v1, %v2670_v15 }
  0xf3   : > { %v11150_v10 = vpop.f32.mrb[0].mxu0  ;;  %10009 = vmatprep.subr.bf16.mxu0 %v10008_v4  ;;  %v10036_v4 = vpack.c.bf16 %v2676_v57, %v2669_v56 }
  0xf4   : > { %v11154_v19 = vpop.f32.mrb[0].mxu1  ;;  %v11156_v14 = vpop.f32.mrb[1].mxu0  ;;  %9564 = vmatmul.mubr.msk.f32.gmra.mrb[106].mxu0 %vm221_vm0, %v10501_v20  ;;  %v3258_v20 = vld [vmem:[%s10559_s19 + $0x430] sm:$0xff] }
  0xf5   : > { %v11164_v23 = vpop.f32.mrb[1].mxu1  ;;  %8947 = vmatmul.mubr.msk.f32.gmra.mrb[106].mxu1 %vm221_vm0, %v10502_v24  ;;  %9566 = vmatprep.mubr.msk.f32.mxu0 %vm221_vm0, %v10503_v25 }
  0xf6   : > { %2414 = vmatprep.mubr.f32.mxu1 %v10514_v0  ;;  %10011 = vmatpush1.bf16.msra.mxu0 %v10010_v18  ;;  %v3260_v18 = vld [vmem:[%s10559_s19 + $0x440] sm:$0xff] }
  0xf7   : > { %v11175_v27 = vpop.f32.mrb[2].mxu0  ;;  %10013 = vmatprep.subr.bf16.mxu0 %v10012_v11 }
  0xf8   : > { %v11177_v29 = vpop.f32.mrb[2].mxu1  ;;  %v11179_v30 = vpop.f32.mrb[3].mxu0  ;;  %9567 = vmatmul.mubr.msk.f32.gmra.mrb[108].mxu0 %vm221_vm0, %v10502_v24 }
  0xf9   : > { %v11182_v2 = vpop.f32.mrb[3].mxu1  ;;  %8948 = vmatmul.mubr.msk.f32.gmra.mrb[108].mxu1 %vm221_vm0, %v10504_v31  ;;  %9569 = vmatprep.mubr.msk.f32.mxu0 %vm221_vm0, %v10504_v31 }
  0xfa   : > { %2420 = vmatprep.mubr.f32.mxu1 %v10514_v0  ;;  %10015 = vmatpush1.bf16.msra.mxu0 %v10014_v26 }
  0xfb   : > { %v11192_v34 = vpop.f32.mrb[4].mxu0  ;;  %10029 = vmatprep.subr.bf16.mxu0 %v10028_v28  ;;  %v10052_v28 = vpack.c.bf16 %v3258_v20, %v3251_v17 }
  0xfc   : > { %v690_v35 = vmax.f32 %v11150_v10, %v11192_v34  ;;  %v11196_v36 = vpop.f32.mrb[4].mxu1  ;;  %v11198_v37 = vpop.f32.mrb[5].mxu0  ;;  %9570 = vmatmul.mubr.msk.f32.gmra.mrb[110].mxu0 %vm221_vm0, %v10505_v38 }
  0xfd   : > { %v692_v41 = vmax.f32 %v11154_v19, %v11196_v36  ;;  %v691_v49 = vmax.f32 %v11156_v14, %v11198_v37  ;;  %v11210_v42 = vpop.f32.mrb[5].mxu1  ;;  %8949 = vmatmul.mubr.msk.f32.gmra.mrb[110].mxu1 %vm221_vm0, %v10505_v38  ;;  %2766 = vmatprep.mubr.f32.mxu0 %v10514_v0  ;;  %v11286_v38 = vpop.permute.xlu0 %736 }
  0xfe   : > { %v693_v46 = vmax.f32 %v11164_v23, %v11210_v42  ;;  %2879 = vmatprep.mubr.f32.mxu1 %v10514_v0 }
  0xff   : > { %v11224_v47 = vpop.f32.mrb[6].mxu0 }
 0x100   : > { %v697_v52 = vmax.f32 %v11175_v27, %v11224_v47  ;;  %v11230_v53 = vpop.f32.mrb[6].mxu1  ;;  %v11232_v54 = vpop.f32.mrb[7].mxu0  ;;  %8958 = vmatmul.mubr.msk.f32.vlgmr.msra.gmra.mrb[112].mxu0 %vm221_vm0, %v11217_v59 }
 0x101   : > { %v699_v58 = vmax.f32 %v11177_v29, %v11230_v53  ;;  %v698_v60 = vmax.f32 %v11179_v30, %v11232_v54  ;;  %v11242_v61 = vpop.f32.mrb[7].mxu1  ;;  %8966 = vmatmul.mubr.msk.f32.vlgmr.msra.gmra.mrb[112].mxu1 %vm221_vm0, %v11217_v59  ;;  %10031 = vmatpush1.bf16.msra.mxu0 %v10030_v43 }
 0x102   : > { %v700_v16 = vmax.f32 %v11182_v2, %v11242_v61  ;;  %10043 = vmatpush3.bf16.msra.mxu1 %v11119_v63  ;;  %2772 = vmatprep.mubr.f32.mxu0 %v10514_v0  ;;  %v3253_v63 = vld [vmem:[%s10559_s19 + $0x130] sm:$0xff] }
 0x103   : > { %v336_v7 = vpop.f32.mrb[8].mxu0  ;;  %2885 = vmatprep.mubr.f32.mxu1 %v10514_v0  ;;  %10033 = vmatprep.subr.bf16.mxu0 %v10032_v48  ;;  %v10064_v24 = vpack.c.bf16 %v3260_v18, %v3253_v63  ;;  %v11368_v2 = vld [vmem:[%s14425_s1 + $0x30] sm:$0xff] }
 0x104   : > { %v449_v8 = vpop.f32.mrb[8].mxu1  ;;  %v338_v9 = vpop.f32.mrb[9].mxu0  ;;  %8959 = vmatmul.mubr.msk.f32.gmra.mrb[114].mxu0 %vm221_vm0, %v11249_v62  ;;  %10045 = vmatprep.subr.bf16.mxu1 %v10044_v55 }
 0x105   : > { %v451_v11 = vpop.f32.mrb[9].mxu1  ;;  %8967 = vmatmul.mubr.msk.f32.gmra.mrb[114].mxu1 %vm221_vm0, %v11249_v62  ;;  %2778 = vmatprep.mubr.f32.mxu0 %v10514_v0 }
 0x106   : > { %2891 = vmatprep.mubr.f32.mxu1 %v10514_v0  ;;  %10035 = vmatpush1.bf16.msra.mxu0 %v10034_v3 }
 0x107   : > { %v342_v22 = vpop.f32.mrb[10].mxu0  ;;  %10047 = vmatpush3.bf16.msra.mxu1 %v10044_v55  ;;  %10037 = vmatprep.subr.bf16.mxu0 %v10036_v4 }
 0x108   : > { %v455_v25 = vpop.f32.mrb[10].mxu1  ;;  %v344_v26 = vpop.f32.mrb[11].mxu0  ;;  %8960 = vmatmul.mubr.msk.f32.gmra.mrb[116].mxu0 %vm221_vm0, %v11270_v12  ;;  %10049 = vmatprep.subr.bf16.mxu1 %v10048_v13 }
 0x109   : > { %v457_v31 = vpop.f32.mrb[11].mxu1  ;;  %8968 = vmatmul.mubr.msk.f32.gmra.mrb[116].mxu1 %vm221_vm0, %v11270_v12  ;;  %2784 = vmatprep.mubr.f32.mxu0 %v10514_v0 }
 0x10a   : > { %2897 = vmatprep.mubr.f32.mxu1 %v10514_v0  ;;  %10039 = vmatpush1.bf16.msra.mxu0 %v10038_v21 }
 0x10b   : > { %v348_v33 = vpop.f32.mrb[12].mxu0  ;;  %10051 = vmatpush3.bf16.msra.mxu1 %v10048_v13  ;;  %10065 = vmatprep.subr.bf16.mxu0 %v10064_v24  ;;  %v11389_v24 = vld [vmem:[%s14425_s1 + $0x38] sm:$0xff] }
 0x10c   : > { %v704_v39 = vmax.f32 %v336_v7, %v348_v33  ;;  %v461_v40 = vpop.f32.mrb[12].mxu1  ;;  %v350_v43 = vpop.f32.mrb[13].mxu0  ;;  %8961 = vmatmul.mubr.msk.f32.gmra.mrb[118].mxu0 %vm221_vm0, %v11283_v32  ;;  %10053 = vmatprep.subr.bf16.mxu1 %v10052_v28  ;;  %v3259_v28 = vld [vmem:[%s10559_s19 + $0x438] sm:$0xff] }
 0x10d   : > { %v706_v44 = vmax.f32 %v449_v8, %v461_v40  ;;  %v705_v45 = vmax.f32 %v338_v9, %v350_v43  ;;  %v463_v48 = vpop.f32.mrb[13].mxu1  ;;  %8969 = vmatmul.mubr.msk.f32.gmra.mrb[118].mxu1 %vm221_vm0, %v11283_v32  ;;  %2790 = vmatprep.mubr.f32.mxu0 %v10514_v0  ;;  %v3250_v33 = vld [vmem:[%s10559_s19 + $0x118] sm:$0xff] }
 0x10e   : > { %v718_v51 = vmax.f32 %v690_v35, %v704_v39  ;;  %v707_v55 = vmax.f32 %v451_v11, %v463_v48  ;;  %2903 = vmatprep.mubr.f32.mxu1 %v10514_v0  ;;  %v3257_v39 = vld [vmem:[%s10559_s19 + $0x428] sm:$0xff]  ;;  %v3272_v48 = vld [vmem:[%s10559_s19 + $0xa50] sm:$0xff] }
 0x10f   : > { %v720_v56 = vmax.f32 %v692_v41, %v706_v44  ;;  %v719_v57 = vmax.f32 %v691_v49, %v705_v45  ;;  %v354_v15 = vpop.f32.mrb[14].mxu0  ;;  %v11324_v41 = vpop.permute.xlu0 %741  ;;  %v11329_v49 = vld [vmem:[%s14425_s1 + $0x28] sm:$0xff]  ;;  %v3265_v45 = vld [vmem:[%s10559_s19 + $0x740] sm:$0xff] }
 0x110   : > { %v721_v1 = vmax.f32 %v693_v46, %v707_v55  ;;  %v744_v3 = vadd.f32 %v11286_v38, %v718_v51  ;;  %v711_v10 = vmax.f32 %v342_v22, %v354_v15  ;;  %v467_v34 = vpop.f32.mrb[14].mxu1  ;;  %v356_v35 = vpop.f32.mrb[15].mxu0  ;;  %8962 = vmatmul.mubr.msk.f32.gmra.mrb[120].mxu0 %vm221_vm0, %v11297_v50  ;;  %v3274_v15 = vld [vmem:[%s10559_s19 + $0xa60] sm:$0xff] }
 0x111   : > { %v745_v19 = vadd.f32 %v11286_v38, %v719_v57  ;;  %v746_v14 = vadd.f32 %v11286_v38, %v720_v56  ;;  %v713_v36 = vmax.f32 %v455_v25, %v467_v34  ;;  %v712_v23 = vmax.f32 %v344_v26, %v356_v35  ;;  %v469_v37 = vpop.f32.mrb[15].mxu1  ;;  %8970 = vmatmul.mubr.msk.f32.gmra.mrb[120].mxu1 %vm221_vm0, %v11297_v50  ;;  %v3252_v26 = vld [vmem:[%s10559_s19 + $0x128] sm:$0xff]  ;;  %v3267_v57 = vld [vmem:[%s10559_s19 + $0x750] sm:$0xff]  ;;  %v3264_v34 = vld [vmem:[%s10559_s19 + $0x738] sm:$0xff] }
 0x112   : > { %v747_v42 = vadd.f32 %v11286_v38, %v721_v1  ;;  %v758_v46 = vmax.f32 %v744_v3, 0.0  ;;  %v725_v7 = vmax.f32 %v697_v52, %v711_v10  ;;  %v714_v4 = vmax.f32 %v457_v31, %v469_v37  ;;  %2796 = vmatprep.mubr.f32.mxu0 %v10514_v0  ;;  %2909 = vmatprep.mubr.f32.mxu1 %v10514_v0  ;;  %v3271_v35 = vld [vmem:[%s10559_s19 + $0xa48] sm:$0xff]  ;;  %v3286_v37 = vld [vmem:[%s10559_s19 + $0x1070] sm:$0xff] }
 0x113   : > { %v759_v5 = vmax.f32 %v745_v19, 0.0  ;;  %v760_v6 = vmax.f32 %v746_v14, 0.0  ;;  %v727_v8 = vmax.f32 %v699_v58, %v713_v36  ;;  %v726_v9 = vmax.f32 %v698_v60, %v712_v23  ;;  %v11343_v13 = vpop.f32.mrb[16].mxu0  ;;  %v3279_v19 = vld [vmem:[%s10559_s19 + $0xd60] sm:$0xff] }
 0x114   : > { %v761_v27 = vmax.f32 %v747_v42, 0.0  ;;  %772 = vst [vmem:[%s11318_s22] sm:$0xff] %v758_v46  ;;  %v728_v47 = vmax.f32 %v700_v16, %v714_v4  ;;  %v751_v52 = vadd.f32 %v11324_v41, %v725_v7  ;;  %v11350_v63 = vpop.f32.mrb[16].mxu1  ;;  %v11352_v18 = vpop.f32.mrb[17].mxu0  ;;  %8963 = vmatmul.mubr.msk.f32.gmra.mrb[122].mxu0 %vm221_vm0, %v11329_v49  ;;  %v10066_v56 = vpack.c.bf16 %v3259_v28, %v3252_v26  ;;  %v3266_v46 = vld [vmem:[%s10559_s19 + $0x748] sm:$0xff]  ;;  %v3273_v7 = vld [vmem:[%s10559_s19 + $0xa58] sm:$0xff] }
 0x115   : > { %773 = vst [vmem:[%s11318_s22 + $0x8] sm:$0xff] %v759_v5  ;;  %774 = vst [vmem:[%s11318_s22 + $0x10] sm:$0xff] %v760_v6  ;;  %v752_v29 = vadd.f32 %v11324_v41, %v726_v9  ;;  %v753_v30 = vadd.f32 %v11324_v41, %v727_v8  ;;  %v11360_v53 = vpop.f32.mrb[17].mxu1  ;;  %8971 = vmatmul.mubr.msk.f32.gmra.mrb[122].mxu1 %vm221_vm0, %v11329_v49  ;;  %2802 = vmatprep.mubr.f32.mxu0 %v10514_v0  ;;  %v3281_v8 = vld [vmem:[%s10559_s19 + $0xd70] sm:$0xff]  ;;  %v3288_v9 = vld [vmem:[%s10559_s19 + $0x1080] sm:$0xff] }
 0x116   : > { %775 = vst [vmem:[%s11318_s22 + $0x18] sm:$0xff] %v761_v27  ;;  %v754_v54 = vadd.f32 %v11324_v41, %v728_v47  ;;  %v765_v58 = vmax.f32 %v751_v52, 0.0  ;;  %2915 = vmatprep.mubr.f32.mxu1 %v10514_v0  ;;  %v10054_v1 = vpack.c.bf16 %v3257_v39, %v3250_v33  ;;  %v10056_v10 = vpack.c.bf16 %v3272_v48, %v3265_v45  ;;  %v3287_v26 = vld [vmem:[%s10559_s19 + $0x1078] sm:$0xff] }
 0x117   : > { %v766_v60 = vmax.f32 %v752_v29, 0.0  ;;  %v767_v61 = vmax.f32 %v753_v30, 0.0  ;;  %v11373_v16 = vpop.f32.mrb[18].mxu0  ;;  %v10068_v42 = vpack.c.bf16 %v3274_v15, %v3267_v57  ;;  %v10058_v47 = vpack.c.bf16 %v3271_v35, %v3264_v34  ;;  %v3278_v30 = vld [vmem:[%s10559_s19 + $0xd58] sm:$0xff] }
 0x118   : > { %v768_v11 = vmax.f32 %v754_v54, 0.0  ;;  %779 = vst [vmem:[%s11318_s22 + $0x310] sm:$0xff] %v765_v58  ;;  %v9493_v17 = vpop.f32.mrb[18].mxu1  ;;  %v11376_v20 = vpop.f32.mrb[19].mxu0  ;;  %8964 = vmatmul.mubr.msk.f32.gmra.mrb[124].mxu0 %vm221_vm0, %v11368_v2  ;;  %v10060_v29 = vpack.c.bf16 %v3286_v37, %v3279_v19  ;;  %v10070_v54 = vpack.c.bf16 %v3273_v7, %v3266_v46  ;;  %v3255_v58 = vld [vmem:[%s10559_s19 + $0x140] sm:$0xff]  ;;  %v3263_v39 = vld [vmem:[%s10559_s19 + $0x458] sm:$0xff] }
 0x119   : > { %780 = vst [vmem:[%s11318_s22 + $0x318] sm:$0xff] %v766_v60  ;;  %781 = vst [vmem:[%s11318_s22 + $0x320] sm:$0xff] %v767_v61  ;;  %v703_v21 = vmax.f32 %v11350_v63, %v9493_v17  ;;  %v661_v22 = vpop.f32.mrb[19].mxu1  ;;  %8972 = vmatmul.mubr.msk.f32.gmra.mrb[124].mxu1 %vm221_vm0, %v11368_v2  ;;  %2808 = vmatprep.mubr.f32.mxu0 %v10514_v0  ;;  %v3262_v17 = vld [vmem:[%s10559_s19 + $0x450] sm:$0xff]  ;;  %v3261_v37 = vld [vmem:[%s10559_s19 + $0x448] sm:$0xff] }
 0x11a   : > { %782 = vst [vmem:[%s11318_s22 + $0x328] sm:$0xff] %v768_v11  ;;  %v696_v25 = vmax.f32 %v11360_v53, %v661_v22  ;;  %2921 = vmatprep.mubr.f32.mxu1 %v10514_v0  ;;  %v3285_v53 = vld [vmem:[%s10559_s19 + $0x1068] sm:$0xff] }
 0x11b   : > { %v11396_v31 = vpop.f32.mrb[20].mxu0  ;;  %v3280_v22 = vld [vmem:[%s10559_s19 + $0xd68] sm:$0xff]  ;;  %v10062_v45 = vpack.c.bf16 %v3285_v53, %v3278_v30 }
 0x11c   : > { %v694_v40 = vmax.f32 %v11343_v13, %v11396_v31  ;;  %v9496_v43 = vpop.f32.mrb[20].mxu1  ;;  %v11402_v44 = vpop.f32.mrb[21].mxu0  ;;  %8965 = vmatmul.mubr.msk.f32.gmra.mrb[126].mxu0 %vm221_vm0, %v11389_v24  ;;  %v10074_v57 = vpack.c.bf16 %v3287_v26, %v3280_v22  ;;  %v3290_v22 = vld [vmem:[%s10559_s19 + $0x1090] sm:$0xff] }
 0x11d   : > { %v695_v51 = vmax.f32 %v11352_v18, %v11402_v44  ;;  %v671_v55 = vpop.f32.mrb[21].mxu1  ;;  %8973 = vmatmul.mubr.msk.f32.gmra.mrb[126].mxu1 %vm221_vm0, %v11389_v24  ;;  %2992 = vmatprep.mubr.f32.mxu0 %v10514_v0 }
 0x11e   : > { %9584 = vmatprep.mubr.msk.f32.mxu1 %vm221_vm0, %v11217_v59 }
 0x11f   : > { %v11417_v3 = vpop.f32.mrb[22].mxu0 }
 0x120   : > { %v701_v14 = vmax.f32 %v11373_v16, %v11417_v3  ;;  %v9499_v36 = vpop.f32.mrb[22].mxu1  ;;  %v11424_v23 = vpop.f32.mrb[23].mxu0  ;;  %8974 = vmatmul.mubr.msk.f32.vlgmr.msra.gmra.mrb[128].mxu0 %vm221_vm0, %v11217_v59  ;;  %v3282_v3 = vld [vmem:[%s10559_s19 + $0xd78] sm:$0xff] }
 0x121   : > { %v717_v4 = vmax.f32 %v9496_v43, %v9499_v36  ;;  %v702_v5 = vmax.f32 %v11376_v20, %v11424_v23  ;;  %v681_v6 = vpop.f32.mrb[23].mxu1  ;;  %9585 = vmatmul.mubr.msk.f32.vlgmr.msra.gmra.mrb[128].mxu1 %vm221_vm0, %v11249_v62  ;;  %10067 = vmatpush1.bf16.msra.mxu0 %v10066_v56  ;;  %v10076_v56 = vpack.c.bf16 %v3262_v17, %v3255_v58  ;;  %v3254_v36 = vld [vmem:[%s10559_s19 + $0x138] sm:$0xff] }
 0x122   : > { %v710_v27 = vmax.f32 %v671_v55, %v681_v6  ;;  %10055 = vmatpush1.bf16.msra.mxu1 %v10054_v1  ;;  %2998 = vmatprep.mubr.f32.mxu0 %v10514_v0  ;;  %v3269_v6 = vld [vmem:[%s10559_s19 + $0x760] sm:$0xff]  ;;  %v10078_v30 = vpack.c.bf16 %v3261_v37, %v3254_v36  ;;  %v3874_v20 = vld [vmem:[%s10559_s19 + $0x478] sm:$0xff] }
 0x123   : > { %v731_v52 = vmax.f32 %v703_v21, %v717_v4  ;;  %v11438_v63 = vpop.f32.mrb[24].mxu0  ;;  %9587 = vmatprep.mubr.msk.f32.mxu1 %vm221_vm0, %v11270_v12  ;;  %10057 = vmatprep.subr.bf16.mxu1 %v10056_v10  ;;  %v10072_v21 = vpack.c.bf16 %v3288_v9, %v3281_v8  ;;  %v3276_v8 = vld [vmem:[%s10559_s19 + $0xa70] sm:$0xff]  ;;  %v3803_v9 = vld [vmem:[%s14426_s2 + $0x8] sm:$0xff] }
 0x124   : > { %v724_v60 = vmax.f32 %v696_v25, %v710_v27  ;;  %v11445_v61 = vpop.f32.mrb[24].mxu1  ;;  %v564_v11 = vpop.f32.mrb[25].mxu0  ;;  %8975 = vmatmul.mubr.msk.f32.gmra.mrb[130].mxu0 %vm221_vm0, %v11249_v62  ;;  %10069 = vmatprep.subr.bf16.mxu0 %v10068_v42  ;;  %v3256_v25 = vld [vmem:[%s10559_s19 + $0x148] sm:$0xff]  ;;  %v3802_v42 = vld [vmem:[%s14426_s2] sm:$0xff]  ;;  %v10080_v58 = vpack.c.bf16 %v3276_v8, %v3269_v6 }
 0x125   : > { %v757_v28 = vadd.f32 %v11324_v41, %v731_v52  ;;  %v11453_v33 = vpop.f32.mrb[25].mxu1  ;;  %9588 = vmatmul.mubr.msk.f32.gmra.mrb[130].mxu1 %vm221_vm0, %v11283_v32  ;;  %3004 = vmatprep.mubr.f32.mxu0 %v10514_v0  ;;  %v11469_v34 = vpack.c.bf16 %v3263_v39, %v3256_v25  ;;  %v11571_v8 = vpop.permute.xlu1 %1350 }
 0x126   : > { %v750_v43 = vadd.f32 %v11286_v38, %v724_v60  ;;  %9590 = vmatprep.mubr.msk.f32.mxu1 %vm221_vm0, %v11297_v50  ;;  %10059 = vmatpush1.bf16.msra.mxu1 %v10058_v47  ;;  %v3268_v60 = vld [vmem:[%s10559_s19 + $0x758] sm:$0xff] }
 0x127   : > { %v771_v48 = vmax.f32 %v757_v28, 0.0  ;;  %v11463_v55 = vpop.f32.mrb[26].mxu0  ;;  %10061 = vmatprep.subr.bf16.mxu1 %v10060_v29  ;;  %10071 = vmatpush1.bf16.msra.mxu0 %v10070_v54 }
 0x128   : > { %v764_v15 = vmax.f32 %v750_v43, 0.0  ;;  %v11465_v1 = vpop.f32.mrb[26].mxu1  ;;  %v570_v10 = vpop.f32.mrb[27].mxu0  ;;  %8976 = vmatmul.mubr.msk.f32.gmra.mrb[132].mxu0 %vm221_vm0, %v11270_v12  ;;  %10073 = vmatprep.subr.bf16.mxu0 %v10072_v21  ;;  %v3283_v21 = vld [vmem:[%s10559_s19 + $0xd80] sm:$0xff] }
 0x129   : > { %785 = vst [vmem:[%s11318_s22 + $0x340] sm:$0xff] %v771_v48  ;;  %v11472_v35 = vpop.f32.mrb[27].mxu1  ;;  %9591 = vmatmul.mubr.msk.f32.gmra.mrb[132].mxu1 %vm221_vm0, %v11329_v49  ;;  %3010 = vmatprep.mubr.f32.mxu0 %v10514_v0  ;;  %v10084_v16 = vpack.c.bf16 %v3290_v22, %v3283_v21 }
 0x12a   : > { %778 = vst [vmem:[%s11318_s22 + $0x30] sm:$0xff] %v764_v15  ;;  %9593 = vmatprep.mubr.msk.f32.mxu1 %vm221_vm0, %v11368_v2  ;;  %10063 = vmatpush1.bf16.msra.mxu1 %v10062_v45  ;;  %v3867_v15 = vld [vmem:[%s10559_s19 + $0x168] sm:$0xff] }
 0x12b   : > { %v574_v19 = vpop.f32.mrb[28].mxu0  ;;  %10077 = vmatprep.subr.bf16.mxu1 %v10076_v56  ;;  %10075 = vmatpush1.bf16.msra.mxu0 %v10074_v57 }
 0x12c   : > { %v708_v46 = vmax.f32 %v11438_v63, %v574_v19  ;;  %v11486_v7 = vpop.f32.mrb[28].mxu1  ;;  %v576_v4 = vpop.f32.mrb[29].mxu0  ;;  %8977 = vmatmul.mubr.msk.f32.gmra.mrb[134].mxu0 %vm221_vm0, %v11283_v32  ;;  %10089 = vmatprep.subr.bf16.mxu0 %v11469_v34 }
 0x12d   : > { %v1304_v27 = vmax.f32 %v11445_v61, %v11486_v7  ;;  %v709_v47 = vmax.f32 %v564_v11, %v576_v4  ;;  %v11498_v52 = vpop.f32.mrb[29].mxu1  ;;  %9594 = vmatmul.mubr.msk.f32.gmra.mrb[134].mxu1 %vm221_vm0, %v11389_v24  ;;  %3016 = vmatprep.mubr.f32.mxu0 %v10514_v0  ;;  %v3275_v11 = vld [vmem:[%s10559_s19 + $0xa68] sm:$0xff] }
 0x12e   : > { %v722_v63 = vmax.f32 %v694_v40, %v708_v46  ;;  %v1305_v29 = vmax.f32 %v11453_v33, %v11498_v52  ;;  %3380 = vmatprep.mubr.f32.mxu1 %v10514_v0  ;;  %3806 = vperm.xlu0 %10496, %v3802_v42   ;;  %v10082_v39 = vpack.c.bf16 %v3275_v11, %v3268_v60 }
 0x12f   : > { %v723_v53 = vmax.f32 %v695_v51, %v709_v47  ;;  %v580_v54 = vpop.f32.mrb[30].mxu0  ;;  %3811 = vperm.xlu1 %10497, %v3803_v9  }
 0x130   : > { %v748_v13 = vadd.f32 %v11286_v38, %v722_v63  ;;  %v715_v31 = vmax.f32 %v11463_v55, %v580_v54  ;;  %v11516_v40 = vpop.f32.mrb[30].mxu1  ;;  %v582_v17 = vpop.f32.mrb[31].mxu0  ;;  %8978 = vmatmul.mubr.msk.f32.gmra.mrb[136].mxu0 %vm221_vm0, %v11297_v50 }
 0x131   : > { %v749_v18 = vadd.f32 %v11286_v38, %v723_v53  ;;  %v1311_v44 = vmax.f32 %v11465_v1, %v11516_v40  ;;  %v716_v51 = vmax.f32 %v570_v10, %v582_v17  ;;  %v11525_v26 = vpop.f32.mrb[31].mxu1  ;;  %8990 = vmatmul.mubr.msk.f32.vlgmr.msra.gmra.mrb[136].mxu1 %vm221_vm0, %v11217_v59  ;;  %3022 = vmatprep.mubr.f32.mxu0 %v10514_v0  ;;  %v3277_v53 = vld [vmem:[%s10559_s19 + $0xa78] sm:$0xff] }
 0x132   : > { %v762_v28 = vmax.f32 %v748_v13, 0.0  ;;  %v729_v25 = vmax.f32 %v701_v14, %v715_v31  ;;  %v1312_v38 = vmax.f32 %v11472_v35, %v11525_v26  ;;  %10079 = vmatpush1.bf16.msra.mxu1 %v10078_v30  ;;  %3386 = vmatprep.mubr.f32.mxu1 %v10514_v0  ;;  %v3289_v14 = vld [vmem:[%s10559_s19 + $0x1088] sm:$0xff] }
 0x133   : > { %v763_v43 = vmax.f32 %v749_v18, 0.0  ;;  %v730_v45 = vmax.f32 %v702_v5, %v716_v51  ;;  %v11539_v48 = vpop.f32.mrb[32].mxu0  ;;  %10081 = vmatprep.subr.bf16.mxu1 %v10080_v58  ;;  %4420 = vperm.xlu0 %10496, %v3802_v42   ;;  %v10086_v19 = vpack.c.bf16 %v3289_v14, %v3282_v3  ;;  %v10112_v42 = vpack.c.bf16 %v3874_v20, %v3867_v15  ;;  %v3270_v30 = vld [vmem:[%s10559_s19 + $0x768] sm:$0xff]  ;;  %v3865_v15 = vld [vmem:[%s10559_s19 + $0x158] sm:$0xff] }
 0x134   : > { %776 = vst [vmem:[%s11318_s22 + $0x20] sm:$0xff] %v762_v28  ;;  %v755_v55 = vadd.f32 %v11324_v41, %v729_v25  ;;  %v950_v56 = vpop.f32.mrb[32].mxu1  ;;  %v11545_v57 = vpop.f32.mrb[33].mxu0  ;;  %8979 = vmatmul.mubr.msk.f32.gmra.mrb[138].mxu0 %vm221_vm0, %v11329_v49  ;;  %4425 = vperm.xlu1 %10497, %v3803_v9   ;;  %v10092_v17 = vpack.c.bf16 %v3277_v53, %v3270_v30  ;;  %v3284_v28 = vld [vmem:[%s10559_s19 + $0xd88] sm:$0xff]  ;;  %v3291_v25 = vld [vmem:[%s10559_s19 + $0x1098] sm:$0xff] }
 0x135   : > { %777 = vst [vmem:[%s11318_s22 + $0x28] sm:$0xff] %v763_v43  ;;  %v756_v23 = vadd.f32 %v11324_v41, %v730_v45  ;;  %v952_v5 = vpop.f32.mrb[33].mxu1  ;;  %8991 = vmatmul.mubr.msk.f32.gmra.mrb[138].mxu1 %vm221_vm0, %v11249_v62  ;;  %3028 = vmatprep.mubr.f32.mxu0 %v10514_v0  ;;  %v3872_v20 = vld [vmem:[%s10559_s19 + $0x468] sm:$0xff] }
 0x136   : > { %v769_v10 = vmax.f32 %v755_v55, 0.0  ;;  %3392 = vmatprep.mubr.f32.mxu1 %v10514_v0  ;;  %10083 = vmatpush1.bf16.msra.mxu1 %v10082_v39  ;;  %v3881_v53 = vld [vmem:[%s10559_s19 + $0x788] sm:$0xff] }
 0x137   : > { %v770_v36 = vmax.f32 %v756_v23, 0.0  ;;  %v11557_v37 = vpop.f32.mrb[34].mxu0  ;;  %10085 = vmatprep.subr.bf16.mxu1 %v10084_v16 }
 0x138   : > { %783 = vst [vmem:[%s11318_s22 + $0x330] sm:$0xff] %v769_v10  ;;  %v956_v46 = vpop.f32.mrb[34].mxu1  ;;  %v11560_v41 = vpop.f32.mrb[35].mxu0  ;;  %8980 = vmatmul.mubr.msk.f32.gmra.mrb[140].mxu0 %vm221_vm0, %v11368_v2 }
 0x139   : > { %784 = vst [vmem:[%s11318_s22 + $0x338] sm:$0xff] %v770_v36  ;;  %v958_v4 = vpop.f32.mrb[35].mxu1  ;;  %8992 = vmatmul.mubr.msk.f32.gmra.mrb[140].mxu1 %vm221_vm0, %v11270_v12  ;;  %3034 = vmatprep.mubr.f32.mxu0 %v10514_v0 }
 0x13a   : > { %3398 = vmatprep.mubr.f32.mxu1 %v10514_v0  ;;  %10087 = vmatpush1.bf16.msra.mxu1 %v10086_v19 }
 0x13b   : > { %v11569_v6 = vpop.f32.mrb[36].mxu0  ;;  %10113 = vmatprep.subr.bf16.mxu1 %v10112_v42  ;;  %v3866_v42 = vld [vmem:[%s10559_s19 + $0x160] sm:$0xff] }
 0x13c   : > { %v962_v9 = vpop.f32.mrb[36].mxu1  ;;  %v1306_v47 = vmax.f32 %v11539_v48, %v11569_v6  ;;  %v11575_v63 = vpop.f32.mrb[37].mxu0  ;;  %8981 = vmatmul.mubr.msk.f32.gmra.mrb[142].mxu0 %vm221_vm0, %v11389_v24 }
 0x13d   : > { %v1318_v54 = vmax.f32 %v950_v56, %v962_v9  ;;  %v964_v58 = vpop.f32.mrb[37].mxu1  ;;  %v1307_v60 = vmax.f32 %v11545_v57, %v11575_v63  ;;  %8993 = vmatmul.mubr.msk.f32.gmra.mrb[142].mxu1 %vm221_vm0, %v11283_v32  ;;  %3493 = vmatprep.mubr.f32.mxu0 %v10514_v0 }
 0x13e   : > { %v1319_v11 = vmax.f32 %v952_v5, %v964_v58  ;;  %3404 = vmatprep.mubr.f32.mxu1 %v10514_v0 }
 0x13f   : > { %v1332_v13 = vmax.f32 %v1304_v27, %v1318_v54  ;;  %v11590_v31 = vpop.f32.mrb[38].mxu0  ;;  %v3888_v54 = vld [vmem:[%s10559_s19 + $0xa98] sm:$0xff] }
 0x140   : > { %v1333_v21 = vmax.f32 %v1305_v29, %v1319_v11  ;;  %v968_v22 = vpop.f32.mrb[38].mxu1  ;;  %v1313_v18 = vmax.f32 %v11557_v37, %v11590_v31  ;;  %v11597_v51 = vpop.f32.mrb[39].mxu0  ;;  %8998 = vmatmul.mubr.msk.f32.vlgmr.msra.gmra.mrb[144].mxu0 %vm221_vm0, %v11217_v59  ;;  %v3894_v31 = vld [vmem:[%s10559_s19 + $0xda0] sm:$0xff] }
 0x141   : > { %v1358_v61 = vadd.f32 %v11571_v8, %v1332_v13  ;;  %v1325_v7 = vmax.f32 %v956_v46, %v968_v22  ;;  %v970_v27 = vpop.f32.mrb[39].mxu1  ;;  %v1314_v39 = vmax.f32 %v11560_v41, %v11597_v51  ;;  %8994 = vmatmul.mubr.msk.f32.gmra.mrb[144].mxu1 %vm221_vm0, %v11297_v50  ;;  %10091 = vmatpush3.bf16.msra.mxu0 %v11469_v34  ;;  %v11610_v29 = vpop.permute.xlu1 %1355  ;;  %v3873_v46 = vld [vmem:[%s10559_s19 + $0x470] sm:$0xff] }
 0x142   : > { %v1359_v33 = vadd.f32 %v11571_v8, %v1333_v21  ;;  %v1326_v52 = vmax.f32 %v958_v4, %v970_v27  ;;  %3410 = vmatprep.mubr.f32.mxu1 %v10514_v0  ;;  %3499 = vmatprep.mubr.f32.mxu0 %v10514_v0  ;;  %v10096_v34 = vpack.c.bf16 %v3291_v25, %v3284_v28  ;;  %v3887_v27 = vld [vmem:[%s10559_s19 + $0xa90] sm:$0xff] }
 0x143   : > { %v1372_v43 = vmax.f32 %v1358_v61, 0.0  ;;  %v1339_v45 = vmax.f32 %v1311_v44, %v1325_v7  ;;  %v1063_v16 = vpop.f32.mrb[40].mxu0  ;;  %10093 = vmatprep.subr.bf16.mxu0 %v10092_v17  ;;  %v10114_v22 = vpack.c.bf16 %v3873_v46, %v3866_v42  ;;  %v10116_v61 = vpack.c.bf16 %v3888_v54, %v3881_v53  ;;  %v3880_v7 = vld [vmem:[%s10559_s19 + $0x780] sm:$0xff] }
 0x144   : > { %v1373_v3 = vmax.f32 %v1359_v33, 0.0  ;;  %v1340_v14 = vmax.f32 %v1312_v38, %v1326_v52  ;;  %v11620_v55 = vpop.f32.mrb[40].mxu1  ;;  %v1065_v56 = vpop.f32.mrb[41].mxu0  ;;  %8999 = vmatmul.mubr.msk.f32.gmra.mrb[146].mxu0 %vm221_vm0, %v11249_v62  ;;  %v10100_v38 = vpack.c.bf16 %v3872_v20, %v3865_v15 }
 0x145   : > { %1386 = vst [vmem:[%s11318_s22 + $0x38] sm:$0xff] %v1372_v43  ;;  %v1365_v1 = vadd.f32 %v11610_v29, %v1339_v45  ;;  %v11628_v40 = vpop.f32.mrb[41].mxu1  ;;  %8995 = vmatmul.mubr.msk.f32.gmra.mrb[146].mxu1 %vm221_vm0, %v11329_v49  ;;  %3505 = vmatprep.mubr.f32.mxu0 %v10514_v0  ;;  %v3902_v43 = vld [vmem:[%s10559_s19 + $0x10b8] sm:$0xff] }
 0x146   : > { %1387 = vst [vmem:[%s11318_s22 + $0x40] sm:$0xff] %v1373_v3  ;;  %v1366_v35 = vadd.f32 %v11610_v29, %v1340_v14  ;;  %3416 = vmatprep.mubr.f32.mxu1 %v10514_v0  ;;  %10095 = vmatpush3.bf16.msra.mxu0 %v10092_v17  ;;  %v10118_v14 = vpack.c.bf16 %v3887_v27, %v3880_v7  ;;  %v3886_v7 = vld [vmem:[%s10559_s19 + $0xa88] sm:$0xff] }
 0x147   : > { %v1379_v44 = vmax.f32 %v1365_v1, 0.0  ;;  %v1069_v26 = vpop.f32.mrb[42].mxu0  ;;  %10097 = vmatprep.subr.bf16.mxu0 %v10096_v34 }
 0x148   : > { %v1380_v23 = vmax.f32 %v1366_v35, 0.0  ;;  %v11636_v5 = vpop.f32.mrb[42].mxu1  ;;  %v1071_v10 = vpop.f32.mrb[43].mxu0  ;;  %9000 = vmatmul.mubr.msk.f32.gmra.mrb[148].mxu0 %vm221_vm0, %v11270_v12 }
 0x149   : > { %1393 = vst [vmem:[%s11318_s22 + $0x348] sm:$0xff] %v1379_v44  ;;  %v11641_v19 = vpop.f32.mrb[43].mxu1  ;;  %8996 = vmatmul.mubr.msk.f32.gmra.mrb[148].mxu1 %vm221_vm0, %v11368_v2  ;;  %3511 = vmatprep.mubr.f32.mxu0 %v10514_v0 }
 0x14a   : > { %1394 = vst [vmem:[%s11318_s22 + $0x350] sm:$0xff] %v1380_v23  ;;  %3422 = vmatprep.mubr.f32.mxu1 %v10514_v0  ;;  %10099 = vmatpush3.bf16.msra.mxu0 %v10096_v34 }
 0x14b   : > { %v1075_v36 = vpop.f32.mrb[44].mxu0  ;;  %10101 = vmatprep.subr.bf16.mxu0 %v10100_v38  ;;  %v3877_v38 = vld [vmem:[%s10559_s19 + $0x490] sm:$0xff] }
 0x14c   : > { %v1320_v4 = vmax.f32 %v1063_v16, %v1075_v36  ;;  %v11650_v9 = vpop.f32.mrb[44].mxu1  ;;  %v1077_v30 = vpop.f32.mrb[45].mxu0  ;;  %9001 = vmatmul.mubr.msk.f32.gmra.mrb[150].mxu0 %vm221_vm0, %v11283_v32 }
 0x14d   : > { %v1308_v58 = vmax.f32 %v11620_v55, %v11650_v9  ;;  %v1321_v11 = vmax.f32 %v1065_v56, %v1077_v30  ;;  %v11658_v13 = vpop.f32.mrb[45].mxu1  ;;  %8997 = vmatmul.mubr.msk.f32.gmra.mrb[150].mxu1 %vm221_vm0, %v11389_v24  ;;  %3517 = vmatprep.mubr.f32.mxu0 %v10514_v0 }
 0x14e   : > { %v1334_v17 = vmax.f32 %v1306_v47, %v1320_v4  ;;  %v1309_v21 = vmax.f32 %v11628_v40, %v11658_v13  ;;  %3606 = vmatprep.mubr.f32.mxu1 %v10514_v0  ;;  %v3895_v47 = vld [vmem:[%s10559_s19 + $0xda8] sm:$0xff] }
 0x14f   : > { %v1335_v28 = vmax.f32 %v1307_v60, %v1321_v11  ;;  %v1081_v25 = vpop.f32.mrb[46].mxu0  ;;  %v10120_v37 = vpack.c.bf16 %v3902_v43, %v3895_v47  ;;  %v3864_v11 = vld [vmem:[%s10559_s19 + $0x150] sm:$0xff]  ;;  %v3885_v47 = vld [vmem:[%s10559_s19 + $0xa80] sm:$0xff] }
 0x150   : > { %v1360_v33 = vadd.f32 %v11571_v8, %v1334_v17  ;;  %v1327_v52 = vmax.f32 %v1069_v26, %v1081_v25  ;;  %v11675_v48 = vpop.f32.mrb[46].mxu1  ;;  %v1083_v6 = vpop.f32.mrb[47].mxu0  ;;  %9002 = vmatmul.mubr.msk.f32.gmra.mrb[152].mxu0 %vm221_vm0, %v11297_v50  ;;  %v3870_v26 = vld [vmem:[%s10559_s19 + $0x180] sm:$0xff] }
 0x151   : > { %v1361_v45 = vadd.f32 %v11571_v8, %v1335_v28  ;;  %v1315_v57 = vmax.f32 %v11636_v5, %v11675_v48  ;;  %v1328_v63 = vmax.f32 %v1071_v10, %v1083_v6  ;;  %v11684_v60 = vpop.f32.mrb[47].mxu1  ;;  %9006 = vmatmul.mubr.msk.f32.vlgmr.msra.gmra.mrb[152].mxu1 %vm221_vm0, %v11217_v59  ;;  %3523 = vmatprep.mubr.f32.mxu0 %v10514_v0  ;;  %v3871_v17 = vld [vmem:[%s10559_s19 + $0x460] sm:$0xff]  ;;  %v3878_v6 = vld [vmem:[%s10559_s19 + $0x770] sm:$0xff]  ;;  %v3869_v48 = vld [vmem:[%s10559_s19 + $0x178] sm:$0xff] }
 0x152   : > { %v1374_v16 = vmax.f32 %v1360_v33, 0.0  ;;  %v1341_v34 = vmax.f32 %v1313_v18, %v1327_v52  ;;  %v1316_v3 = vmax.f32 %v11641_v19, %v11684_v60  ;;  %10115 = vmatpush1.bf16.msra.mxu1 %v10114_v22  ;;  %3612 = vmatprep.mubr.f32.mxu1 %v10514_v0  ;;  %v3901_v18 = vld [vmem:[%s10559_s19 + $0x10b0] sm:$0xff]  ;;  %v11716_v42 = vpack.c.bf16 %v3877_v38, %v3870_v26  ;;  %v3899_v38 = vld [vmem:[%s10559_s19 + $0x10a0] sm:$0xff] }
 0x153   : > { %v1375_v56 = vmax.f32 %v1361_v45, 0.0  ;;  %v1342_v15 = vmax.f32 %v1314_v39, %v1328_v63  ;;  %v11698_v20 = vpop.f32.mrb[48].mxu0  ;;  %10117 = vmatprep.subr.bf16.mxu1 %v10116_v61  ;;  %v10122_v23 = vpack.c.bf16 %v3901_v18, %v3894_v31  ;;  %v3879_v61 = vld [vmem:[%s10559_s19 + $0x778] sm:$0xff]  ;;  %v10102_v52 = vpack.c.bf16 %v3871_v17, %v3864_v11  ;;  %v3892_v26 = vld [vmem:[%s10559_s19 + $0xd90] sm:$0xff]  ;;  %v3875_v11 = vld [vmem:[%s10559_s19 + $0x480] sm:$0xff] }
 0x154   : > { %1388 = vst [vmem:[%s11318_s22 + $0x48] sm:$0xff] %v1374_v16  ;;  %v1367_v1 = vadd.f32 %v11610_v29, %v1341_v34  ;;  %v1176_v35 = vpop.f32.mrb[48].mxu1  ;;  %v11704_v44 = vpop.f32.mrb[49].mxu0  ;;  %9003 = vmatmul.mubr.msk.f32.gmra.mrb[154].mxu0 %vm221_vm0, %v11329_v49  ;;  %v10104_v16 = vpack.c.bf16 %v3886_v7, %v3879_v61  ;;  %v10110_v60 = vpack.c.bf16 %v3899_v38, %v3892_v26 }
 0x155   : > { %1389 = vst [vmem:[%s11318_s22 + $0x50] sm:$0xff] %v1375_v56  ;;  %v1368_v41 = vadd.f32 %v11610_v29, %v1342_v15  ;;  %v1178_v51 = vpop.f32.mrb[49].mxu1  ;;  %9007 = vmatmul.mubr.msk.f32.gmra.mrb[154].mxu1 %vm221_vm0, %v11249_v62  ;;  %3529 = vmatprep.mubr.f32.mxu0 %v10514_v0  ;;  %v10106_v15 = vpack.c.bf16 %v3885_v47, %v3878_v6  ;;  %v3884_v6 = vld [vmem:[%s10559_s19 + $0x7a0] sm:$0xff]  ;;  %v3891_v47 = vld [vmem:[%s10559_s19 + $0xab0] sm:$0xff] }
 0x156   : > { %v1381_v39 = vmax.f32 %v1367_v1, 0.0  ;;  %3618 = vmatprep.mubr.f32.mxu1 %v10514_v0  ;;  %10119 = vmatpush1.bf16.msra.mxu1 %v10118_v14 }
 0x157   : > { %v1382_v10 = vmax.f32 %v1368_v41, 0.0  ;;  %v9517_v36 = vpop.f32.mrb[50].mxu0  ;;  %10121 = vmatprep.subr.bf16.mxu1 %v10120_v37  ;;  %v3900_v37 = vld [vmem:[%s10559_s19 + $0x10a8] sm:$0xff] }
 0x158   : > { %1395 = vst [vmem:[%s11318_s22 + $0x358] sm:$0xff] %v1381_v39  ;;  %v1182_v46 = vpop.f32.mrb[50].mxu1  ;;  %v1317_v4 = vmax.f32 %v11698_v20, %v9517_v36  ;;  %v1275_v30 = vpop.f32.mrb[51].mxu0  ;;  %9004 = vmatmul.mubr.msk.f32.gmra.mrb[156].mxu0 %vm221_vm0, %v11368_v2  ;;  %v3893_v20 = vld [vmem:[%s10559_s19 + $0xd98] sm:$0xff] }
 0x159   : > { %1396 = vst [vmem:[%s11318_s22 + $0x360] sm:$0xff] %v1382_v10  ;;  %v1184_v53 = vpop.f32.mrb[51].mxu1  ;;  %v1310_v54 = vmax.f32 %v11704_v44, %v1275_v30  ;;  %9008 = vmatmul.mubr.msk.f32.gmra.mrb[156].mxu1 %vm221_vm0, %v11270_v12  ;;  %3535 = vmatprep.mubr.f32.mxu0 %v10514_v0  ;;  %v10108_v44 = vpack.c.bf16 %v3900_v37, %v3893_v20  ;;  %v3904_v20 = vld [vmem:[%s10559_s19 + $0x10c8] sm:$0xff] }
 0x15a   : > { %3624 = vmatprep.mubr.f32.mxu1 %v10514_v0  ;;  %10123 = vmatpush1.bf16.msra.mxu1 %v10122_v23 }
 0x15b   : > { %v9520_v22 = vpop.f32.mrb[52].mxu0  ;;  %10137 = vmatprep.subr.bf16.mxu1 %v11716_v42 }
 0x15c   : > { %v1188_v28 = vpop.f32.mrb[52].mxu1  ;;  %v1285_v25 = vpop.f32.mrb[53].mxu0  ;;  %9005 = vmatmul.mubr.msk.f32.gmra.mrb[158].mxu0 %vm221_vm0, %v11389_v24 }
 0x15d   : > { %v1322_v27 = vmax.f32 %v1176_v35, %v1188_v28  ;;  %v1190_v33 = vpop.f32.mrb[53].mxu1  ;;  %9009 = vmatmul.mubr.msk.f32.gmra.mrb[158].mxu1 %vm221_vm0, %v11283_v32  ;;  %9608 = vmatprep.mubr.msk.f32.mxu0 %vm221_vm0, %v11217_v59 }
 0x15e   : > { %v1323_v43 = vmax.f32 %v1178_v51, %v1190_v33  ;;  %3630 = vmatprep.mubr.f32.mxu1 %v10514_v0  ;;  %v11835_v33 = vld [vmem:[%s14425_s1] sm:$0xff] }
 0x15f   : > { %v1336_v45 = vmax.f32 %v1308_v58, %v1322_v27  ;;  %v9523_v63 = vpop.f32.mrb[54].mxu0 }
 0x160   : > { %v1337_v34 = vmax.f32 %v1309_v21, %v1323_v43  ;;  %v1194_v14 = vpop.f32.mrb[54].mxu1  ;;  %v1331_v56 = vmax.f32 %v9520_v22, %v9523_v63  ;;  %v1295_v59 = vpop.f32.mrb[55].mxu0  ;;  %9609 = vmatmul.mubr.msk.f32.vlgmr.msra.gmra.mrb[160].mxu0 %vm221_vm0, %v11249_v62  ;;  %v3882_v63 = vld [vmem:[%s10559_s19 + $0x790] sm:$0xff] }
 0x161   : > { %v1362_v31 = vadd.f32 %v11571_v8, %v1336_v45  ;;  %v1329_v18 = vmax.f32 %v1182_v46, %v1194_v14  ;;  %v1196_v55 = vpop.f32.mrb[55].mxu1  ;;  %v1324_v9 = vmax.f32 %v1285_v25, %v1295_v59  ;;  %9010 = vmatmul.mubr.msk.f32.gmra.mrb[160].mxu1 %vm221_vm0, %v11297_v50  ;;  %10103 = vmatpush1.bf16.msra.mxu0 %v10102_v52  ;;  %v3890_v25 = vld [vmem:[%s10559_s19 + $0xaa8] sm:$0xff] }
 0x162   : > { %v1363_v40 = vadd.f32 %v11571_v8, %v1337_v34  ;;  %v1345_v58 = vmax.f32 %v1317_v4, %v1331_v56  ;;  %v1330_v13 = vmax.f32 %v1184_v53, %v1196_v55  ;;  %3636 = vmatprep.mubr.f32.mxu1 %v10514_v0  ;;  %9611 = vmatprep.mubr.msk.f32.mxu0 %vm221_vm0, %v11270_v12  ;;  %v11867_v55 = vld [vmem:[%s14425_s1 + $0x8] sm:$0xff] }
 0x163   : > { %v1376_v62 = vmax.f32 %v1362_v31, 0.0  ;;  %v1343_v21 = vmax.f32 %v1315_v57, %v1329_v18  ;;  %v1338_v1 = vmax.f32 %v1310_v54, %v1324_v9  ;;  %v11762_v35 = vpop.f32.mrb[56].mxu0  ;;  %10105 = vmatprep.subr.bf16.mxu0 %v10104_v16  ;;  %v3876_v57 = vld [vmem:[%s10559_s19 + $0x488] sm:$0xff]  ;;  %v3868_v54 = vld [vmem:[%s10559_s19 + $0x170] sm:$0xff]  ;;  %v3889_v16 = vld [vmem:[%s10559_s19 + $0xaa0] sm:$0xff]  ;;  %v10140_v59 = vpack.c.bf16 %v3891_v47, %v3884_v6 }
 0x164   : > { %v1377_v41 = vmax.f32 %v1363_v40, 0.0  ;;  %v1371_v51 = vadd.f32 %v11610_v29, %v1345_v58  ;;  %v1344_v12 = vmax.f32 %v1316_v3, %v1330_v13  ;;  %v11770_v39 = vpop.f32.mrb[56].mxu1  ;;  %v11772_v5 = vpop.f32.mrb[57].mxu0  ;;  %9612 = vmatmul.mubr.msk.f32.gmra.mrb[162].mxu0 %vm221_vm0, %v11283_v32  ;;  %v10124_v4 = vpack.c.bf16 %v3876_v57, %v3869_v48  ;;  %v3898_v9 = vld [vmem:[%s10559_s19 + $0xdc0] sm:$0xff]  ;;  %v3905_v40 = vld [vmem:[%s10559_s19 + $0x10d0] sm:$0xff] }
 0x165   : > { %1390 = vst [vmem:[%s11318_s22 + $0x58] sm:$0xff] %v1376_v62  ;;  %v1369_v23 = vadd.f32 %v11610_v29, %v1343_v21  ;;  %v1364_v10 = vadd.f32 %v11571_v8, %v1338_v1  ;;  %v11781_v36 = vpop.f32.mrb[57].mxu1  ;;  %9011 = vmatmul.mubr.msk.f32.gmra.mrb[162].mxu1 %vm221_vm0, %v11329_v49  ;;  %9614 = vmatprep.mubr.msk.f32.mxu0 %vm221_vm0, %v11297_v50  ;;  %v3896_v1 = vld [vmem:[%s10559_s19 + $0xdb0] sm:$0xff] }
 0x166   : > { %1391 = vst [vmem:[%s11318_s22 + $0x60] sm:$0xff] %v1377_v41  ;;  %v1385_v19 = vmax.f32 %v1371_v51, 0.0  ;;  %v1370_v32 = vadd.f32 %v11610_v29, %v1344_v12  ;;  %3642 = vmatprep.mubr.f32.mxu1 %v10514_v0  ;;  %10107 = vmatpush1.bf16.msra.mxu0 %v10106_v15  ;;  %v10126_v52 = vpack.c.bf16 %v3875_v11, %v3868_v54  ;;  %v3897_v15 = vld [vmem:[%s10559_s19 + $0xdb8] sm:$0xff]  ;;  %v4488_v51 = vld [vmem:[%s10559_s19 + $0x4b0] sm:$0xff] }
 0x167   : > { %v1383_v8 = vmax.f32 %v1369_v23, 0.0  ;;  %v1378_v3 = vmax.f32 %v1364_v10, 0.0  ;;  %v11790_v46 = vpop.f32.mrb[58].mxu0  ;;  %10109 = vmatprep.subr.bf16.mxu0 %v10108_v44  ;;  %v10130_v13 = vpack.c.bf16 %v3889_v16, %v3882_v63  ;;  %v10132_v21 = vpack.c.bf16 %v3904_v20, %v3897_v15  ;;  %v3903_v44 = vld [vmem:[%s10559_s19 + $0x10c0] sm:$0xff]  ;;  %v11888_v48 = vld [vmem:[%s14425_s1 + $0x10] sm:$0xff] }
 0x168   : > { %1399 = vst [vmem:[%s11318_s22 + $0x378] sm:$0xff] %v1385_v19  ;;  %v1384_v50 = vmax.f32 %v1370_v32, 0.0  ;;  %v11793_v30 = vpop.f32.mrb[58].mxu1  ;;  %v11795_v53 = vpop.f32.mrb[59].mxu0  ;;  %9615 = vmatmul.mubr.msk.f32.gmra.mrb[164].mxu0 %vm221_vm0, %v11329_v49  ;;  %v10144_v41 = vpack.c.bf16 %v3905_v40, %v3898_v9  ;;  %v4479_v57 = vld [vmem:[%s10559_s19 + $0x190] sm:$0xff]  ;;  %v4486_v23 = vld [vmem:[%s10559_s19 + $0x4a0] sm:$0xff]  ;;  %v10134_v10 = vpack.c.bf16 %v3903_v44, %v3896_v1 }
 0x169   : > { %1397 = vst [vmem:[%s11318_s22 + $0x368] sm:$0xff] %v1383_v8  ;;  %1392 = vst [vmem:[%s11318_s22 + $0x68] sm:$0xff] %v1378_v3  ;;  %v11801_v29 = vpop.f32.mrb[59].mxu1  ;;  %9012 = vmatmul.mubr.msk.f32.gmra.mrb[164].mxu1 %vm221_vm0, %v11368_v2  ;;  %9617 = vmatprep.mubr.msk.f32.mxu0 %vm221_vm0, %v11368_v2  ;;  %v3883_v2 = vld [vmem:[%s10559_s19 + $0x798] sm:$0xff]  ;;  %v10148_v3 = vpack.c.bf16 %v4486_v23, %v4479_v57  ;;  %v11914_v63 = vld [vmem:[%s14425_s1 + $0x20] sm:$0xff] }
 0x16a   : > { %1398 = vst [vmem:[%s11318_s22 + $0x370] sm:$0xff] %v1384_v50  ;;  %3648 = vmatprep.mubr.f32.mxu1 %v10514_v0  ;;  %10111 = vmatpush1.bf16.msra.mxu0 %v10110_v60  ;;  %v11901_v50 = vld [vmem:[%s14425_s1 + $0x18] sm:$0xff] }
 0x16b   : > { %v11811_v49 = vpop.f32.mrb[60].mxu0  ;;  %10125 = vmatprep.subr.bf16.mxu0 %v10124_v4 }
 0x16c   : > { %v1918_v17 = vmax.f32 %v11762_v35, %v11811_v49  ;;  %v11815_v22 = vpop.f32.mrb[60].mxu1  ;;  %v11817_v28 = vpop.f32.mrb[61].mxu0  ;;  %9618 = vmatmul.mubr.msk.f32.gmra.mrb[166].mxu0 %vm221_vm0, %v11389_v24 }
 0x16d   : > { %v1920_v61 = vmax.f32 %v11770_v39, %v11815_v22  ;;  %v1919_v7 = vmax.f32 %v11772_v5, %v11817_v28  ;;  %v11827_v27 = vpop.f32.mrb[61].mxu1  ;;  %9013 = vmatmul.mubr.msk.f32.gmra.mrb[166].mxu1 %vm221_vm0, %v11389_v24  ;;  %3994 = vmatprep.mubr.f32.mxu0 %v10514_v0  ;;  %v10128_v24 = vpack.c.bf16 %v3890_v25, %v3883_v2 }
 0x16e   : > { %v1921_v43 = vmax.f32 %v11781_v36, %v11827_v27  ;;  %4107 = vmatprep.mubr.f32.mxu1 %v10514_v0  ;;  %v11936_v36 = vpop.permute.xlu1 %1969 }
 0x16f   : > { %v11842_v45 = vpop.f32.mrb[62].mxu0 }
 0x170   : > { %v1925_v34 = vmax.f32 %v11790_v46, %v11842_v45  ;;  %v11848_v14 = vpop.f32.mrb[62].mxu1  ;;  %v11850_v56 = vpop.f32.mrb[63].mxu0  ;;  %9022 = vmatmul.mubr.msk.f32.vlgmr.msra.gmra.mrb[168].mxu0 %vm221_vm0, %v11835_v33 }
 0x171   : > { %v1927_v37 = vmax.f32 %v11793_v30, %v11848_v14  ;;  %v1926_v31 = vmax.f32 %v11795_v53, %v11850_v56  ;;  %v11860_v18 = vpop.f32.mrb[63].mxu1  ;;  %9030 = vmatmul.mubr.msk.f32.vlgmr.msra.gmra.mrb[168].mxu1 %vm221_vm0, %v11835_v33  ;;  %10127 = vmatpush1.bf16.msra.mxu0 %v10126_v52 }
 0x172   : > { %v1928_v58 = vmax.f32 %v11801_v29, %v11860_v18  ;;  %10139 = vmatpush3.bf16.msra.mxu1 %v11716_v42  ;;  %4000 = vmatprep.mubr.f32.mxu0 %v10514_v0  ;;  %v4481_v42 = vld [vmem:[%s10559_s19 + $0x1a0] sm:$0xff]  ;;  %v11980_v29 = vld [vmem:[%s14425_s1 + $0x30] sm:$0xff] }
 0x173   : > { %v1564_v62 = vpop.f32.mrb[64].mxu0  ;;  %4113 = vmatprep.mubr.f32.mxu1 %v10514_v0  ;;  %10129 = vmatprep.subr.bf16.mxu0 %v10128_v24  ;;  %v10160_v32 = vpack.c.bf16 %v4488_v51, %v4481_v42  ;;  %v11908_v24 = vpop.permute.xlu0 %1964 }
 0x174   : > { %v1677_v26 = vpop.f32.mrb[64].mxu1  ;;  %v1566_v38 = vpop.f32.mrb[65].mxu0  ;;  %9023 = vmatmul.mubr.msk.f32.gmra.mrb[170].mxu0 %vm221_vm0, %v11867_v55  ;;  %10141 = vmatprep.subr.bf16.mxu1 %v10140_v59 }
 0x175   : > { %v1679_v12 = vpop.f32.mrb[65].mxu1  ;;  %9031 = vmatmul.mubr.msk.f32.gmra.mrb[170].mxu1 %vm221_vm0, %v11867_v55  ;;  %4006 = vmatprep.mubr.f32.mxu0 %v10514_v0 }
 0x176   : > { %4119 = vmatprep.mubr.f32.mxu1 %v10514_v0  ;;  %10131 = vmatpush1.bf16.msra.mxu0 %v10130_v13 }
 0x177   : > { %v1570_v19 = vpop.f32.mrb[66].mxu0  ;;  %10143 = vmatpush3.bf16.msra.mxu1 %v10140_v59  ;;  %10133 = vmatprep.subr.bf16.mxu0 %v10132_v21 }
 0x178   : > { %v1683_v60 = vpop.f32.mrb[66].mxu1  ;;  %v1572_v8 = vpop.f32.mrb[67].mxu0  ;;  %9024 = vmatmul.mubr.msk.f32.gmra.mrb[172].mxu0 %vm221_vm0, %v11888_v48  ;;  %10145 = vmatprep.subr.bf16.mxu1 %v10144_v41 }
 0x179   : > { %v1685_v4 = vpop.f32.mrb[67].mxu1  ;;  %9032 = vmatmul.mubr.msk.f32.gmra.mrb[172].mxu1 %vm221_vm0, %v11888_v48  ;;  %4012 = vmatprep.mubr.f32.mxu0 %v10514_v0 }
 0x17a   : > { %4125 = vmatprep.mubr.f32.mxu1 %v10514_v0  ;;  %10135 = vmatpush1.bf16.msra.mxu0 %v10134_v10 }
 0x17b   : > { %v1576_v54 = vpop.f32.mrb[68].mxu0  ;;  %10147 = vmatpush3.bf16.msra.mxu1 %v10144_v41  ;;  %10161 = vmatprep.subr.bf16.mxu0 %v10160_v32  ;;  %v12001_v32 = vld [vmem:[%s14425_s1 + $0x38] sm:$0xff] }
 0x17c   : > { %v1932_v11 = vmax.f32 %v1564_v62, %v1576_v54  ;;  %v1689_v2 = vpop.f32.mrb[68].mxu1  ;;  %v1578_v25 = vpop.f32.mrb[69].mxu0  ;;  %9025 = vmatmul.mubr.msk.f32.gmra.mrb[174].mxu0 %vm221_vm0, %v11901_v50  ;;  %10149 = vmatprep.subr.bf16.mxu1 %v10148_v3  ;;  %v4487_v3 = vld [vmem:[%s10559_s19 + $0x4a8] sm:$0xff] }
 0x17d   : > { %v1934_v52 = vmax.f32 %v1677_v26, %v1689_v2  ;;  %v1933_v6 = vmax.f32 %v1566_v38, %v1578_v25  ;;  %v1691_v47 = vpop.f32.mrb[69].mxu1  ;;  %9033 = vmatmul.mubr.msk.f32.gmra.mrb[174].mxu1 %vm221_vm0, %v11901_v50  ;;  %4018 = vmatprep.mubr.f32.mxu0 %v10514_v0  ;;  %v4478_v54 = vld [vmem:[%s10559_s19 + $0x188] sm:$0xff] }
 0x17e   : > { %v1946_v16 = vmax.f32 %v1918_v17, %v1932_v11  ;;  %v1935_v59 = vmax.f32 %v1679_v12, %v1691_v47  ;;  %4131 = vmatprep.mubr.f32.mxu1 %v10514_v0  ;;  %v4485_v11 = vld [vmem:[%s10559_s19 + $0x498] sm:$0xff]  ;;  %v4500_v47 = vld [vmem:[%s10559_s19 + $0xac0] sm:$0xff] }
 0x17f   : > { %v1948_v15 = vmax.f32 %v1920_v61, %v1934_v52  ;;  %v1947_v20 = vmax.f32 %v1919_v7, %v1933_v6  ;;  %v1582_v9 = vpop.f32.mrb[70].mxu0  ;;  %v11941_v7 = vld [vmem:[%s14425_s1 + $0x28] sm:$0xff]  ;;  %v4493_v6 = vld [vmem:[%s10559_s19 + $0x7b0] sm:$0xff] }
 0x180   : > { %v1949_v40 = vmax.f32 %v1921_v43, %v1935_v59  ;;  %v1972_v13 = vadd.f32 %v11908_v24, %v1946_v16  ;;  %v1939_v35 = vmax.f32 %v1570_v19, %v1582_v9  ;;  %v1695_v49 = vpop.f32.mrb[70].mxu1  ;;  %v1584_v17 = vpop.f32.mrb[71].mxu0  ;;  %9026 = vmatmul.mubr.msk.f32.gmra.mrb[176].mxu0 %vm221_vm0, %v11914_v63  ;;  %v4502_v9 = vld [vmem:[%s10559_s19 + $0xad0] sm:$0xff] }
 0x181   : > { %v1973_v39 = vadd.f32 %v11908_v24, %v1947_v20  ;;  %v1974_v22 = vadd.f32 %v11908_v24, %v1948_v15  ;;  %v1941_v61 = vmax.f32 %v1683_v60, %v1695_v49  ;;  %v1940_v5 = vmax.f32 %v1572_v8, %v1584_v17  ;;  %v1697_v28 = vpop.f32.mrb[71].mxu1  ;;  %9034 = vmatmul.mubr.msk.f32.gmra.mrb[176].mxu1 %vm221_vm0, %v11914_v63  ;;  %v4480_v8 = vld [vmem:[%s10559_s19 + $0x198] sm:$0xff]  ;;  %v4495_v20 = vld [vmem:[%s10559_s19 + $0x7c0] sm:$0xff]  ;;  %v4492_v49 = vld [vmem:[%s10559_s19 + $0x7a8] sm:$0xff] }
 0x182   : > { %v1975_v27 = vadd.f32 %v11908_v24, %v1949_v40  ;;  %v1986_v43 = vmax.f32 %v1972_v13, 0.0  ;;  %v1953_v62 = vmax.f32 %v1925_v34, %v1939_v35  ;;  %v1942_v21 = vmax.f32 %v1685_v4, %v1697_v28  ;;  %4024 = vmatprep.mubr.f32.mxu0 %v10514_v0  ;;  %4137 = vmatprep.mubr.f32.mxu1 %v10514_v0  ;;  %v4499_v17 = vld [vmem:[%s10559_s19 + $0xab8] sm:$0xff]  ;;  %v4514_v28 = vld [vmem:[%s10559_s19 + $0x10e0] sm:$0xff] }
 0x183   : > { %v1987_v1 = vmax.f32 %v1973_v39, 0.0  ;;  %v1988_v44 = vmax.f32 %v1974_v22, 0.0  ;;  %v1955_v26 = vmax.f32 %v1927_v37, %v1941_v61  ;;  %v1954_v38 = vmax.f32 %v1926_v31, %v1940_v5  ;;  %v11955_v41 = vpop.f32.mrb[72].mxu0  ;;  %v4507_v39 = vld [vmem:[%s10559_s19 + $0xdd0] sm:$0xff] }
 0x184   : > { %v1989_v46 = vmax.f32 %v1975_v27, 0.0  ;;  %2000 = vst [vmem:[%s11318_s22 + $0x70] sm:$0xff] %v1986_v43  ;;  %v1956_v45 = vmax.f32 %v1928_v58, %v1942_v21  ;;  %v1979_v34 = vadd.f32 %v11936_v36, %v1953_v62  ;;  %v11962_v42 = vpop.f32.mrb[72].mxu1  ;;  %v11964_v51 = vpop.f32.mrb[73].mxu0  ;;  %9027 = vmatmul.mubr.msk.f32.gmra.mrb[178].mxu0 %vm221_vm0, %v11941_v7  ;;  %v10162_v15 = vpack.c.bf16 %v4487_v3, %v4480_v8  ;;  %v4494_v43 = vld [vmem:[%s10559_s19 + $0x7b8] sm:$0xff]  ;;  %v4501_v62 = vld [vmem:[%s10559_s19 + $0xac8] sm:$0xff] }
 0x185   : > { %2001 = vst [vmem:[%s11318_s22 + $0x78] sm:$0xff] %v1987_v1  ;;  %2002 = vst [vmem:[%s11318_s22 + $0x80] sm:$0xff] %v1988_v44  ;;  %v1980_v30 = vadd.f32 %v11936_v36, %v1954_v38  ;;  %v1981_v53 = vadd.f32 %v11936_v36, %v1955_v26  ;;  %v11972_v14 = vpop.f32.mrb[73].mxu1  ;;  %9035 = vmatmul.mubr.msk.f32.gmra.mrb[178].mxu1 %vm221_vm0, %v11941_v7  ;;  %4030 = vmatprep.mubr.f32.mxu0 %v10514_v0  ;;  %v4509_v26 = vld [vmem:[%s10559_s19 + $0xde0] sm:$0xff]  ;;  %v4516_v38 = vld [vmem:[%s10559_s19 + $0x10f0] sm:$0xff] }
 0x186   : > { %2003 = vst [vmem:[%s11318_s22 + $0x88] sm:$0xff] %v1989_v46  ;;  %v1982_v56 = vadd.f32 %v11936_v36, %v1956_v45  ;;  %v1993_v37 = vmax.f32 %v1979_v34, 0.0  ;;  %4143 = vmatprep.mubr.f32.mxu1 %v10514_v0  ;;  %v10150_v40 = vpack.c.bf16 %v4485_v11, %v4478_v54  ;;  %v10152_v35 = vpack.c.bf16 %v4500_v47, %v4493_v6  ;;  %v4515_v8 = vld [vmem:[%s10559_s19 + $0x10e8] sm:$0xff] }
 0x187   : > { %v1994_v31 = vmax.f32 %v1980_v30, 0.0  ;;  %v1995_v18 = vmax.f32 %v1981_v53, 0.0  ;;  %v11985_v58 = vpop.f32.mrb[74].mxu0  ;;  %v10164_v27 = vpack.c.bf16 %v4502_v9, %v4495_v20  ;;  %v10154_v45 = vpack.c.bf16 %v4499_v17, %v4492_v49  ;;  %v4506_v53 = vld [vmem:[%s10559_s19 + $0xdc8] sm:$0xff] }
 0x188   : > { %v1996_v12 = vmax.f32 %v1982_v56, 0.0  ;;  %2007 = vst [vmem:[%s11318_s22 + $0x380] sm:$0xff] %v1993_v37  ;;  %v9541_v57 = vpop.f32.mrb[74].mxu1  ;;  %v11988_v23 = vpop.f32.mrb[75].mxu0  ;;  %9028 = vmatmul.mubr.msk.f32.gmra.mrb[180].mxu0 %vm221_vm0, %v11980_v29  ;;  %v10156_v30 = vpack.c.bf16 %v4514_v28, %v4507_v39  ;;  %v10166_v56 = vpack.c.bf16 %v4501_v62, %v4494_v43  ;;  %v4483_v37 = vld [vmem:[%s10559_s19 + $0x1b0] sm:$0xff]  ;;  %v4491_v11 = vld [vmem:[%s10559_s19 + $0x4c8] sm:$0xff] }
 0x189   : > { %2008 = vst [vmem:[%s11318_s22 + $0x388] sm:$0xff] %v1994_v31  ;;  %2009 = vst [vmem:[%s11318_s22 + $0x390] sm:$0xff] %v1995_v18  ;;  %v1931_v10 = vmax.f32 %v11962_v42, %v9541_v57  ;;  %v1889_v19 = vpop.f32.mrb[75].mxu1  ;;  %9036 = vmatmul.mubr.msk.f32.gmra.mrb[180].mxu1 %vm221_vm0, %v11980_v29  ;;  %4036 = vmatprep.mubr.f32.mxu0 %v10514_v0  ;;  %v4490_v57 = vld [vmem:[%s10559_s19 + $0x4c0] sm:$0xff]  ;;  %v4489_v28 = vld [vmem:[%s10559_s19 + $0x4b8] sm:$0xff] }
 0x18a   : > { %2010 = vst [vmem:[%s11318_s22 + $0x398] sm:$0xff] %v1996_v12  ;;  %v1924_v60 = vmax.f32 %v11972_v14, %v1889_v19  ;;  %4149 = vmatprep.mubr.f32.mxu1 %v10514_v0  ;;  %v4513_v14 = vld [vmem:[%s10559_s19 + $0x10d8] sm:$0xff] }
 0x18b   : > { %v12008_v4 = vpop.f32.mrb[76].mxu0  ;;  %v4508_v19 = vld [vmem:[%s10559_s19 + $0xdd8] sm:$0xff]  ;;  %v10158_v6 = vpack.c.bf16 %v4513_v14, %v4506_v53 }
 0x18c   : > { %v1922_v2 = vmax.f32 %v11955_v41, %v12008_v4  ;;  %v9544_v25 = vpop.f32.mrb[76].mxu1  ;;  %v12014_v52 = vpop.f32.mrb[77].mxu0  ;;  %9029 = vmatmul.mubr.msk.f32.gmra.mrb[182].mxu0 %vm221_vm0, %v12001_v32  ;;  %v10170_v20 = vpack.c.bf16 %v4515_v8, %v4508_v19  ;;  %v4518_v19 = vld [vmem:[%s10559_s19 + $0x1100] sm:$0xff] }
 0x18d   : > { %v1923_v16 = vmax.f32 %v11964_v51, %v12014_v52  ;;  %v1899_v59 = vpop.f32.mrb[77].mxu1  ;;  %9037 = vmatmul.mubr.msk.f32.gmra.mrb[182].mxu1 %vm221_vm0, %v12001_v32  ;;  %4220 = vmatprep.mubr.f32.mxu0 %v10514_v0 }
 0x18e   : > { %9632 = vmatprep.mubr.msk.f32.mxu1 %vm221_vm0, %v11835_v33 }
 0x18f   : > { %v12029_v13 = vpop.f32.mrb[78].mxu0 }
 0x190   : > { %v1929_v22 = vmax.f32 %v11985_v58, %v12029_v13  ;;  %v9547_v61 = vpop.f32.mrb[78].mxu1  ;;  %v12036_v5 = vpop.f32.mrb[79].mxu0  ;;  %9038 = vmatmul.mubr.msk.f32.vlgmr.msra.gmra.mrb[184].mxu0 %vm221_vm0, %v11835_v33  ;;  %v4510_v13 = vld [vmem:[%s10559_s19 + $0xde8] sm:$0xff] }
 0x191   : > { %v1945_v21 = vmax.f32 %v9544_v25, %v9547_v61  ;;  %v1930_v1 = vmax.f32 %v11988_v23, %v12036_v5  ;;  %v1909_v44 = vpop.f32.mrb[79].mxu1  ;;  %9633 = vmatmul.mubr.msk.f32.vlgmr.msra.gmra.mrb[184].mxu1 %vm221_vm0, %v11867_v55  ;;  %10163 = vmatpush1.bf16.msra.mxu0 %v10162_v15  ;;  %v10172_v15 = vpack.c.bf16 %v4490_v57, %v4483_v37  ;;  %v4482_v61 = vld [vmem:[%s10559_s19 + $0x1a8] sm:$0xff] }
 0x192   : > { %v1938_v46 = vmax.f32 %v1899_v59, %v1909_v44  ;;  %10151 = vmatpush1.bf16.msra.mxu1 %v10150_v40  ;;  %4226 = vmatprep.mubr.f32.mxu0 %v10514_v0  ;;  %v4497_v44 = vld [vmem:[%s10559_s19 + $0x7d0] sm:$0xff]  ;;  %v10174_v53 = vpack.c.bf16 %v4489_v28, %v4482_v61  ;;  %v5102_v23 = vld [vmem:[%s10559_s19 + $0x4e8] sm:$0xff] }
 0x193   : > { %v1959_v34 = vmax.f32 %v1931_v10, %v1945_v21  ;;  %v12050_v42 = vpop.f32.mrb[80].mxu0  ;;  %9635 = vmatprep.mubr.msk.f32.mxu1 %vm221_vm0, %v11888_v48  ;;  %10153 = vmatprep.subr.bf16.mxu1 %v10152_v35  ;;  %v10168_v10 = vpack.c.bf16 %v4516_v38, %v4509_v26  ;;  %v4504_v26 = vld [vmem:[%s10559_s19 + $0xae0] sm:$0xff]  ;;  %v5031_v38 = vld [vmem:[%s14426_s2 + $0x8] sm:$0xff] }
 0x194   : > { %v1952_v31 = vmax.f32 %v1924_v60, %v1938_v46  ;;  %v12057_v18 = vpop.f32.mrb[80].mxu1  ;;  %v1792_v12 = vpop.f32.mrb[81].mxu0  ;;  %9039 = vmatmul.mubr.msk.f32.gmra.mrb[186].mxu0 %vm221_vm0, %v11867_v55  ;;  %10165 = vmatprep.subr.bf16.mxu0 %v10164_v27  ;;  %v4484_v60 = vld [vmem:[%s10559_s19 + $0x1b8] sm:$0xff]  ;;  %v5030_v27 = vld [vmem:[%s14426_s2] sm:$0xff]  ;;  %v10176_v37 = vpack.c.bf16 %v4504_v26, %v4497_v44 }
 0x195   : > { %v1985_v3 = vadd.f32 %v11936_v36, %v1959_v34  ;;  %v12065_v54 = vpop.f32.mrb[81].mxu1  ;;  %9636 = vmatmul.mubr.msk.f32.gmra.mrb[186].mxu1 %vm221_vm0, %v11901_v50  ;;  %4232 = vmatprep.mubr.f32.mxu0 %v10514_v0  ;;  %v12081_v49 = vpack.c.bf16 %v4491_v11, %v4484_v60 }
 0x196   : > { %v1978_v25 = vadd.f32 %v11908_v24, %v1952_v31  ;;  %9638 = vmatprep.mubr.msk.f32.mxu1 %vm221_vm0, %v11914_v63  ;;  %10155 = vmatpush1.bf16.msra.mxu1 %v10154_v45  ;;  %v4496_v31 = vld [vmem:[%s10559_s19 + $0x7c8] sm:$0xff] }
 0x197   : > { %v1999_v47 = vmax.f32 %v1985_v3, 0.0  ;;  %v12075_v59 = vpop.f32.mrb[82].mxu0  ;;  %10157 = vmatprep.subr.bf16.mxu1 %v10156_v30  ;;  %10167 = vmatpush1.bf16.msra.mxu0 %v10166_v56 }
 0x198   : > { %v1992_v9 = vmax.f32 %v1978_v25, 0.0  ;;  %v12077_v40 = vpop.f32.mrb[82].mxu1  ;;  %v1798_v35 = vpop.f32.mrb[83].mxu0  ;;  %9040 = vmatmul.mubr.msk.f32.gmra.mrb[188].mxu0 %vm221_vm0, %v11888_v48  ;;  %10169 = vmatprep.subr.bf16.mxu0 %v10168_v10  ;;  %v4511_v10 = vld [vmem:[%s10559_s19 + $0xdf0] sm:$0xff] }
 0x199   : > { %2013 = vst [vmem:[%s11318_s22 + $0x3b0] sm:$0xff] %v1999_v47  ;;  %v12084_v17 = vpop.f32.mrb[83].mxu1  ;;  %9639 = vmatmul.mubr.msk.f32.gmra.mrb[188].mxu1 %vm221_vm0, %v11941_v7  ;;  %4238 = vmatprep.mubr.f32.mxu0 %v10514_v0  ;;  %v10180_v58 = vpack.c.bf16 %v4518_v19, %v4511_v10 }
 0x19a   : > { %2006 = vst [vmem:[%s11318_s22 + $0xa0] sm:$0xff] %v1992_v9  ;;  %9641 = vmatprep.mubr.msk.f32.mxu1 %vm221_vm0, %v11980_v29  ;;  %10159 = vmatpush1.bf16.msra.mxu1 %v10158_v6  ;;  %v5095_v9 = vld [vmem:[%s10559_s19 + $0x1d8] sm:$0xff] }
 0x19b   : > { %v1802_v39 = vpop.f32.mrb[84].mxu0  ;;  %10173 = vmatprep.subr.bf16.mxu1 %v10172_v15  ;;  %10171 = vmatpush1.bf16.msra.mxu0 %v10170_v20 }
 0x19c   : > { %v1936_v43 = vmax.f32 %v12050_v42, %v1802_v39  ;;  %v12098_v62 = vpop.f32.mrb[84].mxu1  ;;  %v1804_v21 = vpop.f32.mrb[85].mxu0  ;;  %9041 = vmatmul.mubr.msk.f32.gmra.mrb[190].mxu0 %vm221_vm0, %v11901_v50  ;;  %10185 = vmatprep.subr.bf16.mxu0 %v12081_v49 }
 0x19d   : > { %v2532_v46 = vmax.f32 %v12057_v18, %v12098_v62  ;;  %v1937_v45 = vmax.f32 %v1792_v12, %v1804_v21  ;;  %v12110_v34 = vpop.f32.mrb[85].mxu1  ;;  %9642 = vmatmul.mubr.msk.f32.gmra.mrb[190].mxu1 %vm221_vm0, %v12001_v32  ;;  %4244 = vmatprep.mubr.f32.mxu0 %v10514_v0  ;;  %v4503_v12 = vld [vmem:[%s10559_s19 + $0xad8] sm:$0xff] }
 0x19e   : > { %v1950_v42 = vmax.f32 %v1922_v2, %v1936_v43  ;;  %v2533_v30 = vmax.f32 %v12065_v54, %v12110_v34  ;;  %4608 = vmatprep.mubr.f32.mxu1 %v10514_v0  ;;  %5034 = vperm.xlu0 %10496, %v5030_v27   ;;  %v10178_v11 = vpack.c.bf16 %v4503_v12, %v4496_v31  ;;  %v12196_v12 = vpop.permute.xlu0 %2578 }
 0x19f   : > { %v1951_v14 = vmax.f32 %v1923_v16, %v1937_v45  ;;  %v1808_v56 = vpop.f32.mrb[86].mxu0  ;;  %5039 = vperm.xlu1 %10497, %v5031_v38  }
 0x1a0   : > { %v1976_v41 = vadd.f32 %v11908_v24, %v1950_v42  ;;  %v1943_v4 = vmax.f32 %v12075_v59, %v1808_v56  ;;  %v12128_v2 = vpop.f32.mrb[86].mxu1  ;;  %v1810_v57 = vpop.f32.mrb[87].mxu0  ;;  %9042 = vmatmul.mubr.msk.f32.gmra.mrb[192].mxu0 %vm221_vm0, %v11914_v63  ;;  %v4498_v42 = vld [vmem:[%s10559_s19 + $0x7d8] sm:$0xff] }
 0x1a1   : > { %v1977_v51 = vadd.f32 %v11908_v24, %v1951_v14  ;;  %v2539_v52 = vmax.f32 %v12077_v40, %v12128_v2  ;;  %v1944_v16 = vmax.f32 %v1798_v35, %v1810_v57  ;;  %v12137_v8 = vpop.f32.mrb[87].mxu1  ;;  %9054 = vmatmul.mubr.msk.f32.vlgmr.msra.gmra.mrb[192].mxu1 %vm221_vm0, %v11835_v33  ;;  %4250 = vmatprep.mubr.f32.mxu0 %v10514_v0 }
 0x1a2   : > { %v1990_v3 = vmax.f32 %v1976_v41, 0.0  ;;  %v1957_v60 = vmax.f32 %v1929_v22, %v1943_v4  ;;  %v2540_v24 = vmax.f32 %v12084_v17, %v12137_v8  ;;  %10175 = vmatpush1.bf16.msra.mxu1 %v10174_v53  ;;  %4614 = vmatprep.mubr.f32.mxu1 %v10514_v0  ;;  %v4517_v22 = vld [vmem:[%s10559_s19 + $0x10f8] sm:$0xff]  ;;  %v4505_v53 = vld [vmem:[%s10559_s19 + $0xae8] sm:$0xff] }
 0x1a3   : > { %v1991_v25 = vmax.f32 %v1977_v51, 0.0  ;;  %v1958_v6 = vmax.f32 %v1930_v1, %v1944_v16  ;;  %v12151_v47 = vpop.f32.mrb[88].mxu0  ;;  %10177 = vmatprep.subr.bf16.mxu1 %v10176_v37  ;;  %5648 = vperm.xlu0 %10496, %v5030_v27   ;;  %v10182_v39 = vpack.c.bf16 %v4517_v22, %v4510_v13  ;;  %v10208_v27 = vpack.c.bf16 %v5102_v23, %v5095_v9  ;;  %v5093_v9 = vld [vmem:[%s10559_s19 + $0x1c8] sm:$0xff]  ;;  %v5100_v23 = vld [vmem:[%s10559_s19 + $0x4d8] sm:$0xff] }
 0x1a4   : > { %2004 = vst [vmem:[%s11318_s22 + $0x90] sm:$0xff] %v1990_v3  ;;  %v1983_v59 = vadd.f32 %v11936_v36, %v1957_v60  ;;  %v2178_v15 = vpop.f32.mrb[88].mxu1  ;;  %v12157_v20 = vpop.f32.mrb[89].mxu0  ;;  %9043 = vmatmul.mubr.msk.f32.gmra.mrb[194].mxu0 %vm221_vm0, %v11941_v7  ;;  %5653 = vperm.xlu1 %10497, %v5031_v38   ;;  %v10188_v57 = vpack.c.bf16 %v4505_v53, %v4498_v42  ;;  %v4512_v3 = vld [vmem:[%s10559_s19 + $0xdf8] sm:$0xff]  ;;  %v4519_v60 = vld [vmem:[%s10559_s19 + $0x1108] sm:$0xff] }
 0x1a5   : > { %2005 = vst [vmem:[%s11318_s22 + $0x98] sm:$0xff] %v1991_v25  ;;  %v1984_v5 = vadd.f32 %v11936_v36, %v1958_v6  ;;  %v2180_v1 = vpop.f32.mrb[89].mxu1  ;;  %9055 = vmatmul.mubr.msk.f32.gmra.mrb[194].mxu1 %vm221_vm0, %v11867_v55  ;;  %4256 = vmatprep.mubr.f32.mxu0 %v10514_v0  ;;  %v5109_v53 = vld [vmem:[%s10559_s19 + $0x7f8] sm:$0xff] }
 0x1a6   : > { %v1997_v35 = vmax.f32 %v1983_v59, 0.0  ;;  %4620 = vmatprep.mubr.f32.mxu1 %v10514_v0  ;;  %10179 = vmatpush1.bf16.msra.mxu1 %v10178_v11 }
 0x1a7   : > { %v1998_v61 = vmax.f32 %v1984_v5, 0.0  ;;  %v12169_v28 = vpop.f32.mrb[90].mxu0  ;;  %10181 = vmatprep.subr.bf16.mxu1 %v10180_v58 }
 0x1a8   : > { %2011 = vst [vmem:[%s11318_s22 + $0x3a0] sm:$0xff] %v1997_v35  ;;  %v2184_v36 = vpop.f32.mrb[90].mxu1  ;;  %v12172_v43 = vpop.f32.mrb[91].mxu0  ;;  %9044 = vmatmul.mubr.msk.f32.gmra.mrb[196].mxu0 %vm221_vm0, %v11980_v29 }
 0x1a9   : > { %2012 = vst [vmem:[%s11318_s22 + $0x3a8] sm:$0xff] %v1998_v61  ;;  %v2186_v21 = vpop.f32.mrb[91].mxu1  ;;  %9056 = vmatmul.mubr.msk.f32.gmra.mrb[196].mxu1 %vm221_vm0, %v11888_v48  ;;  %4262 = vmatprep.mubr.f32.mxu0 %v10514_v0 }
 0x1aa   : > { %4626 = vmatprep.mubr.f32.mxu1 %v10514_v0  ;;  %10183 = vmatpush1.bf16.msra.mxu1 %v10182_v39 }
 0x1ab   : > { %v12181_v44 = vpop.f32.mrb[92].mxu0  ;;  %10209 = vmatprep.subr.bf16.mxu1 %v10208_v27  ;;  %v5094_v27 = vld [vmem:[%s10559_s19 + $0x1d0] sm:$0xff] }
 0x1ac   : > { %v2190_v26 = vpop.f32.mrb[92].mxu1  ;;  %v2534_v38 = vmax.f32 %v12151_v47, %v12181_v44  ;;  %v12185_v45 = vpop.f32.mrb[93].mxu0  ;;  %9045 = vmatmul.mubr.msk.f32.gmra.mrb[198].mxu0 %vm221_vm0, %v12001_v32 }
 0x1ad   : > { %v2546_v14 = vmax.f32 %v2178_v15, %v2190_v26  ;;  %v2192_v56 = vpop.f32.mrb[93].mxu1  ;;  %v2535_v37 = vmax.f32 %v12157_v20, %v12185_v45  ;;  %9057 = vmatmul.mubr.msk.f32.gmra.mrb[198].mxu1 %vm221_vm0, %v11901_v50  ;;  %4721 = vmatprep.mubr.f32.mxu0 %v10514_v0 }
 0x1ae   : > { %v2547_v31 = vmax.f32 %v2180_v1, %v2192_v56  ;;  %4632 = vmatprep.mubr.f32.mxu1 %v10514_v0 }
 0x1af   : > { %v2560_v41 = vmax.f32 %v2532_v46, %v2546_v14  ;;  %v12202_v4 = vpop.f32.mrb[94].mxu0  ;;  %v5116_v14 = vld [vmem:[%s10559_s19 + $0xb08] sm:$0xff] }
 0x1b0   : > { %v2561_v10 = vmax.f32 %v2533_v30, %v2547_v31  ;;  %v2196_v19 = vpop.f32.mrb[94].mxu1  ;;  %v2541_v51 = vmax.f32 %v12169_v28, %v12202_v4  ;;  %v12209_v16 = vpop.f32.mrb[95].mxu0  ;;  %9062 = vmatmul.mubr.msk.f32.vlgmr.msra.gmra.mrb[200].mxu0 %vm221_vm0, %v11835_v33  ;;  %v5122_v4 = vld [vmem:[%s10559_s19 + $0xe10] sm:$0xff] }
 0x1b1   : > { %v2586_v18 = vadd.f32 %v12196_v12, %v2560_v41  ;;  %v2553_v62 = vmax.f32 %v2184_v36, %v2196_v19  ;;  %v2198_v46 = vpop.f32.mrb[95].mxu1  ;;  %v2542_v11 = vmax.f32 %v12172_v43, %v12209_v16  ;;  %9058 = vmatmul.mubr.msk.f32.gmra.mrb[200].mxu1 %vm221_vm0, %v11914_v63  ;;  %10187 = vmatpush3.bf16.msra.mxu0 %v12081_v49  ;;  %v12222_v30 = vpop.permute.xlu1 %2583  ;;  %v5101_v36 = vld [vmem:[%s10559_s19 + $0x4e0] sm:$0xff] }
 0x1b2   : > { %v2587_v54 = vadd.f32 %v12196_v12, %v2561_v10  ;;  %v2554_v34 = vmax.f32 %v2186_v21, %v2198_v46  ;;  %4638 = vmatprep.mubr.f32.mxu1 %v10514_v0  ;;  %4727 = vmatprep.mubr.f32.mxu0 %v10514_v0  ;;  %v10192_v49 = vpack.c.bf16 %v4519_v60, %v4512_v3  ;;  %v5115_v46 = vld [vmem:[%s10559_s19 + $0xb00] sm:$0xff] }
 0x1b3   : > { %v2600_v25 = vmax.f32 %v2586_v18, 0.0  ;;  %v2567_v6 = vmax.f32 %v2539_v52, %v2553_v62  ;;  %v2291_v58 = vpop.f32.mrb[96].mxu0  ;;  %10189 = vmatprep.subr.bf16.mxu0 %v10188_v57  ;;  %v10210_v19 = vpack.c.bf16 %v5101_v36, %v5094_v27  ;;  %v10212_v18 = vpack.c.bf16 %v5116_v14, %v5109_v53  ;;  %v5108_v62 = vld [vmem:[%s10559_s19 + $0x7f0] sm:$0xff] }
 0x1b4   : > { %v2601_v13 = vmax.f32 %v2587_v54, 0.0  ;;  %v2568_v22 = vmax.f32 %v2540_v24, %v2554_v34  ;;  %v12232_v59 = vpop.f32.mrb[96].mxu1  ;;  %v2293_v15 = vpop.f32.mrb[97].mxu0  ;;  %9063 = vmatmul.mubr.msk.f32.gmra.mrb[202].mxu0 %vm221_vm0, %v11867_v55  ;;  %v10196_v24 = vpack.c.bf16 %v5100_v23, %v5093_v9 }
 0x1b5   : > { %2614 = vst [vmem:[%s11318_s22 + $0xa8] sm:$0xff] %v2600_v25  ;;  %v2593_v40 = vadd.f32 %v12222_v30, %v2567_v6  ;;  %v12240_v2 = vpop.f32.mrb[97].mxu1  ;;  %9059 = vmatmul.mubr.msk.f32.gmra.mrb[202].mxu1 %vm221_vm0, %v11941_v7  ;;  %4733 = vmatprep.mubr.f32.mxu0 %v10514_v0  ;;  %v5130_v25 = vld [vmem:[%s10559_s19 + $0x1128] sm:$0xff] }
 0x1b6   : > { %2615 = vst [vmem:[%s11318_s22 + $0xb0] sm:$0xff] %v2601_v13  ;;  %v2594_v17 = vadd.f32 %v12222_v30, %v2568_v22  ;;  %4644 = vmatprep.mubr.f32.mxu1 %v10514_v0  ;;  %10191 = vmatpush3.bf16.msra.mxu0 %v10188_v57  ;;  %v10214_v22 = vpack.c.bf16 %v5115_v46, %v5108_v62  ;;  %v5114_v62 = vld [vmem:[%s10559_s19 + $0xaf8] sm:$0xff] }
 0x1b7   : > { %v2607_v52 = vmax.f32 %v2593_v40, 0.0  ;;  %v2297_v8 = vpop.f32.mrb[98].mxu0  ;;  %10193 = vmatprep.subr.bf16.mxu0 %v10192_v49 }
 0x1b8   : > { %v2608_v5 = vmax.f32 %v2594_v17, 0.0  ;;  %v12248_v1 = vpop.f32.mrb[98].mxu1  ;;  %v2299_v35 = vpop.f32.mrb[99].mxu0  ;;  %9064 = vmatmul.mubr.msk.f32.gmra.mrb[204].mxu0 %vm221_vm0, %v11888_v48 }
 0x1b9   : > { %2621 = vst [vmem:[%s11318_s22 + $0x3b8] sm:$0xff] %v2607_v52  ;;  %v12253_v39 = vpop.f32.mrb[99].mxu1  ;;  %9060 = vmatmul.mubr.msk.f32.gmra.mrb[204].mxu1 %vm221_vm0, %v11980_v29  ;;  %4739 = vmatprep.mubr.f32.mxu0 %v10514_v0 }
 0x1ba   : > { %2622 = vst [vmem:[%s11318_s22 + $0x3c0] sm:$0xff] %v2608_v5  ;;  %4650 = vmatprep.mubr.f32.mxu1 %v10514_v0  ;;  %10195 = vmatpush3.bf16.msra.mxu0 %v10192_v49 }
 0x1bb   : > { %v2303_v61 = vpop.f32.mrb[100].mxu0  ;;  %10197 = vmatprep.subr.bf16.mxu0 %v10196_v24  ;;  %v5105_v24 = vld [vmem:[%s10559_s19 + $0x500] sm:$0xff] }
 0x1bc   : > { %v2548_v21 = vmax.f32 %v2291_v58, %v2303_v61  ;;  %v12262_v26 = vpop.f32.mrb[100].mxu1  ;;  %v2305_v42 = vpop.f32.mrb[101].mxu0  ;;  %9065 = vmatmul.mubr.msk.f32.gmra.mrb[206].mxu0 %vm221_vm0, %v11901_v50 }
 0x1bd   : > { %v2536_v56 = vmax.f32 %v12232_v59, %v12262_v26  ;;  %v2549_v31 = vmax.f32 %v2293_v15, %v2305_v42  ;;  %v12270_v41 = vpop.f32.mrb[101].mxu1  ;;  %9061 = vmatmul.mubr.msk.f32.gmra.mrb[206].mxu1 %vm221_vm0, %v12001_v32  ;;  %4745 = vmatprep.mubr.f32.mxu0 %v10514_v0 }
 0x1be   : > { %v2562_v57 = vmax.f32 %v2534_v38, %v2548_v21  ;;  %v2537_v10 = vmax.f32 %v12240_v2, %v12270_v41  ;;  %4834 = vmatprep.mubr.f32.mxu1 %v10514_v0  ;;  %v5123_v38 = vld [vmem:[%s10559_s19 + $0xe18] sm:$0xff] }
 0x1bf   : > { %v2563_v3 = vmax.f32 %v2535_v37, %v2549_v31  ;;  %v2309_v60 = vpop.f32.mrb[102].mxu0  ;;  %v10216_v28 = vpack.c.bf16 %v5130_v25, %v5123_v38  ;;  %v5092_v31 = vld [vmem:[%s10559_s19 + $0x1c0] sm:$0xff]  ;;  %v5113_v38 = vld [vmem:[%s10559_s19 + $0xaf0] sm:$0xff] }
 0x1c0   : > { %v2588_v54 = vadd.f32 %v12196_v12, %v2562_v57  ;;  %v2555_v34 = vmax.f32 %v2297_v8, %v2309_v60  ;;  %v12287_v47 = vpop.f32.mrb[102].mxu1  ;;  %v2311_v44 = vpop.f32.mrb[103].mxu0  ;;  %9066 = vmatmul.mubr.msk.f32.gmra.mrb[208].mxu0 %vm221_vm0, %v11914_v63  ;;  %v5098_v8 = vld [vmem:[%s10559_s19 + $0x1f0] sm:$0xff] }
 0x1c1   : > { %v2589_v6 = vadd.f32 %v12196_v12, %v2563_v3  ;;  %v2543_v20 = vmax.f32 %v12248_v1, %v12287_v47  ;;  %v2556_v45 = vmax.f32 %v2299_v35, %v2311_v44  ;;  %v12296_v37 = vpop.f32.mrb[103].mxu1  ;;  %9070 = vmatmul.mubr.msk.f32.vlgmr.msra.gmra.mrb[208].mxu1 %vm221_vm0, %v11835_v33  ;;  %4751 = vmatprep.mubr.f32.mxu0 %v10514_v0  ;;  %v5099_v57 = vld [vmem:[%s10559_s19 + $0x4d0] sm:$0xff]  ;;  %v5106_v44 = vld [vmem:[%s10559_s19 + $0x7e0] sm:$0xff]  ;;  %v5097_v47 = vld [vmem:[%s10559_s19 + $0x1e8] sm:$0xff] }
 0x1c2   : > { %v2602_v58 = vmax.f32 %v2588_v54, 0.0  ;;  %v2569_v49 = vmax.f32 %v2541_v51, %v2555_v34  ;;  %v2544_v13 = vmax.f32 %v12253_v39, %v12296_v37  ;;  %10211 = vmatpush1.bf16.msra.mxu1 %v10210_v19  ;;  %4840 = vmatprep.mubr.f32.mxu1 %v10514_v0  ;;  %v5129_v51 = vld [vmem:[%s10559_s19 + $0x1120] sm:$0xff]  ;;  %v12328_v27 = vpack.c.bf16 %v5105_v24, %v5098_v8  ;;  %v5127_v24 = vld [vmem:[%s10559_s19 + $0x1110] sm:$0xff] }
 0x1c3   : > { %v2603_v15 = vmax.f32 %v2589_v6, 0.0  ;;  %v2570_v9 = vmax.f32 %v2542_v11, %v2556_v45  ;;  %v12310_v23 = vpop.f32.mrb[104].mxu0  ;;  %10213 = vmatprep.subr.bf16.mxu1 %v10212_v18  ;;  %v10218_v5 = vpack.c.bf16 %v5129_v51, %v5122_v4  ;;  %v5107_v18 = vld [vmem:[%s10559_s19 + $0x7e8] sm:$0xff]  ;;  %v10198_v34 = vpack.c.bf16 %v5099_v57, %v5092_v31  ;;  %v5120_v8 = vld [vmem:[%s10559_s19 + $0xe00] sm:$0xff]  ;;  %v5103_v31 = vld [vmem:[%s10559_s19 + $0x4f0] sm:$0xff] }
 0x1c4   : > { %2616 = vst [vmem:[%s11318_s22 + $0xb8] sm:$0xff] %v2602_v58  ;;  %v2595_v40 = vadd.f32 %v12222_v30, %v2569_v49  ;;  %v2404_v17 = vpop.f32.mrb[104].mxu1  ;;  %v12316_v52 = vpop.f32.mrb[105].mxu0  ;;  %9067 = vmatmul.mubr.msk.f32.gmra.mrb[210].mxu0 %vm221_vm0, %v11941_v7  ;;  %v10200_v58 = vpack.c.bf16 %v5114_v62, %v5107_v18  ;;  %v10206_v37 = vpack.c.bf16 %v5127_v24, %v5120_v8 }
 0x1c5   : > { %2617 = vst [vmem:[%s11318_s22 + $0xc0] sm:$0xff] %v2603_v15  ;;  %v2596_v43 = vadd.f32 %v12222_v30, %v2570_v9  ;;  %v2406_v16 = vpop.f32.mrb[105].mxu1  ;;  %9071 = vmatmul.mubr.msk.f32.gmra.mrb[210].mxu1 %vm221_vm0, %v11867_v55  ;;  %4757 = vmatprep.mubr.f32.mxu0 %v10514_v0  ;;  %v10202_v9 = vpack.c.bf16 %v5113_v38, %v5106_v44  ;;  %v5112_v44 = vld [vmem:[%s10559_s19 + $0x810] sm:$0xff]  ;;  %v5119_v38 = vld [vmem:[%s10559_s19 + $0xb20] sm:$0xff] }
 0x1c6   : > { %v2609_v11 = vmax.f32 %v2595_v40, 0.0  ;;  %4846 = vmatprep.mubr.f32.mxu1 %v10514_v0  ;;  %10215 = vmatpush1.bf16.msra.mxu1 %v10214_v22 }
 0x1c7   : > { %v2610_v35 = vmax.f32 %v2596_v43, 0.0  ;;  %v9565_v61 = vpop.f32.mrb[106].mxu0  ;;  %10217 = vmatprep.subr.bf16.mxu1 %v10216_v28  ;;  %v5128_v28 = vld [vmem:[%s10559_s19 + $0x1118] sm:$0xff] }
 0x1c8   : > { %2623 = vst [vmem:[%s11318_s22 + $0x3c8] sm:$0xff] %v2609_v11  ;;  %v2410_v36 = vpop.f32.mrb[106].mxu1  ;;  %v2545_v21 = vmax.f32 %v12310_v23, %v9565_v61  ;;  %v2503_v42 = vpop.f32.mrb[107].mxu0  ;;  %9068 = vmatmul.mubr.msk.f32.gmra.mrb[212].mxu0 %vm221_vm0, %v11980_v29  ;;  %v5121_v23 = vld [vmem:[%s10559_s19 + $0xe08] sm:$0xff] }
 0x1c9   : > { %2624 = vst [vmem:[%s11318_s22 + $0x3d0] sm:$0xff] %v2610_v35  ;;  %v2412_v53 = vpop.f32.mrb[107].mxu1  ;;  %v2538_v14 = vmax.f32 %v12316_v52, %v2503_v42  ;;  %9072 = vmatmul.mubr.msk.f32.gmra.mrb[212].mxu1 %vm221_vm0, %v11888_v48  ;;  %4763 = vmatprep.mubr.f32.mxu0 %v10514_v0  ;;  %v10204_v52 = vpack.c.bf16 %v5128_v28, %v5121_v23  ;;  %v5132_v23 = vld [vmem:[%s10559_s19 + $0x1138] sm:$0xff] }
 0x1ca   : > { %4852 = vmatprep.mubr.f32.mxu1 %v10514_v0  ;;  %10219 = vmatpush1.bf16.msra.mxu1 %v10218_v5 }
 0x1cb   : > { %v9568_v19 = vpop.f32.mrb[108].mxu0  ;;  %10233 = vmatprep.subr.bf16.mxu1 %v12328_v27 }
 0x1cc   : > { %v2416_v3 = vpop.f32.mrb[108].mxu1  ;;  %v2513_v60 = vpop.f32.mrb[109].mxu0  ;;  %9069 = vmatmul.mubr.msk.f32.gmra.mrb[214].mxu0 %vm221_vm0, %v12001_v32 }
 0x1cd   : > { %v2550_v46 = vmax.f32 %v2404_v17, %v2416_v3  ;;  %v2418_v54 = vpop.f32.mrb[109].mxu1  ;;  %9073 = vmatmul.mubr.msk.f32.gmra.mrb[214].mxu1 %vm221_vm0, %v11901_v50  ;;  %9656 = vmatprep.mubr.msk.f32.mxu0 %vm221_vm0, %v11835_v33 }
 0x1ce   : > { %v2551_v25 = vmax.f32 %v2406_v16, %v2418_v54  ;;  %4858 = vmatprep.mubr.f32.mxu1 %v10514_v0  ;;  %v12447_v54 = vld [vmem:[%s14425_s1] sm:$0xff] }
 0x1cf   : > { %v2564_v6 = vmax.f32 %v2536_v56, %v2550_v46  ;;  %v9571_v45 = vpop.f32.mrb[110].mxu0 }
 0x1d0   : > { %v2565_v49 = vmax.f32 %v2537_v10, %v2551_v25  ;;  %v2422_v22 = vpop.f32.mrb[110].mxu1  ;;  %v2559_v15 = vmax.f32 %v9568_v19, %v9571_v45  ;;  %v2523_v33 = vpop.f32.mrb[111].mxu0  ;;  %9657 = vmatmul.mubr.msk.f32.vlgmr.msra.gmra.mrb[216].mxu0 %vm221_vm0, %v11867_v55  ;;  %v5110_v45 = vld [vmem:[%s10559_s19 + $0x800] sm:$0xff] }
 0x1d1   : > { %v2590_v4 = vadd.f32 %v12196_v12, %v2564_v6  ;;  %v2557_v51 = vmax.f32 %v2410_v36, %v2422_v22  ;;  %v2424_v59 = vpop.f32.mrb[111].mxu1  ;;  %v2552_v26 = vmax.f32 %v2513_v60, %v2523_v33  ;;  %9074 = vmatmul.mubr.msk.f32.gmra.mrb[216].mxu1 %vm221_vm0, %v11914_v63  ;;  %10199 = vmatpush1.bf16.msra.mxu0 %v10198_v34  ;;  %v5118_v60 = vld [vmem:[%s10559_s19 + $0xb18] sm:$0xff] }
 0x1d2   : > { %v2591_v2 = vadd.f32 %v12196_v12, %v2565_v49  ;;  %v2573_v56 = vmax.f32 %v2545_v21, %v2559_v15  ;;  %v2558_v41 = vmax.f32 %v2412_v53, %v2424_v59  ;;  %4864 = vmatprep.mubr.f32.mxu1 %v10514_v0  ;;  %9659 = vmatprep.mubr.msk.f32.mxu0 %vm221_vm0, %v11888_v48  ;;  %v12479_v59 = vld [vmem:[%s14425_s1 + $0x8] sm:$0xff] }
 0x1d3   : > { %v2604_v55 = vmax.f32 %v2590_v4, 0.0  ;;  %v2571_v10 = vmax.f32 %v2543_v20, %v2557_v51  ;;  %v2566_v40 = vmax.f32 %v2538_v14, %v2552_v26  ;;  %v12374_v17 = vpop.f32.mrb[112].mxu0  ;;  %10201 = vmatprep.subr.bf16.mxu0 %v10200_v58  ;;  %v5104_v20 = vld [vmem:[%s10559_s19 + $0x4f8] sm:$0xff]  ;;  %v5096_v14 = vld [vmem:[%s10559_s19 + $0x1e0] sm:$0xff]  ;;  %v5117_v58 = vld [vmem:[%s10559_s19 + $0xb10] sm:$0xff]  ;;  %v10236_v33 = vpack.c.bf16 %v5119_v38, %v5112_v44 }
 0x1d4   : > { %v2605_v43 = vmax.f32 %v2591_v2, 0.0  ;;  %v2599_v16 = vadd.f32 %v12222_v30, %v2573_v56  ;;  %v2572_v48 = vmax.f32 %v2544_v13, %v2558_v41  ;;  %v12382_v11 = vpop.f32.mrb[112].mxu1  ;;  %v12384_v1 = vpop.f32.mrb[113].mxu0  ;;  %9660 = vmatmul.mubr.msk.f32.gmra.mrb[218].mxu0 %vm221_vm0, %v11901_v50  ;;  %v10220_v21 = vpack.c.bf16 %v5104_v20, %v5097_v47  ;;  %v5126_v26 = vld [vmem:[%s10559_s19 + $0xe30] sm:$0xff]  ;;  %v5133_v2 = vld [vmem:[%s10559_s19 + $0x1140] sm:$0xff] }
 0x1d5   : > { %2618 = vst [vmem:[%s11318_s22 + $0xc8] sm:$0xff] %v2604_v55  ;;  %v2597_v5 = vadd.f32 %v12222_v30, %v2571_v10  ;;  %v2592_v35 = vadd.f32 %v12196_v12, %v2566_v40  ;;  %v12393_v61 = vpop.f32.mrb[113].mxu1  ;;  %9075 = vmatmul.mubr.msk.f32.gmra.mrb[218].mxu1 %vm221_vm0, %v11941_v7  ;;  %9662 = vmatprep.mubr.msk.f32.mxu0 %vm221_vm0, %v11914_v63  ;;  %v5124_v40 = vld [vmem:[%s10559_s19 + $0xe20] sm:$0xff]  ;;  %v12500_v47 = vld [vmem:[%s14425_s1 + $0x10] sm:$0xff] }
 0x1d6   : > { %2619 = vst [vmem:[%s11318_s22 + $0xd0] sm:$0xff] %v2605_v43  ;;  %v2613_v39 = vmax.f32 %v2599_v16, 0.0  ;;  %v2598_v50 = vadd.f32 %v12222_v30, %v2572_v48  ;;  %4870 = vmatprep.mubr.f32.mxu1 %v10514_v0  ;;  %10203 = vmatpush1.bf16.msra.mxu0 %v10202_v9  ;;  %v10222_v34 = vpack.c.bf16 %v5103_v31, %v5096_v14  ;;  %v5125_v9 = vld [vmem:[%s10559_s19 + $0xe28] sm:$0xff]  ;;  %v5716_v16 = vld [vmem:[%s10559_s19 + $0x520] sm:$0xff] }
 0x1d7   : > { %v2611_v12 = vmax.f32 %v2597_v5, 0.0  ;;  %v2606_v13 = vmax.f32 %v2592_v35, 0.0  ;;  %v12402_v36 = vpop.f32.mrb[114].mxu0  ;;  %10205 = vmatprep.subr.bf16.mxu0 %v10204_v52  ;;  %v10226_v41 = vpack.c.bf16 %v5117_v58, %v5110_v45  ;;  %v10228_v10 = vpack.c.bf16 %v5132_v23, %v5125_v9  ;;  %v5131_v52 = vld [vmem:[%s10559_s19 + $0x1130] sm:$0xff]  ;;  %v5707_v20 = vld [vmem:[%s10559_s19 + $0x200] sm:$0xff] }
 0x1d8   : > { %2627 = vst [vmem:[%s11318_s22 + $0x3e8] sm:$0xff] %v2613_v39  ;;  %v2612_v63 = vmax.f32 %v2598_v50, 0.0  ;;  %v12405_v42 = vpop.f32.mrb[114].mxu1  ;;  %v12407_v53 = vpop.f32.mrb[115].mxu0  ;;  %9663 = vmatmul.mubr.msk.f32.gmra.mrb[220].mxu0 %vm221_vm0, %v11941_v7  ;;  %v10240_v43 = vpack.c.bf16 %v5133_v2, %v5126_v26  ;;  %v5714_v5 = vld [vmem:[%s10559_s19 + $0x510] sm:$0xff]  ;;  %v10230_v35 = vpack.c.bf16 %v5131_v52, %v5124_v40  ;;  %v12526_v45 = vld [vmem:[%s14425_s1 + $0x20] sm:$0xff] }
 0x1d9   : > { %2625 = vst [vmem:[%s11318_s22 + $0x3d8] sm:$0xff] %v2611_v12  ;;  %2620 = vst [vmem:[%s11318_s22 + $0xd8] sm:$0xff] %v2606_v13  ;;  %v12413_v30 = vpop.f32.mrb[115].mxu1  ;;  %9076 = vmatmul.mubr.msk.f32.gmra.mrb[220].mxu1 %vm221_vm0, %v11980_v29  ;;  %9665 = vmatprep.mubr.msk.f32.mxu0 %vm221_vm0, %v11980_v29  ;;  %v5111_v29 = vld [vmem:[%s10559_s19 + $0x808] sm:$0xff]  ;;  %v10244_v13 = vpack.c.bf16 %v5714_v5, %v5707_v20 }
 0x1da   : > { %2626 = vst [vmem:[%s11318_s22 + $0x3e0] sm:$0xff] %v2612_v63  ;;  %4876 = vmatprep.mubr.f32.mxu1 %v10514_v0  ;;  %10207 = vmatpush1.bf16.msra.mxu0 %v10206_v37  ;;  %v12513_v63 = vld [vmem:[%s14425_s1 + $0x18] sm:$0xff] }
 0x1db   : > { %v12423_v7 = vpop.f32.mrb[116].mxu0  ;;  %10221 = vmatprep.subr.bf16.mxu0 %v10220_v21 }
 0x1dc   : > { %v3146_v57 = vmax.f32 %v12374_v17, %v12423_v7  ;;  %v12427_v19 = vpop.f32.mrb[116].mxu1  ;;  %v12429_v3 = vpop.f32.mrb[117].mxu0  ;;  %9666 = vmatmul.mubr.msk.f32.gmra.mrb[222].mxu0 %vm221_vm0, %v12001_v32 }
 0x1dd   : > { %v3148_v18 = vmax.f32 %v12382_v11, %v12427_v19  ;;  %v3147_v62 = vmax.f32 %v12384_v1, %v12429_v3  ;;  %v12439_v46 = vpop.f32.mrb[117].mxu1  ;;  %9077 = vmatmul.mubr.msk.f32.gmra.mrb[222].mxu1 %vm221_vm0, %v12001_v32  ;;  %5222 = vmatprep.mubr.f32.mxu0 %v10514_v0  ;;  %v10224_v32 = vpack.c.bf16 %v5118_v60, %v5111_v29 }
 0x1de   : > { %v3149_v25 = vmax.f32 %v12393_v61, %v12439_v46  ;;  %5335 = vmatprep.mubr.f32.mxu1 %v10514_v0  ;;  %v12548_v61 = vpop.permute.xlu1 %3197 }
 0x1df   : > { %v12454_v6 = vpop.f32.mrb[118].mxu0 }
 0x1e0   : > { %v3153_v49 = vmax.f32 %v12402_v36, %v12454_v6  ;;  %v12460_v22 = vpop.f32.mrb[118].mxu1  ;;  %v12462_v15 = vpop.f32.mrb[119].mxu0  ;;  %9086 = vmatmul.mubr.msk.f32.vlgmr.msra.gmra.mrb[224].mxu0 %vm221_vm0, %v12447_v54 }
 0x1e1   : > { %v3155_v28 = vmax.f32 %v12405_v42, %v12460_v22  ;;  %v3154_v4 = vmax.f32 %v12407_v53, %v12462_v15  ;;  %v12472_v51 = vpop.f32.mrb[119].mxu1  ;;  %9094 = vmatmul.mubr.msk.f32.vlgmr.msra.gmra.mrb[224].mxu1 %vm221_vm0, %v12447_v54  ;;  %10223 = vmatpush1.bf16.msra.mxu0 %v10222_v34 }
 0x1e2   : > { %v3156_v56 = vmax.f32 %v12413_v30, %v12472_v51  ;;  %10235 = vmatpush3.bf16.msra.mxu1 %v12328_v27  ;;  %5228 = vmatprep.mubr.f32.mxu0 %v10514_v0  ;;  %v5709_v27 = vld [vmem:[%s10559_s19 + $0x210] sm:$0xff] }
 0x1e3   : > { %v2792_v55 = vpop.f32.mrb[120].mxu0  ;;  %5341 = vmatprep.mubr.f32.mxu1 %v10514_v0  ;;  %10225 = vmatprep.subr.bf16.mxu0 %v10224_v32  ;;  %v10256_v50 = vpack.c.bf16 %v5716_v16, %v5709_v27  ;;  %v12520_v32 = vpop.permute.xlu0 %3192  ;;  %v12592_v30 = vld [vmem:[%s14425_s1 + $0x30] sm:$0xff] }
 0x1e4   : > { %v2905_v8 = vpop.f32.mrb[120].mxu1  ;;  %v2794_v24 = vpop.f32.mrb[121].mxu0  ;;  %9087 = vmatmul.mubr.msk.f32.gmra.mrb[226].mxu0 %vm221_vm0, %v12479_v59  ;;  %10237 = vmatprep.subr.bf16.mxu1 %v10236_v33 }
 0x1e5   : > { %v2907_v48 = vpop.f32.mrb[121].mxu1  ;;  %9095 = vmatmul.mubr.msk.f32.gmra.mrb[226].mxu1 %vm221_vm0, %v12479_v59  ;;  %5234 = vmatprep.mubr.f32.mxu0 %v10514_v0 }
 0x1e6   : > { %5347 = vmatprep.mubr.f32.mxu1 %v10514_v0  ;;  %10227 = vmatpush1.bf16.msra.mxu0 %v10226_v41 }
 0x1e7   : > { %v2798_v39 = vpop.f32.mrb[122].mxu0  ;;  %10239 = vmatpush3.bf16.msra.mxu1 %v10236_v33  ;;  %10229 = vmatprep.subr.bf16.mxu0 %v10228_v10 }
 0x1e8   : > { %v2911_v37 = vpop.f32.mrb[122].mxu1  ;;  %v2800_v12 = vpop.f32.mrb[123].mxu0  ;;  %9088 = vmatmul.mubr.msk.f32.gmra.mrb[228].mxu0 %vm221_vm0, %v12500_v47  ;;  %10241 = vmatprep.subr.bf16.mxu1 %v10240_v43 }
 0x1e9   : > { %v2913_v21 = vpop.f32.mrb[123].mxu1  ;;  %9096 = vmatmul.mubr.msk.f32.gmra.mrb[228].mxu1 %vm221_vm0, %v12500_v47  ;;  %5240 = vmatprep.mubr.f32.mxu0 %v10514_v0 }
 0x1ea   : > { %5353 = vmatprep.mubr.f32.mxu1 %v10514_v0  ;;  %10231 = vmatpush1.bf16.msra.mxu0 %v10230_v35 }
 0x1eb   : > { %v2804_v14 = vpop.f32.mrb[124].mxu0  ;;  %10243 = vmatpush3.bf16.msra.mxu1 %v10240_v43  ;;  %10257 = vmatprep.subr.bf16.mxu0 %v10256_v50  ;;  %v12613_v50 = vld [vmem:[%s14425_s1 + $0x38] sm:$0xff] }
 0x1ec   : > { %v3160_v31 = vmax.f32 %v2792_v55, %v2804_v14  ;;  %v2917_v29 = vpop.f32.mrb[124].mxu1  ;;  %v2806_v60 = vpop.f32.mrb[125].mxu0  ;;  %9089 = vmatmul.mubr.msk.f32.gmra.mrb[230].mxu0 %vm221_vm0, %v12513_v63  ;;  %10245 = vmatprep.subr.bf16.mxu1 %v10244_v13  ;;  %v5715_v13 = vld [vmem:[%s10559_s19 + $0x518] sm:$0xff] }
 0x1ed   : > { %v3162_v34 = vmax.f32 %v2905_v8, %v2917_v29  ;;  %v3161_v44 = vmax.f32 %v2794_v24, %v2806_v60  ;;  %v2919_v38 = vpop.f32.mrb[125].mxu1  ;;  %9097 = vmatmul.mubr.msk.f32.gmra.mrb[230].mxu1 %vm221_vm0, %v12513_v63  ;;  %5246 = vmatprep.mubr.f32.mxu0 %v10514_v0  ;;  %v5706_v14 = vld [vmem:[%s10559_s19 + $0x1f8] sm:$0xff] }
 0x1ee   : > { %v3174_v58 = vmax.f32 %v3146_v57, %v3160_v31  ;;  %v3163_v33 = vmax.f32 %v2907_v48, %v2919_v38  ;;  %5359 = vmatprep.mubr.f32.mxu1 %v10514_v0  ;;  %v5713_v31 = vld [vmem:[%s10559_s19 + $0x508] sm:$0xff]  ;;  %v5728_v38 = vld [vmem:[%s10559_s19 + $0xb30] sm:$0xff] }
 0x1ef   : > { %v3176_v9 = vmax.f32 %v3148_v18, %v3162_v34  ;;  %v3175_v23 = vmax.f32 %v3147_v62, %v3161_v44  ;;  %v2810_v26 = vpop.f32.mrb[126].mxu0  ;;  %v12553_v62 = vld [vmem:[%s14425_s1 + $0x28] sm:$0xff]  ;;  %v5721_v44 = vld [vmem:[%s10559_s19 + $0x820] sm:$0xff] }
 0x1f0   : > { %v3177_v2 = vmax.f32 %v3149_v25, %v3163_v33  ;;  %v3200_v41 = vadd.f32 %v12520_v32, %v3174_v58  ;;  %v3167_v17 = vmax.f32 %v2798_v39, %v2810_v26  ;;  %v2923_v7 = vpop.f32.mrb[126].mxu1  ;;  %v2812_v57 = vpop.f32.mrb[127].mxu0  ;;  %9090 = vmatmul.mubr.msk.f32.gmra.mrb[232].mxu0 %vm221_vm0, %v12526_v45  ;;  %v5730_v26 = vld [vmem:[%s10559_s19 + $0xb40] sm:$0xff] }
 0x1f1   : > { %v3201_v11 = vadd.f32 %v12520_v32, %v3175_v23  ;;  %v3202_v19 = vadd.f32 %v12520_v32, %v3176_v9  ;;  %v3169_v18 = vmax.f32 %v2911_v37, %v2923_v7  ;;  %v3168_v1 = vmax.f32 %v2800_v12, %v2812_v57  ;;  %v2925_v3 = vpop.f32.mrb[127].mxu1  ;;  %9098 = vmatmul.mubr.msk.f32.gmra.mrb[232].mxu1 %vm221_vm0, %v12526_v45  ;;  %v5708_v12 = vld [vmem:[%s10559_s19 + $0x208] sm:$0xff]  ;;  %v5723_v23 = vld [vmem:[%s10559_s19 + $0x830] sm:$0xff]  ;;  %v5720_v7 = vld [vmem:[%s10559_s19 + $0x818] sm:$0xff] }
 0x1f2   : > { %v3203_v46 = vadd.f32 %v12520_v32, %v3177_v2  ;;  %v3214_v25 = vmax.f32 %v3200_v41, 0.0  ;;  %v3181_v55 = vmax.f32 %v3153_v49, %v3167_v17  ;;  %v3170_v10 = vmax.f32 %v2913_v21, %v2925_v3  ;;  %5252 = vmatprep.mubr.f32.mxu0 %v10514_v0  ;;  %5365 = vmatprep.mubr.f32.mxu1 %v10514_v0  ;;  %v5727_v57 = vld [vmem:[%s10559_s19 + $0xb28] sm:$0xff]  ;;  %v5742_v3 = vld [vmem:[%s10559_s19 + $0x1150] sm:$0xff] }
 0x1f3   : > { %v3215_v40 = vmax.f32 %v3201_v11, 0.0  ;;  %v3216_v52 = vmax.f32 %v3202_v19, 0.0  ;;  %v3183_v8 = vmax.f32 %v3155_v28, %v3169_v18  ;;  %v3182_v24 = vmax.f32 %v3154_v4, %v3168_v1  ;;  %v12567_v43 = vpop.f32.mrb[128].mxu0  ;;  %v5735_v11 = vld [vmem:[%s10559_s19 + $0xe40] sm:$0xff] }
 0x1f4   : > { %v3217_v36 = vmax.f32 %v3203_v46, 0.0  ;;  %3228 = vst [vmem:[%s11318_s22 + $0xe0] sm:$0xff] %v3214_v25  ;;  %v3184_v6 = vmax.f32 %v3156_v56, %v3170_v10  ;;  %v3207_v49 = vadd.f32 %v12548_v61, %v3181_v55  ;;  %v12574_v27 = vpop.f32.mrb[128].mxu1  ;;  %v12576_v16 = vpop.f32.mrb[129].mxu0  ;;  %9091 = vmatmul.mubr.msk.f32.gmra.mrb[234].mxu0 %vm221_vm0, %v12553_v62  ;;  %v10258_v9 = vpack.c.bf16 %v5715_v13, %v5708_v12  ;;  %v5722_v25 = vld [vmem:[%s10559_s19 + $0x828] sm:$0xff]  ;;  %v5729_v55 = vld [vmem:[%s10559_s19 + $0xb38] sm:$0xff] }
 0x1f5   : > { %3229 = vst [vmem:[%s11318_s22 + $0xe8] sm:$0xff] %v3215_v40  ;;  %3230 = vst [vmem:[%s11318_s22 + $0xf0] sm:$0xff] %v3216_v52  ;;  %v3208_v42 = vadd.f32 %v12548_v61, %v3182_v24  ;;  %v3209_v53 = vadd.f32 %v12548_v61, %v3183_v8  ;;  %v12584_v22 = vpop.f32.mrb[129].mxu1  ;;  %9099 = vmatmul.mubr.msk.f32.gmra.mrb[234].mxu1 %vm221_vm0, %v12553_v62  ;;  %5258 = vmatprep.mubr.f32.mxu0 %v10514_v0  ;;  %v5737_v8 = vld [vmem:[%s10559_s19 + $0xe50] sm:$0xff]  ;;  %v5744_v24 = vld [vmem:[%s10559_s19 + $0x1160] sm:$0xff] }
 0x1f6   : > { %3231 = vst [vmem:[%s11318_s22 + $0xf8] sm:$0xff] %v3217_v36  ;;  %v3210_v15 = vadd.f32 %v12548_v61, %v3184_v6  ;;  %v3221_v28 = vmax.f32 %v3207_v49, 0.0  ;;  %5371 = vmatprep.mubr.f32.mxu1 %v10514_v0  ;;  %v10246_v2 = vpack.c.bf16 %v5713_v31, %v5706_v14  ;;  %v10248_v17 = vpack.c.bf16 %v5728_v38, %v5721_v44  ;;  %v5743_v12 = vld [vmem:[%s10559_s19 + $0x1158] sm:$0xff] }
 0x1f7   : > { %v3222_v4 = vmax.f32 %v3208_v42, 0.0  ;;  %v3223_v51 = vmax.f32 %v3209_v53, 0.0  ;;  %v12597_v56 = vpop.f32.mrb[130].mxu0  ;;  %v10260_v46 = vpack.c.bf16 %v5730_v26, %v5723_v23  ;;  %v10250_v6 = vpack.c.bf16 %v5727_v57, %v5720_v7  ;;  %v5734_v53 = vld [vmem:[%s10559_s19 + $0xe38] sm:$0xff] }
 0x1f8   : > { %v3224_v48 = vmax.f32 %v3210_v15, 0.0  ;;  %3235 = vst [vmem:[%s11318_s22 + $0x3f0] sm:$0xff] %v3221_v28  ;;  %v9589_v20 = vpop.f32.mrb[130].mxu1  ;;  %v12600_v5 = vpop.f32.mrb[131].mxu0  ;;  %9092 = vmatmul.mubr.msk.f32.gmra.mrb[236].mxu0 %vm221_vm0, %v12592_v30  ;;  %v10252_v42 = vpack.c.bf16 %v5742_v3, %v5735_v11  ;;  %v10262_v15 = vpack.c.bf16 %v5729_v55, %v5722_v25  ;;  %v5711_v28 = vld [vmem:[%s10559_s19 + $0x220] sm:$0xff]  ;;  %v5719_v31 = vld [vmem:[%s10559_s19 + $0x538] sm:$0xff] }
 0x1f9   : > { %3236 = vst [vmem:[%s11318_s22 + $0x3f8] sm:$0xff] %v3222_v4  ;;  %3237 = vst [vmem:[%s11318_s22 + $0x400] sm:$0xff] %v3223_v51  ;;  %v3159_v35 = vmax.f32 %v12574_v27, %v9589_v20  ;;  %v3117_v39 = vpop.f32.mrb[131].mxu1  ;;  %9100 = vmatmul.mubr.msk.f32.gmra.mrb[236].mxu1 %vm221_vm0, %v12592_v30  ;;  %5264 = vmatprep.mubr.f32.mxu0 %v10514_v0  ;;  %v5718_v20 = vld [vmem:[%s10559_s19 + $0x530] sm:$0xff]  ;;  %v5717_v3 = vld [vmem:[%s10559_s19 + $0x528] sm:$0xff] }
 0x1fa   : > { %3238 = vst [vmem:[%s11318_s22 + $0x408] sm:$0xff] %v3224_v48  ;;  %v3152_v37 = vmax.f32 %v12584_v22, %v3117_v39  ;;  %5377 = vmatprep.mubr.f32.mxu1 %v10514_v0  ;;  %v5741_v22 = vld [vmem:[%s10559_s19 + $0x1148] sm:$0xff] }
 0x1fb   : > { %v12620_v21 = vpop.f32.mrb[132].mxu0  ;;  %v5736_v39 = vld [vmem:[%s10559_s19 + $0xe48] sm:$0xff]  ;;  %v10254_v44 = vpack.c.bf16 %v5741_v22, %v5734_v53 }
 0x1fc   : > { %v3150_v29 = vmax.f32 %v12567_v43, %v12620_v21  ;;  %v9592_v60 = vpop.f32.mrb[132].mxu1  ;;  %v12626_v34 = vpop.f32.mrb[133].mxu0  ;;  %9093 = vmatmul.mubr.msk.f32.gmra.mrb[238].mxu0 %vm221_vm0, %v12613_v50  ;;  %v10266_v23 = vpack.c.bf16 %v5743_v12, %v5736_v39  ;;  %v5746_v39 = vld [vmem:[%s10559_s19 + $0x1170] sm:$0xff] }
 0x1fd   : > { %v3151_v58 = vmax.f32 %v12576_v16, %v12626_v34  ;;  %v3127_v33 = vpop.f32.mrb[133].mxu1  ;;  %9101 = vmatmul.mubr.msk.f32.gmra.mrb[238].mxu1 %vm221_vm0, %v12613_v50  ;;  %5448 = vmatprep.mubr.f32.mxu0 %v10514_v0 }
 0x1fe   : > { %9680 = vmatprep.mubr.msk.f32.mxu1 %vm221_vm0, %v12447_v54 }
 0x1ff   : > { %v12641_v41 = vpop.f32.mrb[134].mxu0 }
 0x200   : > { %v3157_v19 = vmax.f32 %v12597_v56, %v12641_v41  ;;  %v9595_v18 = vpop.f32.mrb[134].mxu1  ;;  %v12648_v1 = vpop.f32.mrb[135].mxu0  ;;  %9102 = vmatmul.mubr.msk.f32.vlgmr.msra.gmra.mrb[240].mxu0 %vm221_vm0, %v12447_v54  ;;  %v5738_v41 = vld [vmem:[%s10559_s19 + $0xe58] sm:$0xff] }
 0x201   : > { %v3173_v10 = vmax.f32 %v9592_v60, %v9595_v18  ;;  %v3158_v40 = vmax.f32 %v12600_v5, %v12648_v1  ;;  %v3137_v52 = vpop.f32.mrb[135].mxu1  ;;  %9681 = vmatmul.mubr.msk.f32.vlgmr.msra.gmra.mrb[240].mxu1 %vm221_vm0, %v12479_v59  ;;  %10259 = vmatpush1.bf16.msra.mxu0 %v10258_v9  ;;  %v10268_v9 = vpack.c.bf16 %v5718_v20, %v5711_v28  ;;  %v5710_v18 = vld [vmem:[%s10559_s19 + $0x218] sm:$0xff] }
 0x202   : > { %v3166_v36 = vmax.f32 %v3127_v33, %v3137_v52  ;;  %10247 = vmatpush1.bf16.msra.mxu1 %v10246_v2  ;;  %5454 = vmatprep.mubr.f32.mxu0 %v10514_v0  ;;  %v5725_v52 = vld [vmem:[%s10559_s19 + $0x840] sm:$0xff]  ;;  %v10270_v53 = vpack.c.bf16 %v5717_v3, %v5710_v18  ;;  %v6330_v5 = vld [vmem:[%s10559_s19 + $0x558] sm:$0xff] }
 0x203   : > { %v3187_v49 = vmax.f32 %v3159_v35, %v3173_v10  ;;  %v12662_v27 = vpop.f32.mrb[136].mxu0  ;;  %9683 = vmatprep.mubr.msk.f32.mxu1 %vm221_vm0, %v12500_v47  ;;  %10249 = vmatprep.subr.bf16.mxu1 %v10248_v17  ;;  %v10264_v35 = vpack.c.bf16 %v5744_v24, %v5737_v8  ;;  %v5732_v8 = vld [vmem:[%s10559_s19 + $0xb50] sm:$0xff]  ;;  %v6259_v24 = vld [vmem:[%s14426_s2 + $0x8] sm:$0xff] }
 0x204   : > { %v3180_v4 = vmax.f32 %v3152_v37, %v3166_v36  ;;  %v12669_v51 = vpop.f32.mrb[136].mxu1  ;;  %v3020_v48 = vpop.f32.mrb[137].mxu0  ;;  %9103 = vmatmul.mubr.msk.f32.gmra.mrb[242].mxu0 %vm221_vm0, %v12479_v59  ;;  %10261 = vmatprep.subr.bf16.mxu0 %v10260_v46  ;;  %v5712_v37 = vld [vmem:[%s10559_s19 + $0x228] sm:$0xff]  ;;  %v6258_v46 = vld [vmem:[%s14426_s2] sm:$0xff]  ;;  %v10272_v28 = vpack.c.bf16 %v5732_v8, %v5725_v52 }
 0x205   : > { %v3213_v13 = vadd.f32 %v12548_v61, %v3187_v49  ;;  %v12677_v14 = vpop.f32.mrb[137].mxu1  ;;  %9684 = vmatmul.mubr.msk.f32.gmra.mrb[242].mxu1 %vm221_vm0, %v12513_v63  ;;  %5460 = vmatprep.mubr.f32.mxu0 %v10514_v0  ;;  %v12693_v7 = vpack.c.bf16 %v5719_v31, %v5712_v37 }
 0x206   : > { %v3206_v60 = vadd.f32 %v12520_v32, %v3180_v4  ;;  %9686 = vmatprep.mubr.msk.f32.mxu1 %vm221_vm0, %v12526_v45  ;;  %10251 = vmatpush1.bf16.msra.mxu1 %v10250_v6  ;;  %v5724_v4 = vld [vmem:[%s10559_s19 + $0x838] sm:$0xff] }
 0x207   : > { %v3227_v38 = vmax.f32 %v3213_v13, 0.0  ;;  %v12687_v33 = vpop.f32.mrb[138].mxu0  ;;  %10253 = vmatprep.subr.bf16.mxu1 %v10252_v42  ;;  %10263 = vmatpush1.bf16.msra.mxu0 %v10262_v15 }
 0x208   : > { %v3220_v26 = vmax.f32 %v3206_v60, 0.0  ;;  %v12689_v2 = vpop.f32.mrb[138].mxu1  ;;  %v3026_v17 = vpop.f32.mrb[139].mxu0  ;;  %9104 = vmatmul.mubr.msk.f32.gmra.mrb[244].mxu0 %vm221_vm0, %v12500_v47  ;;  %10265 = vmatprep.subr.bf16.mxu0 %v10264_v35  ;;  %v5739_v35 = vld [vmem:[%s10559_s19 + $0xe60] sm:$0xff] }
 0x209   : > { %3241 = vst [vmem:[%s11318_s22 + $0x420] sm:$0xff] %v3227_v38  ;;  %v12696_v57 = vpop.f32.mrb[139].mxu1  ;;  %9687 = vmatmul.mubr.msk.f32.gmra.mrb[244].mxu1 %vm221_vm0, %v12553_v62  ;;  %5466 = vmatprep.mubr.f32.mxu0 %v10514_v0  ;;  %v10276_v56 = vpack.c.bf16 %v5746_v39, %v5739_v35 }
 0x20a   : > { %3234 = vst [vmem:[%s11318_s22 + $0x110] sm:$0xff] %v3220_v26  ;;  %9689 = vmatprep.mubr.msk.f32.mxu1 %vm221_vm0, %v12592_v30  ;;  %10255 = vmatpush1.bf16.msra.mxu1 %v10254_v44  ;;  %v6323_v26 = vld [vmem:[%s10559_s19 + $0x248] sm:$0xff] }
 0x20b   : > { %v3030_v11 = vpop.f32.mrb[140].mxu0  ;;  %10269 = vmatprep.subr.bf16.mxu1 %v10268_v9  ;;  %10267 = vmatpush1.bf16.msra.mxu0 %v10266_v23 }
 0x20c   : > { %v3164_v25 = vmax.f32 %v12662_v27, %v3030_v11  ;;  %v12710_v55 = vpop.f32.mrb[140].mxu1  ;;  %v3032_v10 = vpop.f32.mrb[141].mxu0  ;;  %9105 = vmatmul.mubr.msk.f32.gmra.mrb[246].mxu0 %vm221_vm0, %v12513_v63  ;;  %10281 = vmatprep.subr.bf16.mxu0 %v12693_v7 }
 0x20d   : > { %v3760_v36 = vmax.f32 %v12669_v51, %v12710_v55  ;;  %v3165_v6 = vmax.f32 %v3020_v48, %v3032_v10  ;;  %v12722_v49 = vpop.f32.mrb[141].mxu1  ;;  %9690 = vmatmul.mubr.msk.f32.gmra.mrb[246].mxu1 %vm221_vm0, %v12613_v50  ;;  %5472 = vmatprep.mubr.f32.mxu0 %v10514_v0  ;;  %v5731_v48 = vld [vmem:[%s10559_s19 + $0xb48] sm:$0xff] }
 0x20e   : > { %v3178_v27 = vmax.f32 %v3150_v29, %v3164_v25  ;;  %v3761_v42 = vmax.f32 %v12677_v14, %v12722_v49  ;;  %5836 = vmatprep.mubr.f32.mxu1 %v10514_v0  ;;  %6262 = vperm.xlu0 %10496, %v6258_v46   ;;  %v10274_v31 = vpack.c.bf16 %v5731_v48, %v5724_v4  ;;  %v12808_v48 = vpop.permute.xlu0 %3806 }
 0x20f   : > { %v3179_v22 = vmax.f32 %v3151_v58, %v3165_v6  ;;  %v3036_v15 = vpop.f32.mrb[142].mxu0  ;;  %6267 = vperm.xlu1 %10497, %v6259_v24  }
 0x210   : > { %v3204_v43 = vadd.f32 %v12520_v32, %v3178_v27  ;;  %v3171_v21 = vmax.f32 %v12687_v33, %v3036_v15  ;;  %v12740_v29 = vpop.f32.mrb[142].mxu1  ;;  %v3038_v20 = vpop.f32.mrb[143].mxu0  ;;  %9106 = vmatmul.mubr.msk.f32.gmra.mrb[248].mxu0 %vm221_vm0, %v12526_v45  ;;  %v5726_v27 = vld [vmem:[%s10559_s19 + $0x848] sm:$0xff] }
 0x211   : > { %v3205_v16 = vadd.f32 %v12520_v32, %v3179_v22  ;;  %v3767_v34 = vmax.f32 %v12689_v2, %v12740_v29  ;;  %v3172_v58 = vmax.f32 %v3026_v17, %v3038_v20  ;;  %v12749_v12 = vpop.f32.mrb[143].mxu1  ;;  %9118 = vmatmul.mubr.msk.f32.vlgmr.msra.gmra.mrb[248].mxu1 %vm221_vm0, %v12447_v54  ;;  %5478 = vmatprep.mubr.f32.mxu0 %v10514_v0 }
 0x212   : > { %v3218_v13 = vmax.f32 %v3204_v43, 0.0  ;;  %v3185_v37 = vmax.f32 %v3157_v19, %v3171_v21  ;;  %v3768_v32 = vmax.f32 %v12696_v57, %v12749_v12  ;;  %10271 = vmatpush1.bf16.msra.mxu1 %v10270_v53  ;;  %5842 = vmatprep.mubr.f32.mxu1 %v10514_v0  ;;  %v5745_v19 = vld [vmem:[%s10559_s19 + $0x1168] sm:$0xff]  ;;  %v5733_v53 = vld [vmem:[%s10559_s19 + $0xb58] sm:$0xff] }
 0x213   : > { %v3219_v60 = vmax.f32 %v3205_v16, 0.0  ;;  %v3186_v44 = vmax.f32 %v3158_v40, %v3172_v58  ;;  %v12763_v38 = vpop.f32.mrb[144].mxu0  ;;  %10273 = vmatprep.subr.bf16.mxu1 %v10272_v28  ;;  %6876 = vperm.xlu0 %10496, %v6258_v46   ;;  %v10278_v11 = vpack.c.bf16 %v5745_v19, %v5738_v41  ;;  %v10304_v46 = vpack.c.bf16 %v6330_v5, %v6323_v26  ;;  %v6321_v26 = vld [vmem:[%s10559_s19 + $0x238] sm:$0xff]  ;;  %v6328_v5 = vld [vmem:[%s10559_s19 + $0x548] sm:$0xff] }
 0x214   : > { %3232 = vst [vmem:[%s11318_s22 + $0x100] sm:$0xff] %v3218_v13  ;;  %v3211_v33 = vadd.f32 %v12548_v61, %v3185_v37  ;;  %v3406_v9 = vpop.f32.mrb[144].mxu1  ;;  %v12769_v23 = vpop.f32.mrb[145].mxu0  ;;  %9107 = vmatmul.mubr.msk.f32.gmra.mrb[250].mxu0 %vm221_vm0, %v12553_v62  ;;  %6881 = vperm.xlu1 %10497, %v6259_v24   ;;  %v10284_v20 = vpack.c.bf16 %v5733_v53, %v5726_v27  ;;  %v5740_v13 = vld [vmem:[%s10559_s19 + $0xe68] sm:$0xff]  ;;  %v5747_v37 = vld [vmem:[%s10559_s19 + $0x1178] sm:$0xff] }
 0x215   : > { %3233 = vst [vmem:[%s11318_s22 + $0x108] sm:$0xff] %v3219_v60  ;;  %v3212_v1 = vadd.f32 %v12548_v61, %v3186_v44  ;;  %v3408_v40 = vpop.f32.mrb[145].mxu1  ;;  %9119 = vmatmul.mubr.msk.f32.gmra.mrb[250].mxu1 %vm221_vm0, %v12479_v59  ;;  %5484 = vmatprep.mubr.f32.mxu0 %v10514_v0  ;;  %v6337_v53 = vld [vmem:[%s10559_s19 + $0x868] sm:$0xff] }
 0x216   : > { %v3225_v17 = vmax.f32 %v3211_v33, 0.0  ;;  %5848 = vmatprep.mubr.f32.mxu1 %v10514_v0  ;;  %10275 = vmatpush1.bf16.msra.mxu1 %v10274_v31 }
 0x217   : > { %v3226_v18 = vmax.f32 %v3212_v1, 0.0  ;;  %v12781_v3 = vpop.f32.mrb[146].mxu0  ;;  %10277 = vmatprep.subr.bf16.mxu1 %v10276_v56 }
 0x218   : > { %3239 = vst [vmem:[%s11318_s22 + $0x410] sm:$0xff] %v3225_v17  ;;  %v3412_v61 = vpop.f32.mrb[146].mxu1  ;;  %v12784_v25 = vpop.f32.mrb[147].mxu0  ;;  %9108 = vmatmul.mubr.msk.f32.gmra.mrb[252].mxu0 %vm221_vm0, %v12592_v30 }
 0x219   : > { %3240 = vst [vmem:[%s11318_s22 + $0x418] sm:$0xff] %v3226_v18  ;;  %v3414_v10 = vpop.f32.mrb[147].mxu1  ;;  %9120 = vmatmul.mubr.msk.f32.gmra.mrb[252].mxu1 %vm221_vm0, %v12500_v47  ;;  %5490 = vmatprep.mubr.f32.mxu0 %v10514_v0 }
 0x21a   : > { %5854 = vmatprep.mubr.f32.mxu1 %v10514_v0  ;;  %10279 = vmatpush1.bf16.msra.mxu1 %v10278_v11 }
 0x21b   : > { %v12793_v52 = vpop.f32.mrb[148].mxu0  ;;  %10305 = vmatprep.subr.bf16.mxu1 %v10304_v46  ;;  %v6322_v46 = vld [vmem:[%s10559_s19 + $0x240] sm:$0xff] }
 0x21c   : > { %v3418_v8 = vpop.f32.mrb[148].mxu1  ;;  %v3762_v24 = vmax.f32 %v12763_v38, %v12793_v52  ;;  %v12797_v6 = vpop.f32.mrb[149].mxu0  ;;  %9109 = vmatmul.mubr.msk.f32.gmra.mrb[254].mxu0 %vm221_vm0, %v12613_v50 }
 0x21d   : > { %v3774_v22 = vmax.f32 %v3406_v9, %v3418_v8  ;;  %v3420_v15 = vpop.f32.mrb[149].mxu1  ;;  %v3763_v28 = vmax.f32 %v12769_v23, %v12797_v6  ;;  %9121 = vmatmul.mubr.msk.f32.gmra.mrb[254].mxu1 %vm221_vm0, %v12513_v63  ;;  %5949 = vmatprep.mubr.f32.mxu0 %v10514_v0 }
 0x21e   : > { %v3775_v4 = vmax.f32 %v3408_v40, %v3420_v15  ;;  %5860 = vmatprep.mubr.f32.mxu1 %v10514_v0 }
 0x21f   : > { %v3788_v43 = vmax.f32 %v3760_v36, %v3774_v22  ;;  %v12814_v21 = vpop.f32.mrb[150].mxu0  ;;  %v6344_v22 = vld [vmem:[%s10559_s19 + $0xb78] sm:$0xff] }
 0x220   : > { %v3789_v35 = vmax.f32 %v3761_v42, %v3775_v4  ;;  %v3424_v39 = vpop.f32.mrb[150].mxu1  ;;  %v3769_v16 = vmax.f32 %v12781_v3, %v12814_v21  ;;  %v12821_v58 = vpop.f32.mrb[151].mxu0  ;;  %9126 = vmatmul.mubr.msk.f32.vlgmr.msra.gmra.mrb[0].mxu0 %vm221_vm0, %v12447_v54  ;;  %v6350_v21 = vld [vmem:[%s10559_s19 + $0xe80] sm:$0xff] }
 0x221   : > { %v3814_v51 = vadd.f32 %v12808_v48, %v3788_v43  ;;  %v3781_v55 = vmax.f32 %v3412_v61, %v3424_v39  ;;  %v3426_v36 = vpop.f32.mrb[151].mxu1  ;;  %v3770_v31 = vmax.f32 %v12784_v25, %v12821_v58  ;;  %9122 = vmatmul.mubr.msk.f32.gmra.mrb[0].mxu1 %vm221_vm0, %v12526_v45  ;;  %10283 = vmatpush3.bf16.msra.mxu0 %v12693_v7  ;;  %v12834_v42 = vpop.permute.xlu1 %3811  ;;  %v6329_v61 = vld [vmem:[%s10559_s19 + $0x550] sm:$0xff] }
 0x222   : > { %v3815_v14 = vadd.f32 %v12808_v48, %v3789_v35  ;;  %v3782_v49 = vmax.f32 %v3414_v10, %v3426_v36  ;;  %5866 = vmatprep.mubr.f32.mxu1 %v10514_v0  ;;  %5955 = vmatprep.mubr.f32.mxu0 %v10514_v0  ;;  %v10288_v7 = vpack.c.bf16 %v5747_v37, %v5740_v13  ;;  %v6343_v36 = vld [vmem:[%s10559_s19 + $0xb70] sm:$0xff] }
 0x223   : > { %v3828_v60 = vmax.f32 %v3814_v51, 0.0  ;;  %v3795_v44 = vmax.f32 %v3767_v34, %v3781_v55  ;;  %v3519_v56 = vpop.f32.mrb[152].mxu0  ;;  %10285 = vmatprep.subr.bf16.mxu0 %v10284_v20  ;;  %v10306_v39 = vpack.c.bf16 %v6329_v61, %v6322_v46  ;;  %v10308_v51 = vpack.c.bf16 %v6344_v22, %v6337_v53  ;;  %v6336_v55 = vld [vmem:[%s10559_s19 + $0x860] sm:$0xff] }
 0x224   : > { %v3829_v41 = vmax.f32 %v3815_v14, 0.0  ;;  %v3796_v19 = vmax.f32 %v3768_v32, %v3782_v49  ;;  %v12844_v33 = vpop.f32.mrb[152].mxu1  ;;  %v3521_v9 = vpop.f32.mrb[153].mxu0  ;;  %9127 = vmatmul.mubr.msk.f32.gmra.mrb[2].mxu0 %vm221_vm0, %v12479_v59  ;;  %v10292_v32 = vpack.c.bf16 %v6328_v5, %v6321_v26 }
 0x225   : > { %3842 = vst [vmem:[%s11318_s22 + $0x118] sm:$0xff] %v3828_v60  ;;  %v3821_v2 = vadd.f32 %v12834_v42, %v3795_v44  ;;  %v12852_v29 = vpop.f32.mrb[153].mxu1  ;;  %9123 = vmatmul.mubr.msk.f32.gmra.mrb[2].mxu1 %vm221_vm0, %v12553_v62  ;;  %5961 = vmatprep.mubr.f32.mxu0 %v10514_v0  ;;  %v6358_v60 = vld [vmem:[%s10559_s19 + $0x1198] sm:$0xff] }
 0x226   : > { %3843 = vst [vmem:[%s11318_s22 + $0x120] sm:$0xff] %v3829_v41  ;;  %v3822_v57 = vadd.f32 %v12834_v42, %v3796_v19  ;;  %5872 = vmatprep.mubr.f32.mxu1 %v10514_v0  ;;  %10287 = vmatpush3.bf16.msra.mxu0 %v10284_v20  ;;  %v10310_v19 = vpack.c.bf16 %v6343_v36, %v6336_v55  ;;  %v6342_v55 = vld [vmem:[%s10559_s19 + $0xb68] sm:$0xff] }
 0x227   : > { %v3835_v34 = vmax.f32 %v3821_v2, 0.0  ;;  %v3525_v12 = vpop.f32.mrb[154].mxu0  ;;  %10289 = vmatprep.subr.bf16.mxu0 %v10288_v7 }
 0x228   : > { %v3836_v1 = vmax.f32 %v3822_v57, 0.0  ;;  %v12860_v40 = vpop.f32.mrb[154].mxu1  ;;  %v3527_v17 = vpop.f32.mrb[155].mxu0  ;;  %9128 = vmatmul.mubr.msk.f32.gmra.mrb[4].mxu0 %vm221_vm0, %v12500_v47 }
 0x229   : > { %3849 = vst [vmem:[%s11318_s22 + $0x428] sm:$0xff] %v3835_v34  ;;  %v12865_v11 = vpop.f32.mrb[155].mxu1  ;;  %9124 = vmatmul.mubr.msk.f32.gmra.mrb[4].mxu1 %vm221_vm0, %v12592_v30  ;;  %5967 = vmatprep.mubr.f32.mxu0 %v10514_v0 }
 0x22a   : > { %3850 = vst [vmem:[%s11318_s22 + $0x430] sm:$0xff] %v3836_v1  ;;  %5878 = vmatprep.mubr.f32.mxu1 %v10514_v0  ;;  %10291 = vmatpush3.bf16.msra.mxu0 %v10288_v7 }
 0x22b   : > { %v3531_v18 = vpop.f32.mrb[156].mxu0  ;;  %10293 = vmatprep.subr.bf16.mxu0 %v10292_v32  ;;  %v6333_v32 = vld [vmem:[%s10559_s19 + $0x570] sm:$0xff] }
 0x22c   : > { %v3776_v10 = vmax.f32 %v3519_v56, %v3531_v18  ;;  %v12874_v8 = vpop.f32.mrb[156].mxu1  ;;  %v3533_v27 = vpop.f32.mrb[157].mxu0  ;;  %9129 = vmatmul.mubr.msk.f32.gmra.mrb[6].mxu0 %vm221_vm0, %v12513_v63 }
 0x22d   : > { %v3764_v15 = vmax.f32 %v12844_v33, %v12874_v8  ;;  %v3777_v4 = vmax.f32 %v3521_v9, %v3533_v27  ;;  %v12882_v43 = vpop.f32.mrb[157].mxu1  ;;  %9125 = vmatmul.mubr.msk.f32.gmra.mrb[6].mxu1 %vm221_vm0, %v12613_v50  ;;  %5973 = vmatprep.mubr.f32.mxu0 %v10514_v0 }
 0x22e   : > { %v3790_v20 = vmax.f32 %v3762_v24, %v3776_v10  ;;  %v3765_v35 = vmax.f32 %v12852_v29, %v12882_v43  ;;  %6062 = vmatprep.mubr.f32.mxu1 %v10514_v0  ;;  %v6351_v24 = vld [vmem:[%s10559_s19 + $0xe88] sm:$0xff] }
 0x22f   : > { %v3791_v13 = vmax.f32 %v3763_v28, %v3777_v4  ;;  %v3537_v37 = vpop.f32.mrb[158].mxu0  ;;  %v10312_v3 = vpack.c.bf16 %v6358_v60, %v6351_v24  ;;  %v6320_v4 = vld [vmem:[%s10559_s19 + $0x230] sm:$0xff]  ;;  %v6341_v24 = vld [vmem:[%s10559_s19 + $0xb60] sm:$0xff] }
 0x230   : > { %v3816_v14 = vadd.f32 %v12808_v48, %v3790_v20  ;;  %v3783_v49 = vmax.f32 %v3525_v12, %v3537_v37  ;;  %v12899_v38 = vpop.f32.mrb[158].mxu1  ;;  %v3539_v52 = vpop.f32.mrb[159].mxu0  ;;  %9130 = vmatmul.mubr.msk.f32.gmra.mrb[8].mxu0 %vm221_vm0, %v12526_v45  ;;  %v6326_v12 = vld [vmem:[%s10559_s19 + $0x260] sm:$0xff] }
 0x231   : > { %v3817_v44 = vadd.f32 %v12808_v48, %v3791_v13  ;;  %v3771_v23 = vmax.f32 %v12860_v40, %v12899_v38  ;;  %v3784_v6 = vmax.f32 %v3527_v17, %v3539_v52  ;;  %v12908_v28 = vpop.f32.mrb[159].mxu1  ;;  %9134 = vmatmul.mubr.msk.f32.vlgmr.msra.gmra.mrb[8].mxu1 %vm221_vm0, %v12447_v54  ;;  %5979 = vmatprep.mubr.f32.mxu0 %v10514_v0  ;;  %v6327_v20 = vld [vmem:[%s10559_s19 + $0x540] sm:$0xff]  ;;  %v6334_v52 = vld [vmem:[%s10559_s19 + $0x850] sm:$0xff]  ;;  %v6325_v38 = vld [vmem:[%s10559_s19 + $0x258] sm:$0xff] }
 0x232   : > { %v3830_v56 = vmax.f32 %v3816_v14, 0.0  ;;  %v3797_v7 = vmax.f32 %v3769_v16, %v3783_v49  ;;  %v3772_v41 = vmax.f32 %v12865_v11, %v12908_v28  ;;  %10307 = vmatpush1.bf16.msra.mxu1 %v10306_v39  ;;  %6068 = vmatprep.mubr.f32.mxu1 %v10514_v0  ;;  %v6357_v16 = vld [vmem:[%s10559_s19 + $0x1190] sm:$0xff]  ;;  %v12940_v46 = vpack.c.bf16 %v6333_v32, %v6326_v12  ;;  %v6355_v32 = vld [vmem:[%s10559_s19 + $0x1180] sm:$0xff] }
 0x233   : > { %v3831_v9 = vmax.f32 %v3817_v44, 0.0  ;;  %v3798_v26 = vmax.f32 %v3770_v31, %v3784_v6  ;;  %v12922_v5 = vpop.f32.mrb[160].mxu0  ;;  %10309 = vmatprep.subr.bf16.mxu1 %v10308_v51  ;;  %v10314_v1 = vpack.c.bf16 %v6357_v16, %v6350_v21  ;;  %v6335_v51 = vld [vmem:[%s10559_s19 + $0x858] sm:$0xff]  ;;  %v10294_v49 = vpack.c.bf16 %v6327_v20, %v6320_v4  ;;  %v6348_v12 = vld [vmem:[%s10559_s19 + $0xe70] sm:$0xff]  ;;  %v6331_v4 = vld [vmem:[%s10559_s19 + $0x560] sm:$0xff] }
 0x234   : > { %3844 = vst [vmem:[%s11318_s22 + $0x128] sm:$0xff] %v3830_v56  ;;  %v3823_v2 = vadd.f32 %v12834_v42, %v3797_v7  ;;  %v3632_v57 = vpop.f32.mrb[160].mxu1  ;;  %v12928_v34 = vpop.f32.mrb[161].mxu0  ;;  %9131 = vmatmul.mubr.msk.f32.gmra.mrb[10].mxu0 %vm221_vm0, %v12553_v62  ;;  %v10296_v56 = vpack.c.bf16 %v6342_v55, %v6335_v51  ;;  %v10302_v28 = vpack.c.bf16 %v6355_v32, %v6348_v12 }
 0x235   : > { %3845 = vst [vmem:[%s11318_s22 + $0x130] sm:$0xff] %v3831_v9  ;;  %v3824_v25 = vadd.f32 %v12834_v42, %v3798_v26  ;;  %v3634_v58 = vpop.f32.mrb[161].mxu1  ;;  %9135 = vmatmul.mubr.msk.f32.gmra.mrb[10].mxu1 %vm221_vm0, %v12479_v59  ;;  %5985 = vmatprep.mubr.f32.mxu0 %v10514_v0  ;;  %v10298_v26 = vpack.c.bf16 %v6341_v24, %v6334_v52  ;;  %v6340_v52 = vld [vmem:[%s10559_s19 + $0x880] sm:$0xff]  ;;  %v6347_v24 = vld [vmem:[%s10559_s19 + $0xb90] sm:$0xff] }
 0x236   : > { %v3837_v31 = vmax.f32 %v3823_v2, 0.0  ;;  %6074 = vmatprep.mubr.f32.mxu1 %v10514_v0  ;;  %10311 = vmatpush1.bf16.msra.mxu1 %v10310_v19 }
 0x237   : > { %v3838_v17 = vmax.f32 %v3824_v25, 0.0  ;;  %v9613_v18 = vpop.f32.mrb[162].mxu0  ;;  %10313 = vmatprep.subr.bf16.mxu1 %v10312_v3  ;;  %v6356_v3 = vld [vmem:[%s10559_s19 + $0x1188] sm:$0xff] }
 0x238   : > { %3851 = vst [vmem:[%s11318_s22 + $0x438] sm:$0xff] %v3837_v31  ;;  %v3638_v61 = vpop.f32.mrb[162].mxu1  ;;  %v3773_v10 = vmax.f32 %v12922_v5, %v9613_v18  ;;  %v3731_v27 = vpop.f32.mrb[163].mxu0  ;;  %9132 = vmatmul.mubr.msk.f32.gmra.mrb[12].mxu0 %vm221_vm0, %v12592_v30  ;;  %v6349_v5 = vld [vmem:[%s10559_s19 + $0xe78] sm:$0xff] }
 0x239   : > { %3852 = vst [vmem:[%s11318_s22 + $0x440] sm:$0xff] %v3838_v17  ;;  %v3640_v53 = vpop.f32.mrb[163].mxu1  ;;  %v3766_v22 = vmax.f32 %v12928_v34, %v3731_v27  ;;  %9136 = vmatmul.mubr.msk.f32.gmra.mrb[12].mxu1 %vm221_vm0, %v12500_v47  ;;  %5991 = vmatprep.mubr.f32.mxu0 %v10514_v0  ;;  %v10300_v34 = vpack.c.bf16 %v6356_v3, %v6349_v5  ;;  %v6360_v5 = vld [vmem:[%s10559_s19 + $0x11a8] sm:$0xff] }
 0x23a   : > { %6080 = vmatprep.mubr.f32.mxu1 %v10514_v0  ;;  %10315 = vmatpush1.bf16.msra.mxu1 %v10314_v1 }
 0x23b   : > { %v9616_v39 = vpop.f32.mrb[164].mxu0  ;;  %10329 = vmatprep.subr.bf16.mxu1 %v12940_v46 }
 0x23c   : > { %v3644_v13 = vpop.f32.mrb[164].mxu1  ;;  %v3741_v37 = vpop.f32.mrb[165].mxu0  ;;  %9133 = vmatmul.mubr.msk.f32.gmra.mrb[14].mxu0 %vm221_vm0, %v12613_v50 }
 0x23d   : > { %v3778_v36 = vmax.f32 %v3632_v57, %v3644_v13  ;;  %v3646_v14 = vpop.f32.mrb[165].mxu1  ;;  %9137 = vmatmul.mubr.msk.f32.gmra.mrb[14].mxu1 %vm221_vm0, %v12513_v63  ;;  %9704 = vmatprep.mubr.msk.f32.mxu0 %vm221_vm0, %v12447_v54 }
 0x23e   : > { %v3779_v60 = vmax.f32 %v3634_v58, %v3646_v14  ;;  %6086 = vmatprep.mubr.f32.mxu1 %v10514_v0  ;;  %v13059_v14 = vld [vmem:[%s14425_s1] sm:$0xff] }
 0x23f   : > { %v3792_v44 = vmax.f32 %v3764_v15, %v3778_v36  ;;  %v9619_v6 = vpop.f32.mrb[166].mxu0 }
 0x240   : > { %v3793_v7 = vmax.f32 %v3765_v35, %v3779_v60  ;;  %v3650_v19 = vpop.f32.mrb[166].mxu1  ;;  %v3787_v9 = vmax.f32 %v9616_v39, %v9619_v6  ;;  %v3751_v54 = vpop.f32.mrb[167].mxu0  ;;  %9705 = vmatmul.mubr.msk.f32.vlgmr.msra.gmra.mrb[16].mxu0 %vm221_vm0, %v12479_v59  ;;  %v6338_v6 = vld [vmem:[%s10559_s19 + $0x870] sm:$0xff] }
 0x241   : > { %v3818_v21 = vadd.f32 %v12808_v48, %v3792_v44  ;;  %v3785_v16 = vmax.f32 %v3638_v61, %v3650_v19  ;;  %v3652_v33 = vpop.f32.mrb[167].mxu1  ;;  %v3780_v8 = vmax.f32 %v3741_v37, %v3751_v54  ;;  %9138 = vmatmul.mubr.msk.f32.gmra.mrb[16].mxu1 %vm221_vm0, %v12526_v45  ;;  %10295 = vmatpush1.bf16.msra.mxu0 %v10294_v49  ;;  %v6346_v37 = vld [vmem:[%s10559_s19 + $0xb88] sm:$0xff] }
 0x242   : > { %v3819_v29 = vadd.f32 %v12808_v48, %v3793_v7  ;;  %v3801_v15 = vmax.f32 %v3773_v10, %v3787_v9  ;;  %v3786_v43 = vmax.f32 %v3640_v53, %v3652_v33  ;;  %6092 = vmatprep.mubr.f32.mxu1 %v10514_v0  ;;  %9707 = vmatprep.mubr.msk.f32.mxu0 %vm221_vm0, %v12500_v47  ;;  %v13091_v33 = vld [vmem:[%s14425_s1 + $0x8] sm:$0xff] }
 0x243   : > { %v3832_v59 = vmax.f32 %v3818_v21, 0.0  ;;  %v3799_v35 = vmax.f32 %v3771_v23, %v3785_v16  ;;  %v3794_v2 = vmax.f32 %v3766_v22, %v3780_v8  ;;  %v12986_v57 = vpop.f32.mrb[168].mxu0  ;;  %10297 = vmatprep.subr.bf16.mxu0 %v10296_v56  ;;  %v6332_v23 = vld [vmem:[%s10559_s19 + $0x568] sm:$0xff]  ;;  %v6324_v22 = vld [vmem:[%s10559_s19 + $0x250] sm:$0xff]  ;;  %v6345_v56 = vld [vmem:[%s10559_s19 + $0xb80] sm:$0xff]  ;;  %v10332_v54 = vpack.c.bf16 %v6347_v24, %v6340_v52 }
 0x244   : > { %v3833_v25 = vmax.f32 %v3819_v29, 0.0  ;;  %v3827_v58 = vadd.f32 %v12834_v42, %v3801_v15  ;;  %v3800_v47 = vmax.f32 %v3772_v41, %v3786_v43  ;;  %v12994_v31 = vpop.f32.mrb[168].mxu1  ;;  %v12996_v40 = vpop.f32.mrb[169].mxu0  ;;  %9708 = vmatmul.mubr.msk.f32.gmra.mrb[18].mxu0 %vm221_vm0, %v12513_v63  ;;  %v10316_v10 = vpack.c.bf16 %v6332_v23, %v6325_v38  ;;  %v6354_v8 = vld [vmem:[%s10559_s19 + $0xea0] sm:$0xff]  ;;  %v6361_v29 = vld [vmem:[%s10559_s19 + $0x11b0] sm:$0xff] }
 0x245   : > { %3846 = vst [vmem:[%s11318_s22 + $0x138] sm:$0xff] %v3832_v59  ;;  %v3825_v1 = vadd.f32 %v12834_v42, %v3799_v35  ;;  %v3820_v17 = vadd.f32 %v12808_v48, %v3794_v2  ;;  %v13005_v18 = vpop.f32.mrb[169].mxu1  ;;  %9139 = vmatmul.mubr.msk.f32.gmra.mrb[18].mxu1 %vm221_vm0, %v12553_v62  ;;  %9710 = vmatprep.mubr.msk.f32.mxu0 %vm221_vm0, %v12526_v45  ;;  %v6352_v2 = vld [vmem:[%s10559_s19 + $0xe90] sm:$0xff] }
 0x246   : > { %3847 = vst [vmem:[%s11318_s22 + $0x140] sm:$0xff] %v3833_v25  ;;  %v3841_v11 = vmax.f32 %v3827_v58, 0.0  ;;  %v3826_v63 = vadd.f32 %v12834_v42, %v3800_v47  ;;  %6098 = vmatprep.mubr.f32.mxu1 %v10514_v0  ;;  %10299 = vmatpush1.bf16.msra.mxu0 %v10298_v26  ;;  %v10318_v49 = vpack.c.bf16 %v6331_v4, %v6324_v22  ;;  %v6353_v26 = vld [vmem:[%s10559_s19 + $0xe98] sm:$0xff]  ;;  %v6944_v58 = vld [vmem:[%s10559_s19 + $0x590] sm:$0xff] }
 0x247   : > { %v3839_v48 = vmax.f32 %v3825_v1, 0.0  ;;  %v3834_v41 = vmax.f32 %v3820_v17, 0.0  ;;  %v13014_v61 = vpop.f32.mrb[170].mxu0  ;;  %10301 = vmatprep.subr.bf16.mxu0 %v10300_v34  ;;  %v10322_v43 = vpack.c.bf16 %v6345_v56, %v6338_v6  ;;  %v10324_v35 = vpack.c.bf16 %v6360_v5, %v6353_v26  ;;  %v6359_v34 = vld [vmem:[%s10559_s19 + $0x11a0] sm:$0xff]  ;;  %v13112_v38 = vld [vmem:[%s14425_s1 + $0x10] sm:$0xff] }
 0x248   : > { %3855 = vst [vmem:[%s11318_s22 + $0x458] sm:$0xff] %v3841_v11  ;;  %v3840_v45 = vmax.f32 %v3826_v63, 0.0  ;;  %v13017_v27 = vpop.f32.mrb[170].mxu1  ;;  %v13019_v53 = vpop.f32.mrb[171].mxu0  ;;  %9711 = vmatmul.mubr.msk.f32.gmra.mrb[20].mxu0 %vm221_vm0, %v12553_v62  ;;  %v10336_v25 = vpack.c.bf16 %v6361_v29, %v6354_v8  ;;  %v6935_v23 = vld [vmem:[%s10559_s19 + $0x270] sm:$0xff]  ;;  %v6942_v1 = vld [vmem:[%s10559_s19 + $0x580] sm:$0xff]  ;;  %v10326_v17 = vpack.c.bf16 %v6359_v34, %v6352_v2 }
 0x249   : > { %3853 = vst [vmem:[%s11318_s22 + $0x448] sm:$0xff] %v3839_v48  ;;  %3848 = vst [vmem:[%s11318_s22 + $0x148] sm:$0xff] %v3834_v41  ;;  %v13025_v42 = vpop.f32.mrb[171].mxu1  ;;  %9140 = vmatmul.mubr.msk.f32.gmra.mrb[20].mxu1 %vm221_vm0, %v12592_v30  ;;  %9713 = vmatprep.mubr.msk.f32.mxu0 %vm221_vm0, %v12592_v30  ;;  %v6339_v30 = vld [vmem:[%s10559_s19 + $0x878] sm:$0xff]  ;;  %v10340_v41 = vpack.c.bf16 %v6942_v1, %v6935_v23  ;;  %v13138_v6 = vld [vmem:[%s14425_s1 + $0x20] sm:$0xff] }
 0x24a   : > { %3854 = vst [vmem:[%s11318_s22 + $0x450] sm:$0xff] %v3840_v45  ;;  %6104 = vmatprep.mubr.f32.mxu1 %v10514_v0  ;;  %10303 = vmatpush1.bf16.msra.mxu0 %v10302_v28  ;;  %v13125_v45 = vld [vmem:[%s14425_s1 + $0x18] sm:$0xff] }
 0x24b   : > { %v13035_v62 = vpop.f32.mrb[172].mxu0  ;;  %10317 = vmatprep.subr.bf16.mxu0 %v10316_v10 }
 0x24c   : > { %v4374_v20 = vmax.f32 %v12986_v57, %v13035_v62  ;;  %v13039_v39 = vpop.f32.mrb[172].mxu1  ;;  %v13041_v13 = vpop.f32.mrb[173].mxu0  ;;  %9714 = vmatmul.mubr.msk.f32.gmra.mrb[22].mxu0 %vm221_vm0, %v12613_v50 }
 0x24d   : > { %v4376_v51 = vmax.f32 %v12994_v31, %v13039_v39  ;;  %v4375_v55 = vmax.f32 %v12996_v40, %v13041_v13  ;;  %v13051_v36 = vpop.f32.mrb[173].mxu1  ;;  %9141 = vmatmul.mubr.msk.f32.gmra.mrb[22].mxu1 %vm221_vm0, %v12613_v50  ;;  %6450 = vmatprep.mubr.f32.mxu0 %v10514_v0  ;;  %v10320_v50 = vpack.c.bf16 %v6346_v37, %v6339_v30 }
 0x24e   : > { %v4377_v60 = vmax.f32 %v13005_v18, %v13051_v36  ;;  %6563 = vmatprep.mubr.f32.mxu1 %v10514_v0  ;;  %v13160_v18 = vpop.permute.xlu1 %4425 }
 0x24f   : > { %v13066_v44 = vpop.f32.mrb[174].mxu0 }
 0x250   : > { %v4381_v7 = vmax.f32 %v13014_v61, %v13066_v44  ;;  %v13072_v19 = vpop.f32.mrb[174].mxu1  ;;  %v13074_v9 = vpop.f32.mrb[175].mxu0  ;;  %9150 = vmatmul.mubr.msk.f32.vlgmr.msra.gmra.mrb[24].mxu0 %vm221_vm0, %v13059_v14 }
 0x251   : > { %v4383_v3 = vmax.f32 %v13017_v27, %v13072_v19  ;;  %v4382_v21 = vmax.f32 %v13019_v53, %v13074_v9  ;;  %v13084_v16 = vpop.f32.mrb[175].mxu1  ;;  %9158 = vmatmul.mubr.msk.f32.vlgmr.msra.gmra.mrb[24].mxu1 %vm221_vm0, %v13059_v14  ;;  %10319 = vmatpush1.bf16.msra.mxu0 %v10318_v49 }
 0x252   : > { %v4384_v15 = vmax.f32 %v13025_v42, %v13084_v16  ;;  %10331 = vmatpush3.bf16.msra.mxu1 %v12940_v46  ;;  %6456 = vmatprep.mubr.f32.mxu0 %v10514_v0  ;;  %v6937_v46 = vld [vmem:[%s10559_s19 + $0x280] sm:$0xff]  ;;  %v13204_v42 = vld [vmem:[%s14425_s1 + $0x30] sm:$0xff] }
 0x253   : > { %v4020_v59 = vpop.f32.mrb[176].mxu0  ;;  %6569 = vmatprep.mubr.f32.mxu1 %v10514_v0  ;;  %10321 = vmatprep.subr.bf16.mxu0 %v10320_v50  ;;  %v10352_v63 = vpack.c.bf16 %v6944_v58, %v6937_v46  ;;  %v13132_v50 = vpop.permute.xlu0 %4420 }
 0x254   : > { %v4133_v12 = vpop.f32.mrb[176].mxu1  ;;  %v4022_v32 = vpop.f32.mrb[177].mxu0  ;;  %9151 = vmatmul.mubr.msk.f32.gmra.mrb[26].mxu0 %vm221_vm0, %v13091_v33  ;;  %10333 = vmatprep.subr.bf16.mxu1 %v10332_v54 }
 0x255   : > { %v4135_v47 = vpop.f32.mrb[177].mxu1  ;;  %9159 = vmatmul.mubr.msk.f32.gmra.mrb[26].mxu1 %vm221_vm0, %v13091_v33  ;;  %6462 = vmatprep.mubr.f32.mxu0 %v10514_v0 }
 0x256   : > { %6575 = vmatprep.mubr.f32.mxu1 %v10514_v0  ;;  %10323 = vmatpush1.bf16.msra.mxu0 %v10322_v43 }
 0x257   : > { %v4026_v11 = vpop.f32.mrb[178].mxu0  ;;  %10335 = vmatpush3.bf16.msra.mxu1 %v10332_v54  ;;  %10325 = vmatprep.subr.bf16.mxu0 %v10324_v35 }
 0x258   : > { %v4139_v28 = vpop.f32.mrb[178].mxu1  ;;  %v4028_v48 = vpop.f32.mrb[179].mxu0  ;;  %9152 = vmatmul.mubr.msk.f32.gmra.mrb[28].mxu0 %vm221_vm0, %v13112_v38  ;;  %10337 = vmatprep.subr.bf16.mxu1 %v10336_v25 }
 0x259   : > { %v4141_v10 = vpop.f32.mrb[179].mxu1  ;;  %9160 = vmatmul.mubr.msk.f32.gmra.mrb[28].mxu1 %vm221_vm0, %v13112_v38  ;;  %6468 = vmatprep.mubr.f32.mxu0 %v10514_v0 }
 0x25a   : > { %6581 = vmatprep.mubr.f32.mxu1 %v10514_v0  ;;  %10327 = vmatpush1.bf16.msra.mxu0 %v10326_v17 }
 0x25b   : > { %v4032_v22 = vpop.f32.mrb[180].mxu0  ;;  %10339 = vmatpush3.bf16.msra.mxu1 %v10336_v25  ;;  %10353 = vmatprep.subr.bf16.mxu0 %v10352_v63  ;;  %v13225_v63 = vld [vmem:[%s14425_s1 + $0x38] sm:$0xff] }
 0x25c   : > { %v4388_v4 = vmax.f32 %v4020_v59, %v4032_v22  ;;  %v4145_v30 = vpop.f32.mrb[180].mxu1  ;;  %v4034_v37 = vpop.f32.mrb[181].mxu0  ;;  %9153 = vmatmul.mubr.msk.f32.gmra.mrb[30].mxu0 %vm221_vm0, %v13125_v45  ;;  %10341 = vmatprep.subr.bf16.mxu1 %v10340_v41  ;;  %v6943_v41 = vld [vmem:[%s10559_s19 + $0x588] sm:$0xff] }
 0x25d   : > { %v4390_v49 = vmax.f32 %v4133_v12, %v4145_v30  ;;  %v4389_v52 = vmax.f32 %v4022_v32, %v4034_v37  ;;  %v4147_v24 = vpop.f32.mrb[181].mxu1  ;;  %9161 = vmatmul.mubr.msk.f32.gmra.mrb[30].mxu1 %vm221_vm0, %v13125_v45  ;;  %6474 = vmatprep.mubr.f32.mxu0 %v10514_v0  ;;  %v6934_v22 = vld [vmem:[%s10559_s19 + $0x268] sm:$0xff] }
 0x25e   : > { %v4402_v56 = vmax.f32 %v4374_v20, %v4388_v4  ;;  %v4391_v54 = vmax.f32 %v4135_v47, %v4147_v24  ;;  %6587 = vmatprep.mubr.f32.mxu1 %v10514_v0  ;;  %v6941_v4 = vld [vmem:[%s10559_s19 + $0x578] sm:$0xff]  ;;  %v6956_v24 = vld [vmem:[%s10559_s19 + $0xba0] sm:$0xff] }
 0x25f   : > { %v4404_v26 = vmax.f32 %v4376_v51, %v4390_v49  ;;  %v4403_v5 = vmax.f32 %v4375_v55, %v4389_v52  ;;  %v4038_v8 = vpop.f32.mrb[182].mxu0  ;;  %v13165_v55 = vld [vmem:[%s14425_s1 + $0x28] sm:$0xff]  ;;  %v6949_v52 = vld [vmem:[%s10559_s19 + $0x890] sm:$0xff] }
 0x260   : > { %v4405_v29 = vmax.f32 %v4377_v60, %v4391_v54  ;;  %v4428_v43 = vadd.f32 %v13132_v50, %v4402_v56  ;;  %v4395_v57 = vmax.f32 %v4026_v11, %v4038_v8  ;;  %v4151_v62 = vpop.f32.mrb[182].mxu1  ;;  %v4040_v20 = vpop.f32.mrb[183].mxu0  ;;  %9154 = vmatmul.mubr.msk.f32.gmra.mrb[32].mxu0 %vm221_vm0, %v13138_v6  ;;  %v6958_v8 = vld [vmem:[%s10559_s19 + $0xbb0] sm:$0xff] }
 0x261   : > { %v4429_v31 = vadd.f32 %v13132_v50, %v4403_v5  ;;  %v4430_v39 = vadd.f32 %v13132_v50, %v4404_v26  ;;  %v4397_v51 = vmax.f32 %v4139_v28, %v4151_v62  ;;  %v4396_v40 = vmax.f32 %v4028_v48, %v4040_v20  ;;  %v4153_v13 = vpop.f32.mrb[183].mxu1  ;;  %9162 = vmatmul.mubr.msk.f32.gmra.mrb[32].mxu1 %vm221_vm0, %v13138_v6  ;;  %v6936_v48 = vld [vmem:[%s10559_s19 + $0x278] sm:$0xff]  ;;  %v6951_v5 = vld [vmem:[%s10559_s19 + $0x8a0] sm:$0xff]  ;;  %v6948_v62 = vld [vmem:[%s10559_s19 + $0x888] sm:$0xff] }
 0x262   : > { %v4431_v36 = vadd.f32 %v13132_v50, %v4405_v29  ;;  %v4442_v60 = vmax.f32 %v4428_v43, 0.0  ;;  %v4409_v59 = vmax.f32 %v4381_v7, %v4395_v57  ;;  %v4398_v35 = vmax.f32 %v4141_v10, %v4153_v13  ;;  %6480 = vmatprep.mubr.f32.mxu0 %v10514_v0  ;;  %6593 = vmatprep.mubr.f32.mxu1 %v10514_v0  ;;  %v6955_v20 = vld [vmem:[%s10559_s19 + $0xb98] sm:$0xff]  ;;  %v6970_v13 = vld [vmem:[%s10559_s19 + $0x11c0] sm:$0xff] }
 0x263   : > { %v4443_v2 = vmax.f32 %v4429_v31, 0.0  ;;  %v4444_v34 = vmax.f32 %v4430_v39, 0.0  ;;  %v4411_v12 = vmax.f32 %v4383_v3, %v4397_v51  ;;  %v4410_v32 = vmax.f32 %v4382_v21, %v4396_v40  ;;  %v13179_v25 = vpop.f32.mrb[184].mxu0  ;;  %v6963_v31 = vld [vmem:[%s10559_s19 + $0xeb0] sm:$0xff] }
 0x264   : > { %v4445_v61 = vmax.f32 %v4431_v36, 0.0  ;;  %4456 = vst [vmem:[%s11318_s22 + $0x150] sm:$0xff] %v4442_v60  ;;  %v4412_v44 = vmax.f32 %v4384_v15, %v4398_v35  ;;  %v4435_v7 = vadd.f32 %v13160_v18, %v4409_v59  ;;  %v13186_v46 = vpop.f32.mrb[184].mxu1  ;;  %v13188_v58 = vpop.f32.mrb[185].mxu0  ;;  %9155 = vmatmul.mubr.msk.f32.gmra.mrb[34].mxu0 %vm221_vm0, %v13165_v55  ;;  %v10354_v26 = vpack.c.bf16 %v6943_v41, %v6936_v48  ;;  %v6950_v60 = vld [vmem:[%s10559_s19 + $0x898] sm:$0xff]  ;;  %v6957_v59 = vld [vmem:[%s10559_s19 + $0xba8] sm:$0xff] }
 0x265   : > { %4457 = vst [vmem:[%s11318_s22 + $0x158] sm:$0xff] %v4443_v2  ;;  %4458 = vst [vmem:[%s11318_s22 + $0x160] sm:$0xff] %v4444_v34  ;;  %v4436_v27 = vadd.f32 %v13160_v18, %v4410_v32  ;;  %v4437_v53 = vadd.f32 %v13160_v18, %v4411_v12  ;;  %v13196_v19 = vpop.f32.mrb[185].mxu1  ;;  %9163 = vmatmul.mubr.msk.f32.gmra.mrb[34].mxu1 %vm221_vm0, %v13165_v55  ;;  %6486 = vmatprep.mubr.f32.mxu0 %v10514_v0  ;;  %v6965_v12 = vld [vmem:[%s10559_s19 + $0xec0] sm:$0xff]  ;;  %v6972_v32 = vld [vmem:[%s10559_s19 + $0x11d0] sm:$0xff] }
 0x266   : > { %4459 = vst [vmem:[%s11318_s22 + $0x168] sm:$0xff] %v4445_v61  ;;  %v4438_v9 = vadd.f32 %v13160_v18, %v4412_v44  ;;  %v4449_v3 = vmax.f32 %v4435_v7, 0.0  ;;  %6599 = vmatprep.mubr.f32.mxu1 %v10514_v0  ;;  %v10342_v29 = vpack.c.bf16 %v6941_v4, %v6934_v22  ;;  %v10344_v57 = vpack.c.bf16 %v6956_v24, %v6949_v52  ;;  %v6971_v48 = vld [vmem:[%s10559_s19 + $0x11c8] sm:$0xff] }
 0x267   : > { %v4450_v21 = vmax.f32 %v4436_v27, 0.0  ;;  %v4451_v16 = vmax.f32 %v4437_v53, 0.0  ;;  %v13209_v15 = vpop.f32.mrb[186].mxu0  ;;  %v10356_v36 = vpack.c.bf16 %v6958_v8, %v6951_v5  ;;  %v10346_v44 = vpack.c.bf16 %v6955_v20, %v6948_v62  ;;  %v6962_v53 = vld [vmem:[%s10559_s19 + $0xea8] sm:$0xff] }
 0x268   : > { %v4452_v47 = vmax.f32 %v4438_v9, 0.0  ;;  %4463 = vst [vmem:[%s11318_s22 + $0x460] sm:$0xff] %v4449_v3  ;;  %v9637_v23 = vpop.f32.mrb[186].mxu1  ;;  %v13212_v1 = vpop.f32.mrb[187].mxu0  ;;  %9156 = vmatmul.mubr.msk.f32.gmra.mrb[36].mxu0 %vm221_vm0, %v13204_v42  ;;  %v10348_v27 = vpack.c.bf16 %v6970_v13, %v6963_v31  ;;  %v10358_v9 = vpack.c.bf16 %v6957_v59, %v6950_v60  ;;  %v6939_v3 = vld [vmem:[%s10559_s19 + $0x290] sm:$0xff]  ;;  %v6947_v4 = vld [vmem:[%s10559_s19 + $0x5a8] sm:$0xff] }
 0x269   : > { %4464 = vst [vmem:[%s11318_s22 + $0x468] sm:$0xff] %v4450_v21  ;;  %4465 = vst [vmem:[%s11318_s22 + $0x470] sm:$0xff] %v4451_v16  ;;  %v4387_v17 = vmax.f32 %v13186_v46, %v9637_v23  ;;  %v4345_v11 = vpop.f32.mrb[187].mxu1  ;;  %9164 = vmatmul.mubr.msk.f32.gmra.mrb[36].mxu1 %vm221_vm0, %v13204_v42  ;;  %6492 = vmatprep.mubr.f32.mxu0 %v10514_v0  ;;  %v6946_v23 = vld [vmem:[%s10559_s19 + $0x5a0] sm:$0xff]  ;;  %v6945_v13 = vld [vmem:[%s10559_s19 + $0x598] sm:$0xff] }
 0x26a   : > { %4466 = vst [vmem:[%s11318_s22 + $0x478] sm:$0xff] %v4452_v47  ;;  %v4380_v28 = vmax.f32 %v13196_v19, %v4345_v11  ;;  %6605 = vmatprep.mubr.f32.mxu1 %v10514_v0  ;;  %v6969_v19 = vld [vmem:[%s10559_s19 + $0x11b8] sm:$0xff] }
 0x26b   : > { %v13232_v10 = vpop.f32.mrb[188].mxu0  ;;  %v6964_v11 = vld [vmem:[%s10559_s19 + $0xeb8] sm:$0xff]  ;;  %v10350_v52 = vpack.c.bf16 %v6969_v19, %v6962_v53 }
 0x26c   : > { %v4378_v30 = vmax.f32 %v13179_v25, %v13232_v10  ;;  %v9640_v37 = vpop.f32.mrb[188].mxu1  ;;  %v13238_v49 = vpop.f32.mrb[189].mxu0  ;;  %9157 = vmatmul.mubr.msk.f32.gmra.mrb[38].mxu0 %vm221_vm0, %v13225_v63  ;;  %v10362_v5 = vpack.c.bf16 %v6971_v48, %v6964_v11  ;;  %v6974_v11 = vld [vmem:[%s10559_s19 + $0x11e0] sm:$0xff] }
 0x26d   : > { %v4379_v56 = vmax.f32 %v13188_v58, %v13238_v49  ;;  %v4355_v54 = vpop.f32.mrb[189].mxu1  ;;  %9165 = vmatmul.mubr.msk.f32.gmra.mrb[38].mxu1 %vm221_vm0, %v13225_v63  ;;  %6676 = vmatprep.mubr.f32.mxu0 %v10514_v0 }
 0x26e   : > { %9728 = vmatprep.mubr.msk.f32.mxu1 %vm221_vm0, %v13059_v14 }
 0x26f   : > { %v13253_v43 = vpop.f32.mrb[190].mxu0 }
 0x270   : > { %v4385_v39 = vmax.f32 %v13209_v15, %v13253_v43  ;;  %v9643_v51 = vpop.f32.mrb[190].mxu1  ;;  %v13260_v40 = vpop.f32.mrb[191].mxu0  ;;  %9166 = vmatmul.mubr.msk.f32.vlgmr.msra.gmra.mrb[40].mxu0 %vm221_vm0, %v13059_v14  ;;  %v6966_v43 = vld [vmem:[%s10559_s19 + $0xec8] sm:$0xff] }
 0x271   : > { %v4401_v35 = vmax.f32 %v9640_v37, %v9643_v51  ;;  %v4386_v2 = vmax.f32 %v13212_v1, %v13260_v40  ;;  %v4365_v34 = vpop.f32.mrb[191].mxu1  ;;  %9729 = vmatmul.mubr.msk.f32.vlgmr.msra.gmra.mrb[40].mxu1 %vm221_vm0, %v13091_v33  ;;  %10355 = vmatpush1.bf16.msra.mxu0 %v10354_v26  ;;  %v10364_v26 = vpack.c.bf16 %v6946_v23, %v6939_v3  ;;  %v6938_v51 = vld [vmem:[%s10559_s19 + $0x288] sm:$0xff]  ;;  %v7551_v1 = vld [vmem:[%s10559_s19 + $0x2b8] sm:$0xff] }
 0x272   : > { %v4394_v61 = vmax.f32 %v4355_v54, %v4365_v34  ;;  %10343 = vmatpush1.bf16.msra.mxu1 %v10342_v29  ;;  %6682 = vmatprep.mubr.f32.mxu0 %v10514_v0  ;;  %v6953_v34 = vld [vmem:[%s10559_s19 + $0x8b0] sm:$0xff]  ;;  %v10366_v53 = vpack.c.bf16 %v6945_v13, %v6938_v51  ;;  %v7558_v40 = vld [vmem:[%s10559_s19 + $0x5c8] sm:$0xff] }
 0x273   : > { %v4415_v7 = vmax.f32 %v4387_v17, %v4401_v35  ;;  %v13274_v46 = vpop.f32.mrb[192].mxu0  ;;  %9731 = vmatprep.mubr.msk.f32.mxu1 %vm221_vm0, %v13112_v38  ;;  %10345 = vmatprep.subr.bf16.mxu1 %v10344_v57  ;;  %v10360_v17 = vpack.c.bf16 %v6972_v32, %v6965_v12  ;;  %v6960_v12 = vld [vmem:[%s10559_s19 + $0xbc0] sm:$0xff]  ;;  %v13334_v32 = vld [vmem:[%s14426_s2 + $0x8] sm:$0xff] }
 0x274   : > { %v4408_v21 = vmax.f32 %v4380_v28, %v4394_v61  ;;  %v13281_v16 = vpop.f32.mrb[192].mxu1  ;;  %v4248_v47 = vpop.f32.mrb[193].mxu0  ;;  %9167 = vmatmul.mubr.msk.f32.gmra.mrb[42].mxu0 %vm221_vm0, %v13091_v33  ;;  %10357 = vmatprep.subr.bf16.mxu0 %v10356_v36  ;;  %v6940_v28 = vld [vmem:[%s10559_s19 + $0x298] sm:$0xff]  ;;  %v13321_v36 = vld [vmem:[%s14426_s2] sm:$0xff]  ;;  %v10368_v3 = vpack.c.bf16 %v6960_v12, %v6953_v34 }
 0x275   : > { %v4441_v41 = vadd.f32 %v13160_v18, %v4415_v7  ;;  %v13289_v22 = vpop.f32.mrb[193].mxu1  ;;  %9732 = vmatmul.mubr.msk.f32.gmra.mrb[42].mxu1 %vm221_vm0, %v13125_v45  ;;  %6688 = vmatprep.mubr.f32.mxu0 %v10514_v0  ;;  %v13305_v62 = vpack.c.bf16 %v6947_v4, %v6940_v28 }
 0x276   : > { %v4434_v37 = vadd.f32 %v13132_v50, %v4408_v21  ;;  %9734 = vmatprep.mubr.msk.f32.mxu1 %vm221_vm0, %v13138_v6  ;;  %10347 = vmatpush1.bf16.msra.mxu1 %v10346_v44  ;;  %v6952_v21 = vld [vmem:[%s10559_s19 + $0x8a8] sm:$0xff] }
 0x277   : > { %v4455_v24 = vmax.f32 %v4441_v41, 0.0  ;;  %v13299_v54 = vpop.f32.mrb[194].mxu0  ;;  %10349 = vmatprep.subr.bf16.mxu1 %v10348_v27  ;;  %10359 = vmatpush1.bf16.msra.mxu0 %v10358_v9 }
 0x278   : > { %v4448_v8 = vmax.f32 %v4434_v37, 0.0  ;;  %v13301_v29 = vpop.f32.mrb[194].mxu1  ;;  %v4254_v57 = vpop.f32.mrb[195].mxu0  ;;  %9168 = vmatmul.mubr.msk.f32.gmra.mrb[44].mxu0 %vm221_vm0, %v13112_v38  ;;  %10361 = vmatprep.subr.bf16.mxu0 %v10360_v17  ;;  %v6967_v17 = vld [vmem:[%s10559_s19 + $0xed0] sm:$0xff] }
 0x279   : > { %4469 = vst [vmem:[%s11318_s22 + $0x490] sm:$0xff] %v4455_v24  ;;  %v13308_v20 = vpop.f32.mrb[195].mxu1  ;;  %9735 = vmatmul.mubr.msk.f32.gmra.mrb[44].mxu1 %vm221_vm0, %v13165_v55  ;;  %6694 = vmatprep.mubr.f32.mxu0 %v10514_v0  ;;  %v10372_v15 = vpack.c.bf16 %v6974_v11, %v6967_v17 }
 0x27a   : > { %4462 = vst [vmem:[%s11318_s22 + $0x180] sm:$0xff] %v4448_v8  ;;  %9737 = vmatprep.mubr.msk.f32.mxu1 %vm221_vm0, %v13204_v42  ;;  %10351 = vmatpush1.bf16.msra.mxu1 %v10350_v52 }
 0x27b   : > { %v4258_v31 = vpop.f32.mrb[196].mxu0  ;;  %10365 = vmatprep.subr.bf16.mxu1 %v10364_v26  ;;  %10363 = vmatpush1.bf16.msra.mxu0 %v10362_v5 }
 0x27c   : > { %v4392_v60 = vmax.f32 %v13274_v46, %v4258_v31  ;;  %v13324_v59 = vpop.f32.mrb[196].mxu1  ;;  %v4260_v35 = vpop.f32.mrb[197].mxu0  ;;  %9169 = vmatmul.mubr.msk.f32.gmra.mrb[46].mxu0 %vm221_vm0, %v13125_v45  ;;  %10377 = vmatprep.subr.bf16.mxu0 %v13305_v62 }
 0x27d   : > { %v4988_v61 = vmax.f32 %v13281_v16, %v13324_v59  ;;  %v4393_v44 = vmax.f32 %v4248_v47, %v4260_v35  ;;  %v13338_v7 = vpop.f32.mrb[197].mxu1  ;;  %9738 = vmatmul.mubr.msk.f32.gmra.mrb[46].mxu1 %vm221_vm0, %v13225_v63  ;;  %6700 = vmatprep.mubr.f32.mxu0 %v10514_v0  ;;  %v6959_v47 = vld [vmem:[%s10559_s19 + $0xbb8] sm:$0xff] }
 0x27e   : > { %v4406_v46 = vmax.f32 %v4378_v30, %v4392_v60  ;;  %v4989_v27 = vmax.f32 %v13289_v22, %v13338_v7  ;;  %7064 = vmatprep.mubr.f32.mxu1 %v10514_v0  ;;  %7490 = vperm.xlu0 %10496, %v13321_v36   ;;  %v10370_v4 = vpack.c.bf16 %v6959_v47, %v6952_v21  ;;  %v13430_v47 = vpop.permute.xlu0 %5034 }
 0x27f   : > { %v4407_v19 = vmax.f32 %v4379_v56, %v4393_v44  ;;  %v4264_v9 = vpop.f32.mrb[198].mxu0  ;;  %7495 = vperm.xlu1 %10497, %v13334_v32   ;;  %v10400_v60 = vpack.c.bf16 %v7558_v40, %v7551_v1  ;;  %v7549_v1 = vld [vmem:[%s10559_s19 + $0x2a8] sm:$0xff]  ;;  %v7556_v40 = vld [vmem:[%s10559_s19 + $0x5b8] sm:$0xff] }
 0x280   : > { %v4432_v25 = vadd.f32 %v13132_v50, %v4406_v46  ;;  %v4399_v10 = vmax.f32 %v13299_v54, %v4264_v9  ;;  %v13358_v30 = vpop.f32.mrb[198].mxu1  ;;  %v4266_v23 = vpop.f32.mrb[199].mxu0  ;;  %9170 = vmatmul.mubr.msk.f32.gmra.mrb[48].mxu0 %vm221_vm0, %v13138_v6 }
 0x281   : > { %v4433_v58 = vadd.f32 %v13132_v50, %v4407_v19  ;;  %v4995_v49 = vmax.f32 %v13301_v29, %v13358_v30  ;;  %v4400_v56 = vmax.f32 %v4254_v57, %v4266_v23  ;;  %v13367_v48 = vpop.f32.mrb[199].mxu1  ;;  %9182 = vmatmul.mubr.msk.f32.vlgmr.msra.gmra.mrb[48].mxu1 %vm221_vm0, %v13059_v14  ;;  %6706 = vmatprep.mubr.f32.mxu0 %v10514_v0 }
 0x282   : > { %v4446_v41 = vmax.f32 %v4432_v25, 0.0  ;;  %v4413_v28 = vmax.f32 %v4385_v39, %v4399_v10  ;;  %v4996_v50 = vmax.f32 %v13308_v20, %v13367_v48  ;;  %10367 = vmatpush1.bf16.msra.mxu1 %v10366_v53  ;;  %7070 = vmatprep.mubr.f32.mxu1 %v10514_v0  ;;  %v6973_v39 = vld [vmem:[%s10559_s19 + $0x11d8] sm:$0xff]  ;;  %v6961_v53 = vld [vmem:[%s10559_s19 + $0xbc8] sm:$0xff] }
 0x283   : > { %v4447_v37 = vmax.f32 %v4433_v58, 0.0  ;;  %v4414_v52 = vmax.f32 %v4386_v2, %v4400_v56  ;;  %v13381_v24 = vpop.f32.mrb[200].mxu0  ;;  %10369 = vmatprep.subr.bf16.mxu1 %v10368_v3  ;;  %8104 = vperm.xlu0 %10496, %v13321_v36   ;;  %v10374_v31 = vpack.c.bf16 %v6973_v39, %v6966_v43 }
 0x284   : > { %4460 = vst [vmem:[%s11318_s22 + $0x170] sm:$0xff] %v4446_v41  ;;  %v4439_v54 = vadd.f32 %v13160_v18, %v4413_v28  ;;  %v4634_v26 = vpop.f32.mrb[200].mxu1  ;;  %v13388_v5 = vpop.f32.mrb[201].mxu0  ;;  %9171 = vmatmul.mubr.msk.f32.gmra.mrb[50].mxu0 %vm221_vm0, %v13165_v55  ;;  %8109 = vperm.xlu1 %10497, %v13334_v32   ;;  %v6968_v41 = vld [vmem:[%s10559_s19 + $0xed8] sm:$0xff]  ;;  %v6975_v28 = vld [vmem:[%s10559_s19 + $0x11e8] sm:$0xff] }
 0x285   : > { %4461 = vst [vmem:[%s11318_s22 + $0x178] sm:$0xff] %v4447_v37  ;;  %v4440_v2 = vadd.f32 %v13160_v18, %v4414_v52  ;;  %v4636_v8 = vpop.f32.mrb[201].mxu1  ;;  %9183 = vmatmul.mubr.msk.f32.gmra.mrb[50].mxu1 %vm221_vm0, %v13091_v33  ;;  %6712 = vmatprep.mubr.f32.mxu0 %v10514_v0 }
 0x286   : > { %v4453_v57 = vmax.f32 %v4439_v54, 0.0  ;;  %7076 = vmatprep.mubr.f32.mxu1 %v10514_v0  ;;  %10371 = vmatpush1.bf16.msra.mxu1 %v10370_v4 }
 0x287   : > { %v4454_v51 = vmax.f32 %v4440_v2, 0.0  ;;  %v13401_v13 = vpop.f32.mrb[202].mxu0  ;;  %10373 = vmatprep.subr.bf16.mxu1 %v10372_v15  ;;  %8718 = vperm.xlu0 %10496, %v13321_v36  }
 0x288   : > { %4467 = vst [vmem:[%s11318_s22 + $0x480] sm:$0xff] %v4453_v57  ;;  %v4640_v18 = vpop.f32.mrb[202].mxu1  ;;  %v13405_v35 = vpop.f32.mrb[203].mxu0  ;;  %9172 = vmatmul.mubr.msk.f32.gmra.mrb[52].mxu0 %vm221_vm0, %v13204_v42  ;;  %8723 = vperm.xlu1 %10497, %v13334_v32   ;;  %v6954_v32 = vld [vmem:[%s10559_s19 + $0x8b8] sm:$0xff] }
 0x289   : > { %4468 = vst [vmem:[%s11318_s22 + $0x488] sm:$0xff] %v4454_v51  ;;  %v4642_v34 = vpop.f32.mrb[203].mxu1  ;;  %9184 = vmatmul.mubr.msk.f32.gmra.mrb[52].mxu1 %vm221_vm0, %v13112_v38  ;;  %6718 = vmatprep.mubr.f32.mxu0 %v10514_v0  ;;  %v10380_v23 = vpack.c.bf16 %v6961_v53, %v6954_v32  ;;  %v7565_v53 = vld [vmem:[%s10559_s19 + $0x8d8] sm:$0xff] }
 0x28a   : > { %7082 = vmatprep.mubr.f32.mxu1 %v10514_v0  ;;  %10375 = vmatpush1.bf16.msra.mxu1 %v10374_v31 }
 0x28b   : > { %v13415_v36 = vpop.f32.mrb[204].mxu0  ;;  %10401 = vmatprep.subr.bf16.mxu1 %v10400_v60  ;;  %v7550_v60 = vld [vmem:[%s10559_s19 + $0x2b0] sm:$0xff] }
 0x28c   : > { %v4646_v12 = vpop.f32.mrb[204].mxu1  ;;  %v4990_v44 = vmax.f32 %v13381_v24, %v13415_v36  ;;  %v13419_v46 = vpop.f32.mrb[205].mxu0  ;;  %9173 = vmatmul.mubr.msk.f32.gmra.mrb[54].mxu0 %vm221_vm0, %v13225_v63 }
 0x28d   : > { %v5002_v19 = vmax.f32 %v4634_v26, %v4646_v12  ;;  %v4648_v9 = vpop.f32.mrb[205].mxu1  ;;  %v4991_v3 = vmax.f32 %v13388_v5, %v13419_v46  ;;  %9185 = vmatmul.mubr.msk.f32.gmra.mrb[54].mxu1 %vm221_vm0, %v13125_v45  ;;  %7177 = vmatprep.mubr.f32.mxu0 %v10514_v0 }
 0x28e   : > { %v5003_v21 = vmax.f32 %v4636_v8, %v4648_v9  ;;  %7088 = vmatprep.mubr.f32.mxu1 %v10514_v0 }
 0x28f   : > { %v5016_v25 = vmax.f32 %v4988_v61, %v5002_v19  ;;  %v13436_v10 = vpop.f32.mrb[206].mxu0  ;;  %v7572_v19 = vld [vmem:[%s10559_s19 + $0xbe8] sm:$0xff] }
 0x290   : > { %v5017_v17 = vmax.f32 %v4989_v27, %v5003_v21  ;;  %v4652_v11 = vpop.f32.mrb[206].mxu1  ;;  %v4997_v58 = vmax.f32 %v13401_v13, %v13436_v10  ;;  %v13443_v56 = vpop.f32.mrb[207].mxu0  ;;  %9190 = vmatmul.mubr.msk.f32.vlgmr.msra.gmra.mrb[56].mxu0 %vm221_vm0, %v13059_v14  ;;  %v7578_v10 = vld [vmem:[%s10559_s19 + $0xef0] sm:$0xff] }
 0x291   : > { %v5042_v16 = vadd.f32 %v13430_v47, %v5016_v25  ;;  %v5009_v59 = vmax.f32 %v4640_v18, %v4652_v11  ;;  %v4654_v61 = vpop.f32.mrb[207].mxu1  ;;  %v4998_v4 = vmax.f32 %v13405_v35, %v13443_v56  ;;  %9186 = vmatmul.mubr.msk.f32.gmra.mrb[56].mxu1 %vm221_vm0, %v13138_v6  ;;  %10379 = vmatpush3.bf16.msra.mxu0 %v13305_v62  ;;  %v13456_v27 = vpop.permute.xlu1 %5039  ;;  %v7557_v18 = vld [vmem:[%s10559_s19 + $0x5c0] sm:$0xff] }
 0x292   : > { %v5043_v22 = vadd.f32 %v13430_v47, %v5017_v17  ;;  %v5010_v7 = vmax.f32 %v4642_v34, %v4654_v61  ;;  %7094 = vmatprep.mubr.f32.mxu1 %v10514_v0  ;;  %7183 = vmatprep.mubr.f32.mxu0 %v10514_v0  ;;  %v10384_v62 = vpack.c.bf16 %v6975_v28, %v6968_v41  ;;  %v7571_v61 = vld [vmem:[%s10559_s19 + $0xbe0] sm:$0xff] }
 0x293   : > { %v5056_v37 = vmax.f32 %v5042_v16, 0.0  ;;  %v5023_v52 = vmax.f32 %v4995_v49, %v5009_v59  ;;  %v4747_v15 = vpop.f32.mrb[208].mxu0  ;;  %10381 = vmatprep.subr.bf16.mxu0 %v10380_v23  ;;  %v10402_v11 = vpack.c.bf16 %v7557_v18, %v7550_v60  ;;  %v10404_v16 = vpack.c.bf16 %v7572_v19, %v7565_v53  ;;  %v7564_v59 = vld [vmem:[%s10559_s19 + $0x8d0] sm:$0xff] }
 0x294   : > { %v5057_v43 = vmax.f32 %v5043_v22, 0.0  ;;  %v5024_v39 = vmax.f32 %v4996_v50, %v5010_v7  ;;  %v13466_v54 = vpop.f32.mrb[208].mxu1  ;;  %v4749_v26 = vpop.f32.mrb[209].mxu0  ;;  %9191 = vmatmul.mubr.msk.f32.gmra.mrb[58].mxu0 %vm221_vm0, %v13091_v33  ;;  %v10388_v50 = vpack.c.bf16 %v7556_v40, %v7549_v1 }
 0x295   : > { %5070 = vst [vmem:[%s11318_s22 + $0x188] sm:$0xff] %v5056_v37  ;;  %v5049_v29 = vadd.f32 %v13456_v27, %v5023_v52  ;;  %v13474_v30 = vpop.f32.mrb[209].mxu1  ;;  %9187 = vmatmul.mubr.msk.f32.gmra.mrb[58].mxu1 %vm221_vm0, %v13165_v55  ;;  %7189 = vmatprep.mubr.f32.mxu0 %v10514_v0  ;;  %v7586_v37 = vld [vmem:[%s10559_s19 + $0x1208] sm:$0xff] }
 0x296   : > { %5071 = vst [vmem:[%s11318_s22 + $0x190] sm:$0xff] %v5057_v43  ;;  %v5050_v20 = vadd.f32 %v13456_v27, %v5024_v39  ;;  %7100 = vmatprep.mubr.f32.mxu1 %v10514_v0  ;;  %10383 = vmatpush3.bf16.msra.mxu0 %v10380_v23  ;;  %v10406_v39 = vpack.c.bf16 %v7571_v61, %v7564_v59  ;;  %v7570_v59 = vld [vmem:[%s10559_s19 + $0xbd8] sm:$0xff] }
 0x297   : > { %v5063_v49 = vmax.f32 %v5049_v29, 0.0  ;;  %v4753_v48 = vpop.f32.mrb[210].mxu0  ;;  %10385 = vmatprep.subr.bf16.mxu0 %v10384_v62 }
 0x298   : > { %v5064_v2 = vmax.f32 %v5050_v20, 0.0  ;;  %v13482_v8 = vpop.f32.mrb[210].mxu1  ;;  %v4755_v57 = vpop.f32.mrb[211].mxu0  ;;  %9192 = vmatmul.mubr.msk.f32.gmra.mrb[60].mxu0 %vm221_vm0, %v13112_v38 }
 0x299   : > { %5077 = vst [vmem:[%s11318_s22 + $0x498] sm:$0xff] %v5063_v49  ;;  %v13487_v31 = vpop.f32.mrb[211].mxu1  ;;  %9188 = vmatmul.mubr.msk.f32.gmra.mrb[60].mxu1 %vm221_vm0, %v13204_v42  ;;  %7195 = vmatprep.mubr.f32.mxu0 %v10514_v0 }
 0x29a   : > { %5078 = vst [vmem:[%s11318_s22 + $0x4a0] sm:$0xff] %v5064_v2  ;;  %7106 = vmatprep.mubr.f32.mxu1 %v10514_v0  ;;  %10387 = vmatpush3.bf16.msra.mxu0 %v10384_v62 }
 0x29b   : > { %v4759_v51 = vpop.f32.mrb[212].mxu0  ;;  %10389 = vmatprep.subr.bf16.mxu0 %v10388_v50  ;;  %v7561_v50 = vld [vmem:[%s10559_s19 + $0x5e0] sm:$0xff] }
 0x29c   : > { %v5004_v34 = vmax.f32 %v4747_v15, %v4759_v51  ;;  %v13496_v12 = vpop.f32.mrb[212].mxu1  ;;  %v4761_v32 = vpop.f32.mrb[213].mxu0  ;;  %9193 = vmatmul.mubr.msk.f32.gmra.mrb[62].mxu0 %vm221_vm0, %v13125_v45 }
 0x29d   : > { %v4992_v9 = vmax.f32 %v13466_v54, %v13496_v12  ;;  %v5005_v21 = vmax.f32 %v4749_v26, %v4761_v32  ;;  %v13504_v25 = vpop.f32.mrb[213].mxu1  ;;  %9189 = vmatmul.mubr.msk.f32.gmra.mrb[62].mxu1 %vm221_vm0, %v13225_v63  ;;  %7201 = vmatprep.mubr.f32.mxu0 %v10514_v0 }
 0x29e   : > { %v5018_v23 = vmax.f32 %v4990_v44, %v5004_v34  ;;  %v4993_v17 = vmax.f32 %v13474_v30, %v13504_v25  ;;  %7290 = vmatprep.mubr.f32.mxu1 %v10514_v0  ;;  %v7579_v44 = vld [vmem:[%s10559_s19 + $0xef8] sm:$0xff] }
 0x29f   : > { %v5019_v41 = vmax.f32 %v4991_v3, %v5005_v21  ;;  %v4765_v28 = vpop.f32.mrb[214].mxu0  ;;  %v10408_v13 = vpack.c.bf16 %v7586_v37, %v7579_v44  ;;  %v7548_v21 = vld [vmem:[%s10559_s19 + $0x2a0] sm:$0xff]  ;;  %v7569_v44 = vld [vmem:[%s10559_s19 + $0xbd0] sm:$0xff] }
 0x2a0   : > { %v5044_v22 = vadd.f32 %v13430_v47, %v5018_v23  ;;  %v5011_v7 = vmax.f32 %v4753_v48, %v4765_v28  ;;  %v13521_v24 = vpop.f32.mrb[214].mxu1  ;;  %v4767_v36 = vpop.f32.mrb[215].mxu0  ;;  %9194 = vmatmul.mubr.msk.f32.gmra.mrb[64].mxu0 %vm221_vm0, %v13138_v6  ;;  %v7554_v48 = vld [vmem:[%s10559_s19 + $0x2d0] sm:$0xff] }
 0x2a1   : > { %v5045_v52 = vadd.f32 %v13430_v47, %v5019_v41  ;;  %v4999_v5 = vmax.f32 %v13482_v8, %v13521_v24  ;;  %v5012_v46 = vmax.f32 %v4755_v57, %v4767_v36  ;;  %v13530_v3 = vpop.f32.mrb[215].mxu1  ;;  %9198 = vmatmul.mubr.msk.f32.vlgmr.msra.gmra.mrb[64].mxu1 %vm221_vm0, %v13059_v14  ;;  %7207 = vmatprep.mubr.f32.mxu0 %v10514_v0  ;;  %v7555_v23 = vld [vmem:[%s10559_s19 + $0x5b0] sm:$0xff]  ;;  %v7562_v36 = vld [vmem:[%s10559_s19 + $0x8c0] sm:$0xff]  ;;  %v7553_v24 = vld [vmem:[%s10559_s19 + $0x2c8] sm:$0xff] }
 0x2a2   : > { %v5058_v15 = vmax.f32 %v5044_v22, 0.0  ;;  %v5025_v62 = vmax.f32 %v4997_v58, %v5011_v7  ;;  %v5000_v43 = vmax.f32 %v13487_v31, %v13530_v3  ;;  %10403 = vmatpush1.bf16.msra.mxu1 %v10402_v11  ;;  %7296 = vmatprep.mubr.f32.mxu1 %v10514_v0  ;;  %v7585_v58 = vld [vmem:[%s10559_s19 + $0x1200] sm:$0xff]  ;;  %v13562_v60 = vpack.c.bf16 %v7561_v50, %v7554_v48  ;;  %v7583_v50 = vld [vmem:[%s10559_s19 + $0x11f0] sm:$0xff] }
 0x2a3   : > { %v5059_v26 = vmax.f32 %v5045_v52, 0.0  ;;  %v5026_v1 = vmax.f32 %v4998_v4, %v5012_v46  ;;  %v13544_v40 = vpop.f32.mrb[216].mxu0  ;;  %10405 = vmatprep.subr.bf16.mxu1 %v10404_v16  ;;  %v10410_v2 = vpack.c.bf16 %v7585_v58, %v7578_v10  ;;  %v7563_v16 = vld [vmem:[%s10559_s19 + $0x8c8] sm:$0xff]  ;;  %v10390_v7 = vpack.c.bf16 %v7555_v23, %v7548_v21  ;;  %v7576_v48 = vld [vmem:[%s10559_s19 + $0xee0] sm:$0xff]  ;;  %v7559_v21 = vld [vmem:[%s10559_s19 + $0x5d0] sm:$0xff] }
 0x2a4   : > { %5072 = vst [vmem:[%s11318_s22 + $0x198] sm:$0xff] %v5058_v15  ;;  %v5051_v29 = vadd.f32 %v13456_v27, %v5025_v62  ;;  %v4860_v20 = vpop.f32.mrb[216].mxu1  ;;  %v13550_v49 = vpop.f32.mrb[217].mxu0  ;;  %9195 = vmatmul.mubr.msk.f32.gmra.mrb[66].mxu0 %vm221_vm0, %v13165_v55  ;;  %v10392_v15 = vpack.c.bf16 %v7570_v59, %v7563_v16  ;;  %v10398_v3 = vpack.c.bf16 %v7583_v50, %v7576_v48 }
 0x2a5   : > { %5073 = vst [vmem:[%s11318_s22 + $0x1a0] sm:$0xff] %v5059_v26  ;;  %v5052_v35 = vadd.f32 %v13456_v27, %v5026_v1  ;;  %v4862_v56 = vpop.f32.mrb[217].mxu1  ;;  %9199 = vmatmul.mubr.msk.f32.gmra.mrb[66].mxu1 %vm221_vm0, %v13091_v33  ;;  %7213 = vmatprep.mubr.f32.mxu0 %v10514_v0  ;;  %v10394_v1 = vpack.c.bf16 %v7569_v44, %v7562_v36  ;;  %v7568_v36 = vld [vmem:[%s10559_s19 + $0x8f0] sm:$0xff]  ;;  %v7575_v44 = vld [vmem:[%s10559_s19 + $0xc00] sm:$0xff] }
 0x2a6   : > { %v5065_v4 = vmax.f32 %v5051_v29, 0.0  ;;  %7302 = vmatprep.mubr.f32.mxu1 %v10514_v0  ;;  %10407 = vmatpush1.bf16.msra.mxu1 %v10406_v39 }
 0x2a7   : > { %v5066_v57 = vmax.f32 %v5052_v35, 0.0  ;;  %v9661_v51 = vpop.f32.mrb[218].mxu0  ;;  %10409 = vmatprep.subr.bf16.mxu1 %v10408_v13  ;;  %v7584_v13 = vld [vmem:[%s10559_s19 + $0x11f8] sm:$0xff] }
 0x2a8   : > { %5079 = vst [vmem:[%s11318_s22 + $0x4a8] sm:$0xff] %v5065_v4  ;;  %v4866_v18 = vpop.f32.mrb[218].mxu1  ;;  %v5001_v34 = vmax.f32 %v13544_v40, %v9661_v51  ;;  %v4959_v32 = vpop.f32.mrb[219].mxu0  ;;  %9196 = vmatmul.mubr.msk.f32.gmra.mrb[68].mxu0 %vm221_vm0, %v13204_v42  ;;  %v7577_v40 = vld [vmem:[%s10559_s19 + $0xee8] sm:$0xff] }
 0x2a9   : > { %5080 = vst [vmem:[%s11318_s22 + $0x4b0] sm:$0xff] %v5066_v57  ;;  %v4868_v53 = vpop.f32.mrb[219].mxu1  ;;  %v4994_v19 = vmax.f32 %v13550_v49, %v4959_v32  ;;  %9200 = vmatmul.mubr.msk.f32.gmra.mrb[68].mxu1 %vm221_vm0, %v13112_v38  ;;  %7219 = vmatprep.mubr.f32.mxu0 %v10514_v0  ;;  %v10396_v49 = vpack.c.bf16 %v7584_v13, %v7577_v40  ;;  %v7588_v40 = vld [vmem:[%s10559_s19 + $0x1218] sm:$0xff] }
 0x2aa   : > { %7308 = vmatprep.mubr.f32.mxu1 %v10514_v0  ;;  %10411 = vmatpush1.bf16.msra.mxu1 %v10410_v2 }
 0x2ab   : > { %v9664_v11 = vpop.f32.mrb[220].mxu0  ;;  %10425 = vmatprep.subr.bf16.mxu1 %v13562_v60 }
 0x2ac   : > { %v4872_v41 = vpop.f32.mrb[220].mxu1  ;;  %v4969_v28 = vpop.f32.mrb[221].mxu0  ;;  %9197 = vmatmul.mubr.msk.f32.gmra.mrb[70].mxu0 %vm221_vm0, %v13225_v63 }
 0x2ad   : > { %v5006_v61 = vmax.f32 %v4860_v20, %v4872_v41  ;;  %v4874_v22 = vpop.f32.mrb[221].mxu1  ;;  %9201 = vmatmul.mubr.msk.f32.gmra.mrb[70].mxu1 %vm221_vm0, %v13125_v45  ;;  %9752 = vmatprep.mubr.msk.f32.mxu0 %vm221_vm0, %v13059_v14 }
 0x2ae   : > { %v5007_v37 = vmax.f32 %v4862_v56, %v4874_v22  ;;  %7314 = vmatprep.mubr.f32.mxu1 %v10514_v0  ;;  %v13681_v22 = vld [vmem:[%s14425_s1] sm:$0xff] }
 0x2af   : > { %v5020_v52 = vmax.f32 %v4992_v9, %v5006_v61  ;;  %v9667_v46 = vpop.f32.mrb[222].mxu0 }
 0x2b0   : > { %v5021_v62 = vmax.f32 %v4993_v17, %v5007_v37  ;;  %v4878_v39 = vpop.f32.mrb[222].mxu1  ;;  %v5015_v26 = vmax.f32 %v9664_v11, %v9667_v46  ;;  %v4979_v14 = vpop.f32.mrb[223].mxu0  ;;  %9753 = vmatmul.mubr.msk.f32.vlgmr.msra.gmra.mrb[72].mxu0 %vm221_vm0, %v13091_v33  ;;  %v7566_v46 = vld [vmem:[%s10559_s19 + $0x8e0] sm:$0xff] }
 0x2b1   : > { %v5046_v10 = vadd.f32 %v13430_v47, %v5020_v52  ;;  %v5013_v58 = vmax.f32 %v4866_v18, %v4878_v39  ;;  %v4880_v54 = vpop.f32.mrb[223].mxu1  ;;  %v5008_v12 = vmax.f32 %v4969_v28, %v4979_v14  ;;  %9202 = vmatmul.mubr.msk.f32.gmra.mrb[72].mxu1 %vm221_vm0, %v13138_v6  ;;  %10391 = vmatpush1.bf16.msra.mxu0 %v10390_v7  ;;  %v7574_v28 = vld [vmem:[%s10559_s19 + $0xbf8] sm:$0xff] }
 0x2b2   : > { %v5047_v30 = vadd.f32 %v13430_v47, %v5021_v62  ;;  %v5029_v9 = vmax.f32 %v5001_v34, %v5015_v26  ;;  %v5014_v25 = vmax.f32 %v4868_v53, %v4880_v54  ;;  %7320 = vmatprep.mubr.f32.mxu1 %v10514_v0  ;;  %9755 = vmatprep.mubr.msk.f32.mxu0 %vm221_vm0, %v13112_v38  ;;  %v13713_v54 = vld [vmem:[%s14425_s1 + $0x8] sm:$0xff] }
 0x2b3   : > { %v5060_v33 = vmax.f32 %v5046_v10, 0.0  ;;  %v5027_v17 = vmax.f32 %v4999_v5, %v5013_v58  ;;  %v5022_v29 = vmax.f32 %v4994_v19, %v5008_v12  ;;  %v13608_v20 = vpop.f32.mrb[224].mxu0  ;;  %10393 = vmatprep.subr.bf16.mxu0 %v10392_v15  ;;  %v7560_v5 = vld [vmem:[%s10559_s19 + $0x5d8] sm:$0xff]  ;;  %v7552_v19 = vld [vmem:[%s10559_s19 + $0x2c0] sm:$0xff]  ;;  %v7573_v15 = vld [vmem:[%s10559_s19 + $0xbf0] sm:$0xff]  ;;  %v10428_v14 = vpack.c.bf16 %v7575_v44, %v7568_v36 }
 0x2b4   : > { %v5061_v35 = vmax.f32 %v5047_v30, 0.0  ;;  %v5055_v56 = vadd.f32 %v13456_v27, %v5029_v9  ;;  %v5028_v38 = vmax.f32 %v5000_v43, %v5014_v25  ;;  %v13616_v4 = vpop.f32.mrb[224].mxu1  ;;  %v13618_v8 = vpop.f32.mrb[225].mxu0  ;;  %9756 = vmatmul.mubr.msk.f32.gmra.mrb[74].mxu0 %vm221_vm0, %v13125_v45  ;;  %v10412_v34 = vpack.c.bf16 %v7560_v5, %v7553_v24  ;;  %v7582_v12 = vld [vmem:[%s10559_s19 + $0xf10] sm:$0xff]  ;;  %v7589_v30 = vld [vmem:[%s10559_s19 + $0x1220] sm:$0xff] }
 0x2b5   : > { %5074 = vst [vmem:[%s11318_s22 + $0x1a8] sm:$0xff] %v5060_v33  ;;  %v5053_v2 = vadd.f32 %v13456_v27, %v5027_v17  ;;  %v5048_v57 = vadd.f32 %v13430_v47, %v5022_v29  ;;  %v13627_v51 = vpop.f32.mrb[225].mxu1  ;;  %9203 = vmatmul.mubr.msk.f32.gmra.mrb[74].mxu1 %vm221_vm0, %v13165_v55  ;;  %9758 = vmatprep.mubr.msk.f32.mxu0 %vm221_vm0, %v13138_v6  ;;  %v7580_v29 = vld [vmem:[%s10559_s19 + $0xf00] sm:$0xff]  ;;  %v13734_v24 = vld [vmem:[%s14425_s1 + $0x10] sm:$0xff] }
 0x2b6   : > { %5075 = vst [vmem:[%s11318_s22 + $0x1b0] sm:$0xff] %v5061_v35  ;;  %v5069_v31 = vmax.f32 %v5055_v56, 0.0  ;;  %v5054_v45 = vadd.f32 %v13456_v27, %v5028_v38  ;;  %7326 = vmatprep.mubr.f32.mxu1 %v10514_v0  ;;  %10395 = vmatpush1.bf16.msra.mxu0 %v10394_v1  ;;  %v10414_v7 = vpack.c.bf16 %v7559_v21, %v7552_v19  ;;  %v7581_v1 = vld [vmem:[%s10559_s19 + $0xf08] sm:$0xff]  ;;  %v8172_v56 = vld [vmem:[%s10559_s19 + $0x600] sm:$0xff] }
 0x2b7   : > { %v5067_v47 = vmax.f32 %v5053_v2, 0.0  ;;  %v5062_v43 = vmax.f32 %v5048_v57, 0.0  ;;  %v13636_v18 = vpop.f32.mrb[226].mxu0  ;;  %10397 = vmatprep.subr.bf16.mxu0 %v10396_v49  ;;  %v10418_v25 = vpack.c.bf16 %v7573_v15, %v7566_v46  ;;  %v10420_v17 = vpack.c.bf16 %v7588_v40, %v7581_v1  ;;  %v7587_v49 = vld [vmem:[%s10559_s19 + $0x1210] sm:$0xff]  ;;  %v8163_v5 = vld [vmem:[%s10559_s19 + $0x2e0] sm:$0xff] }
 0x2b8   : > { %5083 = vst [vmem:[%s11318_s22 + $0x4c8] sm:$0xff] %v5069_v31  ;;  %v5068_v6 = vmax.f32 %v5054_v45, 0.0  ;;  %v13639_v32 = vpop.f32.mrb[226].mxu1  ;;  %v13641_v53 = vpop.f32.mrb[227].mxu0  ;;  %9759 = vmatmul.mubr.msk.f32.gmra.mrb[76].mxu0 %vm221_vm0, %v13165_v55  ;;  %v10432_v35 = vpack.c.bf16 %v7589_v30, %v7582_v12  ;;  %v8170_v2 = vld [vmem:[%s10559_s19 + $0x5f0] sm:$0xff]  ;;  %v10422_v57 = vpack.c.bf16 %v7587_v49, %v7580_v29  ;;  %v13760_v46 = vld [vmem:[%s14425_s1 + $0x20] sm:$0xff] }
 0x2b9   : > { %5081 = vst [vmem:[%s11318_s22 + $0x4b8] sm:$0xff] %v5067_v47  ;;  %5076 = vst [vmem:[%s11318_s22 + $0x1b8] sm:$0xff] %v5062_v43  ;;  %v13647_v27 = vpop.f32.mrb[227].mxu1  ;;  %9204 = vmatmul.mubr.msk.f32.gmra.mrb[76].mxu1 %vm221_vm0, %v13204_v42  ;;  %9761 = vmatprep.mubr.msk.f32.mxu0 %vm221_vm0, %v13204_v42  ;;  %v7567_v42 = vld [vmem:[%s10559_s19 + $0x8e8] sm:$0xff]  ;;  %v10436_v43 = vpack.c.bf16 %v8170_v2, %v8163_v5 }
 0x2ba   : > { %5082 = vst [vmem:[%s11318_s22 + $0x4c0] sm:$0xff] %v5068_v6  ;;  %7332 = vmatprep.mubr.f32.mxu1 %v10514_v0  ;;  %10399 = vmatpush1.bf16.msra.mxu0 %v10398_v3  ;;  %v13747_v6 = vld [vmem:[%s14425_s1 + $0x18] sm:$0xff] }
 0x2bb   : > { %v13657_v55 = vpop.f32.mrb[228].mxu0  ;;  %10413 = vmatprep.subr.bf16.mxu0 %v10412_v34 }
 0x2bc   : > { %v5602_v23 = vmax.f32 %v13608_v20, %v13657_v55  ;;  %v13661_v11 = vpop.f32.mrb[228].mxu1  ;;  %v13663_v41 = vpop.f32.mrb[229].mxu0  ;;  %9762 = vmatmul.mubr.msk.f32.gmra.mrb[78].mxu0 %vm221_vm0, %v13225_v63 }
 0x2bd   : > { %v5604_v16 = vmax.f32 %v13616_v4, %v13661_v11  ;;  %v5603_v59 = vmax.f32 %v13618_v8, %v13663_v41  ;;  %v13673_v61 = vpop.f32.mrb[229].mxu1  ;;  %9205 = vmatmul.mubr.msk.f32.gmra.mrb[78].mxu1 %vm221_vm0, %v13225_v63  ;;  %7678 = vmatprep.mubr.f32.mxu0 %v10514_v0  ;;  %v10416_v63 = vpack.c.bf16 %v7574_v28, %v7567_v42 }
 0x2be   : > { %v5605_v37 = vmax.f32 %v13627_v51, %v13673_v61  ;;  %7791 = vmatprep.mubr.f32.mxu1 %v10514_v0  ;;  %v13782_v51 = vpop.permute.xlu1 %5653 }
 0x2bf   : > { %v13688_v52 = vpop.f32.mrb[230].mxu0 }
 0x2c0   : > { %v5609_v62 = vmax.f32 %v13636_v18, %v13688_v52  ;;  %v13694_v39 = vpop.f32.mrb[230].mxu1  ;;  %v13696_v26 = vpop.f32.mrb[231].mxu0  ;;  %9214 = vmatmul.mubr.msk.f32.vlgmr.msra.gmra.mrb[80].mxu0 %vm221_vm0, %v13681_v22 }
 0x2c1   : > { %v5611_v13 = vmax.f32 %v13639_v32, %v13694_v39  ;;  %v5610_v10 = vmax.f32 %v13641_v53, %v13696_v26  ;;  %v13706_v58 = vpop.f32.mrb[231].mxu1  ;;  %9222 = vmatmul.mubr.msk.f32.vlgmr.msra.gmra.mrb[80].mxu1 %vm221_vm0, %v13681_v22  ;;  %10415 = vmatpush1.bf16.msra.mxu0 %v10414_v7 }
 0x2c2   : > { %v5612_v9 = vmax.f32 %v13647_v27, %v13706_v58  ;;  %10427 = vmatpush3.bf16.msra.mxu1 %v13562_v60  ;;  %7684 = vmatprep.mubr.f32.mxu0 %v10514_v0  ;;  %v8165_v60 = vld [vmem:[%s10559_s19 + $0x2f0] sm:$0xff] }
 0x2c3   : > { %v5248_v33 = vpop.f32.mrb[232].mxu0  ;;  %7797 = vmatprep.mubr.f32.mxu1 %v10514_v0  ;;  %10417 = vmatprep.subr.bf16.mxu0 %v10416_v63  ;;  %v10448_v45 = vpack.c.bf16 %v8172_v56, %v8165_v60  ;;  %v13754_v63 = vpop.permute.xlu0 %5648  ;;  %v13826_v27 = vld [vmem:[%s14425_s1 + $0x30] sm:$0xff] }
 0x2c4   : > { %v5361_v48 = vpop.f32.mrb[232].mxu1  ;;  %v5250_v50 = vpop.f32.mrb[233].mxu0  ;;  %9215 = vmatmul.mubr.msk.f32.gmra.mrb[82].mxu0 %vm221_vm0, %v13713_v54  ;;  %10429 = vmatprep.subr.bf16.mxu1 %v10428_v14 }
 0x2c5   : > { %v5363_v38 = vpop.f32.mrb[233].mxu1  ;;  %9223 = vmatmul.mubr.msk.f32.gmra.mrb[82].mxu1 %vm221_vm0, %v13713_v54  ;;  %7690 = vmatprep.mubr.f32.mxu0 %v10514_v0 }
 0x2c6   : > { %7803 = vmatprep.mubr.f32.mxu1 %v10514_v0  ;;  %10419 = vmatpush1.bf16.msra.mxu0 %v10418_v25 }
 0x2c7   : > { %v5254_v31 = vpop.f32.mrb[234].mxu0  ;;  %10431 = vmatpush3.bf16.msra.mxu1 %v10428_v14  ;;  %10421 = vmatprep.subr.bf16.mxu0 %v10420_v17 }
 0x2c8   : > { %v5367_v3 = vpop.f32.mrb[234].mxu1  ;;  %v5256_v47 = vpop.f32.mrb[235].mxu0  ;;  %9216 = vmatmul.mubr.msk.f32.gmra.mrb[84].mxu0 %vm221_vm0, %v13734_v24  ;;  %10433 = vmatprep.subr.bf16.mxu1 %v10432_v35 }
 0x2c9   : > { %v5369_v34 = vpop.f32.mrb[235].mxu1  ;;  %9224 = vmatmul.mubr.msk.f32.gmra.mrb[84].mxu1 %vm221_vm0, %v13734_v24  ;;  %7696 = vmatprep.mubr.f32.mxu0 %v10514_v0 }
 0x2ca   : > { %7809 = vmatprep.mubr.f32.mxu1 %v10514_v0  ;;  %10423 = vmatpush1.bf16.msra.mxu0 %v10422_v57 }
 0x2cb   : > { %v5260_v19 = vpop.f32.mrb[236].mxu0  ;;  %10435 = vmatpush3.bf16.msra.mxu1 %v10432_v35  ;;  %10449 = vmatprep.subr.bf16.mxu0 %v10448_v45  ;;  %v13847_v45 = vld [vmem:[%s14425_s1 + $0x38] sm:$0xff] }
 0x2cc   : > { %v5616_v21 = vmax.f32 %v5248_v33, %v5260_v19  ;;  %v5373_v42 = vpop.f32.mrb[236].mxu1  ;;  %v5262_v28 = vpop.f32.mrb[237].mxu0  ;;  %9217 = vmatmul.mubr.msk.f32.gmra.mrb[86].mxu0 %vm221_vm0, %v13747_v6  ;;  %10437 = vmatprep.subr.bf16.mxu1 %v10436_v43  ;;  %v8171_v43 = vld [vmem:[%s10559_s19 + $0x5f8] sm:$0xff] }
 0x2cd   : > { %v5618_v7 = vmax.f32 %v5361_v48, %v5373_v42  ;;  %v5617_v36 = vmax.f32 %v5250_v50, %v5262_v28  ;;  %v5375_v44 = vpop.f32.mrb[237].mxu1  ;;  %9225 = vmatmul.mubr.msk.f32.gmra.mrb[86].mxu1 %vm221_vm0, %v13747_v6  ;;  %7702 = vmatprep.mubr.f32.mxu0 %v10514_v0  ;;  %v8162_v19 = vld [vmem:[%s10559_s19 + $0x2d8] sm:$0xff] }
 0x2ce   : > { %v5630_v15 = vmax.f32 %v5602_v23, %v5616_v21  ;;  %v5619_v14 = vmax.f32 %v5363_v38, %v5375_v44  ;;  %7815 = vmatprep.mubr.f32.mxu1 %v10514_v0  ;;  %v8169_v21 = vld [vmem:[%s10559_s19 + $0x5e8] sm:$0xff]  ;;  %v8184_v44 = vld [vmem:[%s10559_s19 + $0xc10] sm:$0xff] }
 0x2cf   : > { %v5632_v1 = vmax.f32 %v5604_v16, %v5618_v7  ;;  %v5631_v40 = vmax.f32 %v5603_v59, %v5617_v36  ;;  %v5266_v12 = vpop.f32.mrb[238].mxu0  ;;  %v13787_v59 = vld [vmem:[%s14425_s1 + $0x28] sm:$0xff]  ;;  %v8177_v36 = vld [vmem:[%s10559_s19 + $0x900] sm:$0xff] }
 0x2d0   : > { %v5633_v30 = vmax.f32 %v5605_v37, %v5619_v14  ;;  %v5656_v25 = vadd.f32 %v13754_v63, %v5630_v15  ;;  %v5623_v20 = vmax.f32 %v5254_v31, %v5266_v12  ;;  %v5379_v55 = vpop.f32.mrb[238].mxu1  ;;  %v5268_v23 = vpop.f32.mrb[239].mxu0  ;;  %9218 = vmatmul.mubr.msk.f32.gmra.mrb[88].mxu0 %vm221_vm0, %v13760_v46  ;;  %v8186_v12 = vld [vmem:[%s10559_s19 + $0xc20] sm:$0xff] }
 0x2d1   : > { %v5657_v4 = vadd.f32 %v13754_v63, %v5631_v40  ;;  %v5658_v11 = vadd.f32 %v13754_v63, %v5632_v1  ;;  %v5625_v16 = vmax.f32 %v5367_v3, %v5379_v55  ;;  %v5624_v8 = vmax.f32 %v5256_v47, %v5268_v23  ;;  %v5381_v41 = vpop.f32.mrb[239].mxu1  ;;  %9226 = vmatmul.mubr.msk.f32.gmra.mrb[88].mxu1 %vm221_vm0, %v13760_v46  ;;  %v8164_v47 = vld [vmem:[%s10559_s19 + $0x2e8] sm:$0xff]  ;;  %v8179_v40 = vld [vmem:[%s10559_s19 + $0x910] sm:$0xff]  ;;  %v8176_v55 = vld [vmem:[%s10559_s19 + $0x8f8] sm:$0xff] }
 0x2d2   : > { %v5659_v61 = vadd.f32 %v13754_v63, %v5633_v30  ;;  %v5670_v37 = vmax.f32 %v5656_v25, 0.0  ;;  %v5637_v33 = vmax.f32 %v5609_v62, %v5623_v20  ;;  %v5626_v17 = vmax.f32 %v5369_v34, %v5381_v41  ;;  %7708 = vmatprep.mubr.f32.mxu0 %v10514_v0  ;;  %7821 = vmatprep.mubr.f32.mxu1 %v10514_v0  ;;  %v8183_v23 = vld [vmem:[%s10559_s19 + $0xc08] sm:$0xff]  ;;  %v8198_v41 = vld [vmem:[%s10559_s19 + $0x1230] sm:$0xff] }
 0x2d3   : > { %v5671_v29 = vmax.f32 %v5657_v4, 0.0  ;;  %v5672_v49 = vmax.f32 %v5658_v11, 0.0  ;;  %v5639_v48 = vmax.f32 %v5611_v13, %v5625_v16  ;;  %v5638_v50 = vmax.f32 %v5610_v10, %v5624_v8  ;;  %v13801_v35 = vpop.f32.mrb[240].mxu0  ;;  %v8191_v4 = vld [vmem:[%s10559_s19 + $0xf20] sm:$0xff] }
 0x2d4   : > { %v5673_v18 = vmax.f32 %v5659_v61, 0.0  ;;  %5684 = vst [vmem:[%s11318_s22 + $0x1c0] sm:$0xff] %v5670_v37  ;;  %v5640_v52 = vmax.f32 %v5612_v9, %v5626_v17  ;;  %v5663_v62 = vadd.f32 %v13782_v51, %v5637_v33  ;;  %v13808_v60 = vpop.f32.mrb[240].mxu1  ;;  %v13810_v56 = vpop.f32.mrb[241].mxu0  ;;  %9219 = vmatmul.mubr.msk.f32.gmra.mrb[90].mxu0 %vm221_vm0, %v13787_v59  ;;  %v10450_v1 = vpack.c.bf16 %v8171_v43, %v8164_v47  ;;  %v8178_v37 = vld [vmem:[%s10559_s19 + $0x908] sm:$0xff]  ;;  %v8185_v33 = vld [vmem:[%s10559_s19 + $0xc18] sm:$0xff] }
 0x2d5   : > { %5685 = vst [vmem:[%s11318_s22 + $0x1c8] sm:$0xff] %v5671_v29  ;;  %5686 = vst [vmem:[%s11318_s22 + $0x1d0] sm:$0xff] %v5672_v49  ;;  %v5664_v32 = vadd.f32 %v13782_v51, %v5638_v50  ;;  %v5665_v53 = vadd.f32 %v13782_v51, %v5639_v48  ;;  %v13818_v39 = vpop.f32.mrb[241].mxu1  ;;  %9227 = vmatmul.mubr.msk.f32.gmra.mrb[90].mxu1 %vm221_vm0, %v13787_v59  ;;  %7714 = vmatprep.mubr.f32.mxu0 %v10514_v0  ;;  %v8193_v48 = vld [vmem:[%s10559_s19 + $0xf30] sm:$0xff]  ;;  %v8200_v50 = vld [vmem:[%s10559_s19 + $0x1240] sm:$0xff] }
 0x2d6   : > { %5687 = vst [vmem:[%s11318_s22 + $0x1d8] sm:$0xff] %v5673_v18  ;;  %v5666_v26 = vadd.f32 %v13782_v51, %v5640_v52  ;;  %v5677_v13 = vmax.f32 %v5663_v62, 0.0  ;;  %7827 = vmatprep.mubr.f32.mxu1 %v10514_v0  ;;  %v10438_v30 = vpack.c.bf16 %v8169_v21, %v8162_v19  ;;  %v10440_v20 = vpack.c.bf16 %v8184_v44, %v8177_v36  ;;  %v8199_v47 = vld [vmem:[%s10559_s19 + $0x1238] sm:$0xff] }
 0x2d7   : > { %v5678_v10 = vmax.f32 %v5664_v32, 0.0  ;;  %v5679_v58 = vmax.f32 %v5665_v53, 0.0  ;;  %v13831_v9 = vpop.f32.mrb[242].mxu0  ;;  %v10452_v61 = vpack.c.bf16 %v8186_v12, %v8179_v40  ;;  %v10442_v52 = vpack.c.bf16 %v8183_v23, %v8176_v55  ;;  %v8190_v53 = vld [vmem:[%s10559_s19 + $0xf18] sm:$0xff] }
 0x2d8   : > { %v5680_v38 = vmax.f32 %v5666_v26, 0.0  ;;  %5691 = vst [vmem:[%s11318_s22 + $0x4d0] sm:$0xff] %v5677_v13  ;;  %v9685_v5 = vpop.f32.mrb[242].mxu1  ;;  %v13834_v2 = vpop.f32.mrb[243].mxu0  ;;  %9220 = vmatmul.mubr.msk.f32.gmra.mrb[92].mxu0 %vm221_vm0, %v13826_v27  ;;  %v10444_v32 = vpack.c.bf16 %v8198_v41, %v8191_v4  ;;  %v10454_v26 = vpack.c.bf16 %v8185_v33, %v8178_v37  ;;  %v8167_v13 = vld [vmem:[%s10559_s19 + $0x300] sm:$0xff]  ;;  %v8175_v21 = vld [vmem:[%s10559_s19 + $0x618] sm:$0xff] }
 0x2d9   : > { %5692 = vst [vmem:[%s11318_s22 + $0x4d8] sm:$0xff] %v5678_v10  ;;  %5693 = vst [vmem:[%s11318_s22 + $0x4e0] sm:$0xff] %v5679_v58  ;;  %v5615_v57 = vmax.f32 %v13808_v60, %v9685_v5  ;;  %v5573_v31 = vpop.f32.mrb[243].mxu1  ;;  %9228 = vmatmul.mubr.msk.f32.gmra.mrb[92].mxu1 %vm221_vm0, %v13826_v27  ;;  %7720 = vmatprep.mubr.f32.mxu0 %v10514_v0  ;;  %v8174_v5 = vld [vmem:[%s10559_s19 + $0x610] sm:$0xff]  ;;  %v8173_v41 = vld [vmem:[%s10559_s19 + $0x608] sm:$0xff] }
 0x2da   : > { %5694 = vst [vmem:[%s11318_s22 + $0x4e8] sm:$0xff] %v5680_v38  ;;  %v5608_v3 = vmax.f32 %v13818_v39, %v5573_v31  ;;  %7833 = vmatprep.mubr.f32.mxu1 %v10514_v0  ;;  %v8197_v39 = vld [vmem:[%s10559_s19 + $0x1228] sm:$0xff] }
 0x2db   : > { %v13854_v34 = vpop.f32.mrb[244].mxu0  ;;  %v8192_v31 = vld [vmem:[%s10559_s19 + $0xf28] sm:$0xff]  ;;  %v10446_v36 = vpack.c.bf16 %v8197_v39, %v8190_v53 }
 0x2dc   : > { %v5606_v42 = vmax.f32 %v13801_v35, %v13854_v34  ;;  %v9688_v28 = vpop.f32.mrb[244].mxu1  ;;  %v13860_v7 = vpop.f32.mrb[245].mxu0  ;;  %9221 = vmatmul.mubr.msk.f32.gmra.mrb[94].mxu0 %vm221_vm0, %v13847_v45  ;;  %v10458_v40 = vpack.c.bf16 %v8199_v47, %v8192_v31 }
 0x2dd   : > { %v5607_v15 = vmax.f32 %v13810_v56, %v13860_v7  ;;  %v5583_v14 = vpop.f32.mrb[245].mxu1  ;;  %9229 = vmatmul.mubr.msk.f32.gmra.mrb[94].mxu1 %vm221_vm0, %v13847_v45  ;;  %7904 = vmatprep.mubr.f32.mxu0 %v10514_v0 }
 0x2de   : > { %9776 = vmatprep.mubr.msk.f32.mxu1 %vm221_vm0, %v13681_v22 }
 0x2df   : > { %v13875_v25 = vpop.f32.mrb[246].mxu0 }
 0x2e0   : > { %v5613_v11 = vmax.f32 %v13831_v9, %v13875_v25  ;;  %v9691_v16 = vpop.f32.mrb[246].mxu1  ;;  %v13882_v8 = vpop.f32.mrb[247].mxu0  ;;  %9230 = vmatmul.mubr.msk.f32.vlgmr.msra.gmra.mrb[96].mxu0 %vm221_vm0, %v13681_v22  ;;  %v8201_v9 = vld [vmem:[%s10559_s19 + $0x1248] sm:$0xff] }
 0x2e1   : > { %v5629_v17 = vmax.f32 %v9688_v28, %v9691_v16  ;;  %v5614_v29 = vmax.f32 %v13834_v2, %v13882_v8  ;;  %v5593_v49 = vpop.f32.mrb[247].mxu1  ;;  %9777 = vmatmul.mubr.msk.f32.vlgmr.msra.gmra.mrb[96].mxu1 %vm221_vm0, %v13713_v54  ;;  %10451 = vmatpush1.bf16.msra.mxu0 %v10450_v1  ;;  %v10460_v1 = vpack.c.bf16 %v8174_v5, %v8167_v13  ;;  %v8166_v16 = vld [vmem:[%s10559_s19 + $0x2f8] sm:$0xff]  ;;  %v8187_v13 = vld [vmem:[%s10559_s19 + $0xc28] sm:$0xff]  ;;  %v8202_v5 = vld [vmem:[%s10559_s19 + $0x1250] sm:$0xff] }
 0x2e2   : > { %v5622_v18 = vmax.f32 %v5583_v14, %v5593_v49  ;;  %10439 = vmatpush1.bf16.msra.mxu1 %v10438_v30  ;;  %7910 = vmatprep.mubr.f32.mxu0 %v10514_v0  ;;  %v8188_v49 = vld [vmem:[%s10559_s19 + $0xc30] sm:$0xff] }
 0x2e3   : > { %v5643_v62 = vmax.f32 %v5615_v57, %v5629_v17  ;;  %v13896_v60 = vpop.f32.mrb[248].mxu0  ;;  %9779 = vmatprep.mubr.msk.f32.mxu1 %vm221_vm0, %v13734_v24  ;;  %10441 = vmatprep.subr.bf16.mxu1 %v10440_v20  ;;  %v10456_v57 = vpack.c.bf16 %v8200_v50, %v8193_v48  ;;  %v8181_v17 = vld [vmem:[%s10559_s19 + $0x920] sm:$0xff] }
 0x2e4   : > { %v5636_v10 = vmax.f32 %v5608_v3, %v5622_v18  ;;  %v13903_v58 = vpop.f32.mrb[248].mxu1  ;;  %v5476_v38 = vpop.f32.mrb[249].mxu0  ;;  %9231 = vmatmul.mubr.msk.f32.gmra.mrb[98].mxu0 %vm221_vm0, %v13713_v54  ;;  %10453 = vmatprep.subr.bf16.mxu0 %v10452_v61  ;;  %v8168_v3 = vld [vmem:[%s10559_s19 + $0x308] sm:$0xff]  ;;  %v10464_v39 = vpack.c.bf16 %v8188_v49, %v8181_v17  ;;  %v8189_v49 = vld [vmem:[%s10559_s19 + $0xc38] sm:$0xff] }
 0x2e5   : > { %v5669_v43 = vadd.f32 %v13782_v51, %v5643_v62  ;;  %v13911_v19 = vpop.f32.mrb[249].mxu1  ;;  %9780 = vmatmul.mubr.msk.f32.gmra.mrb[98].mxu1 %vm221_vm0, %v13747_v6  ;;  %7916 = vmatprep.mubr.f32.mxu0 %v10514_v0  ;;  %v13925_v55 = vpack.c.bf16 %v8175_v21, %v8168_v3  ;;  %v8182_v17 = vld [vmem:[%s10559_s19 + $0x928] sm:$0xff] }
 0x2e6   : > { %v5662_v28 = vadd.f32 %v13754_v63, %v5636_v10  ;;  %9782 = vmatprep.mubr.msk.f32.mxu1 %vm221_vm0, %v13760_v46  ;;  %10443 = vmatpush1.bf16.msra.mxu1 %v10442_v52 }
 0x2e7   : > { %v5683_v44 = vmax.f32 %v5669_v43, 0.0  ;;  %v5480_v14 = vpop.f32.mrb[250].mxu0  ;;  %10445 = vmatprep.subr.bf16.mxu1 %v10444_v32  ;;  %10455 = vmatpush1.bf16.msra.mxu0 %v10454_v26  ;;  %v8180_v26 = vld [vmem:[%s10559_s19 + $0x918] sm:$0xff] }
 0x2e8   : > { %v5676_v12 = vmax.f32 %v5662_v28, 0.0  ;;  %v13921_v30 = vpop.f32.mrb[250].mxu1  ;;  %v5482_v20 = vpop.f32.mrb[251].mxu0  ;;  %9232 = vmatmul.mubr.msk.f32.gmra.mrb[100].mxu0 %vm221_vm0, %v13734_v24  ;;  %10457 = vmatprep.subr.bf16.mxu0 %v10456_v57  ;;  %v10466_v43 = vpack.c.bf16 %v8187_v13, %v8180_v26  ;;  %v10476_v13 = vpack.c.bf16 %v8189_v49, %v8182_v17 }
 0x2e9   : > { %5697 = vst [vmem:[%s11318_s22 + $0x500] sm:$0xff] %v5683_v44  ;;  %v13928_v23 = vpop.f32.mrb[251].mxu1  ;;  %9783 = vmatmul.mubr.msk.f32.gmra.mrb[100].mxu1 %vm221_vm0, %v13787_v59  ;;  %7922 = vmatprep.mubr.f32.mxu0 %v10514_v0  ;;  %v8194_v44 = vld [vmem:[%s10559_s19 + $0xf38] sm:$0xff] }
 0x2ea   : > { %5690 = vst [vmem:[%s11318_s22 + $0x1f0] sm:$0xff] %v5676_v12  ;;  %9785 = vmatprep.mubr.msk.f32.mxu1 %vm221_vm0, %v13826_v27  ;;  %10447 = vmatpush1.bf16.msra.mxu1 %v10446_v36 }
 0x2eb   : > { %v5486_v4 = vpop.f32.mrb[252].mxu0  ;;  %10461 = vmatprep.subr.bf16.mxu1 %v10460_v1  ;;  %10459 = vmatpush1.bf16.msra.mxu0 %v10458_v40  ;;  %v10470_v1 = vpack.c.bf16 %v8201_v9, %v8194_v44 }
 0x2ec   : > { %v5620_v61 = vmax.f32 %v13896_v60, %v5486_v4  ;;  %v13939_v37 = vpop.f32.mrb[252].mxu1  ;;  %v5488_v33 = vpop.f32.mrb[253].mxu0  ;;  %9233 = vmatmul.mubr.msk.f32.gmra.mrb[102].mxu0 %vm221_vm0, %v13747_v6  ;;  %10473 = vmatprep.subr.bf16.mxu0 %v13925_v55  ;;  %v10462_v60 = vpack.c.bf16 %v8173_v41, %v8166_v16 }
 0x2ed   : > { %v6216_v48 = vmax.f32 %v13903_v58, %v13939_v37  ;;  %v5621_v50 = vmax.f32 %v5476_v38, %v5488_v33  ;;  %v13948_v18 = vpop.f32.mrb[253].mxu1  ;;  %9786 = vmatmul.mubr.msk.f32.gmra.mrb[102].mxu1 %vm221_vm0, %v13847_v45  ;;  %7928 = vmatprep.mubr.f32.mxu0 %v10514_v0 }
 0x2ee   : > { %v5634_v52 = vmax.f32 %v5606_v42, %v5620_v61  ;;  %v6217_v62 = vmax.f32 %v13911_v19, %v13948_v18  ;;  %8292 = vmatprep.mubr.f32.mxu1 %v10514_v0  ;;  %v8195_v42 = vld [vmem:[%s10559_s19 + $0xf40] sm:$0xff] }
 0x2ef   : > { %v5635_v32 = vmax.f32 %v5607_v15, %v5621_v50  ;;  %v5492_v53 = vpop.f32.mrb[254].mxu0  ;;  %v10468_v36 = vpack.c.bf16 %v8202_v5, %v8195_v42  ;;  %v8196_v5 = vld [vmem:[%s10559_s19 + $0xf48] sm:$0xff] }
 0x2f0   : > { %v5660_v10 = vadd.f32 %v13754_v63, %v5634_v52  ;;  %v5627_v38 = vmax.f32 %v5480_v14, %v5492_v53  ;;  %v13965_v35 = vpop.f32.mrb[254].mxu1  ;;  %v5494_v34 = vpop.f32.mrb[255].mxu0  ;;  %9234 = vmatmul.mubr.msk.f32.gmra.mrb[104].mxu0 %vm221_vm0, %v13760_v46 }
 0x2f1   : > { %v5661_v57 = vadd.f32 %v13754_v63, %v5635_v32  ;;  %v6223_v56 = vmax.f32 %v13921_v30, %v13965_v35  ;;  %v5628_v7 = vmax.f32 %v5482_v20, %v5494_v34  ;;  %v13974_v15 = vpop.f32.mrb[255].mxu1  ;;  %9246 = vmatmul.mubr.msk.f32.vlgmr.msra.gmra.mrb[104].mxu1 %vm221_vm0, %v13681_v22  ;;  %7934 = vmatprep.mubr.f32.mxu0 %v10514_v0  ;;  %v14031_v53 = vpop.permute.xlu0 %6262 }
 0x2f2   : > { %v5674_v31 = vmax.f32 %v5660_v10, 0.0  ;;  %v5641_v47 = vmax.f32 %v5613_v11, %v5627_v38  ;;  %v6224_v63 = vmax.f32 %v13928_v23, %v13974_v15  ;;  %10463 = vmatpush1.bf16.msra.mxu1 %v10462_v60  ;;  %8298 = vmatprep.mubr.f32.mxu1 %v10514_v0 }
 0x2f3   : > { %v5675_v3 = vmax.f32 %v5661_v57, 0.0  ;;  %v5642_v21 = vmax.f32 %v5614_v29, %v5628_v7  ;;  %v13988_v28 = vpop.f32.mrb[0].mxu0  ;;  %10465 = vmatprep.subr.bf16.mxu1 %v10464_v39  ;;  %v8203_v57 = vld [vmem:[%s10559_s19 + $0x1258] sm:$0xff] }
 0x2f4   : > { %5688 = vst [vmem:[%s11318_s22 + $0x1e0] sm:$0xff] %v5674_v31  ;;  %v5667_v25 = vadd.f32 %v13782_v51, %v5641_v47  ;;  %v5862_v11 = vpop.f32.mrb[0].mxu1  ;;  %v13994_v14 = vpop.f32.mrb[1].mxu0  ;;  %9235 = vmatmul.mubr.msk.f32.gmra.mrb[106].mxu0 %vm221_vm0, %v13787_v59 }
 0x2f5   : > { %5689 = vst [vmem:[%s11318_s22 + $0x1e8] sm:$0xff] %v5675_v3  ;;  %v5668_v2 = vadd.f32 %v13782_v51, %v5642_v21  ;;  %v5864_v8 = vpop.f32.mrb[1].mxu1  ;;  %9247 = vmatmul.mubr.msk.f32.gmra.mrb[106].mxu1 %vm221_vm0, %v13713_v54  ;;  %7940 = vmatprep.mubr.f32.mxu0 %v10514_v0  ;;  %v10480_v3 = vpack.c.bf16 %v8203_v57, %v8196_v5 }
 0x2f6   : > { %v5681_v29 = vmax.f32 %v5667_v25, 0.0  ;;  %8304 = vmatprep.mubr.f32.mxu1 %v10514_v0  ;;  %10467 = vmatpush1.bf16.msra.mxu1 %v10466_v43 }
 0x2f7   : > { %v5682_v40 = vmax.f32 %v5668_v2, 0.0  ;;  %v14004_v12 = vpop.f32.mrb[2].mxu0  ;;  %10469 = vmatprep.subr.bf16.mxu1 %v10468_v36 }
 0x2f8   : > { %5695 = vst [vmem:[%s11318_s22 + $0x4f0] sm:$0xff] %v5681_v29  ;;  %v5868_v20 = vpop.f32.mrb[2].mxu1  ;;  %v14007_v51 = vpop.f32.mrb[3].mxu0  ;;  %9236 = vmatmul.mubr.msk.f32.gmra.mrb[108].mxu0 %vm221_vm0, %v13826_v27 }
 0x2f9   : > { %5696 = vst [vmem:[%s11318_s22 + $0x4f8] sm:$0xff] %v5682_v40  ;;  %v5870_v4 = vpop.f32.mrb[3].mxu1  ;;  %9248 = vmatmul.mubr.msk.f32.gmra.mrb[108].mxu1 %vm221_vm0, %v13734_v24  ;;  %7946 = vmatprep.mubr.f32.mxu0 %v10514_v0 }
 0x2fa   : > { %8310 = vmatprep.mubr.f32.mxu1 %v10514_v0  ;;  %10471 = vmatpush1.bf16.msra.mxu1 %v10470_v1 }
 0x2fb   : > { %v14016_v16 = vpop.f32.mrb[4].mxu0 }
 0x2fc   : > { %v5874_v41 = vpop.f32.mrb[4].mxu1  ;;  %v6218_v61 = vmax.f32 %v13988_v28, %v14016_v16  ;;  %v14020_v33 = vpop.f32.mrb[5].mxu0  ;;  %9237 = vmatmul.mubr.msk.f32.gmra.mrb[110].mxu0 %vm221_vm0, %v13847_v45 }
 0x2fd   : > { %v6230_v50 = vmax.f32 %v5862_v11, %v5874_v41  ;;  %v5876_v52 = vpop.f32.mrb[5].mxu1  ;;  %v6219_v60 = vmax.f32 %v13994_v14, %v14020_v33  ;;  %9249 = vmatmul.mubr.msk.f32.gmra.mrb[110].mxu1 %vm221_vm0, %v13747_v6  ;;  %8405 = vmatprep.mubr.f32.mxu0 %v10514_v0 }
 0x2fe   : > { %v6231_v32 = vmax.f32 %v5864_v8, %v5876_v52  ;;  %8316 = vmatprep.mubr.f32.mxu1 %v10514_v0 }
 0x2ff   : > { %v6244_v39 = vmax.f32 %v6216_v48, %v6230_v50  ;;  %v14037_v26 = vpop.f32.mrb[6].mxu0 }
 0x300   : > { %v6245_v10 = vmax.f32 %v6217_v62, %v6231_v32  ;;  %v5880_v38 = vpop.f32.mrb[6].mxu1  ;;  %v6225_v34 = vmax.f32 %v14004_v12, %v14037_v26  ;;  %v14044_v42 = vpop.f32.mrb[7].mxu0  ;;  %9254 = vmatmul.mubr.msk.f32.vlgmr.msra.gmra.mrb[112].mxu0 %vm221_vm0, %v13681_v22 }
 0x301   : > { %v6270_v58 = vadd.f32 %v14031_v53, %v6244_v39  ;;  %v6237_v37 = vmax.f32 %v5868_v20, %v5880_v38  ;;  %v5882_v48 = vpop.f32.mrb[7].mxu1  ;;  %v6226_v7 = vmax.f32 %v14007_v51, %v14044_v42  ;;  %9250 = vmatmul.mubr.msk.f32.gmra.mrb[112].mxu1 %vm221_vm0, %v13760_v46  ;;  %10475 = vmatpush3.bf16.msra.mxu0 %v13925_v55  ;;  %v14057_v62 = vpop.permute.xlu1 %6267 }
 0x302   : > { %v6271_v19 = vadd.f32 %v14031_v53, %v6245_v10  ;;  %v6238_v18 = vmax.f32 %v5870_v4, %v5882_v48  ;;  %8322 = vmatprep.mubr.f32.mxu1 %v10514_v0  ;;  %8411 = vmatprep.mubr.f32.mxu0 %v10514_v0 }
 0x303   : > { %v6284_v31 = vmax.f32 %v6270_v58, 0.0  ;;  %v6251_v47 = vmax.f32 %v6223_v56, %v6237_v37  ;;  %v5975_v43 = vpop.f32.mrb[8].mxu0  ;;  %10477 = vmatprep.subr.bf16.mxu0 %v10476_v13 }
 0x304   : > { %v6285_v55 = vmax.f32 %v6271_v19, 0.0  ;;  %v6252_v21 = vmax.f32 %v6224_v63, %v6238_v18  ;;  %v14067_v36 = vpop.f32.mrb[8].mxu1  ;;  %v5977_v44 = vpop.f32.mrb[9].mxu0  ;;  %9255 = vmatmul.mubr.msk.f32.gmra.mrb[114].mxu0 %vm221_vm0, %v13713_v54 }
 0x305   : > { %6298 = vst [vmem:[%s11318_s22 + $0x1f8] sm:$0xff] %v6284_v31  ;;  %v6277_v9 = vadd.f32 %v14057_v62, %v6251_v47  ;;  %v14073_v30 = vpop.f32.mrb[9].mxu1  ;;  %9251 = vmatmul.mubr.msk.f32.gmra.mrb[114].mxu1 %vm221_vm0, %v13787_v59  ;;  %8417 = vmatprep.mubr.f32.mxu0 %v10514_v0 }
 0x306   : > { %6299 = vst [vmem:[%s11318_s22 + $0x200] sm:$0xff] %v6285_v55  ;;  %v6278_v23 = vadd.f32 %v14057_v62, %v6252_v21  ;;  %8328 = vmatprep.mubr.f32.mxu1 %v10514_v0  ;;  %10479 = vmatpush3.bf16.msra.mxu0 %v10476_v13 }
 0x307   : > { %v6291_v35 = vmax.f32 %v6277_v9, 0.0  ;;  %v5981_v56 = vpop.f32.mrb[10].mxu0  ;;  %10481 = vmatprep.subr.bf16.mxu0 %v10480_v3 }
 0x308   : > { %v6292_v15 = vmax.f32 %v6278_v23, 0.0  ;;  %v14081_v63 = vpop.f32.mrb[10].mxu1  ;;  %v5983_v25 = vpop.f32.mrb[11].mxu0  ;;  %9256 = vmatmul.mubr.msk.f32.gmra.mrb[116].mxu0 %vm221_vm0, %v13734_v24 }
 0x309   : > { %6305 = vst [vmem:[%s11318_s22 + $0x508] sm:$0xff] %v6291_v35  ;;  %v14086_v11 = vpop.f32.mrb[11].mxu1  ;;  %9252 = vmatmul.mubr.msk.f32.gmra.mrb[116].mxu1 %vm221_vm0, %v13826_v27  ;;  %8423 = vmatprep.mubr.f32.mxu0 %v10514_v0 }
 0x30a   : > { %6306 = vst [vmem:[%s11318_s22 + $0x510] sm:$0xff] %v6292_v15  ;;  %8334 = vmatprep.mubr.f32.mxu1 %v10514_v0  ;;  %10483 = vmatpush3.bf16.msra.mxu0 %v10480_v3 }
 0x30b   : > { %v5987_v2 = vpop.f32.mrb[12].mxu0 }
 0x30c   : > { %v6232_v8 = vmax.f32 %v5975_v43, %v5987_v2  ;;  %v14093_v29 = vpop.f32.mrb[12].mxu1  ;;  %v5989_v1 = vpop.f32.mrb[13].mxu0  ;;  %9257 = vmatmul.mubr.msk.f32.gmra.mrb[118].mxu0 %vm221_vm0, %v13747_v6 }
 0x30d   : > { %v6220_v40 = vmax.f32 %v14067_v36, %v14093_v29  ;;  %v6233_v20 = vmax.f32 %v5977_v44, %v5989_v1  ;;  %v14099_v4 = vpop.f32.mrb[13].mxu1  ;;  %9253 = vmatmul.mubr.msk.f32.gmra.mrb[118].mxu1 %vm221_vm0, %v13847_v45  ;;  %8429 = vmatprep.mubr.f32.mxu0 %v10514_v0 }
 0x30e   : > { %v6246_v41 = vmax.f32 %v6218_v61, %v6232_v8  ;;  %v6221_v17 = vmax.f32 %v14073_v30, %v14099_v4  ;;  %8518 = vmatprep.mubr.f32.mxu1 %v10514_v0 }
 0x30f   : > { %v6247_v49 = vmax.f32 %v6219_v60, %v6233_v20  ;;  %v5993_v50 = vpop.f32.mrb[14].mxu0 }
 0x310   : > { %v6272_v52 = vadd.f32 %v14031_v53, %v6246_v41  ;;  %v6239_v32 = vmax.f32 %v5981_v56, %v5993_v50  ;;  %v14114_v39 = vpop.f32.mrb[14].mxu1  ;;  %v5995_v13 = vpop.f32.mrb[15].mxu0  ;;  %9258 = vmatmul.mubr.msk.f32.gmra.mrb[120].mxu0 %vm221_vm0, %v13760_v46 }
 0x311   : > { %v6273_v28 = vadd.f32 %v14031_v53, %v6247_v49  ;;  %v6227_v16 = vmax.f32 %v14081_v63, %v14114_v39  ;;  %v6240_v61 = vmax.f32 %v5983_v25, %v5995_v13  ;;  %v14121_v14 = vpop.f32.mrb[15].mxu1  ;;  %9262 = vmatmul.mubr.msk.f32.vlgmr.msra.gmra.mrb[120].mxu1 %vm221_vm0, %v13681_v22  ;;  %8435 = vmatprep.mubr.f32.mxu0 %v10514_v0 }
 0x312   : > { %v6286_v33 = vmax.f32 %v6272_v52, 0.0  ;;  %v6253_v60 = vmax.f32 %v6225_v34, %v6239_v32  ;;  %v6228_v10 = vmax.f32 %v14086_v11, %v14121_v14  ;;  %8524 = vmatprep.mubr.f32.mxu1 %v10514_v0 }
 0x313   : > { %v6287_v38 = vmax.f32 %v6273_v28, 0.0  ;;  %v6254_v5 = vmax.f32 %v6226_v7, %v6240_v61  ;;  %v9706_v57 = vpop.f32.mrb[16].mxu0 }
 0x314   : > { %6300 = vst [vmem:[%s11318_s22 + $0x208] sm:$0xff] %v6286_v33  ;;  %v6279_v58 = vadd.f32 %v14057_v62, %v6253_v60  ;;  %v6088_v37 = vpop.f32.mrb[16].mxu1  ;;  %v6177_v48 = vpop.f32.mrb[17].mxu0  ;;  %9259 = vmatmul.mubr.msk.f32.gmra.mrb[122].mxu0 %vm221_vm0, %v13787_v59 }
 0x315   : > { %6301 = vst [vmem:[%s11318_s22 + $0x210] sm:$0xff] %v6287_v38  ;;  %v6280_v12 = vadd.f32 %v14057_v62, %v6254_v5  ;;  %v6090_v26 = vpop.f32.mrb[17].mxu1  ;;  %9263 = vmatmul.mubr.msk.f32.gmra.mrb[122].mxu1 %vm221_vm0, %v13713_v54  ;;  %8441 = vmatprep.mubr.f32.mxu0 %v10514_v0 }
 0x316   : > { %v6293_v51 = vmax.f32 %v6279_v58, 0.0  ;;  %8530 = vmatprep.mubr.f32.mxu1 %v10514_v0 }
 0x317   : > { %v6294_v34 = vmax.f32 %v6280_v12, 0.0  ;;  %v9709_v42 = vpop.f32.mrb[18].mxu0 }
 0x318   : > { %6307 = vst [vmem:[%s11318_s22 + $0x518] sm:$0xff] %v6293_v51  ;;  %v6094_v7 = vpop.f32.mrb[18].mxu1  ;;  %v6229_v19 = vmax.f32 %v9706_v57, %v9709_v42  ;;  %v6187_v18 = vpop.f32.mrb[19].mxu0  ;;  %9260 = vmatmul.mubr.msk.f32.gmra.mrb[124].mxu0 %vm221_vm0, %v13826_v27 }
 0x319   : > { %6308 = vst [vmem:[%s11318_s22 + $0x520] sm:$0xff] %v6294_v34  ;;  %v6096_v31 = vpop.f32.mrb[19].mxu1  ;;  %v6222_v47 = vmax.f32 %v6177_v48, %v6187_v18  ;;  %9264 = vmatmul.mubr.msk.f32.gmra.mrb[124].mxu1 %vm221_vm0, %v13734_v24  ;;  %8447 = vmatprep.mubr.f32.mxu0 %v10514_v0 }
 0x31a   : > { %8536 = vmatprep.mubr.f32.mxu1 %v10514_v0 }
 0x31b   : > { %v9712_v43 = vpop.f32.mrb[20].mxu0 }
 0x31c   : > { %v6100_v3 = vpop.f32.mrb[20].mxu1  ;;  %v6197_v55 = vpop.f32.mrb[21].mxu0  ;;  %9261 = vmatmul.mubr.msk.f32.gmra.mrb[126].mxu0 %vm221_vm0, %v13847_v45 }
 0x31d   : > { %v6234_v21 = vmax.f32 %v6088_v37, %v6100_v3  ;;  %v6102_v44 = vpop.f32.mrb[21].mxu1  ;;  %9265 = vmatmul.mubr.msk.f32.gmra.mrb[126].mxu1 %vm221_vm0, %v13747_v6  ;;  %9800 = vmatprep.mubr.msk.f32.mxu0 %vm221_vm0, %v13681_v22 }
 0x31e   : > { %v6235_v9 = vmax.f32 %v6090_v26, %v6102_v44  ;;  %8542 = vmatprep.mubr.f32.mxu1 %v10514_v0 }
 0x31f   : > { %v6248_v30 = vmax.f32 %v6220_v40, %v6234_v21  ;;  %v9715_v23 = vpop.f32.mrb[22].mxu0 }
 0x320   : > { %v6249_v35 = vmax.f32 %v6221_v17, %v6235_v9  ;;  %v6106_v56 = vpop.f32.mrb[22].mxu1  ;;  %v6243_v15 = vmax.f32 %v9712_v43, %v9715_v23  ;;  %v6207_v25 = vpop.f32.mrb[23].mxu0  ;;  %9801 = vmatmul.mubr.msk.f32.vlgmr.msra.gmra.mrb[128].mxu0 %vm221_vm0, %v13713_v54 }
 0x321   : > { %v6274_v2 = vadd.f32 %v14031_v53, %v6248_v30  ;;  %v6241_v8 = vmax.f32 %v6094_v7, %v6106_v56  ;;  %v6108_v1 = vpop.f32.mrb[23].mxu1  ;;  %v6236_v22 = vmax.f32 %v6197_v55, %v6207_v25  ;;  %9266 = vmatmul.mubr.msk.f32.gmra.mrb[128].mxu1 %vm221_vm0, %v13760_v46  ;;  %9803 = vmatprep.mubr.msk.f32.mxu0 %vm221_vm0, %v13734_v24  ;;  %v14227_v23 = vpop.permute.xlu0 %6876 }
 0x322   : > { %v6275_v36 = vadd.f32 %v14031_v53, %v6249_v35  ;;  %v6257_v29 = vmax.f32 %v6229_v19, %v6243_v15  ;;  %v6242_v40 = vmax.f32 %v6096_v31, %v6108_v1  ;;  %8548 = vmatprep.mubr.f32.mxu1 %v10514_v0 }
 0x323   : > { %v6288_v20 = vmax.f32 %v6274_v2, 0.0  ;;  %v6255_v54 = vmax.f32 %v6227_v16, %v6241_v8  ;;  %v6250_v4 = vmax.f32 %v6222_v47, %v6236_v22  ;;  %v14175_v41 = vpop.f32.mrb[24].mxu0 }
 0x324   : > { %v6289_v17 = vmax.f32 %v6275_v36, 0.0  ;;  %v6283_v49 = vadd.f32 %v14057_v62, %v6257_v29  ;;  %v6256_v24 = vmax.f32 %v6228_v10, %v6242_v40  ;;  %v14181_v50 = vpop.f32.mrb[24].mxu1  ;;  %v14183_v52 = vpop.f32.mrb[25].mxu0  ;;  %9804 = vmatmul.mubr.msk.f32.gmra.mrb[130].mxu0 %vm221_vm0, %v13747_v6 }
 0x325   : > { %6302 = vst [vmem:[%s11318_s22 + $0x218] sm:$0xff] %v6288_v20  ;;  %v6281_v63 = vadd.f32 %v14057_v62, %v6255_v54  ;;  %v6276_v32 = vadd.f32 %v14031_v53, %v6250_v4  ;;  %v6567_v39 = vpop.f32.mrb[25].mxu1  ;;  %9267 = vmatmul.mubr.msk.f32.gmra.mrb[130].mxu1 %vm221_vm0, %v13787_v59  ;;  %9806 = vmatprep.mubr.msk.f32.mxu0 %vm221_vm0, %v13760_v46 }
 0x326   : > { %6303 = vst [vmem:[%s11318_s22 + $0x220] sm:$0xff] %v6289_v17  ;;  %v6297_v11 = vmax.f32 %v6283_v49, 0.0  ;;  %v6282_v13 = vadd.f32 %v14057_v62, %v6256_v24  ;;  %8554 = vmatprep.mubr.f32.mxu1 %v10514_v0  ;;  %v14232_v17 = vpop.permute.xlu1 %6881 }
 0x327   : > { %v6295_v6 = vmax.f32 %v6281_v63, 0.0  ;;  %v6290_v28 = vmax.f32 %v6276_v32, 0.0  ;;  %v14197_v16 = vpop.f32.mrb[26].mxu0 }
 0x328   : > { %6311 = vst [vmem:[%s11318_s22 + $0x538] sm:$0xff] %v6297_v11  ;;  %v6296_v53 = vmax.f32 %v6282_v13, 0.0  ;;  %v14200_v61 = vpop.f32.mrb[26].mxu1  ;;  %v14202_v14 = vpop.f32.mrb[27].mxu0  ;;  %9807 = vmatmul.mubr.msk.f32.gmra.mrb[132].mxu0 %vm221_vm0, %v13787_v59 }
 0x329   : > { %6309 = vst [vmem:[%s11318_s22 + $0x528] sm:$0xff] %v6295_v6  ;;  %6304 = vst [vmem:[%s11318_s22 + $0x228] sm:$0xff] %v6290_v28  ;;  %v14208_v46 = vpop.f32.mrb[27].mxu1  ;;  %9268 = vmatmul.mubr.msk.f32.gmra.mrb[132].mxu1 %vm221_vm0, %v13826_v27  ;;  %9809 = vmatprep.mubr.msk.f32.mxu0 %vm221_vm0, %v13826_v27 }
 0x32a   : > { %6310 = vst [vmem:[%s11318_s22 + $0x530] sm:$0xff] %v6296_v53  ;;  %8560 = vmatprep.mubr.f32.mxu1 %v10514_v0 }
 0x32b   : > { %v6464_v62 = vpop.f32.mrb[28].mxu0 }
 0x32c   : > { %v6830_v33 = vmax.f32 %v14175_v41, %v6464_v62  ;;  %v6577_v60 = vpop.f32.mrb[28].mxu1  ;;  %v6466_v10 = vpop.f32.mrb[29].mxu0  ;;  %9810 = vmatmul.mubr.msk.f32.gmra.mrb[134].mxu0 %vm221_vm0, %v13847_v45 }
 0x32d   : > { %v6832_v59 = vmax.f32 %v14181_v50, %v6577_v60  ;;  %v6831_v38 = vmax.f32 %v14183_v52, %v6466_v10  ;;  %v6579_v5 = vpop.f32.mrb[29].mxu1  ;;  %9269 = vmatmul.mubr.msk.f32.gmra.mrb[134].mxu1 %vm221_vm0, %v13847_v45 }
 0x32e   : > { %v6833_v27 = vmax.f32 %v6567_v39, %v6579_v5 }
 0x32f   : > { %v6470_v57 = vpop.f32.mrb[30].mxu0 }
 0x330   : > { %v6837_v0 = vmax.f32 %v14197_v16, %v6470_v57  ;;  %v6583_v58 = vpop.f32.mrb[30].mxu1  ;;  %v6472_v37 = vpop.f32.mrb[31].mxu0 }
 0x331   : > { %v6839_v48 = vmax.f32 %v14200_v61, %v6583_v58  ;;  %v6838_v12 = vmax.f32 %v14202_v14, %v6472_v37  ;;  %v6585_v26 = vpop.f32.mrb[31].mxu1 }
 0x332   : > { %v6840_v51 = vmax.f32 %v14208_v46, %v6585_v26 }
 0x333   : > { %v6476_v34 = vpop.f32.mrb[32].mxu0 }
 0x334   : > { %v6589_v42 = vpop.f32.mrb[32].mxu1  ;;  %v6478_v7 = vpop.f32.mrb[33].mxu0 }
 0x335   : > { %v6591_v19 = vpop.f32.mrb[33].mxu1 }
 0x337   : > { %v6482_v18 = vpop.f32.mrb[34].mxu0 }
 0x338   : > { %v6595_v31 = vpop.f32.mrb[34].mxu1  ;;  %v6484_v45 = vpop.f32.mrb[35].mxu0 }
 0x339   : > { %v6597_v47 = vpop.f32.mrb[35].mxu1 }
 0x33b   : > { %v6488_v43 = vpop.f32.mrb[36].mxu0 }
 0x33c   : > { %v6844_v3 = vmax.f32 %v6476_v34, %v6488_v43  ;;  %v6601_v55 = vpop.f32.mrb[36].mxu1  ;;  %v6490_v21 = vpop.f32.mrb[37].mxu0 }
 0x33d   : > { %v6846_v44 = vmax.f32 %v6589_v42, %v6601_v55  ;;  %v6845_v9 = vmax.f32 %v6478_v7, %v6490_v21  ;;  %v6603_v30 = vpop.f32.mrb[37].mxu1 }
 0x33e   : > { %v6858_v35 = vmax.f32 %v6830_v33, %v6844_v3  ;;  %v6847_v56 = vmax.f32 %v6591_v19, %v6603_v30 }
 0x33f   : > { %v6860_v15 = vmax.f32 %v6832_v59, %v6846_v44  ;;  %v6859_v25 = vmax.f32 %v6831_v38, %v6845_v9  ;;  %v6494_v2 = vpop.f32.mrb[38].mxu0 }
 0x340   : > { %v6861_v8 = vmax.f32 %v6833_v27, %v6847_v56  ;;  %v6884_v1 = vadd.f32 %v14227_v23, %v6858_v35  ;;  %v6851_v22 = vmax.f32 %v6482_v18, %v6494_v2  ;;  %v6607_v36 = vpop.f32.mrb[38].mxu1  ;;  %v6496_v29 = vpop.f32.mrb[39].mxu0 }
 0x341   : > { %v6885_v40 = vadd.f32 %v14227_v23, %v6859_v25  ;;  %v6886_v20 = vadd.f32 %v14227_v23, %v6860_v15  ;;  %v6853_v54 = vmax.f32 %v6595_v31, %v6607_v36  ;;  %v6852_v4 = vmax.f32 %v6484_v45, %v6496_v29  ;;  %v6609_v41 = vpop.f32.mrb[39].mxu1 }
 0x342   : > { %v6887_v49 = vadd.f32 %v14227_v23, %v6861_v8  ;;  %v6898_v24 = vmax.f32 %v6884_v1, 0.0  ;;  %v6865_v50 = vmax.f32 %v6837_v0, %v6851_v22  ;;  %v6854_v52 = vmax.f32 %v6597_v47, %v6609_v41 }
 0x343   : > { %v6899_v63 = vmax.f32 %v6885_v40, 0.0  ;;  %v6900_v32 = vmax.f32 %v6886_v20, 0.0  ;;  %v6867_v39 = vmax.f32 %v6839_v48, %v6853_v54  ;;  %v6866_v11 = vmax.f32 %v6838_v12, %v6852_v4  ;;  %v14235_v13 = vpop.f32.mrb[40].mxu0 }
 0x344   : > { %v6901_v6 = vmax.f32 %v6887_v49, 0.0  ;;  %6912 = vst [vmem:[%s11318_s22 + $0x230] sm:$0xff] %v6898_v24  ;;  %v6868_v28 = vmax.f32 %v6840_v51, %v6854_v52  ;;  %v6891_v16 = vadd.f32 %v14232_v17, %v6865_v50  ;;  %v9730_v53 = vpop.f32.mrb[40].mxu1  ;;  %v6680_v61 = vpop.f32.mrb[41].mxu0 }
 0x345   : > { %6913 = vst [vmem:[%s11318_s22 + $0x238] sm:$0xff] %v6899_v63  ;;  %6914 = vst [vmem:[%s11318_s22 + $0x240] sm:$0xff] %v6900_v32  ;;  %v6892_v14 = vadd.f32 %v14232_v17, %v6866_v11  ;;  %v6893_v46 = vadd.f32 %v14232_v17, %v6867_v39  ;;  %v6791_v62 = vpop.f32.mrb[41].mxu1 }
 0x346   : > { %6915 = vst [vmem:[%s11318_s22 + $0x248] sm:$0xff] %v6901_v6  ;;  %v6894_v33 = vadd.f32 %v14232_v17, %v6868_v28  ;;  %v6905_v60 = vmax.f32 %v6891_v16, 0.0 }
 0x347   : > { %v6906_v10 = vmax.f32 %v6892_v14, 0.0  ;;  %v6907_v59 = vmax.f32 %v6893_v46, 0.0  ;;  %v6684_v38 = vpop.f32.mrb[42].mxu0 }
 0x348   : > { %v6908_v5 = vmax.f32 %v6894_v33, 0.0  ;;  %6919 = vst [vmem:[%s11318_s22 + $0x540] sm:$0xff] %v6905_v60  ;;  %v9733_v27 = vpop.f32.mrb[42].mxu1  ;;  %v6686_v57 = vpop.f32.mrb[43].mxu0 }
 0x349   : > { %6920 = vst [vmem:[%s11318_s22 + $0x548] sm:$0xff] %v6906_v10  ;;  %6921 = vst [vmem:[%s11318_s22 + $0x550] sm:$0xff] %v6907_v59  ;;  %v6843_v0 = vmax.f32 %v9730_v53, %v9733_v27  ;;  %v6801_v58 = vpop.f32.mrb[43].mxu1 }
 0x34a   : > { %6922 = vst [vmem:[%s11318_s22 + $0x558] sm:$0xff] %v6908_v5  ;;  %v6836_v37 = vmax.f32 %v6791_v62, %v6801_v58 }
 0x34b   : > { %v6690_v48 = vpop.f32.mrb[44].mxu0 }
 0x34c   : > { %v6834_v12 = vmax.f32 %v14235_v13, %v6690_v48  ;;  %v9736_v26 = vpop.f32.mrb[44].mxu1  ;;  %v6692_v51 = vpop.f32.mrb[45].mxu0 }
 0x34d   : > { %v6835_v34 = vmax.f32 %v6680_v61, %v6692_v51  ;;  %v6811_v42 = vpop.f32.mrb[45].mxu1 }
 0x34f   : > { %v6696_v7 = vpop.f32.mrb[46].mxu0 }
 0x350   : > { %v6841_v19 = vmax.f32 %v6684_v38, %v6696_v7  ;;  %v9739_v18 = vpop.f32.mrb[46].mxu1  ;;  %v6698_v31 = vpop.f32.mrb[47].mxu0 }
 0x351   : > { %v6857_v45 = vmax.f32 %v9736_v26, %v9739_v18  ;;  %v6842_v47 = vmax.f32 %v6686_v57, %v6698_v31  ;;  %v6821_v43 = vpop.f32.mrb[47].mxu1  ;;  %v14281_v18 = vpop.permute.xlu0 %7490 }
 0x352   : > { %v6850_v3 = vmax.f32 %v6811_v42, %v6821_v43 }
 0x353   : > { %v6871_v55 = vmax.f32 %v6843_v0, %v6857_v45  ;;  %v6702_v21 = vpop.f32.mrb[48].mxu0 }
 0x354   : > { %v6864_v44 = vmax.f32 %v6836_v37, %v6850_v3  ;;  %v14250_v9 = vpop.f32.mrb[48].mxu1  ;;  %v6704_v30 = vpop.f32.mrb[49].mxu0 }
 0x355   : > { %v6897_v35 = vadd.f32 %v14232_v17, %v6871_v55  ;;  %v7068_v56 = vpop.f32.mrb[49].mxu1 }
 0x356   : > { %v6890_v15 = vadd.f32 %v14227_v23, %v6864_v44 }
 0x357   : > { %v6911_v25 = vmax.f32 %v6897_v35, 0.0  ;;  %v6708_v2 = vpop.f32.mrb[50].mxu0 }
 0x358   : > { %v6904_v8 = vmax.f32 %v6890_v15, 0.0  ;;  %v14254_v1 = vpop.f32.mrb[50].mxu1  ;;  %v6710_v22 = vpop.f32.mrb[51].mxu0 }
 0x359   : > { %6925 = vst [vmem:[%s11318_s22 + $0x570] sm:$0xff] %v6911_v25  ;;  %v14257_v36 = vpop.f32.mrb[51].mxu1  ;;  %v14287_v15 = vpop.permute.xlu1 %7495 }
 0x35a   : > { %6918 = vst [vmem:[%s11318_s22 + $0x260] sm:$0xff] %v6904_v8 }
 0x35b   : > { %v6714_v29 = vpop.f32.mrb[52].mxu0 }
 0x35c   : > { %v6848_v40 = vmax.f32 %v6702_v21, %v6714_v29  ;;  %v7078_v20 = vpop.f32.mrb[52].mxu1  ;;  %v6716_v54 = vpop.f32.mrb[53].mxu0 }
 0x35d   : > { %v7444_v4 = vmax.f32 %v14250_v9, %v7078_v20  ;;  %v6849_v41 = vmax.f32 %v6704_v30, %v6716_v54  ;;  %v7080_v49 = vpop.f32.mrb[53].mxu1 }
 0x35e   : > { %v6862_v24 = vmax.f32 %v6834_v12, %v6848_v40  ;;  %v7445_v50 = vmax.f32 %v7068_v56, %v7080_v49 }
 0x35f   : > { %v6863_v52 = vmax.f32 %v6835_v34, %v6849_v41  ;;  %v6720_v63 = vpop.f32.mrb[54].mxu0 }
 0x360   : > { %v6888_v32 = vadd.f32 %v14227_v23, %v6862_v24  ;;  %v6855_v39 = vmax.f32 %v6708_v2, %v6720_v63  ;;  %v7084_v11 = vpop.f32.mrb[54].mxu1  ;;  %v6722_v13 = vpop.f32.mrb[55].mxu0 }
 0x361   : > { %v6889_v6 = vadd.f32 %v14227_v23, %v6863_v52  ;;  %v7451_v28 = vmax.f32 %v14254_v1, %v7084_v11  ;;  %v6856_v16 = vmax.f32 %v6710_v22, %v6722_v13  ;;  %v7086_v53 = vpop.f32.mrb[55].mxu1 }
 0x362   : > { %v6902_v61 = vmax.f32 %v6888_v32, 0.0  ;;  %v6869_v14 = vmax.f32 %v6841_v19, %v6855_v39  ;;  %v7452_v46 = vmax.f32 %v14257_v36, %v7086_v53 }
 0x363   : > { %v6903_v62 = vmax.f32 %v6889_v6, 0.0  ;;  %v6870_v33 = vmax.f32 %v6842_v47, %v6856_v16  ;;  %v14265_v60 = vpop.f32.mrb[56].mxu0 }
 0x364   : > { %6916 = vst [vmem:[%s11318_s22 + $0x250] sm:$0xff] %v6902_v61  ;;  %v6895_v10 = vadd.f32 %v14232_v17, %v6869_v14  ;;  %v7090_v59 = vpop.f32.mrb[56].mxu1  ;;  %v14269_v38 = vpop.f32.mrb[57].mxu0 }
 0x365   : > { %6917 = vst [vmem:[%s11318_s22 + $0x258] sm:$0xff] %v6903_v62  ;;  %v6896_v23 = vadd.f32 %v14232_v17, %v6870_v33  ;;  %v7092_v5 = vpop.f32.mrb[57].mxu1 }
 0x366   : > { %v6909_v27 = vmax.f32 %v6895_v10, 0.0 }
 0x367   : > { %v6910_v57 = vmax.f32 %v6896_v23, 0.0  ;;  %v14273_v0 = vpop.f32.mrb[58].mxu0 }
 0x368   : > { %6923 = vst [vmem:[%s11318_s22 + $0x560] sm:$0xff] %v6909_v27  ;;  %v7096_v58 = vpop.f32.mrb[58].mxu1  ;;  %v14276_v37 = vpop.f32.mrb[59].mxu0 }
 0x369   : > { %6924 = vst [vmem:[%s11318_s22 + $0x568] sm:$0xff] %v6910_v57  ;;  %v7098_v48 = vpop.f32.mrb[59].mxu1 }
 0x36b   : > { %v7191_v12 = vpop.f32.mrb[60].mxu0 }
 0x36c   : > { %v7102_v26 = vpop.f32.mrb[60].mxu1  ;;  %v7446_v51 = vmax.f32 %v14265_v60, %v7191_v12  ;;  %v7193_v34 = vpop.f32.mrb[61].mxu0 }
 0x36d   : > { %v7458_v42 = vmax.f32 %v7090_v59, %v7102_v26  ;;  %v7104_v7 = vpop.f32.mrb[61].mxu1  ;;  %v7447_v17 = vmax.f32 %v14269_v38, %v7193_v34 }
 0x36e   : > { %v7459_v19 = vmax.f32 %v7092_v5, %v7104_v7 }
 0x36f   : > { %v7472_v31 = vmax.f32 %v7444_v4, %v7458_v42  ;;  %v7197_v45 = vpop.f32.mrb[62].mxu0 }
 0x370   : > { %v7473_v47 = vmax.f32 %v7445_v50, %v7459_v19  ;;  %v7108_v43 = vpop.f32.mrb[62].mxu1  ;;  %v7453_v3 = vmax.f32 %v14273_v0, %v7197_v45  ;;  %v7199_v55 = vpop.f32.mrb[63].mxu0 }
 0x371   : > { %v7498_v21 = vadd.f32 %v14281_v18, %v7472_v31  ;;  %v7465_v44 = vmax.f32 %v7096_v58, %v7108_v43  ;;  %v7110_v9 = vpop.f32.mrb[63].mxu1  ;;  %v7454_v30 = vmax.f32 %v14276_v37, %v7199_v55 }
 0x372   : > { %v7499_v35 = vadd.f32 %v14281_v18, %v7473_v47  ;;  %v7466_v56 = vmax.f32 %v7098_v48, %v7110_v9 }
 0x373   : > { %v7512_v25 = vmax.f32 %v7498_v21, 0.0  ;;  %v7479_v2 = vmax.f32 %v7451_v28, %v7465_v44  ;;  %v7203_v8 = vpop.f32.mrb[64].mxu0 }
 0x374   : > { %v7513_v1 = vmax.f32 %v7499_v35, 0.0  ;;  %v7480_v22 = vmax.f32 %v7452_v46, %v7466_v56  ;;  %v14289_v36 = vpop.f32.mrb[64].mxu1  ;;  %v7205_v29 = vpop.f32.mrb[65].mxu0 }
 0x375   : > { %7526 = vst [vmem:[%s11318_s22 + $0x268] sm:$0xff] %v7512_v25  ;;  %v7505_v40 = vadd.f32 %v14287_v15, %v7479_v2  ;;  %v7294_v20 = vpop.f32.mrb[65].mxu1 }
 0x376   : > { %7527 = vst [vmem:[%s11318_s22 + $0x270] sm:$0xff] %v7513_v1  ;;  %v7506_v54 = vadd.f32 %v14287_v15, %v7480_v22 }
 0x377   : > { %v7519_v4 = vmax.f32 %v7505_v40, 0.0  ;;  %v7209_v41 = vpop.f32.mrb[66].mxu0 }
 0x378   : > { %v7520_v49 = vmax.f32 %v7506_v54, 0.0  ;;  %v14295_v24 = vpop.f32.mrb[66].mxu1  ;;  %v7211_v50 = vpop.f32.mrb[67].mxu0 }
 0x379   : > { %7533 = vst [vmem:[%s11318_s22 + $0x578] sm:$0xff] %v7519_v4  ;;  %v14298_v52 = vpop.f32.mrb[67].mxu1 }
 0x37a   : > { %7534 = vst [vmem:[%s11318_s22 + $0x580] sm:$0xff] %v7520_v49 }
 0x37b   : > { %v7215_v63 = vpop.f32.mrb[68].mxu0 }
 0x37c   : > { %v7460_v32 = vmax.f32 %v7203_v8, %v7215_v63  ;;  %v7304_v39 = vpop.f32.mrb[68].mxu1  ;;  %v7217_v11 = vpop.f32.mrb[69].mxu0 }
 0x37d   : > { %v7448_v13 = vmax.f32 %v14289_v36, %v7304_v39  ;;  %v7461_v6 = vmax.f32 %v7205_v29, %v7217_v11  ;;  %v7306_v28 = vpop.f32.mrb[69].mxu1 }
 0x37e   : > { %v7474_v16 = vmax.f32 %v7446_v51, %v7460_v32  ;;  %v7449_v53 = vmax.f32 %v7294_v20, %v7306_v28 }
 0x37f   : > { %v7475_v61 = vmax.f32 %v7447_v17, %v7461_v6  ;;  %v7221_v14 = vpop.f32.mrb[70].mxu0 }
 0x380   : > { %v7500_v46 = vadd.f32 %v14281_v18, %v7474_v16  ;;  %v7467_v62 = vmax.f32 %v7209_v41, %v7221_v14  ;;  %v7310_v33 = vpop.f32.mrb[70].mxu1  ;;  %v7223_v60 = vpop.f32.mrb[71].mxu0 }
 0x381   : > { %v7501_v10 = vadd.f32 %v14281_v18, %v7475_v61  ;;  %v7455_v59 = vmax.f32 %v14295_v24, %v7310_v33  ;;  %v7468_v38 = vmax.f32 %v7211_v50, %v7223_v60  ;;  %v7312_v23 = vpop.f32.mrb[71].mxu1 }
 0x382   : > { %v7514_v5 = vmax.f32 %v7500_v46, 0.0  ;;  %v7481_v27 = vmax.f32 %v7453_v3, %v7467_v62  ;;  %v7456_v57 = vmax.f32 %v14298_v52, %v7312_v23 }
 0x383   : > { %v7515_v0 = vmax.f32 %v7501_v10, 0.0  ;;  %v7482_v58 = vmax.f32 %v7454_v30, %v7468_v38  ;;  %v9754_v37 = vpop.f32.mrb[72].mxu0 }
 0x384   : > { %7528 = vst [vmem:[%s11318_s22 + $0x278] sm:$0xff] %v7514_v5  ;;  %v7507_v48 = vadd.f32 %v14287_v15, %v7481_v27  ;;  %v7316_v12 = vpop.f32.mrb[72].mxu1  ;;  %v7405_v26 = vpop.f32.mrb[73].mxu0 }
 0x385   : > { %7529 = vst [vmem:[%s11318_s22 + $0x280] sm:$0xff] %v7515_v0  ;;  %v7508_v51 = vadd.f32 %v14287_v15, %v7482_v58  ;;  %v7318_v34 = vpop.f32.mrb[73].mxu1 }
 0x386   : > { %v7521_v42 = vmax.f32 %v7507_v48, 0.0 }
 0x387   : > { %v7522_v7 = vmax.f32 %v7508_v51, 0.0  ;;  %v9757_v17 = vpop.f32.mrb[74].mxu0 }
 0x388   : > { %7535 = vst [vmem:[%s11318_s22 + $0x588] sm:$0xff] %v7521_v42  ;;  %v7322_v19 = vpop.f32.mrb[74].mxu1  ;;  %v7457_v31 = vmax.f32 %v9754_v37, %v9757_v17  ;;  %v7415_v45 = vpop.f32.mrb[75].mxu0 }
 0x389   : > { %7536 = vst [vmem:[%s11318_s22 + $0x590] sm:$0xff] %v7522_v7  ;;  %v7324_v47 = vpop.f32.mrb[75].mxu1  ;;  %v7450_v43 = vmax.f32 %v7405_v26, %v7415_v45 }
 0x38b   : > { %v9760_v3 = vpop.f32.mrb[76].mxu0 }
 0x38c   : > { %v7328_v55 = vpop.f32.mrb[76].mxu1  ;;  %v7425_v21 = vpop.f32.mrb[77].mxu0 }
 0x38d   : > { %v7462_v44 = vmax.f32 %v7316_v12, %v7328_v55  ;;  %v7330_v9 = vpop.f32.mrb[77].mxu1 }
 0x38e   : > { %v7463_v30 = vmax.f32 %v7318_v34, %v7330_v9 }
 0x38f   : > { %v7476_v35 = vmax.f32 %v7448_v13, %v7462_v44  ;;  %v9763_v56 = vpop.f32.mrb[78].mxu0 }
 0x390   : > { %v7477_v25 = vmax.f32 %v7449_v53, %v7463_v30  ;;  %v7334_v2 = vpop.f32.mrb[78].mxu1  ;;  %v7471_v8 = vmax.f32 %v9760_v3, %v9763_v56  ;;  %v7435_v1 = vpop.f32.mrb[79].mxu0 }
 0x391   : > { %v7502_v22 = vadd.f32 %v14281_v18, %v7476_v35  ;;  %v7469_v36 = vmax.f32 %v7322_v19, %v7334_v2  ;;  %v7336_v29 = vpop.f32.mrb[79].mxu1  ;;  %v7464_v40 = vmax.f32 %v7425_v21, %v7435_v1  ;;  %v14324_v56 = vpop.permute.xlu0 %8104 }
 0x392   : > { %v7503_v20 = vadd.f32 %v14281_v18, %v7477_v25  ;;  %v7485_v54 = vmax.f32 %v7457_v31, %v7471_v8  ;;  %v7470_v4 = vmax.f32 %v7324_v47, %v7336_v29 }
 0x393   : > { %v7516_v41 = vmax.f32 %v7502_v22, 0.0  ;;  %v7483_v49 = vmax.f32 %v7455_v59, %v7469_v36  ;;  %v7478_v24 = vmax.f32 %v7450_v43, %v7464_v40  ;;  %v7680_v50 = vpop.f32.mrb[80].mxu0 }
 0x394   : > { %v7517_v52 = vmax.f32 %v7503_v20, 0.0  ;;  %v7511_v63 = vadd.f32 %v14287_v15, %v7485_v54  ;;  %v7484_v32 = vmax.f32 %v7456_v57, %v7470_v4  ;;  %v7793_v39 = vpop.f32.mrb[80].mxu1  ;;  %v7682_v11 = vpop.f32.mrb[81].mxu0 }
 0x395   : > { %7530 = vst [vmem:[%s11318_s22 + $0x288] sm:$0xff] %v7516_v41  ;;  %v7509_v13 = vadd.f32 %v14287_v15, %v7483_v49  ;;  %v7504_v6 = vadd.f32 %v14281_v18, %v7478_v24  ;;  %v7795_v28 = vpop.f32.mrb[81].mxu1 }
 0x396   : > { %7531 = vst [vmem:[%s11318_s22 + $0x290] sm:$0xff] %v7517_v52  ;;  %v7525_v16 = vmax.f32 %v7511_v63, 0.0  ;;  %v7510_v53 = vadd.f32 %v14287_v15, %v7484_v32  ;;  %v14329_v52 = vpop.permute.xlu1 %8109 }
 0x397   : > { %v7523_v61 = vmax.f32 %v7509_v13, 0.0  ;;  %v7518_v14 = vmax.f32 %v7504_v6, 0.0  ;;  %v7686_v46 = vpop.f32.mrb[82].mxu0 }
 0x398   : > { %7539 = vst [vmem:[%s11318_s22 + $0x5a8] sm:$0xff] %v7525_v16  ;;  %v7524_v62 = vmax.f32 %v7510_v53, 0.0  ;;  %v7799_v33 = vpop.f32.mrb[82].mxu1  ;;  %v7688_v60 = vpop.f32.mrb[83].mxu0 }
 0x399   : > { %7537 = vst [vmem:[%s11318_s22 + $0x598] sm:$0xff] %v7523_v61  ;;  %7532 = vst [vmem:[%s11318_s22 + $0x298] sm:$0xff] %v7518_v14  ;;  %v7801_v10 = vpop.f32.mrb[83].mxu1 }
 0x39a   : > { %7538 = vst [vmem:[%s11318_s22 + $0x5a0] sm:$0xff] %v7524_v62 }
 0x39b   : > { %v7692_v59 = vpop.f32.mrb[84].mxu0 }
 0x39c   : > { %v8058_v38 = vmax.f32 %v7680_v50, %v7692_v59  ;;  %v7805_v23 = vpop.f32.mrb[84].mxu1  ;;  %v7694_v18 = vpop.f32.mrb[85].mxu0 }
 0x39d   : > { %v8060_v5 = vmax.f32 %v7793_v39, %v7805_v23  ;;  %v8059_v27 = vmax.f32 %v7682_v11, %v7694_v18  ;;  %v7807_v57 = vpop.f32.mrb[85].mxu1 }
 0x39e   : > { %v8061_v0 = vmax.f32 %v7795_v28, %v7807_v57 }
 0x39f   : > { %v7698_v15 = vpop.f32.mrb[86].mxu0 }
 0x3a0   : > { %v8065_v58 = vmax.f32 %v7686_v46, %v7698_v15  ;;  %v7811_v37 = vpop.f32.mrb[86].mxu1  ;;  %v7700_v48 = vpop.f32.mrb[87].mxu0 }
 0x3a1   : > { %v8067_v12 = vmax.f32 %v7799_v33, %v7811_v37  ;;  %v8066_v26 = vmax.f32 %v7688_v60, %v7700_v48  ;;  %v7813_v51 = vpop.f32.mrb[87].mxu1 }
 0x3a2   : > { %v8068_v34 = vmax.f32 %v7801_v10, %v7813_v51 }
 0x3a3   : > { %v7704_v42 = vpop.f32.mrb[88].mxu0 }
 0x3a4   : > { %v7817_v7 = vpop.f32.mrb[88].mxu1  ;;  %v7706_v17 = vpop.f32.mrb[89].mxu0 }
 0x3a5   : > { %v7819_v19 = vpop.f32.mrb[89].mxu1 }
 0x3a7   : > { %v7710_v31 = vpop.f32.mrb[90].mxu0 }
 0x3a8   : > { %v7823_v45 = vpop.f32.mrb[90].mxu1  ;;  %v7712_v47 = vpop.f32.mrb[91].mxu0 }
 0x3a9   : > { %v7825_v43 = vpop.f32.mrb[91].mxu1 }
 0x3ab   : > { %v7716_v3 = vpop.f32.mrb[92].mxu0 }
 0x3ac   : > { %v8072_v55 = vmax.f32 %v7704_v42, %v7716_v3  ;;  %v7829_v21 = vpop.f32.mrb[92].mxu1  ;;  %v7718_v44 = vpop.f32.mrb[93].mxu0 }
 0x3ad   : > { %v8074_v9 = vmax.f32 %v7817_v7, %v7829_v21  ;;  %v8073_v30 = vmax.f32 %v7706_v17, %v7718_v44  ;;  %v7831_v35 = vpop.f32.mrb[93].mxu1 }
 0x3ae   : > { %v8086_v25 = vmax.f32 %v8058_v38, %v8072_v55  ;;  %v8075_v2 = vmax.f32 %v7819_v19, %v7831_v35 }
 0x3af   : > { %v8088_v8 = vmax.f32 %v8060_v5, %v8074_v9  ;;  %v8087_v1 = vmax.f32 %v8059_v27, %v8073_v30  ;;  %v7722_v22 = vpop.f32.mrb[94].mxu0 }
 0x3b0   : > { %v8089_v36 = vmax.f32 %v8061_v0, %v8075_v2  ;;  %v8112_v29 = vadd.f32 %v14324_v56, %v8086_v25  ;;  %v8079_v40 = vmax.f32 %v7710_v31, %v7722_v22  ;;  %v7835_v20 = vpop.f32.mrb[94].mxu1  ;;  %v7724_v54 = vpop.f32.mrb[95].mxu0 }
 0x3b1   : > { %v8113_v4 = vadd.f32 %v14324_v56, %v8087_v1  ;;  %v8114_v41 = vadd.f32 %v14324_v56, %v8088_v8  ;;  %v8081_v49 = vmax.f32 %v7823_v45, %v7835_v20  ;;  %v8080_v24 = vmax.f32 %v7712_v47, %v7724_v54  ;;  %v7837_v50 = vpop.f32.mrb[95].mxu1 }
 0x3b2   : > { %v8115_v63 = vadd.f32 %v14324_v56, %v8089_v36  ;;  %v8126_v32 = vmax.f32 %v8112_v29, 0.0  ;;  %v8093_v39 = vmax.f32 %v8065_v58, %v8079_v40  ;;  %v8082_v11 = vmax.f32 %v7825_v43, %v7837_v50 }
 0x3b3   : > { %v8127_v13 = vmax.f32 %v8113_v4, 0.0  ;;  %v8128_v6 = vmax.f32 %v8114_v41, 0.0  ;;  %v8095_v28 = vmax.f32 %v8067_v12, %v8081_v49  ;;  %v8094_v16 = vmax.f32 %v8066_v26, %v8080_v24  ;;  %v14332_v53 = vpop.f32.mrb[96].mxu0 }
 0x3b4   : > { %v8129_v61 = vmax.f32 %v8115_v63, 0.0  ;;  %8140 = vst [vmem:[%s11318_s22 + $0x2a0] sm:$0xff] %v8126_v32  ;;  %v8096_v14 = vmax.f32 %v8068_v34, %v8082_v11  ;;  %v8119_v46 = vadd.f32 %v14329_v52, %v8093_v39  ;;  %v9778_v62 = vpop.f32.mrb[96].mxu1  ;;  %v7908_v33 = vpop.f32.mrb[97].mxu0 }
 0x3b5   : > { %8141 = vst [vmem:[%s11318_s22 + $0x2a8] sm:$0xff] %v8127_v13  ;;  %8142 = vst [vmem:[%s11318_s22 + $0x2b0] sm:$0xff] %v8128_v6  ;;  %v8120_v60 = vadd.f32 %v14329_v52, %v8094_v16  ;;  %v8121_v10 = vadd.f32 %v14329_v52, %v8095_v28  ;;  %v8019_v59 = vpop.f32.mrb[97].mxu1 }
 0x3b6   : > { %8143 = vst [vmem:[%s11318_s22 + $0x2b8] sm:$0xff] %v8129_v61  ;;  %v8122_v38 = vadd.f32 %v14329_v52, %v8096_v14  ;;  %v8133_v23 = vmax.f32 %v8119_v46, 0.0 }
 0x3b7   : > { %v8134_v18 = vmax.f32 %v8120_v60, 0.0  ;;  %v8135_v5 = vmax.f32 %v8121_v10, 0.0  ;;  %v7912_v27 = vpop.f32.mrb[98].mxu0 }
 0x3b8   : > { %v8136_v57 = vmax.f32 %v8122_v38, 0.0  ;;  %8147 = vst [vmem:[%s11318_s22 + $0x5b0] sm:$0xff] %v8133_v23  ;;  %v9781_v0 = vpop.f32.mrb[98].mxu1  ;;  %v7914_v15 = vpop.f32.mrb[99].mxu0 }
 0x3b9   : > { %8148 = vst [vmem:[%s11318_s22 + $0x5b8] sm:$0xff] %v8134_v18  ;;  %8149 = vst [vmem:[%s11318_s22 + $0x5c0] sm:$0xff] %v8135_v5  ;;  %v8071_v58 = vmax.f32 %v9778_v62, %v9781_v0  ;;  %v8029_v37 = vpop.f32.mrb[99].mxu1 }
 0x3ba   : > { %8150 = vst [vmem:[%s11318_s22 + $0x5c8] sm:$0xff] %v8136_v57  ;;  %v8064_v48 = vmax.f32 %v8019_v59, %v8029_v37 }
 0x3bb   : > { %v7918_v12 = vpop.f32.mrb[100].mxu0 }
 0x3bc   : > { %v8062_v26 = vmax.f32 %v14332_v53, %v7918_v12  ;;  %v9784_v51 = vpop.f32.mrb[100].mxu1  ;;  %v7920_v34 = vpop.f32.mrb[101].mxu0 }
 0x3bd   : > { %v8063_v42 = vmax.f32 %v7908_v33, %v7920_v34  ;;  %v8039_v7 = vpop.f32.mrb[101].mxu1 }
 0x3bf   : > { %v7924_v17 = vpop.f32.mrb[102].mxu0 }
 0x3c0   : > { %v8069_v19 = vmax.f32 %v7912_v27, %v7924_v17  ;;  %v9787_v31 = vpop.f32.mrb[102].mxu1  ;;  %v7926_v45 = vpop.f32.mrb[103].mxu0 }
 0x3c1   : > { %v8085_v47 = vmax.f32 %v9784_v51, %v9787_v31  ;;  %v8070_v43 = vmax.f32 %v7914_v15, %v7926_v45  ;;  %v8049_v3 = vpop.f32.mrb[103].mxu1  ;;  %v14378_v31 = vpop.permute.xlu0 %8718 }
 0x3c2   : > { %v8078_v55 = vmax.f32 %v8039_v7, %v8049_v3 }
 0x3c3   : > { %v8099_v21 = vmax.f32 %v8071_v58, %v8085_v47  ;;  %v7930_v44 = vpop.f32.mrb[104].mxu0 }
 0x3c4   : > { %v8092_v9 = vmax.f32 %v8064_v48, %v8078_v55  ;;  %v14347_v30 = vpop.f32.mrb[104].mxu1  ;;  %v7932_v35 = vpop.f32.mrb[105].mxu0 }
 0x3c5   : > { %v8125_v25 = vadd.f32 %v14329_v52, %v8099_v21  ;;  %v8296_v2 = vpop.f32.mrb[105].mxu1 }
 0x3c6   : > { %v8118_v8 = vadd.f32 %v14324_v56, %v8092_v9 }
 0x3c7   : > { %v8139_v1 = vmax.f32 %v8125_v25, 0.0  ;;  %v7936_v22 = vpop.f32.mrb[106].mxu0 }
 0x3c8   : > { %v8132_v36 = vmax.f32 %v8118_v8, 0.0  ;;  %v14351_v29 = vpop.f32.mrb[106].mxu1  ;;  %v7938_v40 = vpop.f32.mrb[107].mxu0 }
 0x3c9   : > { %8153 = vst [vmem:[%s11318_s22 + $0x5e0] sm:$0xff] %v8139_v1  ;;  %v14354_v20 = vpop.f32.mrb[107].mxu1  ;;  %v14384_v8 = vpop.permute.xlu1 %8723 }
 0x3ca   : > { %8146 = vst [vmem:[%s11318_s22 + $0x2d0] sm:$0xff] %v8132_v36 }
 0x3cb   : > { %v7942_v54 = vpop.f32.mrb[108].mxu0 }
 0x3cc   : > { %v8076_v4 = vmax.f32 %v7930_v44, %v7942_v54  ;;  %v8306_v41 = vpop.f32.mrb[108].mxu1  ;;  %v7944_v49 = vpop.f32.mrb[109].mxu0 }
 0x3cd   : > { %v8672_v24 = vmax.f32 %v14347_v30, %v8306_v41  ;;  %v8077_v50 = vmax.f32 %v7932_v35, %v7944_v49  ;;  %v8308_v63 = vpop.f32.mrb[109].mxu1 }
 0x3ce   : > { %v8090_v32 = vmax.f32 %v8062_v26, %v8076_v4  ;;  %v8673_v39 = vmax.f32 %v8296_v2, %v8308_v63 }
 0x3cf   : > { %v8091_v11 = vmax.f32 %v8063_v42, %v8077_v50  ;;  %v7948_v13 = vpop.f32.mrb[110].mxu0 }
 0x3d0   : > { %v8116_v6 = vadd.f32 %v14324_v56, %v8090_v32  ;;  %v8083_v28 = vmax.f32 %v7936_v22, %v7948_v13  ;;  %v8312_v16 = vpop.f32.mrb[110].mxu1  ;;  %v7950_v53 = vpop.f32.mrb[111].mxu0 }
 0x3d1   : > { %v8117_v61 = vadd.f32 %v14324_v56, %v8091_v11  ;;  %v8679_v14 = vmax.f32 %v14351_v29, %v8312_v16  ;;  %v8084_v46 = vmax.f32 %v7938_v40, %v7950_v53  ;;  %v8314_v62 = vpop.f32.mrb[111].mxu1 }
 0x3d2   : > { %v8130_v33 = vmax.f32 %v8116_v6, 0.0  ;;  %v8097_v60 = vmax.f32 %v8069_v19, %v8083_v28  ;;  %v8680_v10 = vmax.f32 %v14354_v20, %v8314_v62 }
 0x3d3   : > { %v8131_v59 = vmax.f32 %v8117_v61, 0.0  ;;  %v8098_v38 = vmax.f32 %v8070_v43, %v8084_v46  ;;  %v14362_v23 = vpop.f32.mrb[112].mxu0 }
 0x3d4   : > { %8144 = vst [vmem:[%s11318_s22 + $0x2c0] sm:$0xff] %v8130_v33  ;;  %v8123_v18 = vadd.f32 %v14329_v52, %v8097_v60  ;;  %v8318_v5 = vpop.f32.mrb[112].mxu1  ;;  %v14366_v27 = vpop.f32.mrb[113].mxu0 }
 0x3d5   : > { %8145 = vst [vmem:[%s11318_s22 + $0x2c8] sm:$0xff] %v8131_v59  ;;  %v8124_v56 = vadd.f32 %v14329_v52, %v8098_v38  ;;  %v8320_v57 = vpop.f32.mrb[113].mxu1 }
 0x3d6   : > { %v8137_v0 = vmax.f32 %v8123_v18, 0.0 }
 0x3d7   : > { %v8138_v15 = vmax.f32 %v8124_v56, 0.0  ;;  %v14370_v58 = vpop.f32.mrb[114].mxu0 }
 0x3d8   : > { %8151 = vst [vmem:[%s11318_s22 + $0x5d0] sm:$0xff] %v8137_v0  ;;  %v8324_v37 = vpop.f32.mrb[114].mxu1  ;;  %v14373_v48 = vpop.f32.mrb[115].mxu0 }
 0x3d9   : > { %8152 = vst [vmem:[%s11318_s22 + $0x5d8] sm:$0xff] %v8138_v15  ;;  %v8326_v12 = vpop.f32.mrb[115].mxu1 }
 0x3db   : > { %v8419_v26 = vpop.f32.mrb[116].mxu0 }
 0x3dc   : > { %v8330_v51 = vpop.f32.mrb[116].mxu1  ;;  %v8674_v34 = vmax.f32 %v14362_v23, %v8419_v26  ;;  %v8421_v42 = vpop.f32.mrb[117].mxu0 }
 0x3dd   : > { %v8686_v7 = vmax.f32 %v8318_v5, %v8330_v51  ;;  %v8332_v17 = vpop.f32.mrb[117].mxu1  ;;  %v8675_v52 = vmax.f32 %v14366_v27, %v8421_v42 }
 0x3de   : > { %v8687_v19 = vmax.f32 %v8320_v57, %v8332_v17 }
 0x3df   : > { %v8700_v45 = vmax.f32 %v8672_v24, %v8686_v7  ;;  %v8425_v47 = vpop.f32.mrb[118].mxu0 }
 0x3e0   : > { %v8701_v43 = vmax.f32 %v8673_v39, %v8687_v19  ;;  %v8336_v3 = vpop.f32.mrb[118].mxu1  ;;  %v8681_v55 = vmax.f32 %v14370_v58, %v8425_v47  ;;  %v8427_v21 = vpop.f32.mrb[119].mxu0 }
 0x3e1   : > { %v8726_v44 = vadd.f32 %v14378_v31, %v8700_v45  ;;  %v8693_v9 = vmax.f32 %v8324_v37, %v8336_v3  ;;  %v8338_v30 = vpop.f32.mrb[119].mxu1  ;;  %v8682_v35 = vmax.f32 %v14373_v48, %v8427_v21 }
 0x3e2   : > { %v8727_v25 = vadd.f32 %v14378_v31, %v8701_v43  ;;  %v8694_v2 = vmax.f32 %v8326_v12, %v8338_v30 }
 0x3e3   : > { %v8740_v1 = vmax.f32 %v8726_v44, 0.0  ;;  %v8707_v22 = vmax.f32 %v8679_v14, %v8693_v9  ;;  %v8431_v36 = vpop.f32.mrb[120].mxu0 }
 0x3e4   : > { %v8741_v29 = vmax.f32 %v8727_v25, 0.0  ;;  %v8708_v40 = vmax.f32 %v8680_v10, %v8694_v2  ;;  %v14386_v20 = vpop.f32.mrb[120].mxu1  ;;  %v8433_v54 = vpop.f32.mrb[121].mxu0 }
 0x3e5   : > { %8754 = vst [vmem:[%s11318_s22 + $0x2d8] sm:$0xff] %v8740_v1  ;;  %v8733_v4 = vadd.f32 %v14384_v8, %v8707_v22  ;;  %v8522_v41 = vpop.f32.mrb[121].mxu1 }
 0x3e6   : > { %8755 = vst [vmem:[%s11318_s22 + $0x2e0] sm:$0xff] %v8741_v29  ;;  %v8734_v49 = vadd.f32 %v14384_v8, %v8708_v40 }
 0x3e7   : > { %v8747_v24 = vmax.f32 %v8733_v4, 0.0  ;;  %v8437_v50 = vpop.f32.mrb[122].mxu0 }
 0x3e8   : > { %v8748_v63 = vmax.f32 %v8734_v49, 0.0  ;;  %v14392_v32 = vpop.f32.mrb[122].mxu1  ;;  %v8439_v39 = vpop.f32.mrb[123].mxu0 }
 0x3e9   : > { %8761 = vst [vmem:[%s11318_s22 + $0x5e8] sm:$0xff] %v8747_v24  ;;  %v14395_v11 = vpop.f32.mrb[123].mxu1 }
 0x3ea   : > { %8762 = vst [vmem:[%s11318_s22 + $0x5f0] sm:$0xff] %v8748_v63 }
 0x3eb   : > { %v8443_v13 = vpop.f32.mrb[124].mxu0 }
 0x3ec   : > { %v8688_v6 = vmax.f32 %v8431_v36, %v8443_v13  ;;  %v8532_v28 = vpop.f32.mrb[124].mxu1  ;;  %v8445_v16 = vpop.f32.mrb[125].mxu0 }
 0x3ed   : > { %v8676_v53 = vmax.f32 %v14386_v20, %v8532_v28  ;;  %v8689_v61 = vmax.f32 %v8433_v54, %v8445_v16  ;;  %v8534_v14 = vpop.f32.mrb[125].mxu1 }
 0x3ee   : > { %v8702_v46 = vmax.f32 %v8674_v34, %v8688_v6  ;;  %v8677_v62 = vmax.f32 %v8522_v41, %v8534_v14 }
 0x3ef   : > { %v8703_v33 = vmax.f32 %v8675_v52, %v8689_v61  ;;  %v8449_v60 = vpop.f32.mrb[126].mxu0 }
 0x3f0   : > { %v8728_v10 = vadd.f32 %v14378_v31, %v8702_v46  ;;  %v8695_v59 = vmax.f32 %v8437_v50, %v8449_v60  ;;  %v8538_v38 = vpop.f32.mrb[126].mxu1  ;;  %v8451_v23 = vpop.f32.mrb[127].mxu0 }
 0x3f1   : > { %v8729_v18 = vadd.f32 %v14378_v31, %v8703_v33  ;;  %v8683_v5 = vmax.f32 %v14392_v32, %v8538_v38  ;;  %v8696_v27 = vmax.f32 %v8439_v39, %v8451_v23  ;;  %v8540_v56 = vpop.f32.mrb[127].mxu1 }
 0x3f2   : > { %v8742_v57 = vmax.f32 %v8728_v10, 0.0  ;;  %v8709_v0 = vmax.f32 %v8681_v55, %v8695_v59  ;;  %v8684_v15 = vmax.f32 %v14395_v11, %v8540_v56 }
 0x3f3   : > { %v8743_v58 = vmax.f32 %v8729_v18, 0.0  ;;  %v8710_v37 = vmax.f32 %v8682_v35, %v8696_v27  ;;  %v9802_v48 = vpop.f32.mrb[128].mxu0 }
 0x3f4   : > { %8756 = vst [vmem:[%s11318_s22 + $0x2e8] sm:$0xff] %v8742_v57  ;;  %v8735_v12 = vadd.f32 %v14384_v8, %v8709_v0  ;;  %v8544_v26 = vpop.f32.mrb[128].mxu1  ;;  %v8633_v51 = vpop.f32.mrb[129].mxu0 }
 0x3f5   : > { %8757 = vst [vmem:[%s11318_s22 + $0x2f0] sm:$0xff] %v8743_v58  ;;  %v8736_v34 = vadd.f32 %v14384_v8, %v8710_v37  ;;  %v8546_v42 = vpop.f32.mrb[129].mxu1 }
 0x3f6   : > { %v8749_v7 = vmax.f32 %v8735_v12, 0.0 }
 0x3f7   : > { %v8750_v17 = vmax.f32 %v8736_v34, 0.0  ;;  %v9805_v52 = vpop.f32.mrb[130].mxu0 }
 0x3f8   : > { %8763 = vst [vmem:[%s11318_s22 + $0x5f8] sm:$0xff] %v8749_v7  ;;  %v8550_v19 = vpop.f32.mrb[130].mxu1  ;;  %v8685_v45 = vmax.f32 %v9802_v48, %v9805_v52  ;;  %v8643_v47 = vpop.f32.mrb[131].mxu0 }
 0x3f9   : > { %8764 = vst [vmem:[%s11318_s22 + $0x600] sm:$0xff] %v8750_v17  ;;  %v8552_v43 = vpop.f32.mrb[131].mxu1  ;;  %v8678_v3 = vmax.f32 %v8633_v51, %v8643_v47 }
 0x3fb   : > { %v9808_v55 = vpop.f32.mrb[132].mxu0 }
 0x3fc   : > { %v8556_v21 = vpop.f32.mrb[132].mxu1  ;;  %v8653_v44 = vpop.f32.mrb[133].mxu0 }
 0x3fd   : > { %v8690_v9 = vmax.f32 %v8544_v26, %v8556_v21  ;;  %v8558_v30 = vpop.f32.mrb[133].mxu1 }
 0x3fe   : > { %v8691_v35 = vmax.f32 %v8546_v42, %v8558_v30 }
 0x3ff   : > { %v8704_v25 = vmax.f32 %v8676_v53, %v8690_v9  ;;  %v9811_v2 = vpop.f32.mrb[134].mxu0 }
 0x400   : > { %v8705_v1 = vmax.f32 %v8677_v62, %v8691_v35  ;;  %v8562_v22 = vpop.f32.mrb[134].mxu1  ;;  %v8699_v36 = vmax.f32 %v9808_v55, %v9811_v2  ;;  %v8663_v29 = vpop.f32.mrb[135].mxu0 }
 0x401   : > { %v8730_v40 = vadd.f32 %v14378_v31, %v8704_v25  ;;  %v8697_v20 = vmax.f32 %v8550_v19, %v8562_v22  ;;  %v8564_v54 = vpop.f32.mrb[135].mxu1  ;;  %v8692_v4 = vmax.f32 %v8653_v44, %v8663_v29 }
 0x402   : > { %v8731_v41 = vadd.f32 %v14378_v31, %v8705_v1  ;;  %v8713_v49 = vmax.f32 %v8685_v45, %v8699_v36  ;;  %v8698_v24 = vmax.f32 %v8552_v43, %v8564_v54 }
 0x403   : > { %v8744_v50 = vmax.f32 %v8730_v40, 0.0  ;;  %v8711_v63 = vmax.f32 %v8683_v5, %v8697_v20  ;;  %v8706_v32 = vmax.f32 %v8678_v3, %v8692_v4 }
 0x404   : > { %v8745_v39 = vmax.f32 %v8731_v41, 0.0  ;;  %v8739_v11 = vadd.f32 %v14384_v8, %v8713_v49  ;;  %v8712_v13 = vmax.f32 %v8684_v15, %v8698_v24 }
 0x405   : > { %8758 = vst [vmem:[%s11318_s22 + $0x2f8] sm:$0xff] %v8744_v50  ;;  %v8737_v6 = vadd.f32 %v14384_v8, %v8711_v63  ;;  %v8732_v28 = vadd.f32 %v14378_v31, %v8706_v32 }
 0x406   : > { %8759 = vst [vmem:[%s11318_s22 + $0x300] sm:$0xff] %v8745_v39  ;;  %v8753_v16 = vmax.f32 %v8739_v11, 0.0  ;;  %v8738_v53 = vadd.f32 %v14384_v8, %v8712_v13 }
 0x407   : > { %v8751_v61 = vmax.f32 %v8737_v6, 0.0  ;;  %v8746_v14 = vmax.f32 %v8732_v28, 0.0 }
 0x408   : > { %8767 = vst [vmem:[%s11318_s22 + $0x618] sm:$0xff] %v8753_v16  ;;  %v8752_v46 = vmax.f32 %v8738_v53, 0.0 }
 0x409   : > { %8765 = vst [vmem:[%s11318_s22 + $0x608] sm:$0xff] %v8751_v61  ;;  %8760 = vst [vmem:[%s11318_s22 + $0x308] sm:$0xff] %v8746_v14 }
 0x40a   : > { %8766 = vst [vmem:[%s11318_s22 + $0x610] sm:$0xff] %v8752_v46 }
 0x40b PF: > { %s13_s12 = sadd.s32 1, %s10512_s12  }
 0x40c   : > { %p10_p4 = scmp.ge.s32.totalorder %s13_s12, 4  }
 0x40e   :  { %12 = sbr.rel (!%p10_p4) target bundleno = 1 (0x1), region = 62 }

// kernel: simple_cnn_brain_forward.3
= control target key start
LH: loop header
LB: loop body
LE: loop exit
PB: predicated region body
PF: predicated region fallthrough
CT: control target
= control target key end

     0   :  { %8 = vsyncpa [#allocation4], 0  ;;  %s17406_s12 = smov 0   ;;  %s18090_s0 = inlined_call_operand.vmem [shape: f32[2,200704], index: 0, kind: input, shape index: {}]   ;;  %s18091_s1 = inlined_call_operand.vmem [shape: f32[4,200704], index: 1, kind: input, shape index: {}]   ;;  %s18092_s2 = inlined_call_operand.vmem [shape: f32[1,4], index: 2, kind: input, shape index: {}]   ;;  %s18093_s3 = inlined_call_operand.hbm [shape: f32[2,4], index: 3, kind: output, shape index: {}]  }
   0x1 LB: > { %s17412_s13 = sadd.s32 4294967295, %s17381_s12   ;;  %p17024_p0 = scmp.ge.s32.totalorder %s17381_s12, 1  ;;  %s17381_s12 = sphi %s17406_s12, %s14_s12  }
   0x2   : > { %p145_p1 = scmp.lt.s32.totalorder %s17381_s12, 5 }
   0x4   : > { %p146_p2 = pnand %p17024_p0, %p145_p1 }
   0x5   : > { %s169_s14 = smul.u32 (!%p146_p2), 392, %s17412_s13  ;;  %p17027_p4 = scmp.ne.s32.totalorder (!%p146_p2), %s17412_s13, 0 }
   0x6   : > { %149 = sbr.rel (%p146_p2) target bundleno = 674 (0x2a2), region = 32 }
   0x7   : > { %p170_p3 = scmp.lt.s32.totalorder (!%p146_p2), %s169_s14, 1567 }
   0xd   : > { %s18095_s14 = smov (!%p170_p3, %s169_s14), 1567  ;;  %184 = sbr.rel (%p17027_p4) target bundleno = 20 (0x14), region = 36 }
   0xe   : > { %s17025_s15 = sshll.u32 %s18095_s14, 1  ;;  %s17026_s16 = sshll.u32 %s18095_s14, 2  ;;  %vm185_vm0 = vcmask (!%p17027_p4), 25600   ;;  %v17383_v0 = vmov (!%p17027_p4), 0.0  }
   0xf   : > { %s17420_s19 = scalar_lea.vmem %s18090_s0, %s17025_s15  ;;  %s17425_s22 = scalar_lea.vmem %s18091_s1, %s17026_s16  ;;  %186 = vst.msk [vmem:[#allocation2] sm:$0x3] (!%p17027_p4), %vm185_vm0, %v17383_v0 }
  0x14 PF: > { %v286_v1 = vld [vmem:[%s17425_s22] sm:$0xff]  ;;  %v287_v2 = vld [vmem:[%s17425_s22 + $0x8] sm:$0xff]  ;;  %v584_v4 = vlaneseq  ;;  %v17384_v7 = vmov 1983009808   ;;  %v288_v9 = vld [vmem:[%s17425_s22 + $0x10] sm:$0xff]  ;;  %vm16947_vm1 = vcmask 25600  }
  0x15   : > { %v188_v3 = vld [vmem:[%s17420_s19] sm:$0xff]  ;;  %v2834_v5 = vcombine.high %v286_v1, %v286_v1  ;;  %v2835_v6 = vcombine.high %v287_v2, %v287_v2  ;;  %v582_v8 = vunpack.c.l.s4 %v17384_v7  ;;  %v289_v10 = vld [vmem:[%s17425_s22 + $0x18] sm:$0xff]  ;;  %v189_v11 = vld [vmem:[%s17420_s19 + $0x8] sm:$0xff]  ;;  %v2836_v13 = vcombine.high %v288_v9, %v288_v9  ;;  %p17028_p5 = scmp.ne.s32.totalorder %s17412_s13, 3 }
  0x16   : > { %v585_v12 = vshrl.u32 %v584_v4, 7  ;;  %v2837_v14 = vcombine.high %v289_v10, %v289_v10  ;;  %v580_v16 = vcombine.high %v188_v3, %v188_v3  ;;  %v597_v17 = vcombine.high %v189_v11, %v189_v11  ;;  %v190_v18 = vld [vmem:[%s17420_s19 + $0x10] sm:$0xff]  ;;  %v290_v24 = vld [vmem:[%s17425_s22 + $0x20] sm:$0xff]  ;;  %v291_v26 = vld [vmem:[%s17425_s22 + $0x28] sm:$0xff] }
  0x17   : > { %3226 = vmatprep.subr.mxu0 %v2834_v5  ;;  %3296 = vmatprep.subr.mxu1 %v2835_v6  ;;  %v583_v15 = vunpack.c.0.s8 %v582_v8  ;;  %v614_v20 = vcombine.high %v190_v18, %v190_v18  ;;  %v191_v27 = vld [vmem:[%s17420_s19 + $0x18] sm:$0xff]  ;;  %v2838_v31 = vcombine.high %v290_v24, %v290_v24  ;;  %v2839_v32 = vcombine.high %v291_v26, %v291_v26  ;;  %v292_v34 = vld [vmem:[%s17425_s22 + $0x30] sm:$0xff]  ;;  %v192_v39 = vld [vmem:[%s17420_s19 + $0x20] sm:$0xff] }
  0x18   : > { %3227 = vmatpush1.xpose.msra.mxu0 %v286_v1  ;;  %3297 = vmatpush1.xpose.msra.mxu1 %v287_v2  ;;  %v293_v37 = vld [vmem:[%s17425_s22 + $0x38] sm:$0xff]  ;;  %v631_v38 = vcombine.high %v191_v27, %v191_v27  ;;  %v2840_v40 = vcombine.high %v292_v34, %v292_v34  ;;  %v294_v44 = vld [vmem:[%s17425_s22 + $0x40] sm:$0xff]  ;;  %v295_v47 = vld [vmem:[%s17425_s22 + $0x48] sm:$0xff]  ;;  %v648_v48 = vcombine.high %v192_v39, %v192_v39 }
  0x19   : > { %v17435_v19 = vsub.s32 %v583_v15, %v585_v12  ;;  %3366 = vmatprep.subr.mxu0 %v2836_v13  ;;  %3436 = vmatprep.subr.mxu1 %v2837_v14  ;;  %v2841_v42 = vcombine.high %v293_v37, %v293_v37  ;;  %v193_v49 = vld [vmem:[%s17420_s19 + $0x28] sm:$0xff]  ;;  %v2842_v50 = vcombine.high %v294_v44, %v294_v44  ;;  %v296_v54 = vld [vmem:[%s17425_s22 + $0x50] sm:$0xff]  ;;  %v297_v57 = vld [vmem:[%s17425_s22 + $0x58] sm:$0xff] }
  0x1a   : > { %v2843_v52 = vcombine.high %v295_v47, %v295_v47  ;;  %v665_v58 = vcombine.high %v193_v49, %v193_v49  ;;  %v194_v59 = vld [vmem:[%s17420_s19 + $0x30] sm:$0xff]  ;;  %v2844_v60 = vcombine.high %v296_v54, %v296_v54  ;;  %v2845_v62 = vcombine.high %v297_v57, %v297_v57  ;;  %v298_v0 = vld [vmem:[%s17425_s22 + $0x60] sm:$0xff]  ;;  %v195_v5 = vld [vmem:[%s17420_s19 + $0x38] sm:$0xff] }
  0x1b   : > { %v587_v21 = vrot.slane %v188_v3, %v17435_v19  ;;  %v594_v22 = vrot.slane %v580_v16, %v17435_v19  ;;  %v604_v23 = vrot.slane %v189_v11, %v17435_v19  ;;  %v611_v25 = vrot.slane %v597_v17, %v17435_v19  ;;  %v299_v3 = vld [vmem:[%s17425_s22 + $0x68] sm:$0xff]  ;;  %v301_v13 = vld [vmem:[%s17425_s22 + $0x78] sm:$0xff]  ;;  %v196_v15 = vld [vmem:[%s17420_s19 + $0x40] sm:$0xff] }
  0x1c   : > { %v621_v33 = vrot.slane %v190_v18, %v17435_v19  ;;  %v628_v36 = vrot.slane %v614_v20, %v17435_v19  ;;  %v638_v43 = vrot.slane %v191_v27, %v17435_v19  ;;  %v645_v46 = vrot.slane %v631_v38, %v17435_v19 }
  0x1d   : > { %v595_v28 = vcombine.high %v587_v21, %v587_v21  ;;  %v596_v29 = vcombine.high %v594_v22, %v594_v22  ;;  %v612_v30 = vcombine.high %v604_v23, %v604_v23  ;;  %v613_v35 = vcombine.high %v611_v25, %v611_v25 }
  0x1e   : > { %v629_v41 = vcombine.high %v621_v33, %v621_v33  ;;  %v630_v45 = vcombine.high %v628_v36, %v628_v36  ;;  %v646_v51 = vcombine.high %v638_v43, %v638_v43  ;;  %v655_v53 = vrot.slane %v192_v39, %v17435_v19 }
  0x1f   : > { %3290 = vmatprep.mubr.f32.mxu0 %v595_v28  ;;  %3360 = vmatprep.mubr.f32.mxu1 %v596_v29  ;;  %v647_v55 = vcombine.high %v645_v46, %v645_v46  ;;  %v662_v56 = vrot.slane %v648_v48, %v17435_v19  ;;  %v672_v63 = vrot.slane %v193_v49, %v17435_v19 }
  0x20   : > { %3291 = vmatmul.mubr.f32.vlgmr.msra.gmra.mrb[0].mxu0 %v587_v21  ;;  %3361 = vmatmul.mubr.f32.vlgmr.msra.gmra.mrb[0].mxu1 %v594_v22  ;;  %v663_v61 = vcombine.high %v655_v53, %v655_v53  ;;  %v679_v2 = vrot.slane %v665_v58, %v17435_v19  ;;  %v682_v4 = vcombine.high %v194_v59, %v194_v59  ;;  %v302_v21 = vld [vmem:[%s17425_s22 + $0x80] sm:$0xff] }
  0x21   : > { %3367 = vmatpush1.xpose.msra.mxu0 %v288_v9  ;;  %3437 = vmatpush1.xpose.msra.mxu1 %v289_v10  ;;  %v664_v1 = vcombine.high %v662_v56, %v662_v56  ;;  %v2846_v6 = vcombine.high %v298_v0, %v298_v0  ;;  %v680_v7 = vcombine.high %v672_v63, %v672_v63  ;;  %v300_v10 = vld [vmem:[%s17425_s22 + $0x70] sm:$0xff] }
  0x22   : > { %3430 = vmatprep.mubr.f32.mxu0 %v612_v30  ;;  %3506 = vmatprep.subr.mxu0 %v2838_v31  ;;  %v2847_v8 = vcombine.high %v299_v3, %v299_v3  ;;  %v689_v9 = vrot.slane %v194_v59, %v17435_v19  ;;  %v681_v11 = vcombine.high %v679_v2, %v679_v2  ;;  %v304_v31 = vld [vmem:[%s17425_s22 + $0x90] sm:$0xff] }
  0x23   : > { %3500 = vmatprep.mubr.f32.mxu1 %v613_v35  ;;  %3576 = vmatprep.subr.mxu1 %v2839_v32  ;;  %v696_v12 = vrot.slane %v682_v4, %v17435_v19  ;;  %v699_v14 = vcombine.high %v195_v5, %v195_v5  ;;  %v2848_v16 = vcombine.high %v300_v10, %v300_v10 }
  0x24   : > { %3431 = vmatmul.mubr.f32.vlgmr.msra.gmra.mrb[2].mxu0 %v604_v23  ;;  %3501 = vmatmul.mubr.f32.vlgmr.msra.gmra.mrb[2].mxu1 %v611_v25  ;;  %v697_v17 = vcombine.high %v689_v9, %v689_v9  ;;  %v2849_v18 = vcombine.high %v301_v13, %v301_v13  ;;  %v706_v20 = vrot.slane %v195_v5, %v17435_v19 }
  0x25   : > { %3507 = vmatpush1.xpose.msra.mxu0 %v290_v24  ;;  %3577 = vmatpush1.xpose.msra.mxu1 %v291_v26  ;;  %v698_v22 = vcombine.high %v696_v12, %v696_v12  ;;  %v713_v23 = vrot.slane %v699_v14, %v17435_v19  ;;  %v303_v24 = vld [vmem:[%s17425_s22 + $0x88] sm:$0xff]  ;;  %v716_v25 = vcombine.high %v196_v15, %v196_v15 }
  0x26   : > { %3570 = vmatprep.mubr.f32.mxu0 %v629_v41  ;;  %3646 = vmatprep.subr.mxu0 %v2840_v40  ;;  %v197_v26 = vld [vmem:[%s17420_s19 + $0x48] sm:$0xff]  ;;  %v2850_v27 = vcombine.high %v302_v21, %v302_v21  ;;  %v714_v28 = vcombine.high %v706_v20, %v706_v20  ;;  %v2851_v29 = vcombine.high %v303_v24, %v303_v24  ;;  %v306_v41 = vld [vmem:[%s17425_s22 + $0xa0] sm:$0xff] }
  0x27   : > { %3640 = vmatprep.mubr.f32.mxu1 %v630_v45  ;;  %3716 = vmatprep.subr.mxu1 %v2841_v42  ;;  %v723_v30 = vrot.slane %v196_v15, %v17435_v19  ;;  %v715_v32 = vcombine.high %v713_v23, %v713_v23  ;;  %v733_v35 = vcombine.high %v197_v26, %v197_v26 }
  0x28   : > { %3571 = vmatmul.mubr.f32.vlgmr.msra.gmra.mrb[4].mxu0 %v621_v33  ;;  %3641 = vmatmul.mubr.f32.vlgmr.msra.gmra.mrb[4].mxu1 %v628_v36  ;;  %v730_v33 = vrot.slane %v716_v25, %v17435_v19  ;;  %v198_v36 = vld [vmem:[%s17420_s19 + $0x50] sm:$0xff]  ;;  %v740_v40 = vrot.slane %v197_v26, %v17435_v19 }
  0x29   : > { %3647 = vmatpush1.xpose.msra.mxu0 %v292_v34  ;;  %3717 = vmatpush1.xpose.msra.mxu1 %v293_v37  ;;  %v305_v34 = vld [vmem:[%s17425_s22 + $0x98] sm:$0xff]  ;;  %v2852_v37 = vcombine.high %v304_v31, %v304_v31  ;;  %v731_v38 = vcombine.high %v723_v30, %v723_v30  ;;  %v750_v45 = vcombine.high %v198_v36, %v198_v36 }
  0x2a   : > { %3710 = vmatprep.mubr.f32.mxu0 %v646_v51  ;;  %3786 = vmatprep.subr.mxu0 %v2842_v50  ;;  %v2853_v39 = vcombine.high %v305_v34, %v305_v34  ;;  %v732_v42 = vcombine.high %v730_v33, %v730_v33  ;;  %v748_v48 = vcombine.high %v740_v40, %v740_v40  ;;  %v308_v51 = vld [vmem:[%s17425_s22 + $0xb0] sm:$0xff] }
  0x2b   : > { %3780 = vmatprep.mubr.f32.mxu1 %v647_v55  ;;  %3856 = vmatprep.subr.mxu1 %v2843_v52  ;;  %v757_v50 = vrot.slane %v198_v36, %v17435_v19 }
  0x2c   : > { %3711 = vmatmul.mubr.f32.vlgmr.msra.gmra.mrb[6].mxu0 %v638_v43  ;;  %3781 = vmatmul.mubr.f32.vlgmr.msra.gmra.mrb[6].mxu1 %v645_v46  ;;  %v747_v43 = vrot.slane %v733_v35, %v17435_v19  ;;  %v199_v46 = vld [vmem:[%s17420_s19 + $0x58] sm:$0xff] }
  0x2d   : > { %3787 = vmatpush1.xpose.msra.mxu0 %v294_v44  ;;  %3857 = vmatpush1.xpose.msra.mxu1 %v295_v47  ;;  %v307_v44 = vld [vmem:[%s17425_s22 + $0xa8] sm:$0xff]  ;;  %v2854_v47 = vcombine.high %v306_v41, %v306_v41  ;;  %v767_v55 = vcombine.high %v199_v46, %v199_v46  ;;  %v765_v58 = vcombine.high %v757_v50, %v757_v50 }
  0x2e   : > { %3850 = vmatprep.mubr.f32.mxu0 %v663_v61  ;;  %3926 = vmatprep.subr.mxu0 %v2844_v60  ;;  %v2855_v49 = vcombine.high %v307_v44, %v307_v44  ;;  %v749_v52 = vcombine.high %v747_v43, %v747_v43  ;;  %v774_v60 = vrot.slane %v199_v46, %v17435_v19  ;;  %v310_v61 = vld [vmem:[%s17425_s22 + $0xc0] sm:$0xff] }
  0x2f   : > { %3920 = vmatprep.mubr.f32.mxu1 %v664_v1  ;;  %3996 = vmatprep.subr.mxu1 %v2845_v62 }
  0x30   : > { %3851 = vmatmul.mubr.f32.vlgmr.msra.gmra.mrb[8].mxu0 %v655_v53  ;;  %3921 = vmatmul.mubr.f32.vlgmr.msra.gmra.mrb[8].mxu1 %v662_v56  ;;  %v764_v53 = vrot.slane %v750_v45, %v17435_v19  ;;  %v200_v56 = vld [vmem:[%s17420_s19 + $0x60] sm:$0xff]  ;;  %v782_v4 = vcombine.high %v774_v60, %v774_v60 }
  0x31   : > { %3927 = vmatpush1.xpose.msra.mxu0 %v296_v54  ;;  %3997 = vmatpush1.xpose.msra.mxu1 %v297_v57  ;;  %v309_v54 = vld [vmem:[%s17425_s22 + $0xb8] sm:$0xff]  ;;  %v2856_v57 = vcombine.high %v308_v51, %v308_v51  ;;  %v784_v1 = vcombine.high %v200_v56, %v200_v56 }
  0x32   : > { %3990 = vmatprep.mubr.f32.mxu0 %v680_v7  ;;  %4066 = vmatprep.subr.mxu0 %v2846_v6  ;;  %v2857_v59 = vcombine.high %v309_v54, %v309_v54  ;;  %v766_v62 = vcombine.high %v764_v53, %v764_v53  ;;  %v791_v6 = vrot.slane %v200_v56, %v17435_v19  ;;  %v312_v7 = vld [vmem:[%s17425_s22 + $0xd0] sm:$0xff] }
  0x33   : > { %4060 = vmatprep.mubr.f32.mxu1 %v681_v11  ;;  %4136 = vmatprep.subr.mxu1 %v2847_v8 }
  0x34   : > { %3991 = vmatmul.mubr.f32.vlgmr.msra.gmra.mrb[10].mxu0 %v672_v63  ;;  %4061 = vmatmul.mubr.f32.vlgmr.msra.gmra.mrb[10].mxu1 %v679_v2  ;;  %v781_v63 = vrot.slane %v767_v55, %v17435_v19  ;;  %v201_v2 = vld [vmem:[%s17420_s19 + $0x68] sm:$0xff]  ;;  %v799_v14 = vcombine.high %v791_v6, %v791_v6 }
  0x35   : > { %4067 = vmatpush1.xpose.msra.mxu0 %v298_v0  ;;  %4137 = vmatpush1.xpose.msra.mxu1 %v299_v3  ;;  %v311_v0 = vld [vmem:[%s17425_s22 + $0xc8] sm:$0xff]  ;;  %v2858_v3 = vcombine.high %v310_v61, %v310_v61  ;;  %v801_v11 = vcombine.high %v201_v2, %v201_v2 }
  0x36   : > { %4130 = vmatprep.mubr.f32.mxu0 %v697_v17  ;;  %4206 = vmatprep.subr.mxu0 %v2848_v16  ;;  %v2859_v5 = vcombine.high %v311_v0, %v311_v0  ;;  %v783_v8 = vcombine.high %v781_v63, %v781_v63  ;;  %v808_v16 = vrot.slane %v201_v2, %v17435_v19  ;;  %v314_v17 = vld [vmem:[%s17425_s22 + $0xe0] sm:$0xff] }
  0x37   : > { %4200 = vmatprep.mubr.f32.mxu1 %v698_v22  ;;  %4276 = vmatprep.subr.mxu1 %v2849_v18 }
  0x38   : > { %4131 = vmatmul.mubr.f32.vlgmr.msra.gmra.mrb[12].mxu0 %v689_v9  ;;  %4201 = vmatmul.mubr.f32.vlgmr.msra.gmra.mrb[12].mxu1 %v696_v12  ;;  %v798_v9 = vrot.slane %v784_v1, %v17435_v19  ;;  %v202_v12 = vld [vmem:[%s17420_s19 + $0x70] sm:$0xff]  ;;  %v816_v25 = vcombine.high %v808_v16, %v808_v16 }
  0x39   : > { %4207 = vmatpush1.xpose.msra.mxu0 %v300_v10  ;;  %4277 = vmatpush1.xpose.msra.mxu1 %v301_v13  ;;  %v313_v10 = vld [vmem:[%s17425_s22 + $0xd8] sm:$0xff]  ;;  %v2860_v13 = vcombine.high %v312_v7, %v312_v7  ;;  %v818_v22 = vcombine.high %v202_v12, %v202_v12 }
  0x3a   : > { %4270 = vmatprep.mubr.f32.mxu0 %v714_v28  ;;  %4346 = vmatprep.subr.mxu0 %v2850_v27  ;;  %v2861_v15 = vcombine.high %v313_v10, %v313_v10  ;;  %v800_v18 = vcombine.high %v798_v9, %v798_v9  ;;  %v825_v27 = vrot.slane %v202_v12, %v17435_v19  ;;  %v316_v28 = vld [vmem:[%s17425_s22 + $0xf0] sm:$0xff] }
  0x3b   : > { %4340 = vmatprep.mubr.f32.mxu1 %v715_v32  ;;  %4416 = vmatprep.subr.mxu1 %v2851_v29 }
  0x3c   : > { %4271 = vmatmul.mubr.f32.vlgmr.msra.gmra.mrb[14].mxu0 %v706_v20  ;;  %4341 = vmatmul.mubr.f32.vlgmr.msra.gmra.mrb[14].mxu1 %v713_v23  ;;  %v815_v20 = vrot.slane %v801_v11, %v17435_v19  ;;  %v203_v23 = vld [vmem:[%s17420_s19 + $0x78] sm:$0xff]  ;;  %v833_v35 = vcombine.high %v825_v27, %v825_v27 }
  0x3d   : > { %4347 = vmatpush1.xpose.msra.mxu0 %v302_v21  ;;  %4417 = vmatpush1.xpose.msra.mxu1 %v303_v24  ;;  %v315_v21 = vld [vmem:[%s17425_s22 + $0xe8] sm:$0xff]  ;;  %v2862_v24 = vcombine.high %v314_v17, %v314_v17  ;;  %v835_v32 = vcombine.high %v203_v23, %v203_v23 }
  0x3e   : > { %4410 = vmatprep.mubr.f32.mxu0 %v731_v38  ;;  %4486 = vmatprep.subr.mxu0 %v2852_v37  ;;  %v2863_v26 = vcombine.high %v315_v21, %v315_v21  ;;  %v817_v29 = vcombine.high %v815_v20, %v815_v20  ;;  %v842_v37 = vrot.slane %v203_v23, %v17435_v19  ;;  %v318_v38 = vld [vmem:[%s17425_s22 + $0x100] sm:$0xff] }
  0x3f   : > { %4480 = vmatprep.mubr.f32.mxu1 %v732_v42  ;;  %4556 = vmatprep.subr.mxu1 %v2853_v39 }
  0x40   : > { %4411 = vmatmul.mubr.f32.vlgmr.msra.gmra.mrb[16].mxu0 %v723_v30  ;;  %4481 = vmatmul.mubr.f32.vlgmr.msra.gmra.mrb[16].mxu1 %v730_v33  ;;  %v832_v30 = vrot.slane %v818_v22, %v17435_v19  ;;  %v204_v33 = vld [vmem:[%s17420_s19 + $0x80] sm:$0xff]  ;;  %v850_v45 = vcombine.high %v842_v37, %v842_v37 }
  0x41   : > { %4487 = vmatpush1.xpose.msra.mxu0 %v304_v31  ;;  %4557 = vmatpush1.xpose.msra.mxu1 %v305_v34  ;;  %v317_v31 = vld [vmem:[%s17425_s22 + $0xf8] sm:$0xff]  ;;  %v2864_v34 = vcombine.high %v316_v28, %v316_v28  ;;  %v852_v42 = vcombine.high %v204_v33, %v204_v33 }
  0x42   : > { %4550 = vmatprep.mubr.f32.mxu0 %v748_v48  ;;  %4626 = vmatprep.subr.mxu0 %v2854_v47  ;;  %v2865_v36 = vcombine.high %v317_v31, %v317_v31  ;;  %v834_v39 = vcombine.high %v832_v30, %v832_v30  ;;  %v859_v47 = vrot.slane %v204_v33, %v17435_v19  ;;  %v320_v48 = vld [vmem:[%s17425_s22 + $0x110] sm:$0xff] }
  0x43   : > { %4620 = vmatprep.mubr.f32.mxu1 %v749_v52  ;;  %4696 = vmatprep.subr.mxu1 %v2855_v49 }
  0x44   : > { %4551 = vmatmul.mubr.f32.vlgmr.msra.gmra.mrb[18].mxu0 %v740_v40  ;;  %4621 = vmatmul.mubr.f32.vlgmr.msra.gmra.mrb[18].mxu1 %v747_v43  ;;  %v849_v40 = vrot.slane %v835_v32, %v17435_v19  ;;  %v205_v43 = vld [vmem:[%s17420_s19 + $0x88] sm:$0xff]  ;;  %v867_v55 = vcombine.high %v859_v47, %v859_v47 }
  0x45   : > { %4627 = vmatpush1.xpose.msra.mxu0 %v306_v41  ;;  %4697 = vmatpush1.xpose.msra.mxu1 %v307_v44  ;;  %v319_v41 = vld [vmem:[%s17425_s22 + $0x108] sm:$0xff]  ;;  %v2866_v44 = vcombine.high %v318_v38, %v318_v38  ;;  %v869_v52 = vcombine.high %v205_v43, %v205_v43 }
  0x46   : > { %4690 = vmatprep.mubr.f32.mxu0 %v765_v58  ;;  %4766 = vmatprep.subr.mxu0 %v2856_v57  ;;  %v2867_v46 = vcombine.high %v319_v41, %v319_v41  ;;  %v851_v49 = vcombine.high %v849_v40, %v849_v40  ;;  %v876_v57 = vrot.slane %v205_v43, %v17435_v19  ;;  %v322_v58 = vld [vmem:[%s17425_s22 + $0x120] sm:$0xff] }
  0x47   : > { %4760 = vmatprep.mubr.f32.mxu1 %v766_v62  ;;  %4836 = vmatprep.subr.mxu1 %v2857_v59 }
  0x48   : > { %4691 = vmatmul.mubr.f32.vlgmr.msra.gmra.mrb[20].mxu0 %v757_v50  ;;  %4761 = vmatmul.mubr.f32.vlgmr.msra.gmra.mrb[20].mxu1 %v764_v53  ;;  %v866_v50 = vrot.slane %v852_v42, %v17435_v19  ;;  %v206_v53 = vld [vmem:[%s17420_s19 + $0x90] sm:$0xff]  ;;  %v884_v1 = vcombine.high %v876_v57, %v876_v57 }
  0x49   : > { %4767 = vmatpush1.xpose.msra.mxu0 %v308_v51  ;;  %4837 = vmatpush1.xpose.msra.mxu1 %v309_v54  ;;  %v321_v51 = vld [vmem:[%s17425_s22 + $0x118] sm:$0xff]  ;;  %v2868_v54 = vcombine.high %v320_v48, %v320_v48  ;;  %v886_v62 = vcombine.high %v206_v53, %v206_v53 }
  0x4a   : > { %4830 = vmatprep.mubr.f32.mxu0 %v782_v4  ;;  %4906 = vmatprep.subr.mxu0 %v2858_v3  ;;  %v2869_v56 = vcombine.high %v321_v51, %v321_v51  ;;  %v868_v59 = vcombine.high %v866_v50, %v866_v50  ;;  %v893_v3 = vrot.slane %v206_v53, %v17435_v19  ;;  %v324_v4 = vld [vmem:[%s17425_s22 + $0x130] sm:$0xff] }
  0x4b   : > { %4900 = vmatprep.mubr.f32.mxu1 %v783_v8  ;;  %4976 = vmatprep.subr.mxu1 %v2859_v5 }
  0x4c   : > { %4831 = vmatmul.mubr.f32.vlgmr.msra.gmra.mrb[22].mxu0 %v774_v60  ;;  %4901 = vmatmul.mubr.f32.vlgmr.msra.gmra.mrb[22].mxu1 %v781_v63  ;;  %v883_v60 = vrot.slane %v869_v52, %v17435_v19  ;;  %v207_v63 = vld [vmem:[%s17420_s19 + $0x98] sm:$0xff]  ;;  %v901_v11 = vcombine.high %v893_v3, %v893_v3 }
  0x4d   : > { %4907 = vmatpush1.xpose.msra.mxu0 %v310_v61  ;;  %4977 = vmatpush1.xpose.msra.mxu1 %v311_v0  ;;  %v323_v61 = vld [vmem:[%s17425_s22 + $0x128] sm:$0xff]  ;;  %v2870_v0 = vcombine.high %v322_v58, %v322_v58  ;;  %v903_v8 = vcombine.high %v207_v63, %v207_v63 }
  0x4e   : > { %4970 = vmatprep.mubr.f32.mxu0 %v799_v14  ;;  %5046 = vmatprep.subr.mxu0 %v2860_v13  ;;  %v2871_v2 = vcombine.high %v323_v61, %v323_v61  ;;  %v885_v5 = vcombine.high %v883_v60, %v883_v60  ;;  %v910_v13 = vrot.slane %v207_v63, %v17435_v19  ;;  %v326_v14 = vld [vmem:[%s17425_s22 + $0x140] sm:$0xff] }
  0x4f   : > { %5040 = vmatprep.mubr.f32.mxu1 %v800_v18  ;;  %5116 = vmatprep.subr.mxu1 %v2861_v15 }
  0x50   : > { %4971 = vmatmul.mubr.f32.vlgmr.msra.gmra.mrb[24].mxu0 %v791_v6  ;;  %5041 = vmatmul.mubr.f32.vlgmr.msra.gmra.mrb[24].mxu1 %v798_v9  ;;  %v900_v6 = vrot.slane %v886_v62, %v17435_v19  ;;  %v208_v9 = vld [vmem:[%s17420_s19 + $0xa0] sm:$0xff]  ;;  %v918_v22 = vcombine.high %v910_v13, %v910_v13 }
  0x51   : > { %5047 = vmatpush1.xpose.msra.mxu0 %v312_v7  ;;  %5117 = vmatpush1.xpose.msra.mxu1 %v313_v10  ;;  %v325_v7 = vld [vmem:[%s17425_s22 + $0x138] sm:$0xff]  ;;  %v2872_v10 = vcombine.high %v324_v4, %v324_v4  ;;  %v920_v18 = vcombine.high %v208_v9, %v208_v9 }
  0x52   : > { %5110 = vmatprep.mubr.f32.mxu0 %v816_v25  ;;  %5186 = vmatprep.subr.mxu0 %v2862_v24  ;;  %v2873_v12 = vcombine.high %v325_v7, %v325_v7  ;;  %v902_v15 = vcombine.high %v900_v6, %v900_v6  ;;  %v927_v24 = vrot.slane %v208_v9, %v17435_v19  ;;  %v328_v25 = vld [vmem:[%s17425_s22 + $0x150] sm:$0xff] }
  0x53   : > { %5180 = vmatprep.mubr.f32.mxu1 %v817_v29  ;;  %5256 = vmatprep.subr.mxu1 %v2863_v26 }
  0x54   : > { %5111 = vmatmul.mubr.f32.vlgmr.msra.gmra.mrb[26].mxu0 %v808_v16  ;;  %5181 = vmatmul.mubr.f32.vlgmr.msra.gmra.mrb[26].mxu1 %v815_v20  ;;  %v917_v16 = vrot.slane %v903_v8, %v17435_v19  ;;  %v209_v20 = vld [vmem:[%s17420_s19 + $0xa8] sm:$0xff]  ;;  %v935_v32 = vcombine.high %v927_v24, %v927_v24 }
  0x55   : > { %5187 = vmatpush1.xpose.msra.mxu0 %v314_v17  ;;  %5257 = vmatpush1.xpose.msra.mxu1 %v315_v21  ;;  %v327_v17 = vld [vmem:[%s17425_s22 + $0x148] sm:$0xff]  ;;  %v2874_v21 = vcombine.high %v326_v14, %v326_v14  ;;  %v937_v29 = vcombine.high %v209_v20, %v209_v20 }
  0x56   : > { %5250 = vmatprep.mubr.f32.mxu0 %v833_v35  ;;  %5326 = vmatprep.subr.mxu0 %v2864_v34  ;;  %v2875_v23 = vcombine.high %v327_v17, %v327_v17  ;;  %v919_v26 = vcombine.high %v917_v16, %v917_v16  ;;  %v944_v34 = vrot.slane %v209_v20, %v17435_v19  ;;  %v330_v35 = vld [vmem:[%s17425_s22 + $0x160] sm:$0xff] }
  0x57   : > { %5320 = vmatprep.mubr.f32.mxu1 %v834_v39  ;;  %5396 = vmatprep.subr.mxu1 %v2865_v36 }
  0x58   : > { %5251 = vmatmul.mubr.f32.vlgmr.msra.gmra.mrb[28].mxu0 %v825_v27  ;;  %5321 = vmatmul.mubr.f32.vlgmr.msra.gmra.mrb[28].mxu1 %v832_v30  ;;  %v934_v27 = vrot.slane %v920_v18, %v17435_v19  ;;  %v210_v30 = vld [vmem:[%s17420_s19 + $0xb0] sm:$0xff]  ;;  %v952_v42 = vcombine.high %v944_v34, %v944_v34 }
  0x59   : > { %5327 = vmatpush1.xpose.msra.mxu0 %v316_v28  ;;  %5397 = vmatpush1.xpose.msra.mxu1 %v317_v31  ;;  %v329_v28 = vld [vmem:[%s17425_s22 + $0x158] sm:$0xff]  ;;  %v2876_v31 = vcombine.high %v328_v25, %v328_v25  ;;  %v954_v39 = vcombine.high %v210_v30, %v210_v30 }
  0x5a   : > { %5390 = vmatprep.mubr.f32.mxu0 %v850_v45  ;;  %5466 = vmatprep.subr.mxu0 %v2866_v44  ;;  %v2877_v33 = vcombine.high %v329_v28, %v329_v28  ;;  %v936_v36 = vcombine.high %v934_v27, %v934_v27  ;;  %v961_v44 = vrot.slane %v210_v30, %v17435_v19  ;;  %v332_v45 = vld [vmem:[%s17425_s22 + $0x170] sm:$0xff] }
  0x5b   : > { %5460 = vmatprep.mubr.f32.mxu1 %v851_v49  ;;  %5536 = vmatprep.subr.mxu1 %v2867_v46 }
  0x5c   : > { %5391 = vmatmul.mubr.f32.vlgmr.msra.gmra.mrb[30].mxu0 %v842_v37  ;;  %5461 = vmatmul.mubr.f32.vlgmr.msra.gmra.mrb[30].mxu1 %v849_v40  ;;  %v951_v37 = vrot.slane %v937_v29, %v17435_v19  ;;  %v211_v40 = vld [vmem:[%s17420_s19 + $0xb8] sm:$0xff]  ;;  %v969_v52 = vcombine.high %v961_v44, %v961_v44 }
  0x5d   : > { %5467 = vmatpush1.xpose.msra.mxu0 %v318_v38  ;;  %5537 = vmatpush1.xpose.msra.mxu1 %v319_v41  ;;  %v331_v38 = vld [vmem:[%s17425_s22 + $0x168] sm:$0xff]  ;;  %v2878_v41 = vcombine.high %v330_v35, %v330_v35  ;;  %v971_v49 = vcombine.high %v211_v40, %v211_v40 }
  0x5e   : > { %5530 = vmatprep.mubr.f32.mxu0 %v867_v55  ;;  %5606 = vmatprep.subr.mxu0 %v2868_v54  ;;  %v2879_v43 = vcombine.high %v331_v38, %v331_v38  ;;  %v953_v46 = vcombine.high %v951_v37, %v951_v37  ;;  %v978_v54 = vrot.slane %v211_v40, %v17435_v19  ;;  %v334_v55 = vld [vmem:[%s17425_s22 + $0x180] sm:$0xff] }
  0x5f   : > { %5600 = vmatprep.mubr.f32.mxu1 %v868_v59  ;;  %5676 = vmatprep.subr.mxu1 %v2869_v56 }
  0x60   : > { %5531 = vmatmul.mubr.f32.vlgmr.msra.gmra.mrb[32].mxu0 %v859_v47  ;;  %5601 = vmatmul.mubr.f32.vlgmr.msra.gmra.mrb[32].mxu1 %v866_v50  ;;  %v968_v47 = vrot.slane %v954_v39, %v17435_v19  ;;  %v212_v50 = vld [vmem:[%s17420_s19 + $0xc0] sm:$0xff]  ;;  %v986_v62 = vcombine.high %v978_v54, %v978_v54 }
  0x61   : > { %5607 = vmatpush1.xpose.msra.mxu0 %v320_v48  ;;  %5677 = vmatpush1.xpose.msra.mxu1 %v321_v51  ;;  %v333_v48 = vld [vmem:[%s17425_s22 + $0x178] sm:$0xff]  ;;  %v2880_v51 = vcombine.high %v332_v45, %v332_v45  ;;  %v988_v59 = vcombine.high %v212_v50, %v212_v50 }
  0x62   : > { %5670 = vmatprep.mubr.f32.mxu0 %v884_v1  ;;  %5746 = vmatprep.subr.mxu0 %v2870_v0  ;;  %v2881_v53 = vcombine.high %v333_v48, %v333_v48  ;;  %v970_v56 = vcombine.high %v968_v47, %v968_v47  ;;  %v995_v0 = vrot.slane %v212_v50, %v17435_v19  ;;  %v336_v1 = vld [vmem:[%s17425_s22 + $0x190] sm:$0xff] }
  0x63   : > { %5740 = vmatprep.mubr.f32.mxu1 %v885_v5  ;;  %5816 = vmatprep.subr.mxu1 %v2871_v2 }
  0x64   : > { %5671 = vmatmul.mubr.f32.vlgmr.msra.gmra.mrb[34].mxu0 %v876_v57  ;;  %5741 = vmatmul.mubr.f32.vlgmr.msra.gmra.mrb[34].mxu1 %v883_v60  ;;  %v985_v57 = vrot.slane %v971_v49, %v17435_v19  ;;  %v213_v60 = vld [vmem:[%s17420_s19 + $0xc8] sm:$0xff]  ;;  %v1003_v8 = vcombine.high %v995_v0, %v995_v0 }
  0x65   : > { %5747 = vmatpush1.xpose.msra.mxu0 %v322_v58  ;;  %5817 = vmatpush1.xpose.msra.mxu1 %v323_v61  ;;  %v335_v58 = vld [vmem:[%s17425_s22 + $0x188] sm:$0xff]  ;;  %v2882_v61 = vcombine.high %v334_v55, %v334_v55  ;;  %v1005_v5 = vcombine.high %v213_v60, %v213_v60 }
  0x66   : > { %5810 = vmatprep.mubr.f32.mxu0 %v901_v11  ;;  %5886 = vmatprep.subr.mxu0 %v2872_v10  ;;  %v2883_v63 = vcombine.high %v335_v58, %v335_v58  ;;  %v987_v2 = vcombine.high %v985_v57, %v985_v57  ;;  %v1012_v10 = vrot.slane %v213_v60, %v17435_v19  ;;  %v338_v11 = vld [vmem:[%s17425_s22 + $0x1a0] sm:$0xff] }
  0x67   : > { %5880 = vmatprep.mubr.f32.mxu1 %v902_v15  ;;  %5956 = vmatprep.subr.mxu1 %v2873_v12 }
  0x68   : > { %5811 = vmatmul.mubr.f32.vlgmr.msra.gmra.mrb[36].mxu0 %v893_v3  ;;  %5881 = vmatmul.mubr.f32.vlgmr.msra.gmra.mrb[36].mxu1 %v900_v6  ;;  %v1002_v3 = vrot.slane %v988_v59, %v17435_v19  ;;  %v214_v6 = vld [vmem:[%s17420_s19 + $0xd0] sm:$0xff]  ;;  %v1020_v18 = vcombine.high %v1012_v10, %v1012_v10 }
  0x69   : > { %5887 = vmatpush1.xpose.msra.mxu0 %v324_v4  ;;  %5957 = vmatpush1.xpose.msra.mxu1 %v325_v7  ;;  %v337_v4 = vld [vmem:[%s17425_s22 + $0x198] sm:$0xff]  ;;  %v2884_v7 = vcombine.high %v336_v1, %v336_v1  ;;  %v1022_v15 = vcombine.high %v214_v6, %v214_v6 }
  0x6a   : > { %5950 = vmatprep.mubr.f32.mxu0 %v918_v22  ;;  %6026 = vmatprep.subr.mxu0 %v2874_v21  ;;  %v2885_v9 = vcombine.high %v337_v4, %v337_v4  ;;  %v1004_v12 = vcombine.high %v1002_v3, %v1002_v3  ;;  %v1029_v21 = vrot.slane %v214_v6, %v17435_v19  ;;  %v340_v22 = vld [vmem:[%s17425_s22 + $0x1b0] sm:$0xff] }
  0x6b   : > { %6020 = vmatprep.mubr.f32.mxu1 %v919_v26  ;;  %6096 = vmatprep.subr.mxu1 %v2875_v23 }
  0x6c   : > { %5951 = vmatmul.mubr.f32.vlgmr.msra.gmra.mrb[38].mxu0 %v910_v13  ;;  %6021 = vmatmul.mubr.f32.vlgmr.msra.gmra.mrb[38].mxu1 %v917_v16  ;;  %v1019_v13 = vrot.slane %v1005_v5, %v17435_v19  ;;  %v215_v16 = vld [vmem:[%s17420_s19 + $0xd8] sm:$0xff]  ;;  %v1037_v29 = vcombine.high %v1029_v21, %v1029_v21 }
  0x6d   : > { %6027 = vmatpush1.xpose.msra.mxu0 %v326_v14  ;;  %6097 = vmatpush1.xpose.msra.mxu1 %v327_v17  ;;  %v339_v14 = vld [vmem:[%s17425_s22 + $0x1a8] sm:$0xff]  ;;  %v2886_v17 = vcombine.high %v338_v11, %v338_v11  ;;  %v1039_v26 = vcombine.high %v215_v16, %v215_v16 }
  0x6e   : > { %6090 = vmatprep.mubr.f32.mxu0 %v935_v32  ;;  %6166 = vmatprep.subr.mxu0 %v2876_v31  ;;  %v2887_v20 = vcombine.high %v339_v14, %v339_v14  ;;  %v1021_v23 = vcombine.high %v1019_v13, %v1019_v13  ;;  %v1046_v31 = vrot.slane %v215_v16, %v17435_v19  ;;  %v342_v32 = vld [vmem:[%s17425_s22 + $0x1c0] sm:$0xff] }
  0x6f   : > { %6160 = vmatprep.mubr.f32.mxu1 %v936_v36  ;;  %6236 = vmatprep.subr.mxu1 %v2877_v33 }
  0x70   : > { %6091 = vmatmul.mubr.f32.vlgmr.msra.gmra.mrb[40].mxu0 %v927_v24  ;;  %6161 = vmatmul.mubr.f32.vlgmr.msra.gmra.mrb[40].mxu1 %v934_v27  ;;  %v1036_v24 = vrot.slane %v1022_v15, %v17435_v19  ;;  %v216_v27 = vld [vmem:[%s17420_s19 + $0xe0] sm:$0xff]  ;;  %v1054_v39 = vcombine.high %v1046_v31, %v1046_v31 }
  0x71   : > { %6167 = vmatpush1.xpose.msra.mxu0 %v328_v25  ;;  %6237 = vmatpush1.xpose.msra.mxu1 %v329_v28  ;;  %v341_v25 = vld [vmem:[%s17425_s22 + $0x1b8] sm:$0xff]  ;;  %v2888_v28 = vcombine.high %v340_v22, %v340_v22  ;;  %v1056_v36 = vcombine.high %v216_v27, %v216_v27 }
  0x72   : > { %6230 = vmatprep.mubr.f32.mxu0 %v952_v42  ;;  %6306 = vmatprep.subr.mxu0 %v2878_v41  ;;  %v2889_v30 = vcombine.high %v341_v25, %v341_v25  ;;  %v1038_v33 = vcombine.high %v1036_v24, %v1036_v24  ;;  %v1063_v41 = vrot.slane %v216_v27, %v17435_v19  ;;  %v344_v42 = vld [vmem:[%s17425_s22 + $0x1d0] sm:$0xff] }
  0x73   : > { %6300 = vmatprep.mubr.f32.mxu1 %v953_v46  ;;  %6376 = vmatprep.subr.mxu1 %v2879_v43 }
  0x74   : > { %6231 = vmatmul.mubr.f32.vlgmr.msra.gmra.mrb[42].mxu0 %v944_v34  ;;  %6301 = vmatmul.mubr.f32.vlgmr.msra.gmra.mrb[42].mxu1 %v951_v37  ;;  %v1053_v34 = vrot.slane %v1039_v26, %v17435_v19  ;;  %v217_v37 = vld [vmem:[%s17420_s19 + $0xe8] sm:$0xff]  ;;  %v1071_v49 = vcombine.high %v1063_v41, %v1063_v41 }
  0x75   : > { %6307 = vmatpush1.xpose.msra.mxu0 %v330_v35  ;;  %6377 = vmatpush1.xpose.msra.mxu1 %v331_v38  ;;  %v343_v35 = vld [vmem:[%s17425_s22 + $0x1c8] sm:$0xff]  ;;  %v2890_v38 = vcombine.high %v342_v32, %v342_v32  ;;  %v1073_v46 = vcombine.high %v217_v37, %v217_v37 }
  0x76   : > { %6370 = vmatprep.mubr.f32.mxu0 %v969_v52  ;;  %6446 = vmatprep.subr.mxu0 %v2880_v51  ;;  %v2891_v40 = vcombine.high %v343_v35, %v343_v35  ;;  %v1055_v43 = vcombine.high %v1053_v34, %v1053_v34  ;;  %v1080_v51 = vrot.slane %v217_v37, %v17435_v19  ;;  %v346_v52 = vld [vmem:[%s17425_s22 + $0x1e0] sm:$0xff] }
  0x77   : > { %6440 = vmatprep.mubr.f32.mxu1 %v970_v56  ;;  %6516 = vmatprep.subr.mxu1 %v2881_v53 }
  0x78   : > { %6371 = vmatmul.mubr.f32.vlgmr.msra.gmra.mrb[44].mxu0 %v961_v44  ;;  %6441 = vmatmul.mubr.f32.vlgmr.msra.gmra.mrb[44].mxu1 %v968_v47  ;;  %v1070_v44 = vrot.slane %v1056_v36, %v17435_v19  ;;  %v218_v47 = vld [vmem:[%s17420_s19 + $0xf0] sm:$0xff]  ;;  %v1088_v59 = vcombine.high %v1080_v51, %v1080_v51 }
  0x79   : > { %6447 = vmatpush1.xpose.msra.mxu0 %v332_v45  ;;  %6517 = vmatpush1.xpose.msra.mxu1 %v333_v48  ;;  %v345_v45 = vld [vmem:[%s17425_s22 + $0x1d8] sm:$0xff]  ;;  %v2892_v48 = vcombine.high %v344_v42, %v344_v42  ;;  %v1090_v56 = vcombine.high %v218_v47, %v218_v47 }
  0x7a   : > { %6510 = vmatprep.mubr.f32.mxu0 %v986_v62  ;;  %6586 = vmatprep.subr.mxu0 %v2882_v61  ;;  %v2893_v50 = vcombine.high %v345_v45, %v345_v45  ;;  %v1072_v53 = vcombine.high %v1070_v44, %v1070_v44  ;;  %v1097_v61 = vrot.slane %v218_v47, %v17435_v19  ;;  %v348_v62 = vld [vmem:[%s17425_s22 + $0x1f0] sm:$0xff] }
  0x7b   : > { %6580 = vmatprep.mubr.f32.mxu1 %v987_v2  ;;  %6656 = vmatprep.subr.mxu1 %v2883_v63 }
  0x7c   : > { %6511 = vmatmul.mubr.f32.vlgmr.msra.gmra.mrb[46].mxu0 %v978_v54  ;;  %6581 = vmatmul.mubr.f32.vlgmr.msra.gmra.mrb[46].mxu1 %v985_v57  ;;  %v1087_v54 = vrot.slane %v1073_v46, %v17435_v19  ;;  %v219_v57 = vld [vmem:[%s17420_s19 + $0xf8] sm:$0xff]  ;;  %v1105_v5 = vcombine.high %v1097_v61, %v1097_v61 }
  0x7d   : > { %6587 = vmatpush1.xpose.msra.mxu0 %v334_v55  ;;  %6657 = vmatpush1.xpose.msra.mxu1 %v335_v58  ;;  %v347_v55 = vld [vmem:[%s17425_s22 + $0x1e8] sm:$0xff]  ;;  %v2894_v58 = vcombine.high %v346_v52, %v346_v52  ;;  %v1107_v2 = vcombine.high %v219_v57, %v219_v57 }
  0x7e   : > { %6650 = vmatprep.mubr.f32.mxu0 %v1003_v8  ;;  %6726 = vmatprep.subr.mxu0 %v2884_v7  ;;  %v2895_v60 = vcombine.high %v347_v55, %v347_v55  ;;  %v1089_v63 = vcombine.high %v1087_v54, %v1087_v54  ;;  %v1114_v7 = vrot.slane %v219_v57, %v17435_v19  ;;  %v350_v8 = vld [vmem:[%s17425_s22 + $0x200] sm:$0xff] }
  0x7f   : > { %6720 = vmatprep.mubr.f32.mxu1 %v1004_v12  ;;  %6796 = vmatprep.subr.mxu1 %v2885_v9 }
  0x80   : > { %6651 = vmatmul.mubr.f32.vlgmr.msra.gmra.mrb[48].mxu0 %v995_v0  ;;  %6721 = vmatmul.mubr.f32.vlgmr.msra.gmra.mrb[48].mxu1 %v1002_v3  ;;  %v1104_v0 = vrot.slane %v1090_v56, %v17435_v19  ;;  %v220_v3 = vld [vmem:[%s17420_s19 + $0x100] sm:$0xff]  ;;  %v1122_v15 = vcombine.high %v1114_v7, %v1114_v7 }
  0x81   : > { %6727 = vmatpush1.xpose.msra.mxu0 %v336_v1  ;;  %6797 = vmatpush1.xpose.msra.mxu1 %v337_v4  ;;  %v349_v1 = vld [vmem:[%s17425_s22 + $0x1f8] sm:$0xff]  ;;  %v2896_v4 = vcombine.high %v348_v62, %v348_v62  ;;  %v1124_v12 = vcombine.high %v220_v3, %v220_v3 }
  0x82   : > { %6790 = vmatprep.mubr.f32.mxu0 %v1020_v18  ;;  %6866 = vmatprep.subr.mxu0 %v2886_v17  ;;  %v2897_v6 = vcombine.high %v349_v1, %v349_v1  ;;  %v1106_v9 = vcombine.high %v1104_v0, %v1104_v0  ;;  %v1131_v17 = vrot.slane %v220_v3, %v17435_v19  ;;  %v352_v18 = vld [vmem:[%s17425_s22 + $0x210] sm:$0xff] }
  0x83   : > { %6860 = vmatprep.mubr.f32.mxu1 %v1021_v23  ;;  %6936 = vmatprep.subr.mxu1 %v2887_v20 }
  0x84   : > { %6791 = vmatmul.mubr.f32.vlgmr.msra.gmra.mrb[50].mxu0 %v1012_v10  ;;  %6861 = vmatmul.mubr.f32.vlgmr.msra.gmra.mrb[50].mxu1 %v1019_v13  ;;  %v1121_v10 = vrot.slane %v1107_v2, %v17435_v19  ;;  %v221_v13 = vld [vmem:[%s17420_s19 + $0x108] sm:$0xff]  ;;  %v1139_v26 = vcombine.high %v1131_v17, %v1131_v17 }
  0x85   : > { %6867 = vmatpush1.xpose.msra.mxu0 %v338_v11  ;;  %6937 = vmatpush1.xpose.msra.mxu1 %v339_v14  ;;  %v351_v11 = vld [vmem:[%s17425_s22 + $0x208] sm:$0xff]  ;;  %v2898_v14 = vcombine.high %v350_v8, %v350_v8  ;;  %v1141_v23 = vcombine.high %v221_v13, %v221_v13 }
  0x86   : > { %6930 = vmatprep.mubr.f32.mxu0 %v1037_v29  ;;  %7006 = vmatprep.subr.mxu0 %v2888_v28  ;;  %v2899_v16 = vcombine.high %v351_v11, %v351_v11  ;;  %v1123_v20 = vcombine.high %v1121_v10, %v1121_v10  ;;  %v1148_v28 = vrot.slane %v221_v13, %v17435_v19  ;;  %v354_v29 = vld [vmem:[%s17425_s22 + $0x220] sm:$0xff] }
  0x87   : > { %7000 = vmatprep.mubr.f32.mxu1 %v1038_v33  ;;  %7076 = vmatprep.subr.mxu1 %v2889_v30 }
  0x88   : > { %6931 = vmatmul.mubr.f32.vlgmr.msra.gmra.mrb[52].mxu0 %v1029_v21  ;;  %7001 = vmatmul.mubr.f32.vlgmr.msra.gmra.mrb[52].mxu1 %v1036_v24  ;;  %v1138_v21 = vrot.slane %v1124_v12, %v17435_v19  ;;  %v222_v24 = vld [vmem:[%s17420_s19 + $0x110] sm:$0xff]  ;;  %v1156_v36 = vcombine.high %v1148_v28, %v1148_v28 }
  0x89   : > { %7007 = vmatpush1.xpose.msra.mxu0 %v340_v22  ;;  %7077 = vmatpush1.xpose.msra.mxu1 %v341_v25  ;;  %v353_v22 = vld [vmem:[%s17425_s22 + $0x218] sm:$0xff]  ;;  %v2900_v25 = vcombine.high %v352_v18, %v352_v18  ;;  %v1158_v33 = vcombine.high %v222_v24, %v222_v24 }
  0x8a   : > { %7070 = vmatprep.mubr.f32.mxu0 %v1054_v39  ;;  %7146 = vmatprep.subr.mxu0 %v2890_v38  ;;  %v2901_v27 = vcombine.high %v353_v22, %v353_v22  ;;  %v1140_v30 = vcombine.high %v1138_v21, %v1138_v21  ;;  %v1165_v38 = vrot.slane %v222_v24, %v17435_v19  ;;  %v356_v39 = vld [vmem:[%s17425_s22 + $0x230] sm:$0xff] }
  0x8b   : > { %7140 = vmatprep.mubr.f32.mxu1 %v1055_v43  ;;  %7216 = vmatprep.subr.mxu1 %v2891_v40 }
  0x8c   : > { %7071 = vmatmul.mubr.f32.vlgmr.msra.gmra.mrb[54].mxu0 %v1046_v31  ;;  %7141 = vmatmul.mubr.f32.vlgmr.msra.gmra.mrb[54].mxu1 %v1053_v34  ;;  %v1155_v31 = vrot.slane %v1141_v23, %v17435_v19  ;;  %v223_v34 = vld [vmem:[%s17420_s19 + $0x118] sm:$0xff]  ;;  %v1173_v46 = vcombine.high %v1165_v38, %v1165_v38 }
  0x8d   : > { %7147 = vmatpush1.xpose.msra.mxu0 %v342_v32  ;;  %7217 = vmatpush1.xpose.msra.mxu1 %v343_v35  ;;  %v355_v32 = vld [vmem:[%s17425_s22 + $0x228] sm:$0xff]  ;;  %v2902_v35 = vcombine.high %v354_v29, %v354_v29  ;;  %v1175_v43 = vcombine.high %v223_v34, %v223_v34 }
  0x8e   : > { %7210 = vmatprep.mubr.f32.mxu0 %v1071_v49  ;;  %7286 = vmatprep.subr.mxu0 %v2892_v48  ;;  %v2903_v37 = vcombine.high %v355_v32, %v355_v32  ;;  %v1157_v40 = vcombine.high %v1155_v31, %v1155_v31  ;;  %v1182_v48 = vrot.slane %v223_v34, %v17435_v19  ;;  %v358_v49 = vld [vmem:[%s17425_s22 + $0x240] sm:$0xff] }
  0x8f   : > { %7280 = vmatprep.mubr.f32.mxu1 %v1072_v53  ;;  %7356 = vmatprep.subr.mxu1 %v2893_v50 }
  0x90   : > { %7211 = vmatmul.mubr.f32.vlgmr.msra.gmra.mrb[56].mxu0 %v1063_v41  ;;  %7281 = vmatmul.mubr.f32.vlgmr.msra.gmra.mrb[56].mxu1 %v1070_v44  ;;  %v1172_v41 = vrot.slane %v1158_v33, %v17435_v19  ;;  %v224_v44 = vld [vmem:[%s17420_s19 + $0x120] sm:$0xff]  ;;  %v1190_v56 = vcombine.high %v1182_v48, %v1182_v48 }
  0x91   : > { %7287 = vmatpush1.xpose.msra.mxu0 %v344_v42  ;;  %7357 = vmatpush1.xpose.msra.mxu1 %v345_v45  ;;  %v357_v42 = vld [vmem:[%s17425_s22 + $0x238] sm:$0xff]  ;;  %v2904_v45 = vcombine.high %v356_v39, %v356_v39  ;;  %v1192_v53 = vcombine.high %v224_v44, %v224_v44 }
  0x92   : > { %7350 = vmatprep.mubr.f32.mxu0 %v1088_v59  ;;  %7426 = vmatprep.subr.mxu0 %v2894_v58  ;;  %v2905_v47 = vcombine.high %v357_v42, %v357_v42  ;;  %v1174_v50 = vcombine.high %v1172_v41, %v1172_v41  ;;  %v1199_v58 = vrot.slane %v224_v44, %v17435_v19  ;;  %v360_v59 = vld [vmem:[%s17425_s22 + $0x250] sm:$0xff] }
  0x93   : > { %7420 = vmatprep.mubr.f32.mxu1 %v1089_v63  ;;  %7496 = vmatprep.subr.mxu1 %v2895_v60 }
  0x94   : > { %7351 = vmatmul.mubr.f32.vlgmr.msra.gmra.mrb[58].mxu0 %v1080_v51  ;;  %7421 = vmatmul.mubr.f32.vlgmr.msra.gmra.mrb[58].mxu1 %v1087_v54  ;;  %v1189_v51 = vrot.slane %v1175_v43, %v17435_v19  ;;  %v225_v54 = vld [vmem:[%s17420_s19 + $0x128] sm:$0xff]  ;;  %v1207_v2 = vcombine.high %v1199_v58, %v1199_v58 }
  0x95   : > { %7427 = vmatpush1.xpose.msra.mxu0 %v346_v52  ;;  %7497 = vmatpush1.xpose.msra.mxu1 %v347_v55  ;;  %v359_v52 = vld [vmem:[%s17425_s22 + $0x248] sm:$0xff]  ;;  %v2906_v55 = vcombine.high %v358_v49, %v358_v49  ;;  %v1209_v63 = vcombine.high %v225_v54, %v225_v54 }
  0x96   : > { %7490 = vmatprep.mubr.f32.mxu0 %v1105_v5  ;;  %7566 = vmatprep.subr.mxu0 %v2896_v4  ;;  %v2907_v57 = vcombine.high %v359_v52, %v359_v52  ;;  %v1191_v60 = vcombine.high %v1189_v51, %v1189_v51  ;;  %v1216_v4 = vrot.slane %v225_v54, %v17435_v19  ;;  %v362_v5 = vld [vmem:[%s17425_s22 + $0x260] sm:$0xff] }
  0x97   : > { %7560 = vmatprep.mubr.f32.mxu1 %v1106_v9  ;;  %7636 = vmatprep.subr.mxu1 %v2897_v6 }
  0x98   : > { %7491 = vmatmul.mubr.f32.vlgmr.msra.gmra.mrb[60].mxu0 %v1097_v61  ;;  %7561 = vmatmul.mubr.f32.vlgmr.msra.gmra.mrb[60].mxu1 %v1104_v0  ;;  %v1206_v61 = vrot.slane %v1192_v53, %v17435_v19  ;;  %v226_v0 = vld [vmem:[%s17420_s19 + $0x130] sm:$0xff]  ;;  %v1224_v12 = vcombine.high %v1216_v4, %v1216_v4 }
  0x99   : > { %7567 = vmatpush1.xpose.msra.mxu0 %v348_v62  ;;  %7637 = vmatpush1.xpose.msra.mxu1 %v349_v1  ;;  %v361_v62 = vld [vmem:[%s17425_s22 + $0x258] sm:$0xff]  ;;  %v2908_v1 = vcombine.high %v360_v59, %v360_v59  ;;  %v1226_v9 = vcombine.high %v226_v0, %v226_v0 }
  0x9a   : > { %7630 = vmatprep.mubr.f32.mxu0 %v1122_v15  ;;  %7706 = vmatprep.subr.mxu0 %v2898_v14  ;;  %v2909_v3 = vcombine.high %v361_v62, %v361_v62  ;;  %v1208_v6 = vcombine.high %v1206_v61, %v1206_v61  ;;  %v1233_v14 = vrot.slane %v226_v0, %v17435_v19  ;;  %v364_v15 = vld [vmem:[%s17425_s22 + $0x270] sm:$0xff] }
  0x9b   : > { %7700 = vmatprep.mubr.f32.mxu1 %v1123_v20  ;;  %7776 = vmatprep.subr.mxu1 %v2899_v16 }
  0x9c   : > { %7631 = vmatmul.mubr.f32.vlgmr.msra.gmra.mrb[62].mxu0 %v1114_v7  ;;  %7701 = vmatmul.mubr.f32.vlgmr.msra.gmra.mrb[62].mxu1 %v1121_v10  ;;  %v1223_v7 = vrot.slane %v1209_v63, %v17435_v19  ;;  %v227_v10 = vld [vmem:[%s17420_s19 + $0x138] sm:$0xff]  ;;  %v1241_v23 = vcombine.high %v1233_v14, %v1233_v14 }
  0x9d   : > { %7707 = vmatpush1.xpose.msra.mxu0 %v350_v8  ;;  %7777 = vmatpush1.xpose.msra.mxu1 %v351_v11  ;;  %v363_v8 = vld [vmem:[%s17425_s22 + $0x268] sm:$0xff]  ;;  %v2910_v11 = vcombine.high %v362_v5, %v362_v5  ;;  %v1243_v20 = vcombine.high %v227_v10, %v227_v10 }
  0x9e   : > { %7770 = vmatprep.mubr.f32.mxu0 %v1139_v26  ;;  %7846 = vmatprep.subr.mxu0 %v2900_v25  ;;  %v2911_v13 = vcombine.high %v363_v8, %v363_v8  ;;  %v1225_v16 = vcombine.high %v1223_v7, %v1223_v7  ;;  %v1250_v25 = vrot.slane %v227_v10, %v17435_v19  ;;  %v366_v26 = vld [vmem:[%s17425_s22 + $0x280] sm:$0xff] }
  0x9f   : > { %7840 = vmatprep.mubr.f32.mxu1 %v1140_v30  ;;  %7916 = vmatprep.subr.mxu1 %v2901_v27 }
  0xa0   : > { %7771 = vmatmul.mubr.f32.vlgmr.msra.gmra.mrb[64].mxu0 %v1131_v17  ;;  %7841 = vmatmul.mubr.f32.vlgmr.msra.gmra.mrb[64].mxu1 %v1138_v21  ;;  %v1240_v17 = vrot.slane %v1226_v9, %v17435_v19  ;;  %v228_v21 = vld [vmem:[%s17420_s19 + $0x140] sm:$0xff]  ;;  %v1258_v33 = vcombine.high %v1250_v25, %v1250_v25 }
  0xa1   : > { %7847 = vmatpush1.xpose.msra.mxu0 %v352_v18  ;;  %7917 = vmatpush1.xpose.msra.mxu1 %v353_v22  ;;  %v365_v18 = vld [vmem:[%s17425_s22 + $0x278] sm:$0xff]  ;;  %v2912_v22 = vcombine.high %v364_v15, %v364_v15  ;;  %v1260_v30 = vcombine.high %v228_v21, %v228_v21 }
  0xa2   : > { %7910 = vmatprep.mubr.f32.mxu0 %v1156_v36  ;;  %7986 = vmatprep.subr.mxu0 %v2902_v35  ;;  %v2913_v24 = vcombine.high %v365_v18, %v365_v18  ;;  %v1242_v27 = vcombine.high %v1240_v17, %v1240_v17  ;;  %v1267_v35 = vrot.slane %v228_v21, %v17435_v19  ;;  %v368_v36 = vld [vmem:[%s17425_s22 + $0x290] sm:$0xff] }
  0xa3   : > { %7980 = vmatprep.mubr.f32.mxu1 %v1157_v40  ;;  %8056 = vmatprep.subr.mxu1 %v2903_v37 }
  0xa4   : > { %7911 = vmatmul.mubr.f32.vlgmr.msra.gmra.mrb[66].mxu0 %v1148_v28  ;;  %7981 = vmatmul.mubr.f32.vlgmr.msra.gmra.mrb[66].mxu1 %v1155_v31  ;;  %v1257_v28 = vrot.slane %v1243_v20, %v17435_v19  ;;  %v229_v31 = vld [vmem:[%s17420_s19 + $0x148] sm:$0xff]  ;;  %v1275_v43 = vcombine.high %v1267_v35, %v1267_v35 }
  0xa5   : > { %7987 = vmatpush1.xpose.msra.mxu0 %v354_v29  ;;  %8057 = vmatpush1.xpose.msra.mxu1 %v355_v32  ;;  %v367_v29 = vld [vmem:[%s17425_s22 + $0x288] sm:$0xff]  ;;  %v2914_v32 = vcombine.high %v366_v26, %v366_v26  ;;  %v1277_v40 = vcombine.high %v229_v31, %v229_v31 }
  0xa6   : > { %8050 = vmatprep.mubr.f32.mxu0 %v1173_v46  ;;  %8126 = vmatprep.subr.mxu0 %v2904_v45  ;;  %v2915_v34 = vcombine.high %v367_v29, %v367_v29  ;;  %v1259_v37 = vcombine.high %v1257_v28, %v1257_v28  ;;  %v1284_v45 = vrot.slane %v229_v31, %v17435_v19  ;;  %v370_v46 = vld [vmem:[%s17425_s22 + $0x2a0] sm:$0xff] }
  0xa7   : > { %8120 = vmatprep.mubr.f32.mxu1 %v1174_v50  ;;  %8196 = vmatprep.subr.mxu1 %v2905_v47 }
  0xa8   : > { %8051 = vmatmul.mubr.f32.vlgmr.msra.gmra.mrb[68].mxu0 %v1165_v38  ;;  %8121 = vmatmul.mubr.f32.vlgmr.msra.gmra.mrb[68].mxu1 %v1172_v41  ;;  %v1274_v38 = vrot.slane %v1260_v30, %v17435_v19  ;;  %v230_v41 = vld [vmem:[%s17420_s19 + $0x150] sm:$0xff]  ;;  %v1292_v53 = vcombine.high %v1284_v45, %v1284_v45 }
  0xa9   : > { %8127 = vmatpush1.xpose.msra.mxu0 %v356_v39  ;;  %8197 = vmatpush1.xpose.msra.mxu1 %v357_v42  ;;  %v369_v39 = vld [vmem:[%s17425_s22 + $0x298] sm:$0xff]  ;;  %v2916_v42 = vcombine.high %v368_v36, %v368_v36  ;;  %v1294_v50 = vcombine.high %v230_v41, %v230_v41 }
  0xaa   : > { %8190 = vmatprep.mubr.f32.mxu0 %v1190_v56  ;;  %8266 = vmatprep.subr.mxu0 %v2906_v55  ;;  %v2917_v44 = vcombine.high %v369_v39, %v369_v39  ;;  %v1276_v47 = vcombine.high %v1274_v38, %v1274_v38  ;;  %v1301_v55 = vrot.slane %v230_v41, %v17435_v19  ;;  %v372_v56 = vld [vmem:[%s17425_s22 + $0x2b0] sm:$0xff] }
  0xab   : > { %8260 = vmatprep.mubr.f32.mxu1 %v1191_v60  ;;  %8336 = vmatprep.subr.mxu1 %v2907_v57 }
  0xac   : > { %8191 = vmatmul.mubr.f32.vlgmr.msra.gmra.mrb[70].mxu0 %v1182_v48  ;;  %8261 = vmatmul.mubr.f32.vlgmr.msra.gmra.mrb[70].mxu1 %v1189_v51  ;;  %v1291_v48 = vrot.slane %v1277_v40, %v17435_v19  ;;  %v231_v51 = vld [vmem:[%s17420_s19 + $0x158] sm:$0xff]  ;;  %v1309_v63 = vcombine.high %v1301_v55, %v1301_v55 }
  0xad   : > { %8267 = vmatpush1.xpose.msra.mxu0 %v358_v49  ;;  %8337 = vmatpush1.xpose.msra.mxu1 %v359_v52  ;;  %v371_v49 = vld [vmem:[%s17425_s22 + $0x2a8] sm:$0xff]  ;;  %v2918_v52 = vcombine.high %v370_v46, %v370_v46  ;;  %v1311_v60 = vcombine.high %v231_v51, %v231_v51 }
  0xae   : > { %8330 = vmatprep.mubr.f32.mxu0 %v1207_v2  ;;  %8406 = vmatprep.subr.mxu0 %v2908_v1  ;;  %v2919_v54 = vcombine.high %v371_v49, %v371_v49  ;;  %v1293_v57 = vcombine.high %v1291_v48, %v1291_v48  ;;  %v1318_v1 = vrot.slane %v231_v51, %v17435_v19  ;;  %v374_v2 = vld [vmem:[%s17425_s22 + $0x2c0] sm:$0xff] }
  0xaf   : > { %8400 = vmatprep.mubr.f32.mxu1 %v1208_v6  ;;  %8476 = vmatprep.subr.mxu1 %v2909_v3 }
  0xb0   : > { %8331 = vmatmul.mubr.f32.vlgmr.msra.gmra.mrb[72].mxu0 %v1199_v58  ;;  %8401 = vmatmul.mubr.f32.vlgmr.msra.gmra.mrb[72].mxu1 %v1206_v61  ;;  %v1308_v58 = vrot.slane %v1294_v50, %v17435_v19  ;;  %v232_v61 = vld [vmem:[%s17420_s19 + $0x160] sm:$0xff]  ;;  %v1326_v9 = vcombine.high %v1318_v1, %v1318_v1 }
  0xb1   : > { %8407 = vmatpush1.xpose.msra.mxu0 %v360_v59  ;;  %8477 = vmatpush1.xpose.msra.mxu1 %v361_v62  ;;  %v373_v59 = vld [vmem:[%s17425_s22 + $0x2b8] sm:$0xff]  ;;  %v2920_v62 = vcombine.high %v372_v56, %v372_v56  ;;  %v1328_v6 = vcombine.high %v232_v61, %v232_v61 }
  0xb2   : > { %8470 = vmatprep.mubr.f32.mxu0 %v1224_v12  ;;  %8546 = vmatprep.subr.mxu0 %v2910_v11  ;;  %v2921_v0 = vcombine.high %v373_v59, %v373_v59  ;;  %v1310_v3 = vcombine.high %v1308_v58, %v1308_v58  ;;  %v1335_v11 = vrot.slane %v232_v61, %v17435_v19  ;;  %v376_v12 = vld [vmem:[%s17425_s22 + $0x2d0] sm:$0xff] }
  0xb3   : > { %8540 = vmatprep.mubr.f32.mxu1 %v1225_v16  ;;  %8616 = vmatprep.subr.mxu1 %v2911_v13 }
  0xb4   : > { %8471 = vmatmul.mubr.f32.vlgmr.msra.gmra.mrb[74].mxu0 %v1216_v4  ;;  %8541 = vmatmul.mubr.f32.vlgmr.msra.gmra.mrb[74].mxu1 %v1223_v7  ;;  %v1325_v4 = vrot.slane %v1311_v60, %v17435_v19  ;;  %v233_v7 = vld [vmem:[%s17420_s19 + $0x168] sm:$0xff]  ;;  %v1343_v20 = vcombine.high %v1335_v11, %v1335_v11 }
  0xb5   : > { %8547 = vmatpush1.xpose.msra.mxu0 %v362_v5  ;;  %8617 = vmatpush1.xpose.msra.mxu1 %v363_v8  ;;  %v375_v5 = vld [vmem:[%s17425_s22 + $0x2c8] sm:$0xff]  ;;  %v2922_v8 = vcombine.high %v374_v2, %v374_v2  ;;  %v1345_v16 = vcombine.high %v233_v7, %v233_v7 }
  0xb6   : > { %8610 = vmatprep.mubr.f32.mxu0 %v1241_v23  ;;  %8686 = vmatprep.subr.mxu0 %v2912_v22  ;;  %v2923_v10 = vcombine.high %v375_v5, %v375_v5  ;;  %v1327_v13 = vcombine.high %v1325_v4, %v1325_v4  ;;  %v1352_v22 = vrot.slane %v233_v7, %v17435_v19  ;;  %v378_v23 = vld [vmem:[%s17425_s22 + $0x2e0] sm:$0xff] }
  0xb7   : > { %8680 = vmatprep.mubr.f32.mxu1 %v1242_v27  ;;  %8756 = vmatprep.subr.mxu1 %v2913_v24 }
  0xb8   : > { %8611 = vmatmul.mubr.f32.vlgmr.msra.gmra.mrb[76].mxu0 %v1233_v14  ;;  %8681 = vmatmul.mubr.f32.vlgmr.msra.gmra.mrb[76].mxu1 %v1240_v17  ;;  %v1342_v14 = vrot.slane %v1328_v6, %v17435_v19  ;;  %v234_v17 = vld [vmem:[%s17420_s19 + $0x170] sm:$0xff]  ;;  %v1360_v30 = vcombine.high %v1352_v22, %v1352_v22 }
  0xb9   : > { %8687 = vmatpush1.xpose.msra.mxu0 %v364_v15  ;;  %8757 = vmatpush1.xpose.msra.mxu1 %v365_v18  ;;  %v377_v15 = vld [vmem:[%s17425_s22 + $0x2d8] sm:$0xff]  ;;  %v2924_v18 = vcombine.high %v376_v12, %v376_v12  ;;  %v1362_v27 = vcombine.high %v234_v17, %v234_v17 }
  0xba   : > { %8750 = vmatprep.mubr.f32.mxu0 %v1258_v33  ;;  %8826 = vmatprep.subr.mxu0 %v2914_v32  ;;  %v2925_v21 = vcombine.high %v377_v15, %v377_v15  ;;  %v1344_v24 = vcombine.high %v1342_v14, %v1342_v14  ;;  %v1369_v32 = vrot.slane %v234_v17, %v17435_v19  ;;  %v380_v33 = vld [vmem:[%s17425_s22 + $0x2f0] sm:$0xff] }
  0xbb   : > { %8820 = vmatprep.mubr.f32.mxu1 %v1259_v37  ;;  %8896 = vmatprep.subr.mxu1 %v2915_v34 }
  0xbc   : > { %8751 = vmatmul.mubr.f32.vlgmr.msra.gmra.mrb[78].mxu0 %v1250_v25  ;;  %8821 = vmatmul.mubr.f32.vlgmr.msra.gmra.mrb[78].mxu1 %v1257_v28  ;;  %v1359_v25 = vrot.slane %v1345_v16, %v17435_v19  ;;  %v235_v28 = vld [vmem:[%s17420_s19 + $0x178] sm:$0xff]  ;;  %v1377_v40 = vcombine.high %v1369_v32, %v1369_v32 }
  0xbd   : > { %8827 = vmatpush1.xpose.msra.mxu0 %v366_v26  ;;  %8897 = vmatpush1.xpose.msra.mxu1 %v367_v29  ;;  %v379_v26 = vld [vmem:[%s17425_s22 + $0x2e8] sm:$0xff]  ;;  %v2926_v29 = vcombine.high %v378_v23, %v378_v23  ;;  %v1379_v37 = vcombine.high %v235_v28, %v235_v28 }
  0xbe   : > { %8890 = vmatprep.mubr.f32.mxu0 %v1275_v43  ;;  %8966 = vmatprep.subr.mxu0 %v2916_v42  ;;  %v2927_v31 = vcombine.high %v379_v26, %v379_v26  ;;  %v1361_v34 = vcombine.high %v1359_v25, %v1359_v25  ;;  %v1386_v42 = vrot.slane %v235_v28, %v17435_v19  ;;  %v382_v43 = vld [vmem:[%s17425_s22 + $0x300] sm:$0xff] }
  0xbf   : > { %8960 = vmatprep.mubr.f32.mxu1 %v1276_v47  ;;  %9036 = vmatprep.subr.mxu1 %v2917_v44 }
  0xc0   : > { %8891 = vmatmul.mubr.f32.vlgmr.msra.gmra.mrb[80].mxu0 %v1267_v35  ;;  %8961 = vmatmul.mubr.f32.vlgmr.msra.gmra.mrb[80].mxu1 %v1274_v38  ;;  %v1376_v35 = vrot.slane %v1362_v27, %v17435_v19  ;;  %v236_v38 = vld [vmem:[%s17420_s19 + $0x180] sm:$0xff]  ;;  %v1394_v50 = vcombine.high %v1386_v42, %v1386_v42 }
  0xc1   : > { %8967 = vmatpush1.xpose.msra.mxu0 %v368_v36  ;;  %9037 = vmatpush1.xpose.msra.mxu1 %v369_v39  ;;  %v381_v36 = vld [vmem:[%s17425_s22 + $0x2f8] sm:$0xff]  ;;  %v2928_v39 = vcombine.high %v380_v33, %v380_v33  ;;  %v1396_v47 = vcombine.high %v236_v38, %v236_v38 }
  0xc2   : > { %9030 = vmatprep.mubr.f32.mxu0 %v1292_v53  ;;  %9106 = vmatprep.subr.mxu0 %v2918_v52  ;;  %v2929_v41 = vcombine.high %v381_v36, %v381_v36  ;;  %v1378_v44 = vcombine.high %v1376_v35, %v1376_v35  ;;  %v1403_v52 = vrot.slane %v236_v38, %v17435_v19  ;;  %v384_v53 = vld [vmem:[%s17425_s22 + $0x310] sm:$0xff] }
  0xc3   : > { %9100 = vmatprep.mubr.f32.mxu1 %v1293_v57  ;;  %9176 = vmatprep.subr.mxu1 %v2919_v54 }
  0xc4   : > { %9031 = vmatmul.mubr.f32.vlgmr.msra.gmra.mrb[82].mxu0 %v1284_v45  ;;  %9101 = vmatmul.mubr.f32.vlgmr.msra.gmra.mrb[82].mxu1 %v1291_v48  ;;  %v1393_v45 = vrot.slane %v1379_v37, %v17435_v19  ;;  %v237_v48 = vld [vmem:[%s17420_s19 + $0x188] sm:$0xff]  ;;  %v1411_v60 = vcombine.high %v1403_v52, %v1403_v52 }
  0xc5   : > { %9107 = vmatpush1.xpose.msra.mxu0 %v370_v46  ;;  %9177 = vmatpush1.xpose.msra.mxu1 %v371_v49  ;;  %v383_v46 = vld [vmem:[%s17425_s22 + $0x308] sm:$0xff]  ;;  %v2930_v49 = vcombine.high %v382_v43, %v382_v43  ;;  %v1413_v57 = vcombine.high %v237_v48, %v237_v48 }
  0xc6   : > { %9170 = vmatprep.mubr.f32.mxu0 %v1309_v63  ;;  %9246 = vmatprep.subr.mxu0 %v2920_v62  ;;  %v2931_v51 = vcombine.high %v383_v46, %v383_v46  ;;  %v1395_v54 = vcombine.high %v1393_v45, %v1393_v45  ;;  %v1420_v62 = vrot.slane %v237_v48, %v17435_v19  ;;  %v386_v63 = vld [vmem:[%s17425_s22 + $0x320] sm:$0xff] }
  0xc7   : > { %9240 = vmatprep.mubr.f32.mxu1 %v1310_v3  ;;  %9316 = vmatprep.subr.mxu1 %v2921_v0 }
  0xc8   : > { %9171 = vmatmul.mubr.f32.vlgmr.msra.gmra.mrb[84].mxu0 %v1301_v55  ;;  %9241 = vmatmul.mubr.f32.vlgmr.msra.gmra.mrb[84].mxu1 %v1308_v58  ;;  %v1410_v55 = vrot.slane %v1396_v47, %v17435_v19  ;;  %v238_v58 = vld [vmem:[%s17420_s19 + $0x190] sm:$0xff]  ;;  %v1428_v6 = vcombine.high %v1420_v62, %v1420_v62 }
  0xc9   : > { %9247 = vmatpush1.xpose.msra.mxu0 %v372_v56  ;;  %9317 = vmatpush1.xpose.msra.mxu1 %v373_v59  ;;  %v385_v56 = vld [vmem:[%s17425_s22 + $0x318] sm:$0xff]  ;;  %v2932_v59 = vcombine.high %v384_v53, %v384_v53  ;;  %v1430_v3 = vcombine.high %v238_v58, %v238_v58 }
  0xca   : > { %9310 = vmatprep.mubr.f32.mxu0 %v1326_v9  ;;  %9386 = vmatprep.subr.mxu0 %v2922_v8  ;;  %v2933_v61 = vcombine.high %v385_v56, %v385_v56  ;;  %v1412_v0 = vcombine.high %v1410_v55, %v1410_v55  ;;  %v1437_v8 = vrot.slane %v238_v58, %v17435_v19  ;;  %v388_v9 = vld [vmem:[%s17425_s22 + $0x330] sm:$0xff] }
  0xcb   : > { %9380 = vmatprep.mubr.f32.mxu1 %v1327_v13  ;;  %9456 = vmatprep.subr.mxu1 %v2923_v10 }
  0xcc   : > { %9311 = vmatmul.mubr.f32.vlgmr.msra.gmra.mrb[86].mxu0 %v1318_v1  ;;  %9381 = vmatmul.mubr.f32.vlgmr.msra.gmra.mrb[86].mxu1 %v1325_v4  ;;  %v1427_v1 = vrot.slane %v1413_v57, %v17435_v19  ;;  %v239_v4 = vld [vmem:[%s17420_s19 + $0x198] sm:$0xff]  ;;  %v1445_v16 = vcombine.high %v1437_v8, %v1437_v8 }
  0xcd   : > { %9387 = vmatpush1.xpose.msra.mxu0 %v374_v2  ;;  %9457 = vmatpush1.xpose.msra.mxu1 %v375_v5  ;;  %v387_v2 = vld [vmem:[%s17425_s22 + $0x328] sm:$0xff]  ;;  %v2934_v5 = vcombine.high %v386_v63, %v386_v63  ;;  %v1447_v13 = vcombine.high %v239_v4, %v239_v4 }
  0xce   : > { %9450 = vmatprep.mubr.f32.mxu0 %v1343_v20  ;;  %9526 = vmatprep.subr.mxu0 %v2924_v18  ;;  %v2935_v7 = vcombine.high %v387_v2, %v387_v2  ;;  %v1429_v10 = vcombine.high %v1427_v1, %v1427_v1  ;;  %v1454_v18 = vrot.slane %v239_v4, %v17435_v19  ;;  %v390_v20 = vld [vmem:[%s17425_s22 + $0x340] sm:$0xff] }
  0xcf   : > { %9520 = vmatprep.mubr.f32.mxu1 %v1344_v24  ;;  %9596 = vmatprep.subr.mxu1 %v2925_v21 }
  0xd0   : > { %9451 = vmatmul.mubr.f32.vlgmr.msra.gmra.mrb[88].mxu0 %v1335_v11  ;;  %9521 = vmatmul.mubr.f32.vlgmr.msra.gmra.mrb[88].mxu1 %v1342_v14  ;;  %v1444_v11 = vrot.slane %v1430_v3, %v17435_v19  ;;  %v240_v14 = vld [vmem:[%s17420_s19 + $0x1a0] sm:$0xff]  ;;  %v1462_v27 = vcombine.high %v1454_v18, %v1454_v18 }
  0xd1   : > { %9527 = vmatpush1.xpose.msra.mxu0 %v376_v12  ;;  %9597 = vmatpush1.xpose.msra.mxu1 %v377_v15  ;;  %v389_v12 = vld [vmem:[%s17425_s22 + $0x338] sm:$0xff]  ;;  %v2936_v15 = vcombine.high %v388_v9, %v388_v9  ;;  %v1464_v24 = vcombine.high %v240_v14, %v240_v14 }
  0xd2   : > { %9590 = vmatprep.mubr.f32.mxu0 %v1360_v30  ;;  %9666 = vmatprep.subr.mxu0 %v2926_v29  ;;  %v2937_v17 = vcombine.high %v389_v12, %v389_v12  ;;  %v1446_v21 = vcombine.high %v1444_v11, %v1444_v11  ;;  %v1471_v29 = vrot.slane %v240_v14, %v17435_v19  ;;  %v392_v30 = vld [vmem:[%s17425_s22 + $0x350] sm:$0xff] }
  0xd3   : > { %9660 = vmatprep.mubr.f32.mxu1 %v1361_v34  ;;  %9736 = vmatprep.subr.mxu1 %v2927_v31 }
  0xd4   : > { %9591 = vmatmul.mubr.f32.vlgmr.msra.gmra.mrb[90].mxu0 %v1352_v22  ;;  %9661 = vmatmul.mubr.f32.vlgmr.msra.gmra.mrb[90].mxu1 %v1359_v25  ;;  %v1461_v22 = vrot.slane %v1447_v13, %v17435_v19  ;;  %v241_v25 = vld [vmem:[%s17420_s19 + $0x1a8] sm:$0xff]  ;;  %v1479_v37 = vcombine.high %v1471_v29, %v1471_v29 }
  0xd5   : > { %9667 = vmatpush1.xpose.msra.mxu0 %v378_v23  ;;  %9737 = vmatpush1.xpose.msra.mxu1 %v379_v26  ;;  %v391_v23 = vld [vmem:[%s17425_s22 + $0x348] sm:$0xff]  ;;  %v2938_v26 = vcombine.high %v390_v20, %v390_v20  ;;  %v1481_v34 = vcombine.high %v241_v25, %v241_v25 }
  0xd6   : > { %9730 = vmatprep.mubr.f32.mxu0 %v1377_v40  ;;  %9806 = vmatprep.subr.mxu0 %v2928_v39  ;;  %v2939_v28 = vcombine.high %v391_v23, %v391_v23  ;;  %v1463_v31 = vcombine.high %v1461_v22, %v1461_v22  ;;  %v1488_v39 = vrot.slane %v241_v25, %v17435_v19  ;;  %v394_v40 = vld [vmem:[%s17425_s22 + $0x360] sm:$0xff] }
  0xd7   : > { %9800 = vmatprep.mubr.f32.mxu1 %v1378_v44  ;;  %9876 = vmatprep.subr.mxu1 %v2929_v41 }
  0xd8   : > { %9731 = vmatmul.mubr.f32.vlgmr.msra.gmra.mrb[92].mxu0 %v1369_v32  ;;  %9801 = vmatmul.mubr.f32.vlgmr.msra.gmra.mrb[92].mxu1 %v1376_v35  ;;  %v1478_v32 = vrot.slane %v1464_v24, %v17435_v19  ;;  %v242_v35 = vld [vmem:[%s17420_s19 + $0x1b0] sm:$0xff]  ;;  %v1496_v47 = vcombine.high %v1488_v39, %v1488_v39 }
  0xd9   : > { %9807 = vmatpush1.xpose.msra.mxu0 %v380_v33  ;;  %9877 = vmatpush1.xpose.msra.mxu1 %v381_v36  ;;  %v393_v33 = vld [vmem:[%s17425_s22 + $0x358] sm:$0xff]  ;;  %v2940_v36 = vcombine.high %v392_v30, %v392_v30  ;;  %v1498_v44 = vcombine.high %v242_v35, %v242_v35 }
  0xda   : > { %9870 = vmatprep.mubr.f32.mxu0 %v1394_v50  ;;  %9946 = vmatprep.subr.mxu0 %v2930_v49  ;;  %v2941_v38 = vcombine.high %v393_v33, %v393_v33  ;;  %v1480_v41 = vcombine.high %v1478_v32, %v1478_v32  ;;  %v1505_v49 = vrot.slane %v242_v35, %v17435_v19  ;;  %v396_v50 = vld [vmem:[%s17425_s22 + $0x370] sm:$0xff] }
  0xdb   : > { %9940 = vmatprep.mubr.f32.mxu1 %v1395_v54  ;;  %10016 = vmatprep.subr.mxu1 %v2931_v51 }
  0xdc   : > { %9871 = vmatmul.mubr.f32.vlgmr.msra.gmra.mrb[94].mxu0 %v1386_v42  ;;  %9941 = vmatmul.mubr.f32.vlgmr.msra.gmra.mrb[94].mxu1 %v1393_v45  ;;  %v1495_v42 = vrot.slane %v1481_v34, %v17435_v19  ;;  %v243_v45 = vld [vmem:[%s17420_s19 + $0x1b8] sm:$0xff]  ;;  %v1513_v57 = vcombine.high %v1505_v49, %v1505_v49 }
  0xdd   : > { %9947 = vmatpush1.xpose.msra.mxu0 %v382_v43  ;;  %10017 = vmatpush1.xpose.msra.mxu1 %v383_v46  ;;  %v395_v43 = vld [vmem:[%s17425_s22 + $0x368] sm:$0xff]  ;;  %v2942_v46 = vcombine.high %v394_v40, %v394_v40  ;;  %v1515_v54 = vcombine.high %v243_v45, %v243_v45 }
  0xde   : > { %10010 = vmatprep.mubr.f32.mxu0 %v1411_v60  ;;  %10086 = vmatprep.subr.mxu0 %v2932_v59  ;;  %v2943_v48 = vcombine.high %v395_v43, %v395_v43  ;;  %v1497_v51 = vcombine.high %v1495_v42, %v1495_v42  ;;  %v1522_v59 = vrot.slane %v243_v45, %v17435_v19  ;;  %v398_v60 = vld [vmem:[%s17425_s22 + $0x380] sm:$0xff] }
  0xdf   : > { %10080 = vmatprep.mubr.f32.mxu1 %v1412_v0  ;;  %10156 = vmatprep.subr.mxu1 %v2933_v61  ;;  %v1529_v0 = vrot.slane %v1515_v54, %v17435_v19  ;;  %v248_v54 = vld [vmem:[%s17420_s19 + $0x1e0] sm:$0xff] }
  0xe0   : > { %10011 = vmatmul.mubr.f32.vlgmr.msra.gmra.mrb[96].mxu0 %v1403_v52  ;;  %10081 = vmatmul.mubr.f32.vlgmr.msra.gmra.mrb[96].mxu1 %v1410_v55  ;;  %v1512_v52 = vrot.slane %v1498_v44, %v17435_v19  ;;  %v244_v55 = vld [vmem:[%s17420_s19 + $0x1c0] sm:$0xff]  ;;  %v404_v44 = vld [vmem:[%s17425_s22 + $0x3b0] sm:$0xff] }
  0xe1   : > { %10087 = vmatpush1.xpose.msra.mxu0 %v384_v53  ;;  %10157 = vmatpush1.xpose.msra.mxu1 %v385_v56  ;;  %v397_v53 = vld [vmem:[%s17425_s22 + $0x378] sm:$0xff]  ;;  %v2944_v56 = vcombine.high %v396_v50, %v396_v50 }
  0xe2   : > { %10150 = vmatprep.mubr.f32.mxu0 %v1428_v6  ;;  %10226 = vmatprep.subr.mxu0 %v2934_v5  ;;  %v2945_v58 = vcombine.high %v397_v53, %v397_v53  ;;  %v245_v6 = vld [vmem:[%s17420_s19 + $0x1c8] sm:$0xff] }
  0xe3   : > { %10220 = vmatprep.mubr.f32.mxu1 %v1429_v10  ;;  %10296 = vmatprep.subr.mxu1 %v2935_v7  ;;  %v2946_v7 = vcombine.high %v398_v60, %v398_v60  ;;  %v1539_v10 = vrot.slane %v244_v55, %v17435_v19 }
  0xe4   : > { %10151 = vmatmul.mubr.f32.vlgmr.msra.gmra.mrb[98].mxu0 %v1420_v62  ;;  %10221 = vmatmul.mubr.f32.vlgmr.msra.gmra.mrb[98].mxu1 %v1427_v1  ;;  %v399_v1 = vld [vmem:[%s17425_s22 + $0x388] sm:$0xff] }
  0xe5   : > { %10227 = vmatpush1.xpose.msra.mxu0 %v386_v63  ;;  %10297 = vmatpush1.xpose.msra.mxu1 %v387_v2  ;;  %v1514_v63 = vcombine.high %v1512_v52, %v1512_v52  ;;  %v1532_v2 = vcombine.high %v244_v55, %v244_v55 }
  0xe6   : > { %10290 = vmatprep.mubr.f32.mxu0 %v1445_v16  ;;  %10366 = vmatprep.subr.mxu0 %v2936_v15  ;;  %v1531_v15 = vcombine.high %v1529_v0, %v1529_v0 }
  0xe7   : > { %10360 = vmatprep.mubr.f32.mxu1 %v1446_v21  ;;  %10436 = vmatprep.subr.mxu1 %v2937_v17  ;;  %v1546_v16 = vrot.slane %v1532_v2, %v17435_v19  ;;  %v1549_v17 = vcombine.high %v245_v6, %v245_v6  ;;  %v1600_v2 = vcombine.high %v248_v54, %v248_v54 }
  0xe8   : > { %10291 = vmatmul.mubr.f32.vlgmr.msra.gmra.mrb[100].mxu0 %v1437_v8  ;;  %10361 = vmatmul.mubr.f32.vlgmr.msra.gmra.mrb[100].mxu1 %v1444_v11  ;;  %v1530_v8 = vcombine.high %v1522_v59, %v1522_v59  ;;  %v400_v11 = vld [vmem:[%s17425_s22 + $0x390] sm:$0xff] }
  0xe9   : > { %10367 = vmatpush1.xpose.msra.mxu0 %v388_v9  ;;  %10437 = vmatpush1.xpose.msra.mxu1 %v389_v12  ;;  %v2947_v9 = vcombine.high %v399_v1, %v399_v1  ;;  %v401_v12 = vld [vmem:[%s17425_s22 + $0x398] sm:$0xff] }
  0xea   : > { %10430 = vmatprep.mubr.f32.mxu0 %v1462_v27  ;;  %10506 = vmatprep.subr.mxu0 %v2938_v26  ;;  %v2949_v24 = vcombine.high %v401_v12, %v401_v12  ;;  %v1547_v26 = vcombine.high %v1539_v10, %v1539_v10  ;;  %v1556_v27 = vrot.slane %v245_v6, %v17435_v19  ;;  %v249_v6 = vld [vmem:[%s17420_s19 + $0x1e8] sm:$0xff] }
  0xeb   : > { %10500 = vmatprep.mubr.f32.mxu1 %v1463_v31  ;;  %10576 = vmatprep.subr.mxu1 %v2939_v28  ;;  %v402_v28 = vld [vmem:[%s17425_s22 + $0x3a0] sm:$0xff]  ;;  %v1548_v31 = vcombine.high %v1546_v16, %v1546_v16 }
  0xec   : > { %10431 = vmatmul.mubr.f32.vlgmr.msra.gmra.mrb[102].mxu0 %v1454_v18  ;;  %10501 = vmatmul.mubr.f32.vlgmr.msra.gmra.mrb[102].mxu1 %v1461_v22  ;;  %v246_v22 = vld [vmem:[%s17420_s19 + $0x1d0] sm:$0xff] }
  0xed   : > { %10507 = vmatpush1.xpose.msra.mxu0 %v390_v20  ;;  %10577 = vmatpush1.xpose.msra.mxu1 %v391_v23  ;;  %v2948_v23 = vcombine.high %v400_v11, %v400_v11  ;;  %v1566_v34 = vcombine.high %v246_v22, %v246_v22 }
  0xee   : > { %10570 = vmatprep.mubr.f32.mxu0 %v1479_v37  ;;  %10646 = vmatprep.subr.mxu0 %v2940_v36 }
  0xef   : > { %10640 = vmatprep.mubr.f32.mxu1 %v1480_v41  ;;  %10716 = vmatprep.subr.mxu1 %v2941_v38  ;;  %v247_v38 = vld [vmem:[%s17420_s19 + $0x1d8] sm:$0xff] }
  0xf0   : > { %10571 = vmatmul.mubr.f32.vlgmr.msra.gmra.mrb[104].mxu0 %v1471_v29  ;;  %10641 = vmatmul.mubr.f32.vlgmr.msra.gmra.mrb[104].mxu1 %v1478_v32  ;;  %v1563_v32 = vrot.slane %v1549_v17, %v17435_v19  ;;  %v409_v17 = vld [vmem:[%s17425_s22 + $0x3d8] sm:$0xff] }
  0xf1   : > { %10647 = vmatpush1.xpose.msra.mxu0 %v392_v30  ;;  %10717 = vmatpush1.xpose.msra.mxu1 %v393_v33  ;;  %v403_v33 = vld [vmem:[%s17425_s22 + $0x3a8] sm:$0xff] }
  0xf2   : > { %10710 = vmatprep.mubr.f32.mxu0 %v1496_v47  ;;  %10786 = vmatprep.subr.mxu0 %v2942_v46  ;;  %v1565_v47 = vcombine.high %v1563_v32, %v1563_v32 }
  0xf3   : > { %v3292_v61 = vpop.f32.mrb[0].mxu0  ;;  %v3362_v62 = vpop.f32.mrb[0].mxu1  ;;  %10780 = vmatprep.mubr.f32.mxu1 %v1497_v51  ;;  %10856 = vmatprep.subr.mxu1 %v2943_v48  ;;  %v1580_v48 = vrot.slane %v1566_v34, %v17435_v19  ;;  %v411_v34 = vld [vmem:[%s17425_s22 + $0x3e8] sm:$0xff] }
  0xf4   : > { %v3363_v3 = vadd.f32 %v3362_v62, %v3292_v61  ;;  %v3294_v4 = vpop.f32.mrb[1].mxu0  ;;  %10711 = vmatmul.mubr.f32.vlgmr.msra.gmra.mrb[106].mxu0 %v1488_v39  ;;  %v3364_v5 = vpop.f32.mrb[1].mxu1  ;;  %10781 = vmatmul.mubr.f32.vlgmr.msra.gmra.mrb[106].mxu1 %v1495_v42  ;;  %v2950_v39 = vcombine.high %v402_v28, %v402_v28  ;;  %v1564_v42 = vcombine.high %v1556_v27, %v1556_v27  ;;  %v407_v61 = vld [vmem:[%s17425_s22 + $0x3c8] sm:$0xff] }
  0xf5   : > { %10787 = vmatpush1.xpose.msra.mxu0 %v394_v40  ;;  %10857 = vmatpush1.xpose.msra.mxu1 %v395_v43  ;;  %v17725_v40 = vrot.slane %v246_v22, %v17435_v19  ;;  %v2951_v43 = vcombine.high %v403_v33, %v403_v33 }
  0xf6   : > { %10850 = vmatprep.mubr.f32.mxu0 %v1513_v57  ;;  %10926 = vmatprep.subr.mxu0 %v2944_v56  ;;  %v2952_v56 = vcombine.high %v404_v44, %v404_v44 }
  0xf7   : > { %v3432_v13 = vpop.f32.mrb[2].mxu0  ;;  %v3502_v14 = vpop.f32.mrb[2].mxu1  ;;  %10920 = vmatprep.mubr.f32.mxu1 %v1514_v63  ;;  %10996 = vmatprep.subr.mxu1 %v2945_v58  ;;  %v1581_v55 = vcombine.high %v17725_v40, %v17725_v40 }
  0xf8   : > { %v3433_v18 = vadd.f32 %v3432_v13, %v3363_v3  ;;  %v3434_v20 = vpop.f32.mrb[3].mxu0  ;;  %10851 = vmatmul.mubr.f32.vlgmr.msra.gmra.mrb[108].mxu0 %v1505_v49  ;;  %v3504_v21 = vpop.f32.mrb[3].mxu1  ;;  %10921 = vmatmul.mubr.f32.vlgmr.msra.gmra.mrb[108].mxu1 %v1512_v52  ;;  %v405_v49 = vld [vmem:[%s17425_s22 + $0x3b8] sm:$0xff] }
  0xf9   : > { %10927 = vmatpush1.xpose.msra.mxu0 %v396_v50  ;;  %10997 = vmatpush1.xpose.msra.mxu1 %v397_v53  ;;  %v1583_v50 = vcombine.high %v247_v38, %v247_v38  ;;  %v2953_v58 = vcombine.high %v405_v49, %v405_v49 }
  0xfa   : > { %v3503_v25 = vadd.f32 %v3502_v14, %v3433_v18  ;;  %10990 = vmatprep.mubr.f32.mxu0 %v1530_v8  ;;  %11066 = vmatprep.subr.mxu0 %v2946_v7  ;;  %v2955_v8 = vcombine.high %v407_v61, %v407_v61  ;;  %v1617_v18 = vcombine.high %v249_v6, %v249_v6 }
  0xfb   : > { %v3572_v29 = vpop.f32.mrb[4].mxu0  ;;  %v3642_v30 = vpop.f32.mrb[4].mxu1  ;;  %11060 = vmatprep.mubr.f32.mxu1 %v1531_v15  ;;  %11136 = vmatprep.subr.mxu1 %v2947_v9 }
  0xfc   : > { %v3573_v35 = vadd.f32 %v3572_v29, %v3503_v25  ;;  %v3574_v36 = vpop.f32.mrb[5].mxu0  ;;  %10991 = vmatmul.mubr.f32.vlgmr.msra.gmra.mrb[110].mxu0 %v1522_v59  ;;  %v3644_v37 = vpop.f32.mrb[5].mxu1  ;;  %11061 = vmatmul.mubr.f32.vlgmr.msra.gmra.mrb[110].mxu1 %v1529_v0  ;;  %v1590_v59 = vrot.slane %v247_v38, %v17435_v19  ;;  %v1582_v0 = vcombine.high %v1580_v48, %v1580_v48  ;;  %v410_v29 = vld [vmem:[%s17425_s22 + $0x3e0] sm:$0xff] }
  0xfd   : > { %11067 = vmatpush1.xpose.msra.mxu0 %v398_v60  ;;  %11137 = vmatpush1.xpose.msra.mxu1 %v399_v1  ;;  %v406_v60 = vld [vmem:[%s17425_s22 + $0x3c0] sm:$0xff]  ;;  %v1597_v1 = vrot.slane %v1583_v50, %v17435_v19  ;;  %v17745_v25 = vrot.slane %v249_v6, %v17435_v19 }
  0xfe   : > { %v3643_v41 = vadd.f32 %v3642_v30, %v3573_v35  ;;  %11130 = vmatprep.mubr.f32.mxu0 %v1547_v26  ;;  %11206 = vmatprep.subr.mxu0 %v2948_v23  ;;  %v2954_v7 = vcombine.high %v406_v60, %v406_v60  ;;  %v250_v23 = vld [vmem:[%s17420_s19 + $0x1f0] sm:$0xff] }
  0xff   : > { %v3712_v45 = vpop.f32.mrb[6].mxu0  ;;  %v3782_v46 = vpop.f32.mrb[6].mxu1  ;;  %11200 = vmatprep.mubr.f32.mxu1 %v1548_v31  ;;  %11276 = vmatprep.subr.mxu1 %v2949_v24  ;;  %v1599_v15 = vcombine.high %v1597_v1, %v1597_v1  ;;  %v1634_v35 = vcombine.high %v250_v23, %v250_v23 }
 0x100   : > { %v3713_v51 = vadd.f32 %v3712_v45, %v3643_v41  ;;  %v3714_v52 = vpop.f32.mrb[7].mxu0  ;;  %11131 = vmatmul.mubr.f32.vlgmr.msra.gmra.mrb[112].mxu0 %v1539_v10  ;;  %v3784_v53 = vpop.f32.mrb[7].mxu1  ;;  %11201 = vmatmul.mubr.f32.vlgmr.msra.gmra.mrb[112].mxu1 %v1546_v16  ;;  %v1598_v10 = vcombine.high %v1590_v59, %v1590_v59  ;;  %v1614_v16 = vrot.slane %v1600_v2, %v17435_v19  ;;  %v412_v45 = vld [vmem:[%s17425_s22 + $0x3f0] sm:$0xff]  ;;  %v415_v2 = vld [vmem:[%s17425_s22 + $0x408] sm:$0xff] }
 0x101   : > { %11207 = vmatpush1.xpose.msra.mxu0 %v400_v11  ;;  %11277 = vmatpush1.xpose.msra.mxu1 %v401_v12  ;;  %v1607_v11 = vrot.slane %v248_v54, %v17435_v19  ;;  %v408_v12 = vld [vmem:[%s17425_s22 + $0x3d0] sm:$0xff]  ;;  %v2958_v41 = vcombine.high %v410_v29, %v410_v29  ;;  %v1648_v50 = vrot.slane %v1634_v35, %v17435_v19 }
 0x102   : > { %v3783_v57 = vadd.f32 %v3782_v46, %v3713_v51  ;;  %11270 = vmatprep.mubr.f32.mxu0 %v1564_v42  ;;  %11346 = vmatprep.subr.mxu0 %v2950_v39  ;;  %v2956_v24 = vcombine.high %v408_v12, %v408_v12  ;;  %v251_v39 = vld [vmem:[%s17420_s19 + $0x1f8] sm:$0xff] }
 0x103   : > { %v3852_v62 = vpop.f32.mrb[8].mxu0  ;;  %v3922_v63 = vpop.f32.mrb[8].mxu1  ;;  %11340 = vmatprep.mubr.f32.mxu1 %v1565_v47  ;;  %11416 = vmatprep.subr.mxu1 %v2951_v43  ;;  %v2959_v43 = vcombine.high %v411_v34, %v411_v34  ;;  %v413_v46 = vld [vmem:[%s17425_s22 + $0x3f8] sm:$0xff]  ;;  %v1651_v51 = vcombine.high %v251_v39, %v251_v39 }
 0x104   : > { %v3853_v3 = vadd.f32 %v3852_v62, %v3783_v57  ;;  %v3854_v4 = vpop.f32.mrb[9].mxu0  ;;  %11271 = vmatmul.mubr.f32.vlgmr.msra.gmra.mrb[114].mxu0 %v1556_v27  ;;  %v3924_v5 = vpop.f32.mrb[9].mxu1  ;;  %11341 = vmatmul.mubr.f32.vlgmr.msra.gmra.mrb[114].mxu1 %v1563_v32  ;;  %v1615_v27 = vcombine.high %v1607_v11, %v1607_v11  ;;  %v1616_v32 = vcombine.high %v1614_v16, %v1614_v16 }
 0x105   : > { %11347 = vmatpush1.xpose.msra.mxu0 %v402_v28  ;;  %11417 = vmatpush1.xpose.msra.mxu1 %v403_v33  ;;  %v2957_v28 = vcombine.high %v409_v17, %v409_v17  ;;  %v1631_v33 = vrot.slane %v1617_v18, %v17435_v19  ;;  %v2961_v57 = vcombine.high %v413_v46, %v413_v46  ;;  %v417_v18 = vld [vmem:[%s17425_s22 + $0x418] sm:$0xff] }
 0x106   : > { %v3923_v9 = vadd.f32 %v3922_v63, %v3853_v3  ;;  %11410 = vmatprep.mubr.f32.mxu0 %v1581_v55  ;;  %11486 = vmatprep.subr.mxu0 %v2952_v56  ;;  %v252_v55 = vld [vmem:[%s17420_s19 + $0x200] sm:$0xff]  ;;  %v2960_v56 = vcombine.high %v412_v45, %v412_v45 }
 0x107   : > { %v3992_v13 = vpop.f32.mrb[10].mxu0  ;;  %v4062_v14 = vpop.f32.mrb[10].mxu1  ;;  %11480 = vmatprep.mubr.f32.mxu1 %v1582_v0  ;;  %11556 = vmatprep.subr.mxu1 %v2953_v58  ;;  %v1650_v0 = vcombine.high %v1648_v50, %v1648_v50  ;;  %v1668_v3 = vcombine.high %v252_v55, %v252_v55 }
 0x108   : > { %v3993_v20 = vadd.f32 %v3992_v13, %v3923_v9  ;;  %v3994_v21 = vpop.f32.mrb[11].mxu0  ;;  %11411 = vmatmul.mubr.f32.vlgmr.msra.gmra.mrb[116].mxu0 %v17725_v40  ;;  %v4064_v22 = vpop.f32.mrb[11].mxu1  ;;  %11481 = vmatmul.mubr.f32.vlgmr.msra.gmra.mrb[116].mxu1 %v1580_v48  ;;  %v1632_v40 = vcombine.high %v17745_v25, %v17745_v25  ;;  %v17765_v9 = vrot.slane %v252_v55, %v17435_v19  ;;  %v416_v13 = vld [vmem:[%s17425_s22 + $0x410] sm:$0xff] }
 0x109   : > { %11487 = vmatpush1.xpose.msra.mxu0 %v404_v44  ;;  %11557 = vmatpush1.xpose.msra.mxu1 %v405_v49  ;;  %v1641_v44 = vrot.slane %v250_v23, %v17435_v19  ;;  %v1633_v49 = vcombine.high %v1631_v33, %v1631_v33 }
 0x10a   : > { %v4063_v26 = vadd.f32 %v4062_v14, %v3993_v20  ;;  %11550 = vmatprep.mubr.f32.mxu0 %v1598_v10  ;;  %11626 = vmatprep.subr.mxu0 %v2954_v7  ;;  %v253_v7 = vld [vmem:[%s17420_s19 + $0x208] sm:$0xff] }
 0x10b   : > { %v4132_v30 = vpop.f32.mrb[12].mxu0  ;;  %v4202_v31 = vpop.f32.mrb[12].mxu1  ;;  %11620 = vmatprep.mubr.f32.mxu1 %v1599_v15  ;;  %11696 = vmatprep.subr.mxu1 %v2955_v8  ;;  %v1685_v20 = vcombine.high %v253_v7, %v253_v7 }
 0x10c   : > { %v4133_v36 = vadd.f32 %v4132_v30, %v4063_v26  ;;  %v4134_v37 = vpop.f32.mrb[13].mxu0  ;;  %11551 = vmatmul.mubr.f32.vlgmr.msra.gmra.mrb[118].mxu0 %v1590_v59  ;;  %v4204_v38 = vpop.f32.mrb[13].mxu1  ;;  %11621 = vmatmul.mubr.f32.vlgmr.msra.gmra.mrb[118].mxu1 %v1597_v1  ;;  %v1649_v59 = vcombine.high %v1641_v44, %v1641_v44  ;;  %v1665_v1 = vrot.slane %v1651_v51, %v17435_v19  ;;  %v418_v30 = vld [vmem:[%s17425_s22 + $0x420] sm:$0xff]  ;;  %v421_v51 = vld [vmem:[%s17425_s22 + $0x438] sm:$0xff] }
 0x10d   : > { %11627 = vmatpush1.xpose.msra.mxu0 %v406_v60  ;;  %11697 = vmatpush1.xpose.msra.mxu1 %v407_v61  ;;  %v1658_v60 = vrot.slane %v251_v39, %v17435_v19  ;;  %v414_v61 = vld [vmem:[%s17425_s22 + $0x400] sm:$0xff]  ;;  %v2964_v26 = vcombine.high %v416_v13, %v416_v13  ;;  %v1699_v35 = vrot.slane %v1685_v20, %v17435_v19 }
 0x10e   : > { %v4203_v42 = vadd.f32 %v4202_v31, %v4133_v36  ;;  %11690 = vmatprep.mubr.f32.mxu0 %v1615_v27  ;;  %11766 = vmatprep.subr.mxu0 %v2956_v24  ;;  %v2962_v8 = vcombine.high %v414_v61, %v414_v61  ;;  %v254_v24 = vld [vmem:[%s17420_s19 + $0x210] sm:$0xff]  ;;  %v419_v31 = vld [vmem:[%s17425_s22 + $0x428] sm:$0xff] }
 0x10f   : > { %v4272_v47 = vpop.f32.mrb[14].mxu0  ;;  %v4342_v48 = vpop.f32.mrb[14].mxu1  ;;  %11760 = vmatprep.mubr.f32.mxu1 %v1616_v32  ;;  %11836 = vmatprep.subr.mxu1 %v2957_v28  ;;  %v2965_v28 = vcombine.high %v417_v18, %v417_v18  ;;  %v1702_v36 = vcombine.high %v254_v24, %v254_v24 }
 0x110   : > { %v4273_v52 = vadd.f32 %v4272_v47, %v4203_v42  ;;  %v4274_v53 = vpop.f32.mrb[15].mxu0  ;;  %11691 = vmatmul.mubr.f32.vlgmr.msra.gmra.mrb[120].mxu0 %v1607_v11  ;;  %v4344_v54 = vpop.f32.mrb[15].mxu1  ;;  %11761 = vmatmul.mubr.f32.vlgmr.msra.gmra.mrb[120].mxu1 %v1614_v16  ;;  %v1666_v11 = vcombine.high %v1658_v60, %v1658_v60  ;;  %v1667_v16 = vcombine.high %v1665_v1, %v1665_v1 }
 0x111   : > { %11767 = vmatpush1.xpose.msra.mxu0 %v408_v12  ;;  %11837 = vmatpush1.xpose.msra.mxu1 %v409_v17  ;;  %v2963_v12 = vcombine.high %v415_v2, %v415_v2  ;;  %v1682_v17 = vrot.slane %v1668_v3, %v17435_v19  ;;  %v2967_v42 = vcombine.high %v419_v31, %v419_v31  ;;  %v423_v3 = vld [vmem:[%s17425_s22 + $0x448] sm:$0xff] }
 0x112   : > { %v4343_v58 = vadd.f32 %v4342_v48, %v4273_v52  ;;  %11830 = vmatprep.mubr.f32.mxu0 %v1632_v40  ;;  %11906 = vmatprep.subr.mxu0 %v2958_v41  ;;  %v255_v40 = vld [vmem:[%s17420_s19 + $0x218] sm:$0xff]  ;;  %v2966_v41 = vcombine.high %v418_v30, %v418_v30 }
 0x113   : > { %v4412_v62 = vpop.f32.mrb[16].mxu0  ;;  %v4482_v63 = vpop.f32.mrb[16].mxu1  ;;  %11900 = vmatprep.mubr.f32.mxu1 %v1633_v49  ;;  %11976 = vmatprep.subr.mxu1 %v2959_v43  ;;  %v1701_v49 = vcombine.high %v1699_v35, %v1699_v35  ;;  %v1719_v52 = vcombine.high %v255_v40, %v255_v40 }
 0x114   : > { %v4413_v4 = vadd.f32 %v4412_v62, %v4343_v58  ;;  %v4414_v5 = vpop.f32.mrb[17].mxu0  ;;  %11831 = vmatmul.mubr.f32.vlgmr.msra.gmra.mrb[122].mxu0 %v17745_v25  ;;  %v4484_v6 = vpop.f32.mrb[17].mxu1  ;;  %11901 = vmatmul.mubr.f32.vlgmr.msra.gmra.mrb[122].mxu1 %v1631_v33  ;;  %v1683_v25 = vcombine.high %v17765_v9, %v17765_v9  ;;  %v17785_v58 = vrot.slane %v255_v40, %v17435_v19  ;;  %v422_v62 = vld [vmem:[%s17425_s22 + $0x440] sm:$0xff] }
 0x115   : > { %11907 = vmatpush1.xpose.msra.mxu0 %v410_v29  ;;  %11977 = vmatpush1.xpose.msra.mxu1 %v411_v34  ;;  %v1692_v29 = vrot.slane %v253_v7, %v17435_v19  ;;  %v1684_v34 = vcombine.high %v1682_v17, %v1682_v17 }
 0x116   : > { %v4483_v10 = vadd.f32 %v4482_v63, %v4413_v4  ;;  %11970 = vmatprep.mubr.f32.mxu0 %v1649_v59  ;;  %12046 = vmatprep.subr.mxu0 %v2960_v56  ;;  %v256_v56 = vld [vmem:[%s17420_s19 + $0x220] sm:$0xff] }
 0x117   : > { %v4552_v14 = vpop.f32.mrb[18].mxu0  ;;  %v4622_v15 = vpop.f32.mrb[18].mxu1  ;;  %12040 = vmatprep.mubr.f32.mxu1 %v1650_v0  ;;  %12116 = vmatprep.subr.mxu1 %v2961_v57  ;;  %v1736_v4 = vcombine.high %v256_v56, %v256_v56 }
 0x118   : > { %v4553_v21 = vadd.f32 %v4552_v14, %v4483_v10  ;;  %v4554_v22 = vpop.f32.mrb[19].mxu0  ;;  %11971 = vmatmul.mubr.f32.vlgmr.msra.gmra.mrb[124].mxu0 %v1641_v44  ;;  %v4624_v23 = vpop.f32.mrb[19].mxu1  ;;  %12041 = vmatmul.mubr.f32.vlgmr.msra.gmra.mrb[124].mxu1 %v1648_v50  ;;  %v1700_v44 = vcombine.high %v1692_v29, %v1692_v29  ;;  %v1716_v50 = vrot.slane %v1702_v36, %v17435_v19  ;;  %v424_v14 = vld [vmem:[%s17425_s22 + $0x450] sm:$0xff]  ;;  %v427_v36 = vld [vmem:[%s17425_s22 + $0x468] sm:$0xff] }
 0x119   : > { %12047 = vmatpush1.xpose.msra.mxu0 %v412_v45  ;;  %12117 = vmatpush1.xpose.msra.mxu1 %v413_v46  ;;  %v1709_v45 = vrot.slane %v254_v24, %v17435_v19  ;;  %v420_v46 = vld [vmem:[%s17425_s22 + $0x430] sm:$0xff]  ;;  %v2970_v10 = vcombine.high %v422_v62, %v422_v62  ;;  %v1750_v20 = vrot.slane %v1736_v4, %v17435_v19 }
 0x11a   : > { %v4623_v27 = vadd.f32 %v4622_v15, %v4553_v21  ;;  %12110 = vmatprep.mubr.f32.mxu0 %v1666_v11  ;;  %12186 = vmatprep.subr.mxu0 %v2962_v8  ;;  %v2968_v57 = vcombine.high %v420_v46, %v420_v46  ;;  %v257_v8 = vld [vmem:[%s17420_s19 + $0x228] sm:$0xff]  ;;  %v425_v15 = vld [vmem:[%s17425_s22 + $0x458] sm:$0xff] }
 0x11b   : > { %v4692_v32 = vpop.f32.mrb[20].mxu0  ;;  %v4762_v33 = vpop.f32.mrb[20].mxu1  ;;  %12180 = vmatprep.mubr.f32.mxu1 %v1667_v16  ;;  %12256 = vmatprep.subr.mxu1 %v2963_v12  ;;  %v2971_v12 = vcombine.high %v423_v3, %v423_v3  ;;  %v1753_v21 = vcombine.high %v257_v8, %v257_v8 }
 0x11c   : > { %v4693_v37 = vadd.f32 %v4692_v32, %v4623_v27  ;;  %v4694_v38 = vpop.f32.mrb[21].mxu0  ;;  %12111 = vmatmul.mubr.f32.vlgmr.msra.gmra.mrb[126].mxu0 %v1658_v60  ;;  %v4764_v39 = vpop.f32.mrb[21].mxu1  ;;  %12181 = vmatmul.mubr.f32.vlgmr.msra.gmra.mrb[126].mxu1 %v1665_v1  ;;  %v1717_v60 = vcombine.high %v1709_v45, %v1709_v45  ;;  %v1718_v1 = vcombine.high %v1716_v50, %v1716_v50 }
 0x11d   : > { %12187 = vmatpush1.xpose.msra.mxu0 %v414_v61  ;;  %12257 = vmatpush1.xpose.msra.mxu1 %v415_v2  ;;  %v2969_v61 = vcombine.high %v421_v51, %v421_v51  ;;  %v1733_v2 = vrot.slane %v1719_v52, %v17435_v19  ;;  %v2973_v27 = vcombine.high %v425_v15, %v425_v15  ;;  %v429_v52 = vld [vmem:[%s17425_s22 + $0x478] sm:$0xff] }
 0x11e   : > { %v4763_v43 = vadd.f32 %v4762_v33, %v4693_v37  ;;  %12250 = vmatprep.mubr.f32.mxu0 %v1683_v25  ;;  %12326 = vmatprep.subr.mxu0 %v2964_v26  ;;  %v258_v25 = vld [vmem:[%s17420_s19 + $0x230] sm:$0xff]  ;;  %v2972_v26 = vcombine.high %v424_v14, %v424_v14 }
 0x11f   : > { %v4832_v47 = vpop.f32.mrb[22].mxu0  ;;  %v4902_v48 = vpop.f32.mrb[22].mxu1  ;;  %12320 = vmatprep.mubr.f32.mxu1 %v1684_v34  ;;  %12396 = vmatprep.subr.mxu1 %v2965_v28  ;;  %v1752_v34 = vcombine.high %v1750_v20, %v1750_v20  ;;  %v1770_v37 = vcombine.high %v258_v25, %v258_v25 }
 0x120   : > { %v4833_v53 = vadd.f32 %v4832_v47, %v4763_v43  ;;  %v4834_v54 = vpop.f32.mrb[23].mxu0  ;;  %12251 = vmatmul.mubr.f32.vlgmr.msra.gmra.mrb[128].mxu0 %v17765_v9  ;;  %v4904_v55 = vpop.f32.mrb[23].mxu1  ;;  %12321 = vmatmul.mubr.f32.vlgmr.msra.gmra.mrb[128].mxu1 %v1682_v17  ;;  %v1734_v9 = vcombine.high %v17785_v58, %v17785_v58  ;;  %v17805_v43 = vrot.slane %v258_v25, %v17435_v19  ;;  %v428_v47 = vld [vmem:[%s17425_s22 + $0x470] sm:$0xff]  ;;  %v433_v25 = vld [vmem:[%s17425_s22 + $0x498] sm:$0xff] }
 0x121   : > { %12327 = vmatpush1.xpose.msra.mxu0 %v416_v13  ;;  %12397 = vmatpush1.xpose.msra.mxu1 %v417_v18  ;;  %v1743_v13 = vrot.slane %v256_v56, %v17435_v19  ;;  %v1735_v18 = vcombine.high %v1733_v2, %v1733_v2 }
 0x122   : > { %v4903_v59 = vadd.f32 %v4902_v48, %v4833_v53  ;;  %12390 = vmatprep.mubr.f32.mxu0 %v1700_v44  ;;  %12466 = vmatprep.subr.mxu0 %v2966_v41  ;;  %v259_v41 = vld [vmem:[%s17420_s19 + $0x238] sm:$0xff] }
 0x123   : > { %v4972_v63 = vpop.f32.mrb[24].mxu0  ;;  %v5042_v0 = vpop.f32.mrb[24].mxu1  ;;  %12460 = vmatprep.mubr.f32.mxu1 %v1701_v49  ;;  %12536 = vmatprep.subr.mxu1 %v2967_v42  ;;  %v1787_v53 = vcombine.high %v259_v41, %v259_v41 }
 0x124   : > { %v4973_v5 = vadd.f32 %v4972_v63, %v4903_v59  ;;  %v4974_v6 = vpop.f32.mrb[25].mxu0  ;;  %12391 = vmatmul.mubr.f32.vlgmr.msra.gmra.mrb[130].mxu0 %v1692_v29  ;;  %v5044_v7 = vpop.f32.mrb[25].mxu1  ;;  %12461 = vmatmul.mubr.f32.vlgmr.msra.gmra.mrb[130].mxu1 %v1699_v35  ;;  %v1751_v29 = vcombine.high %v1743_v13, %v1743_v13  ;;  %v1767_v35 = vrot.slane %v1753_v21, %v17435_v19  ;;  %v430_v63 = vld [vmem:[%s17425_s22 + $0x480] sm:$0xff] }
 0x125   : > { %12467 = vmatpush1.xpose.msra.mxu0 %v418_v30  ;;  %12537 = vmatpush1.xpose.msra.mxu1 %v419_v31  ;;  %v1760_v30 = vrot.slane %v257_v8, %v17435_v19  ;;  %v426_v31 = vld [vmem:[%s17425_s22 + $0x460] sm:$0xff]  ;;  %v2976_v59 = vcombine.high %v428_v47, %v428_v47 }
 0x126   : > { %v5043_v11 = vadd.f32 %v5042_v0, %v4973_v5  ;;  %12530 = vmatprep.mubr.f32.mxu0 %v1717_v60  ;;  %12606 = vmatprep.subr.mxu0 %v2968_v57  ;;  %v2974_v42 = vcombine.high %v426_v31, %v426_v31  ;;  %v260_v57 = vld [vmem:[%s17420_s19 + $0x240] sm:$0xff]  ;;  %v261_v5 = vld [vmem:[%s17420_s19 + $0x248] sm:$0xff] }
 0x127   : > { %v5112_v16 = vpop.f32.mrb[26].mxu0  ;;  %v5182_v17 = vpop.f32.mrb[26].mxu1  ;;  %12600 = vmatprep.mubr.f32.mxu1 %v1718_v1  ;;  %12676 = vmatprep.subr.mxu1 %v2969_v61  ;;  %v2977_v61 = vcombine.high %v429_v52, %v429_v52  ;;  %v1804_v4 = vcombine.high %v260_v57, %v260_v57 }
 0x128   : > { %v5113_v22 = vadd.f32 %v5112_v16, %v5043_v11  ;;  %v5114_v23 = vpop.f32.mrb[27].mxu0  ;;  %12531 = vmatmul.mubr.f32.vlgmr.msra.gmra.mrb[132].mxu0 %v1709_v45  ;;  %v5184_v24 = vpop.f32.mrb[27].mxu1  ;;  %12601 = vmatmul.mubr.f32.vlgmr.msra.gmra.mrb[132].mxu1 %v1716_v50  ;;  %v1768_v45 = vcombine.high %v1760_v30, %v1760_v30  ;;  %v1769_v50 = vcombine.high %v1767_v35, %v1767_v35 }
 0x129   : > { %12607 = vmatpush1.xpose.msra.mxu0 %v420_v46  ;;  %12677 = vmatpush1.xpose.msra.mxu1 %v421_v51  ;;  %v2975_v46 = vcombine.high %v427_v36, %v427_v36  ;;  %v1784_v51 = vrot.slane %v1770_v37, %v17435_v19  ;;  %v17819_v11 = vrot.slane %v260_v57, %v17435_v19 }
 0x12a   : > { %v5183_v28 = vadd.f32 %v5182_v17, %v5113_v22  ;;  %12670 = vmatprep.mubr.f32.mxu0 %v1734_v9  ;;  %12746 = vmatprep.subr.mxu0 %v2970_v10  ;;  %v431_v9 = vld [vmem:[%s17425_s22 + $0x488] sm:$0xff]  ;;  %v2978_v10 = vcombine.high %v430_v63, %v430_v63  ;;  %v1818_v21 = vrot.slane %v1804_v4, %v17435_v19  ;;  %v438_v4 = vld [vmem:[%s17425_s22 + $0x4c0] sm:$0xff] }
 0x12b   : > { %v5252_v32 = vpop.f32.mrb[28].mxu0  ;;  %v5322_v33 = vpop.f32.mrb[28].mxu1  ;;  %12740 = vmatprep.mubr.f32.mxu1 %v1735_v18  ;;  %12816 = vmatprep.subr.mxu1 %v2971_v12  ;;  %v2979_v18 = vcombine.high %v431_v9, %v431_v9 }
 0x12c   : > { %v5253_v38 = vadd.f32 %v5252_v32, %v5183_v28  ;;  %v5254_v39 = vpop.f32.mrb[29].mxu0  ;;  %12671 = vmatmul.mubr.f32.vlgmr.msra.gmra.mrb[134].mxu0 %v17785_v58  ;;  %v5324_v40 = vpop.f32.mrb[29].mxu1  ;;  %12741 = vmatmul.mubr.f32.vlgmr.msra.gmra.mrb[134].mxu1 %v1733_v2  ;;  %v1785_v58 = vcombine.high %v17805_v43, %v17805_v43  ;;  %v1786_v2 = vcombine.high %v1784_v51, %v1784_v51 }
 0x12d   : > { %12747 = vmatpush1.xpose.msra.mxu0 %v422_v62  ;;  %12817 = vmatpush1.xpose.msra.mxu1 %v423_v3  ;;  %v1794_v62 = vrot.slane %v259_v41, %v17435_v19  ;;  %v1801_v3 = vrot.slane %v1787_v53, %v17435_v19  ;;  %v17829_v28 = vrot.slane %v261_v5, %v17435_v19  ;;  %v435_v41 = vld [vmem:[%s17425_s22 + $0x4a8] sm:$0xff] }
 0x12e   : > { %v5323_v44 = vadd.f32 %v5322_v33, %v5253_v38  ;;  %12810 = vmatprep.mubr.f32.mxu0 %v1751_v29  ;;  %12886 = vmatprep.subr.mxu0 %v2972_v26  ;;  %v262_v26 = vld [vmem:[%s17420_s19 + $0x250] sm:$0xff] }
 0x12f   : > { %v5392_v48 = vpop.f32.mrb[30].mxu0  ;;  %v5462_v49 = vpop.f32.mrb[30].mxu1  ;;  %12880 = vmatprep.mubr.f32.mxu1 %v1752_v34  ;;  %12956 = vmatprep.subr.mxu1 %v2973_v27  ;;  %v1803_v17 = vcombine.high %v1801_v3, %v1801_v3  ;;  %v1819_v27 = vcombine.high %v17819_v11, %v17819_v11  ;;  %v1820_v34 = vcombine.high %v1818_v21, %v1818_v21 }
 0x130   : > { %v5393_v54 = vadd.f32 %v5392_v48, %v5323_v44  ;;  %v5394_v55 = vpop.f32.mrb[31].mxu0  ;;  %12811 = vmatmul.mubr.f32.vlgmr.msra.gmra.mrb[136].mxu0 %v1743_v13  ;;  %v5464_v56 = vpop.f32.mrb[31].mxu1  ;;  %12881 = vmatmul.mubr.f32.vlgmr.msra.gmra.mrb[136].mxu1 %v1750_v20  ;;  %v1802_v13 = vcombine.high %v1794_v62, %v1794_v62  ;;  %v432_v20 = vld [vmem:[%s17425_s22 + $0x490] sm:$0xff]  ;;  %v1838_v37 = vcombine.high %v262_v26, %v262_v26 }
 0x131   : > { %12887 = vmatpush1.xpose.msra.mxu0 %v424_v14  ;;  %12957 = vmatpush1.xpose.msra.mxu1 %v425_v15  ;;  %v1821_v14 = vcombine.high %v261_v5, %v261_v5  ;;  %v17838_v44 = vrot.slane %v262_v26, %v17435_v19  ;;  %v441_v26 = vld [vmem:[%s17425_s22 + $0x4d8] sm:$0xff] }
 0x132   : > { %v5463_v60 = vadd.f32 %v5462_v49, %v5393_v54  ;;  %12950 = vmatprep.mubr.f32.mxu0 %v1768_v45  ;;  %13026 = vmatprep.subr.mxu0 %v2974_v42  ;;  %v263_v42 = vld [vmem:[%s17420_s19 + $0x258] sm:$0xff]  ;;  %v264_v54 = vld [vmem:[%s17420_s19 + $0x260] sm:$0xff] }
 0x133   : > { %v5532_v0 = vpop.f32.mrb[32].mxu0  ;;  %v5602_v1 = vpop.f32.mrb[32].mxu1  ;;  %13020 = vmatprep.mubr.f32.mxu1 %v1769_v50  ;;  %13096 = vmatprep.subr.mxu1 %v2975_v46  ;;  %v2983_v50 = vcombine.high %v435_v41, %v435_v41  ;;  %v1855_v53 = vcombine.high %v263_v42, %v263_v42 }
 0x134   : > { %v5533_v6 = vadd.f32 %v5532_v0, %v5463_v60  ;;  %v5534_v7 = vpop.f32.mrb[33].mxu0  ;;  %12951 = vmatmul.mubr.f32.vlgmr.msra.gmra.mrb[138].mxu0 %v1760_v30  ;;  %v5604_v8 = vpop.f32.mrb[33].mxu1  ;;  %13021 = vmatmul.mubr.f32.vlgmr.msra.gmra.mrb[138].mxu1 %v1767_v35  ;;  %v2980_v30 = vcombine.high %v432_v20, %v432_v20  ;;  %v2981_v35 = vcombine.high %v433_v25, %v433_v25 }
 0x135   : > { %13027 = vmatpush1.xpose.msra.mxu0 %v426_v31  ;;  %13097 = vmatpush1.xpose.msra.mxu1 %v427_v36  ;;  %v1835_v31 = vrot.slane %v1821_v14, %v17435_v19  ;;  %v434_v36 = vld [vmem:[%s17425_s22 + $0x4a0] sm:$0xff]  ;;  %v17848_v60 = vrot.slane %v263_v42, %v17435_v19  ;;  %v1869_v5 = vrot.slane %v1855_v53, %v17435_v19  ;;  %v444_v53 = vld [vmem:[%s17425_s22 + $0x4f0] sm:$0xff] }
 0x136   : > { %v5603_v12 = vadd.f32 %v5602_v1, %v5533_v6  ;;  %13090 = vmatprep.mubr.f32.mxu0 %v1785_v58  ;;  %13166 = vmatprep.subr.mxu0 %v2976_v59  ;;  %v2982_v46 = vcombine.high %v434_v36, %v434_v36  ;;  %v437_v58 = vld [vmem:[%s17425_s22 + $0x4b8] sm:$0xff]  ;;  %v1853_v59 = vcombine.high %v17838_v44, %v17838_v44 }
 0x137   : > { %v5672_v15 = vpop.f32.mrb[34].mxu0  ;;  %v5742_v16 = vpop.f32.mrb[34].mxu1  ;;  %13160 = vmatprep.mubr.f32.mxu1 %v1786_v2  ;;  %13236 = vmatprep.subr.mxu1 %v2977_v61  ;;  %v2986_v14 = vcombine.high %v438_v4, %v438_v4 }
 0x138   : > { %v5673_v22 = vadd.f32 %v5672_v15, %v5603_v12  ;;  %v5674_v23 = vpop.f32.mrb[35].mxu0  ;;  %13091 = vmatmul.mubr.f32.vlgmr.msra.gmra.mrb[140].mxu0 %v17805_v43  ;;  %v5744_v24 = vpop.f32.mrb[35].mxu1  ;;  %13161 = vmatmul.mubr.f32.vlgmr.msra.gmra.mrb[140].mxu1 %v1784_v51  ;;  %v1836_v43 = vcombine.high %v17829_v28, %v17829_v28  ;;  %v436_v51 = vld [vmem:[%s17425_s22 + $0x4b0] sm:$0xff]  ;;  %v17858_v12 = vrot.slane %v264_v54, %v17435_v19 }
 0x139   : > { %13167 = vmatpush1.xpose.msra.mxu0 %v428_v47  ;;  %13237 = vmatpush1.xpose.msra.mxu1 %v429_v52  ;;  %v1837_v47 = vcombine.high %v1835_v31, %v1835_v31  ;;  %v1852_v52 = vrot.slane %v1838_v37, %v17435_v19 }
 0x13a   : > { %v5743_v29 = vadd.f32 %v5742_v16, %v5673_v22  ;;  %13230 = vmatprep.mubr.f32.mxu0 %v1802_v13  ;;  %13306 = vmatprep.subr.mxu0 %v2978_v10  ;;  %v265_v10 = vld [vmem:[%s17420_s19 + $0x268] sm:$0xff] }
 0x13b   : > { %v5812_v32 = vpop.f32.mrb[36].mxu0  ;;  %v5882_v33 = vpop.f32.mrb[36].mxu1  ;;  %13300 = vmatprep.mubr.f32.mxu1 %v1803_v17  ;;  %13376 = vmatprep.subr.mxu1 %v2979_v18  ;;  %v1854_v2 = vcombine.high %v1852_v52, %v1852_v52  ;;  %v1871_v18 = vcombine.high %v1869_v5, %v1869_v5  ;;  %v1889_v22 = vcombine.high %v265_v10, %v265_v10 }
 0x13c   : > { %v5813_v38 = vadd.f32 %v5812_v32, %v5743_v29  ;;  %v5814_v39 = vpop.f32.mrb[37].mxu0  ;;  %13231 = vmatmul.mubr.f32.vlgmr.msra.gmra.mrb[142].mxu0 %v1794_v62  ;;  %v5884_v40 = vpop.f32.mrb[37].mxu1  ;;  %13301 = vmatmul.mubr.f32.vlgmr.msra.gmra.mrb[142].mxu1 %v1801_v3  ;;  %v2984_v62 = vcombine.high %v436_v51, %v436_v51  ;;  %v2985_v3 = vcombine.high %v437_v58, %v437_v58 }
 0x13d   : > { %13307 = vmatpush1.xpose.msra.mxu0 %v430_v63  ;;  %13377 = vmatpush1.xpose.msra.mxu1 %v431_v9  ;;  %v1872_v63 = vcombine.high %v264_v54, %v264_v54  ;;  %v439_v9 = vld [vmem:[%s17425_s22 + $0x4c8] sm:$0xff]  ;;  %v17868_v29 = vrot.slane %v265_v10, %v17435_v19  ;;  %v1903_v37 = vrot.slane %v1889_v22, %v17435_v19  ;;  %v267_v39 = vld [vmem:[%s17420_s19 + $0x278] sm:$0xff] }
 0x13e   : > { %v5883_v45 = vadd.f32 %v5882_v33, %v5813_v38  ;;  %13370 = vmatprep.mubr.f32.mxu0 %v1819_v27  ;;  %13446 = vmatprep.subr.mxu0 %v2980_v30  ;;  %v266_v27 = vld [vmem:[%s17420_s19 + $0x270] sm:$0xff]  ;;  %v447_v10 = vld [vmem:[%s17425_s22 + $0x508] sm:$0xff] }
 0x13f   : > { %v5952_v48 = vpop.f32.mrb[38].mxu0  ;;  %v6022_v49 = vpop.f32.mrb[38].mxu1  ;;  %13440 = vmatprep.mubr.f32.mxu1 %v1820_v34  ;;  %13516 = vmatprep.subr.mxu1 %v2981_v35  ;;  %v1886_v15 = vrot.slane %v1872_v63, %v17435_v19  ;;  %v2989_v35 = vcombine.high %v441_v26, %v441_v26  ;;  %v1906_v38 = vcombine.high %v266_v27, %v266_v27 }
 0x140   : > { %v5953_v55 = vadd.f32 %v5952_v48, %v5883_v45  ;;  %v5954_v56 = vpop.f32.mrb[39].mxu0  ;;  %13371 = vmatmul.mubr.f32.vlgmr.msra.gmra.mrb[144].mxu0 %v17819_v11  ;;  %v6024_v57 = vpop.f32.mrb[39].mxu1  ;;  %13441 = vmatmul.mubr.f32.vlgmr.msra.gmra.mrb[144].mxu1 %v1818_v21  ;;  %v1870_v11 = vcombine.high %v17848_v60, %v17848_v60  ;;  %v440_v21 = vld [vmem:[%s17425_s22 + $0x4d0] sm:$0xff]  ;;  %v17878_v45 = vrot.slane %v266_v27, %v17435_v19 }
 0x141   : > { %13447 = vmatpush1.xpose.msra.mxu0 %v432_v20  ;;  %13517 = vmatpush1.xpose.msra.mxu1 %v433_v25  ;;  %v2987_v20 = vcombine.high %v439_v9, %v439_v9  ;;  %v1888_v32 = vcombine.high %v1886_v15, %v1886_v15  ;;  %v1923_v48 = vcombine.high %v267_v39, %v267_v39 }
 0x142   : > { %v6023_v61 = vadd.f32 %v6022_v49, %v5953_v55  ;;  %13510 = vmatprep.mubr.f32.mxu0 %v1836_v43  ;;  %13586 = vmatprep.subr.mxu0 %v2982_v46  ;;  %v443_v43 = vld [vmem:[%s17425_s22 + $0x4e8] sm:$0xff]  ;;  %v1920_v54 = vrot.slane %v1906_v38, %v17435_v19  ;;  %v2992_v63 = vcombine.high %v444_v53, %v444_v53  ;;  %v450_v38 = vld [vmem:[%s17425_s22 + $0x520] sm:$0xff] }
 0x143   : > { %v6092_v0 = vpop.f32.mrb[40].mxu0  ;;  %v6162_v1 = vpop.f32.mrb[40].mxu1  ;;  %13580 = vmatprep.mubr.f32.mxu1 %v1837_v47  ;;  %13656 = vmatprep.subr.mxu1 %v2983_v50 }
 0x144   : > { %v6093_v6 = vadd.f32 %v6092_v0, %v6023_v61  ;;  %v6094_v7 = vpop.f32.mrb[41].mxu0  ;;  %13511 = vmatmul.mubr.f32.vlgmr.msra.gmra.mrb[146].mxu0 %v17829_v28  ;;  %v6164_v8 = vpop.f32.mrb[41].mxu1  ;;  %13581 = vmatmul.mubr.f32.vlgmr.msra.gmra.mrb[146].mxu1 %v1835_v31  ;;  %v1887_v28 = vcombine.high %v17858_v12, %v17858_v12  ;;  %v2988_v31 = vcombine.high %v440_v21, %v440_v21 }
 0x145   : > { %13587 = vmatpush1.xpose.msra.mxu0 %v434_v36  ;;  %13657 = vmatpush1.xpose.msra.mxu1 %v435_v41  ;;  %v442_v36 = vld [vmem:[%s17425_s22 + $0x4e0] sm:$0xff]  ;;  %v17888_v61 = vrot.slane %v267_v39, %v17435_v19  ;;  %v1937_v0 = vrot.slane %v1923_v48, %v17435_v19  ;;  %v2998_v48 = vcombine.high %v450_v38, %v450_v38 }
 0x146   : > { %v6163_v13 = vadd.f32 %v6162_v1, %v6093_v6  ;;  %13650 = vmatprep.mubr.f32.mxu0 %v1853_v59  ;;  %13726 = vmatprep.subr.mxu0 %v2984_v62  ;;  %v2990_v47 = vcombine.high %v442_v36, %v442_v36  ;;  %v268_v59 = vld [vmem:[%s17420_s19 + $0x280] sm:$0xff] }
 0x147   : > { %v6232_v16 = vpop.f32.mrb[42].mxu0  ;;  %v6302_v17 = vpop.f32.mrb[42].mxu1  ;;  %13720 = vmatprep.mubr.f32.mxu1 %v1854_v2  ;;  %13796 = vmatprep.subr.mxu1 %v2985_v3  ;;  %v1922_v3 = vcombine.high %v1920_v54, %v1920_v54  ;;  %v1940_v6 = vcombine.high %v268_v59, %v268_v59 }
 0x148   : > { %v6233_v23 = vadd.f32 %v6232_v16, %v6163_v13  ;;  %v6234_v24 = vpop.f32.mrb[43].mxu0  ;;  %13651 = vmatmul.mubr.f32.vlgmr.msra.gmra.mrb[148].mxu0 %v17838_v44  ;;  %v6304_v25 = vpop.f32.mrb[43].mxu1  ;;  %13721 = vmatmul.mubr.f32.vlgmr.msra.gmra.mrb[148].mxu1 %v1852_v52  ;;  %v1904_v44 = vcombine.high %v17868_v29, %v17868_v29  ;;  %v2991_v52 = vcombine.high %v443_v43, %v443_v43 }
 0x149   : > { %13727 = vmatpush1.xpose.msra.mxu0 %v436_v51  ;;  %13797 = vmatpush1.xpose.msra.mxu1 %v437_v58  ;;  %v1905_v51 = vcombine.high %v1903_v37, %v1903_v37  ;;  %v445_v58 = vld [vmem:[%s17425_s22 + $0x4f8] sm:$0xff]  ;;  %v17898_v13 = vrot.slane %v268_v59, %v17435_v19  ;;  %v1939_v16 = vcombine.high %v1937_v0, %v1937_v0  ;;  %v270_v24 = vld [vmem:[%s17420_s19 + $0x290] sm:$0xff] }
 0x14a   : > { %v6303_v30 = vadd.f32 %v6302_v17, %v6233_v23  ;;  %13790 = vmatprep.mubr.f32.mxu0 %v1870_v11  ;;  %13866 = vmatprep.subr.mxu0 %v2986_v14  ;;  %v269_v11 = vld [vmem:[%s17420_s19 + $0x288] sm:$0xff]  ;;  %v1954_v22 = vrot.slane %v1940_v6, %v17435_v19  ;;  %v453_v59 = vld [vmem:[%s17425_s22 + $0x538] sm:$0xff] }
 0x14b   : > { %v6372_v33 = vpop.f32.mrb[44].mxu0  ;;  %v6442_v34 = vpop.f32.mrb[44].mxu1  ;;  %13860 = vmatprep.mubr.f32.mxu1 %v1871_v18  ;;  %13936 = vmatprep.subr.mxu1 %v2987_v20  ;;  %v2995_v20 = vcombine.high %v447_v10, %v447_v10  ;;  %v1957_v23 = vcombine.high %v269_v11, %v269_v11 }
 0x14c   : > { %v6373_v40 = vadd.f32 %v6372_v33, %v6303_v30  ;;  %v6374_v41 = vpop.f32.mrb[45].mxu0  ;;  %13791 = vmatmul.mubr.f32.vlgmr.msra.gmra.mrb[150].mxu0 %v17848_v60  ;;  %v6444_v42 = vpop.f32.mrb[45].mxu1  ;;  %13861 = vmatmul.mubr.f32.vlgmr.msra.gmra.mrb[150].mxu1 %v1869_v5  ;;  %v1921_v60 = vcombine.high %v17878_v45, %v17878_v45  ;;  %v446_v5 = vld [vmem:[%s17425_s22 + $0x500] sm:$0xff]  ;;  %v17908_v30 = vrot.slane %v269_v11, %v17435_v19 }
 0x14d   : > { %13867 = vmatpush1.xpose.msra.mxu0 %v438_v4  ;;  %13937 = vmatpush1.xpose.msra.mxu1 %v439_v9  ;;  %v2993_v4 = vcombine.high %v445_v58, %v445_v58  ;;  %v1974_v33 = vcombine.high %v270_v24, %v270_v24  ;;  %v1971_v39 = vrot.slane %v1957_v23, %v17435_v19  ;;  %v456_v23 = vld [vmem:[%s17425_s22 + $0x550] sm:$0xff] }
 0x14e   : > { %v6443_v46 = vadd.f32 %v6442_v34, %v6373_v40  ;;  %13930 = vmatprep.mubr.f32.mxu0 %v1887_v28  ;;  %14006 = vmatprep.subr.mxu0 %v2988_v31  ;;  %v449_v28 = vld [vmem:[%s17425_s22 + $0x518] sm:$0xff] }
 0x14f   : > { %v6512_v49 = vpop.f32.mrb[46].mxu0  ;;  %v6582_v50 = vpop.f32.mrb[46].mxu1  ;;  %14000 = vmatprep.mubr.f32.mxu1 %v1888_v32  ;;  %14076 = vmatprep.subr.mxu1 %v2989_v35 }
 0x150   : > { %v6513_v55 = vadd.f32 %v6512_v49, %v6443_v46  ;;  %v6514_v56 = vpop.f32.mrb[47].mxu0  ;;  %13931 = vmatmul.mubr.f32.vlgmr.msra.gmra.mrb[152].mxu0 %v17858_v12  ;;  %v6584_v57 = vpop.f32.mrb[47].mxu1  ;;  %14001 = vmatmul.mubr.f32.vlgmr.msra.gmra.mrb[152].mxu1 %v1886_v15  ;;  %v1938_v12 = vcombine.high %v17888_v61, %v17888_v61  ;;  %v2994_v15 = vcombine.high %v446_v5, %v446_v5 }
 0x151   : > { %14007 = vmatpush1.xpose.msra.mxu0 %v440_v21  ;;  %14077 = vmatpush1.xpose.msra.mxu1 %v441_v26  ;;  %v448_v21 = vld [vmem:[%s17425_s22 + $0x510] sm:$0xff]  ;;  %v17918_v46 = vrot.slane %v270_v24, %v17435_v19  ;;  %v1988_v49 = vrot.slane %v1974_v33, %v17435_v19  ;;  %v3004_v33 = vcombine.high %v456_v23, %v456_v23 }
 0x152   : > { %v6583_v62 = vadd.f32 %v6582_v50, %v6513_v55  ;;  %14070 = vmatprep.mubr.f32.mxu0 %v1904_v44  ;;  %14146 = vmatprep.subr.mxu0 %v2990_v47  ;;  %v2996_v32 = vcombine.high %v448_v21, %v448_v21  ;;  %v271_v44 = vld [vmem:[%s17420_s19 + $0x298] sm:$0xff] }
 0x153   : > { %v6652_v1 = vpop.f32.mrb[48].mxu0  ;;  %v6722_v2 = vpop.f32.mrb[48].mxu1  ;;  %14140 = vmatprep.mubr.f32.mxu1 %v1905_v51  ;;  %14216 = vmatprep.subr.mxu1 %v2991_v52  ;;  %v1973_v52 = vcombine.high %v1971_v39, %v1971_v39  ;;  %v1991_v55 = vcombine.high %v271_v44, %v271_v44 }
 0x154   : > { %v6653_v7 = vadd.f32 %v6652_v1, %v6583_v62  ;;  %v6654_v8 = vpop.f32.mrb[49].mxu0  ;;  %14071 = vmatmul.mubr.f32.vlgmr.msra.gmra.mrb[154].mxu0 %v17868_v29  ;;  %v6724_v9 = vpop.f32.mrb[49].mxu1  ;;  %14141 = vmatmul.mubr.f32.vlgmr.msra.gmra.mrb[154].mxu1 %v1903_v37  ;;  %v1955_v29 = vcombine.high %v17898_v13, %v17898_v13  ;;  %v2997_v37 = vcombine.high %v449_v28, %v449_v28 }
 0x155   : > { %14147 = vmatpush1.xpose.msra.mxu0 %v442_v36  ;;  %14217 = vmatpush1.xpose.msra.mxu1 %v443_v43  ;;  %v1956_v36 = vcombine.high %v1954_v22, %v1954_v22  ;;  %v451_v43 = vld [vmem:[%s17425_s22 + $0x528] sm:$0xff]  ;;  %v17928_v62 = vrot.slane %v271_v44, %v17435_v19  ;;  %v1990_v1 = vcombine.high %v1988_v49, %v1988_v49 }
 0x156   : > { %v6723_v14 = vadd.f32 %v6722_v2, %v6653_v7  ;;  %14210 = vmatprep.mubr.f32.mxu0 %v1921_v60  ;;  %14286 = vmatprep.subr.mxu0 %v2992_v63  ;;  %v272_v60 = vld [vmem:[%s17420_s19 + $0x2a0] sm:$0xff]  ;;  %v2005_v6 = vrot.slane %v1991_v55, %v17435_v19  ;;  %v273_v8 = vld [vmem:[%s17420_s19 + $0x2a8] sm:$0xff] }
 0x157   : > { %v6792_v17 = vpop.f32.mrb[50].mxu0  ;;  %v6862_v18 = vpop.f32.mrb[50].mxu1  ;;  %14280 = vmatprep.mubr.f32.mxu1 %v1922_v3  ;;  %14356 = vmatprep.subr.mxu1 %v2993_v4  ;;  %v3001_v4 = vcombine.high %v453_v59, %v453_v59  ;;  %v2008_v7 = vcombine.high %v272_v60, %v272_v60  ;;  %v459_v44 = vld [vmem:[%s17425_s22 + $0x568] sm:$0xff] }
 0x158   : > { %v6793_v25 = vadd.f32 %v6792_v17, %v6723_v14  ;;  %v6794_v26 = vpop.f32.mrb[51].mxu0  ;;  %14211 = vmatmul.mubr.f32.vlgmr.msra.gmra.mrb[156].mxu0 %v17878_v45  ;;  %v6864_v27 = vpop.f32.mrb[51].mxu1  ;;  %14281 = vmatmul.mubr.f32.vlgmr.msra.gmra.mrb[156].mxu1 %v1920_v54  ;;  %v1972_v45 = vcombine.high %v17908_v30, %v17908_v30  ;;  %v452_v54 = vld [vmem:[%s17425_s22 + $0x530] sm:$0xff]  ;;  %v17938_v14 = vrot.slane %v272_v60, %v17435_v19 }
 0x159   : > { %14287 = vmatpush1.xpose.msra.mxu0 %v444_v53  ;;  %14357 = vmatpush1.xpose.msra.mxu1 %v445_v58  ;;  %v2999_v53 = vcombine.high %v451_v43, %v451_v43  ;;  %v2025_v17 = vcombine.high %v273_v8, %v273_v8  ;;  %v2022_v24 = vrot.slane %v2008_v7, %v17435_v19  ;;  %v462_v7 = vld [vmem:[%s17425_s22 + $0x580] sm:$0xff] }
 0x15a   : > { %v6863_v31 = vadd.f32 %v6862_v18, %v6793_v25  ;;  %14350 = vmatprep.mubr.f32.mxu0 %v1938_v12  ;;  %14426 = vmatprep.subr.mxu0 %v2994_v15  ;;  %v455_v12 = vld [vmem:[%s17425_s22 + $0x548] sm:$0xff] }
 0x15b   : > { %v6932_v34 = vpop.f32.mrb[52].mxu0  ;;  %v7002_v35 = vpop.f32.mrb[52].mxu1  ;;  %14420 = vmatprep.mubr.f32.mxu1 %v1939_v16  ;;  %14496 = vmatprep.subr.mxu1 %v2995_v20 }
 0x15c   : > { %v6933_v40 = vadd.f32 %v6932_v34, %v6863_v31  ;;  %v6934_v41 = vpop.f32.mrb[53].mxu0  ;;  %14351 = vmatmul.mubr.f32.vlgmr.msra.gmra.mrb[158].mxu0 %v17888_v61  ;;  %v7004_v42 = vpop.f32.mrb[53].mxu1  ;;  %14421 = vmatmul.mubr.f32.vlgmr.msra.gmra.mrb[158].mxu1 %v1937_v0  ;;  %v1989_v61 = vcombine.high %v17918_v46, %v17918_v46  ;;  %v3000_v0 = vcombine.high %v452_v54, %v452_v54 }
 0x15d   : > { %14427 = vmatpush1.xpose.msra.mxu0 %v446_v5  ;;  %14497 = vmatpush1.xpose.msra.mxu1 %v447_v10  ;;  %v454_v5 = vld [vmem:[%s17425_s22 + $0x540] sm:$0xff]  ;;  %v17948_v31 = vrot.slane %v273_v8, %v17435_v19  ;;  %v2039_v34 = vrot.slane %v2025_v17, %v17435_v19  ;;  %v3010_v17 = vcombine.high %v462_v7, %v462_v7 }
 0x15e   : > { %v7003_v47 = vadd.f32 %v7002_v35, %v6933_v40  ;;  %14490 = vmatprep.mubr.f32.mxu0 %v1955_v29  ;;  %14566 = vmatprep.subr.mxu0 %v2996_v32  ;;  %v3002_v16 = vcombine.high %v454_v5, %v454_v5  ;;  %v274_v29 = vld [vmem:[%s17420_s19 + $0x2b0] sm:$0xff] }
 0x15f   : > { %v7072_v50 = vpop.f32.mrb[54].mxu0  ;;  %v7142_v51 = vpop.f32.mrb[54].mxu1  ;;  %14560 = vmatprep.mubr.f32.mxu1 %v1956_v36  ;;  %14636 = vmatprep.subr.mxu1 %v2997_v37  ;;  %v2024_v37 = vcombine.high %v2022_v24, %v2022_v24  ;;  %v2042_v40 = vcombine.high %v274_v29, %v274_v29 }
 0x160   : > { %v7073_v56 = vadd.f32 %v7072_v50, %v7003_v47  ;;  %v7074_v57 = vpop.f32.mrb[55].mxu0  ;;  %14491 = vmatmul.mubr.f32.vlgmr.msra.gmra.mrb[160].mxu0 %v17898_v13  ;;  %v7144_v58 = vpop.f32.mrb[55].mxu1  ;;  %14561 = vmatmul.mubr.f32.vlgmr.msra.gmra.mrb[160].mxu1 %v1954_v22  ;;  %v2006_v13 = vcombine.high %v17928_v62, %v17928_v62  ;;  %v3003_v22 = vcombine.high %v455_v12, %v455_v12 }
 0x161   : > { %14567 = vmatpush1.xpose.msra.mxu0 %v448_v21  ;;  %14637 = vmatpush1.xpose.msra.mxu1 %v449_v28  ;;  %v2007_v21 = vcombine.high %v2005_v6, %v2005_v6  ;;  %v457_v28 = vld [vmem:[%s17425_s22 + $0x558] sm:$0xff]  ;;  %v17958_v47 = vrot.slane %v274_v29, %v17435_v19  ;;  %v2041_v50 = vcombine.high %v2039_v34, %v2039_v34  ;;  %v276_v57 = vld [vmem:[%s17420_s19 + $0x2c0] sm:$0xff] }
 0x162   : > { %v7143_v63 = vadd.f32 %v7142_v51, %v7073_v56  ;;  %14630 = vmatprep.mubr.f32.mxu0 %v1972_v45  ;;  %14706 = vmatprep.subr.mxu0 %v2998_v48  ;;  %v275_v45 = vld [vmem:[%s17420_s19 + $0x2b8] sm:$0xff]  ;;  %v2056_v55 = vrot.slane %v2042_v40, %v17435_v19 }
 0x163   : > { %v7212_v2 = vpop.f32.mrb[56].mxu0  ;;  %v7282_v3 = vpop.f32.mrb[56].mxu1  ;;  %14700 = vmatprep.mubr.f32.mxu1 %v1973_v52  ;;  %14776 = vmatprep.subr.mxu1 %v2999_v53  ;;  %v3007_v53 = vcombine.high %v459_v44, %v459_v44  ;;  %v2059_v56 = vcombine.high %v275_v45, %v275_v45  ;;  %v465_v29 = vld [vmem:[%s17425_s22 + $0x598] sm:$0xff] }
 0x164   : > { %v7213_v9 = vadd.f32 %v7212_v2, %v7143_v63  ;;  %v7214_v10 = vpop.f32.mrb[57].mxu0  ;;  %14631 = vmatmul.mubr.f32.vlgmr.msra.gmra.mrb[162].mxu0 %v17908_v30  ;;  %v7284_v11 = vpop.f32.mrb[57].mxu1  ;;  %14701 = vmatmul.mubr.f32.vlgmr.msra.gmra.mrb[162].mxu1 %v1971_v39  ;;  %v2023_v30 = vcombine.high %v17938_v14, %v17938_v14  ;;  %v458_v39 = vld [vmem:[%s17425_s22 + $0x560] sm:$0xff]  ;;  %v17968_v63 = vrot.slane %v275_v45, %v17435_v19 }
 0x165   : > { %14707 = vmatpush1.xpose.msra.mxu0 %v450_v38  ;;  %14777 = vmatpush1.xpose.msra.mxu1 %v451_v43  ;;  %v3005_v38 = vcombine.high %v457_v28, %v457_v28  ;;  %v2076_v2 = vcombine.high %v276_v57, %v276_v57  ;;  %v2073_v8 = vrot.slane %v2059_v56, %v17435_v19  ;;  %v468_v56 = vld [vmem:[%s17425_s22 + $0x5b0] sm:$0xff] }
 0x166   : > { %v7283_v15 = vadd.f32 %v7282_v3, %v7213_v9  ;;  %14770 = vmatprep.mubr.f32.mxu0 %v1989_v61  ;;  %14846 = vmatprep.subr.mxu0 %v3000_v0  ;;  %v461_v61 = vld [vmem:[%s17425_s22 + $0x578] sm:$0xff] }
 0x167   : > { %v7352_v18 = vpop.f32.mrb[58].mxu0  ;;  %v7422_v20 = vpop.f32.mrb[58].mxu1  ;;  %14840 = vmatprep.mubr.f32.mxu1 %v1990_v1  ;;  %14916 = vmatprep.subr.mxu1 %v3001_v4 }
 0x168   : > { %v7353_v25 = vadd.f32 %v7352_v18, %v7283_v15  ;;  %v7354_v26 = vpop.f32.mrb[59].mxu0  ;;  %14771 = vmatmul.mubr.f32.vlgmr.msra.gmra.mrb[164].mxu0 %v17918_v46  ;;  %v7424_v27 = vpop.f32.mrb[59].mxu1  ;;  %14841 = vmatmul.mubr.f32.vlgmr.msra.gmra.mrb[164].mxu1 %v1988_v49  ;;  %v2040_v46 = vcombine.high %v17948_v31, %v17948_v31  ;;  %v3006_v49 = vcombine.high %v458_v39, %v458_v39 }
 0x169   : > { %14847 = vmatpush1.xpose.msra.mxu0 %v452_v54  ;;  %14917 = vmatpush1.xpose.msra.mxu1 %v453_v59  ;;  %v460_v54 = vld [vmem:[%s17425_s22 + $0x570] sm:$0xff]  ;;  %v17978_v15 = vrot.slane %v276_v57, %v17435_v19  ;;  %v2090_v18 = vrot.slane %v2076_v2, %v17435_v19  ;;  %v3016_v2 = vcombine.high %v468_v56, %v468_v56 }
 0x16a   : > { %v7423_v32 = vadd.f32 %v7422_v20, %v7353_v25  ;;  %14910 = vmatprep.mubr.f32.mxu0 %v2006_v13  ;;  %14986 = vmatprep.subr.mxu0 %v3002_v16  ;;  %v3008_v1 = vcombine.high %v460_v54, %v460_v54  ;;  %v277_v13 = vld [vmem:[%s17420_s19 + $0x2c8] sm:$0xff] }
 0x16b   : > { %v7492_v35 = vpop.f32.mrb[60].mxu0  ;;  %v7562_v36 = vpop.f32.mrb[60].mxu1  ;;  %14980 = vmatprep.mubr.f32.mxu1 %v2007_v21  ;;  %15056 = vmatprep.subr.mxu1 %v3003_v22  ;;  %v2075_v22 = vcombine.high %v2073_v8, %v2073_v8  ;;  %v2093_v25 = vcombine.high %v277_v13, %v277_v13 }
 0x16c   : > { %v7493_v41 = vadd.f32 %v7492_v35, %v7423_v32  ;;  %v7494_v42 = vpop.f32.mrb[61].mxu0  ;;  %14911 = vmatmul.mubr.f32.vlgmr.msra.gmra.mrb[166].mxu0 %v17928_v62  ;;  %v7564_v43 = vpop.f32.mrb[61].mxu1  ;;  %14981 = vmatmul.mubr.f32.vlgmr.msra.gmra.mrb[166].mxu1 %v2005_v6  ;;  %v2057_v62 = vcombine.high %v17958_v47, %v17958_v47  ;;  %v3009_v6 = vcombine.high %v461_v61, %v461_v61 }
 0x16d   : > { %14987 = vmatpush1.xpose.msra.mxu0 %v454_v5  ;;  %15057 = vmatpush1.xpose.msra.mxu1 %v455_v12  ;;  %v2058_v5 = vcombine.high %v2056_v55, %v2056_v55  ;;  %v463_v12 = vld [vmem:[%s17425_s22 + $0x588] sm:$0xff]  ;;  %v17988_v32 = vrot.slane %v277_v13, %v17435_v19  ;;  %v2092_v35 = vcombine.high %v2090_v18, %v2090_v18  ;;  %v279_v42 = vld [vmem:[%s17420_s19 + $0x2d8] sm:$0xff] }
 0x16e   : > { %v7563_v48 = vadd.f32 %v7562_v36, %v7493_v41  ;;  %15050 = vmatprep.mubr.f32.mxu0 %v2023_v30  ;;  %15126 = vmatprep.subr.mxu0 %v3004_v33  ;;  %v278_v30 = vld [vmem:[%s17420_s19 + $0x2d0] sm:$0xff]  ;;  %v2107_v40 = vrot.slane %v2093_v25, %v17435_v19  ;;  %v471_v13 = vld [vmem:[%s17425_s22 + $0x5c8] sm:$0xff] }
 0x16f   : > { %v7632_v51 = vpop.f32.mrb[62].mxu0  ;;  %v7702_v52 = vpop.f32.mrb[62].mxu1  ;;  %15120 = vmatprep.mubr.f32.mxu1 %v2024_v37  ;;  %15196 = vmatprep.subr.mxu1 %v3005_v38  ;;  %v3013_v38 = vcombine.high %v465_v29, %v465_v29  ;;  %v2110_v41 = vcombine.high %v278_v30, %v278_v30 }
 0x170   : > { %v7633_v58 = vadd.f32 %v7632_v51, %v7563_v48  ;;  %v7634_v59 = vpop.f32.mrb[63].mxu0  ;;  %15051 = vmatmul.mubr.f32.vlgmr.msra.gmra.mrb[168].mxu0 %v17938_v14  ;;  %v7704_v60 = vpop.f32.mrb[63].mxu1  ;;  %15121 = vmatmul.mubr.f32.vlgmr.msra.gmra.mrb[168].mxu1 %v2022_v24  ;;  %v2074_v14 = vcombine.high %v17968_v63, %v17968_v63  ;;  %v464_v24 = vld [vmem:[%s17425_s22 + $0x590] sm:$0xff]  ;;  %v17998_v48 = vrot.slane %v278_v30, %v17435_v19 }
 0x171   : > { %15127 = vmatpush1.xpose.msra.mxu0 %v456_v23  ;;  %15197 = vmatpush1.xpose.msra.mxu1 %v457_v28  ;;  %v3011_v23 = vcombine.high %v463_v12, %v463_v12  ;;  %v2127_v51 = vcombine.high %v279_v42, %v279_v42  ;;  %v2124_v57 = vrot.slane %v2110_v41, %v17435_v19  ;;  %v474_v41 = vld [vmem:[%s17425_s22 + $0x5e0] sm:$0xff] }
 0x172   : > { %v7703_v0 = vadd.f32 %v7702_v52, %v7633_v58  ;;  %15190 = vmatprep.mubr.f32.mxu0 %v2040_v46  ;;  %15266 = vmatprep.subr.mxu0 %v3006_v49  ;;  %v467_v46 = vld [vmem:[%s17425_s22 + $0x5a8] sm:$0xff] }
 0x173   : > { %v7772_v3 = vpop.f32.mrb[64].mxu0  ;;  %v7842_v4 = vpop.f32.mrb[64].mxu1  ;;  %15260 = vmatprep.mubr.f32.mxu1 %v2041_v50  ;;  %15336 = vmatprep.subr.mxu1 %v3007_v53 }
 0x174   : > { %v7773_v9 = vadd.f32 %v7772_v3, %v7703_v0  ;;  %v7774_v10 = vpop.f32.mrb[65].mxu0  ;;  %15191 = vmatmul.mubr.f32.vlgmr.msra.gmra.mrb[170].mxu0 %v17948_v31  ;;  %v7844_v11 = vpop.f32.mrb[65].mxu1  ;;  %15261 = vmatmul.mubr.f32.vlgmr.msra.gmra.mrb[170].mxu1 %v2039_v34  ;;  %v2091_v31 = vcombine.high %v17978_v15, %v17978_v15  ;;  %v3012_v34 = vcombine.high %v464_v24, %v464_v24 }
 0x175   : > { %15267 = vmatpush1.xpose.msra.mxu0 %v458_v39  ;;  %15337 = vmatpush1.xpose.msra.mxu1 %v459_v44  ;;  %v466_v39 = vld [vmem:[%s17425_s22 + $0x5a0] sm:$0xff]  ;;  %v18008_v0 = vrot.slane %v279_v42, %v17435_v19  ;;  %v2141_v3 = vrot.slane %v2127_v51, %v17435_v19  ;;  %v3022_v51 = vcombine.high %v474_v41, %v474_v41 }
 0x176   : > { %v7843_v16 = vadd.f32 %v7842_v4, %v7773_v9  ;;  %15330 = vmatprep.mubr.f32.mxu0 %v2057_v62  ;;  %15406 = vmatprep.subr.mxu0 %v3008_v1  ;;  %v3014_v50 = vcombine.high %v466_v39, %v466_v39  ;;  %v280_v62 = vld [vmem:[%s17420_s19 + $0x2e0] sm:$0xff] }
 0x177   : > { %v7912_v20 = vpop.f32.mrb[66].mxu0  ;;  %v7982_v21 = vpop.f32.mrb[66].mxu1  ;;  %15400 = vmatprep.mubr.f32.mxu1 %v2058_v5  ;;  %15476 = vmatprep.subr.mxu1 %v3009_v6  ;;  %v2126_v6 = vcombine.high %v2124_v57, %v2124_v57  ;;  %v2144_v9 = vcombine.high %v280_v62, %v280_v62 }
 0x178   : > { %v7913_v26 = vadd.f32 %v7912_v20, %v7843_v16  ;;  %v7914_v27 = vpop.f32.mrb[67].mxu0  ;;  %15331 = vmatmul.mubr.f32.vlgmr.msra.gmra.mrb[172].mxu0 %v17958_v47  ;;  %v7984_v28 = vpop.f32.mrb[67].mxu1  ;;  %15401 = vmatmul.mubr.f32.vlgmr.msra.gmra.mrb[172].mxu1 %v2056_v55  ;;  %v2108_v47 = vcombine.high %v17988_v32, %v17988_v32  ;;  %v3015_v55 = vcombine.high %v467_v46, %v467_v46 }
 0x179   : > { %15407 = vmatpush1.xpose.msra.mxu0 %v460_v54  ;;  %15477 = vmatpush1.xpose.msra.mxu1 %v461_v61  ;;  %v2109_v54 = vcombine.high %v2107_v40, %v2107_v40  ;;  %v469_v61 = vld [vmem:[%s17425_s22 + $0x5b8] sm:$0xff]  ;;  %v18018_v16 = vrot.slane %v280_v62, %v17435_v19  ;;  %v2143_v20 = vcombine.high %v2141_v3, %v2141_v3  ;;  %v282_v27 = vld [vmem:[%s17420_s19 + $0x2f0] sm:$0xff] }
 0x17a   : > { %v7983_v33 = vadd.f32 %v7982_v21, %v7913_v26  ;;  %15470 = vmatprep.mubr.f32.mxu0 %v2074_v14  ;;  %15546 = vmatprep.subr.mxu0 %v3010_v17  ;;  %v281_v14 = vld [vmem:[%s17420_s19 + $0x2e8] sm:$0xff]  ;;  %v2158_v25 = vrot.slane %v2144_v9, %v17435_v19  ;;  %v477_v62 = vld [vmem:[%s17425_s22 + $0x5f8] sm:$0xff] }
 0x17b   : > { %v8052_v36 = vpop.f32.mrb[68].mxu0  ;;  %v8122_v37 = vpop.f32.mrb[68].mxu1  ;;  %15540 = vmatprep.mubr.f32.mxu1 %v2075_v22  ;;  %15616 = vmatprep.subr.mxu1 %v3011_v23  ;;  %v3019_v23 = vcombine.high %v471_v13, %v471_v13  ;;  %v2161_v26 = vcombine.high %v281_v14, %v281_v14 }
 0x17c   : > { %v8053_v43 = vadd.f32 %v8052_v36, %v7983_v33  ;;  %v8054_v44 = vpop.f32.mrb[69].mxu0  ;;  %15471 = vmatmul.mubr.f32.vlgmr.msra.gmra.mrb[174].mxu0 %v17968_v63  ;;  %v8124_v45 = vpop.f32.mrb[69].mxu1  ;;  %15541 = vmatmul.mubr.f32.vlgmr.msra.gmra.mrb[174].mxu1 %v2073_v8  ;;  %v2125_v63 = vcombine.high %v17998_v48, %v17998_v48  ;;  %v470_v8 = vld [vmem:[%s17425_s22 + $0x5c0] sm:$0xff]  ;;  %v18028_v33 = vrot.slane %v281_v14, %v17435_v19 }
 0x17d   : > { %15547 = vmatpush1.xpose.msra.mxu0 %v462_v7  ;;  %15617 = vmatpush1.xpose.msra.mxu1 %v463_v12  ;;  %v3017_v7 = vcombine.high %v469_v61, %v469_v61  ;;  %v2178_v36 = vcombine.high %v282_v27, %v282_v27  ;;  %v2175_v42 = vrot.slane %v2161_v26, %v17435_v19 }
 0x17e   : > { %v8123_v49 = vadd.f32 %v8122_v37, %v8053_v43  ;;  %15610 = vmatprep.mubr.f32.mxu0 %v2091_v31  ;;  %15686 = vmatprep.subr.mxu0 %v3012_v34  ;;  %v473_v31 = vld [vmem:[%s17425_s22 + $0x5d8] sm:$0xff] }
 0x17f   : > { %v8192_v52 = vpop.f32.mrb[70].mxu0  ;;  %v8262_v53 = vpop.f32.mrb[70].mxu1  ;;  %15680 = vmatprep.mubr.f32.mxu1 %v2092_v35  ;;  %15756 = vmatprep.subr.mxu1 %v3013_v38 }
 0x180   : > { %v8193_v58 = vadd.f32 %v8192_v52, %v8123_v49  ;;  %v8194_v59 = vpop.f32.mrb[71].mxu0  ;;  %15611 = vmatmul.mubr.f32.vlgmr.msra.gmra.mrb[176].mxu0 %v17978_v15  ;;  %v8264_v60 = vpop.f32.mrb[71].mxu1  ;;  %15681 = vmatmul.mubr.f32.vlgmr.msra.gmra.mrb[176].mxu1 %v2090_v18  ;;  %v2142_v15 = vcombine.high %v18008_v0, %v18008_v0  ;;  %v3018_v18 = vcombine.high %v470_v8, %v470_v8 }
 0x181   : > { %15687 = vmatpush1.xpose.msra.mxu0 %v464_v24  ;;  %15757 = vmatpush1.xpose.msra.mxu1 %v465_v29  ;;  %v472_v24 = vld [vmem:[%s17425_s22 + $0x5d0] sm:$0xff]  ;;  %v18038_v49 = vrot.slane %v282_v27, %v17435_v19  ;;  %v2192_v52 = vrot.slane %v2178_v36, %v17435_v19 }
 0x182   : > { %v8263_v1 = vadd.f32 %v8262_v53, %v8193_v58  ;;  %15750 = vmatprep.mubr.f32.mxu0 %v2108_v47  ;;  %15826 = vmatprep.subr.mxu0 %v3014_v50  ;;  %v3020_v35 = vcombine.high %v472_v24, %v472_v24  ;;  %v283_v47 = vld [vmem:[%s17420_s19 + $0x2f8] sm:$0xff] }
 0x183   : > { %v8332_v4 = vpop.f32.mrb[72].mxu0  ;;  %v8402_v5 = vpop.f32.mrb[72].mxu1  ;;  %15820 = vmatprep.mubr.f32.mxu1 %v2109_v54  ;;  %15896 = vmatprep.subr.mxu1 %v3015_v55  ;;  %v2177_v55 = vcombine.high %v2175_v42, %v2175_v42  ;;  %v2195_v58 = vcombine.high %v283_v47, %v283_v47 }
 0x184   : > { %v8333_v10 = vadd.f32 %v8332_v4, %v8263_v1  ;;  %v8334_v11 = vpop.f32.mrb[73].mxu0  ;;  %15751 = vmatmul.mubr.f32.vlgmr.msra.gmra.mrb[178].mxu0 %v17988_v32  ;;  %v8404_v12 = vpop.f32.mrb[73].mxu1  ;;  %15821 = vmatmul.mubr.f32.vlgmr.msra.gmra.mrb[178].mxu1 %v2107_v40  ;;  %v2159_v32 = vcombine.high %v18018_v16, %v18018_v16  ;;  %v3021_v40 = vcombine.high %v473_v31, %v473_v31 }
 0x185   : > { %15827 = vmatpush1.xpose.msra.mxu0 %v466_v39  ;;  %15897 = vmatpush1.xpose.msra.mxu1 %v467_v46  ;;  %v2160_v39 = vcombine.high %v2158_v25, %v2158_v25  ;;  %v475_v46 = vld [vmem:[%s17425_s22 + $0x5e8] sm:$0xff]  ;;  %v2202_v1 = vrot.slane %v283_v47, %v17435_v19  ;;  %v2194_v4 = vcombine.high %v2192_v52, %v2192_v52 }
 0x186   : > { %v8403_v17 = vadd.f32 %v8402_v5, %v8333_v10  ;;  %15890 = vmatprep.mubr.f32.mxu0 %v2125_v63  ;;  %15966 = vmatprep.subr.mxu0 %v3016_v2  ;;  %v284_v63 = vld [vmem:[%s17420_s19 + $0x300] sm:$0xff]  ;;  %v2209_v9 = vrot.slane %v2195_v58, %v17435_v19  ;;  %v285_v11 = vld [vmem:[%s17420_s19 + $0x308] sm:$0xff] }
 0x187   : > { %v8472_v21 = vpop.f32.mrb[74].mxu0  ;;  %v8542_v22 = vpop.f32.mrb[74].mxu1  ;;  %15960 = vmatprep.mubr.f32.mxu1 %v2126_v6  ;;  %16036 = vmatprep.subr.mxu1 %v3017_v7  ;;  %v3025_v7 = vcombine.high %v477_v62, %v477_v62  ;;  %v2212_v10 = vcombine.high %v284_v63, %v284_v63 }
 0x188   : > { %v8473_v28 = vadd.f32 %v8472_v21, %v8403_v17  ;;  %v8474_v29 = vpop.f32.mrb[75].mxu0  ;;  %15891 = vmatmul.mubr.f32.vlgmr.msra.gmra.mrb[180].mxu0 %v17998_v48  ;;  %v8544_v30 = vpop.f32.mrb[75].mxu1  ;;  %15961 = vmatmul.mubr.f32.vlgmr.msra.gmra.mrb[180].mxu1 %v2124_v57  ;;  %v2176_v48 = vcombine.high %v18028_v33, %v18028_v33  ;;  %v476_v57 = vld [vmem:[%s17425_s22 + $0x5f0] sm:$0xff]  ;;  %v2219_v17 = vrot.slane %v284_v63, %v17435_v19 }
 0x189   : > { %15967 = vmatpush1.xpose.msra.mxu0 %v468_v56  ;;  %16037 = vmatpush1.xpose.msra.mxu1 %v469_v61  ;;  %v3023_v56 = vcombine.high %v475_v46, %v475_v46  ;;  %v480_v21 = vld [vmem:[%s17425_s22 + $0x610] sm:$0xff]  ;;  %v2226_v27 = vrot.slane %v2212_v10, %v17435_v19 }
 0x18a   : > { %v8543_v34 = vadd.f32 %v8542_v22, %v8473_v28  ;;  %16030 = vmatprep.mubr.f32.mxu0 %v2142_v15  ;;  %16106 = vmatprep.subr.mxu0 %v3018_v18  ;;  %v479_v15 = vld [vmem:[%s17425_s22 + $0x608] sm:$0xff]  ;;  %v2229_v22 = vcombine.high %v285_v11, %v285_v11 }
 0x18b   : > { %v8612_v37 = vpop.f32.mrb[76].mxu0  ;;  %v8682_v38 = vpop.f32.mrb[76].mxu1  ;;  %16100 = vmatprep.mubr.f32.mxu1 %v2143_v20  ;;  %16176 = vmatprep.subr.mxu1 %v3019_v23  ;;  %v3027_v26 = vcombine.high %v479_v15, %v479_v15 }
 0x18c   : > { %v8613_v43 = vadd.f32 %v8612_v37, %v8543_v34  ;;  %v8614_v44 = vpop.f32.mrb[77].mxu0  ;;  %16031 = vmatmul.mubr.f32.vlgmr.msra.gmra.mrb[182].mxu0 %v18008_v0  ;;  %v8684_v45 = vpop.f32.mrb[77].mxu1  ;;  %16101 = vmatmul.mubr.f32.vlgmr.msra.gmra.mrb[182].mxu1 %v2141_v3  ;;  %v2193_v0 = vcombine.high %v18038_v49, %v18038_v49  ;;  %v3024_v3 = vcombine.high %v476_v57, %v476_v57 }
 0x18d   : > { %16107 = vmatpush1.xpose.msra.mxu0 %v470_v8  ;;  %16177 = vmatpush1.xpose.msra.mxu1 %v471_v13  ;;  %v478_v8 = vld [vmem:[%s17425_s22 + $0x600] sm:$0xff]  ;;  %v2243_v36 = vrot.slane %v2229_v22, %v17435_v19 }
 0x18e   : > { %v8683_v50 = vadd.f32 %v8682_v38, %v8613_v43  ;;  %16170 = vmatprep.mubr.f32.mxu0 %v2159_v32  ;;  %16246 = vmatprep.subr.mxu0 %v3020_v35  ;;  %v3026_v20 = vcombine.high %v478_v8, %v478_v8  ;;  %v2227_v32 = vcombine.high %v2219_v17, %v2219_v17 }
 0x18f   : > { %v8752_v53 = vpop.f32.mrb[78].mxu0  ;;  %v8822_v54 = vpop.f32.mrb[78].mxu1  ;;  %16240 = vmatprep.mubr.f32.mxu1 %v2160_v39  ;;  %16316 = vmatprep.subr.mxu1 %v3021_v40  ;;  %v2236_v35 = vrot.slane %v285_v11, %v17435_v19  ;;  %v2228_v39 = vcombine.high %v2226_v27, %v2226_v27 }
 0x190   : > { %v8753_v59 = vadd.f32 %v8752_v53, %v8683_v50  ;;  %v8754_v60 = vpop.f32.mrb[79].mxu0  ;;  %16171 = vmatmul.mubr.f32.vlgmr.msra.gmra.mrb[184].mxu0 %v18018_v16  ;;  %v8824_v61 = vpop.f32.mrb[79].mxu1  ;;  %16241 = vmatmul.mubr.f32.vlgmr.msra.gmra.mrb[184].mxu1 %v2158_v25  ;;  %v2210_v16 = vcombine.high %v2202_v1, %v2202_v1  ;;  %v2211_v25 = vcombine.high %v2209_v9, %v2209_v9 }
 0x191   : > { %16247 = vmatpush1.xpose.msra.mxu0 %v472_v24  ;;  %16317 = vmatpush1.xpose.msra.mxu1 %v473_v31  ;;  %v481_v31 = vld [vmem:[%s17425_s22 + $0x618] sm:$0xff]  ;;  %v2244_v45 = vcombine.high %v2236_v35, %v2236_v35 }
 0x192   : > { %v8823_v2 = vadd.f32 %v8822_v54, %v8753_v59  ;;  %16310 = vmatprep.mubr.f32.mxu0 %v2176_v48  ;;  %16386 = vmatprep.subr.mxu0 %v3022_v51  ;;  %v3029_v40 = vcombine.high %v481_v31, %v481_v31 }
 0x193   : > { %v8892_v5 = vpop.f32.mrb[80].mxu0  ;;  %v8962_v6 = vpop.f32.mrb[80].mxu1  ;;  %16380 = vmatprep.mubr.f32.mxu1 %v2177_v55  ;;  %16456 = vmatprep.subr.mxu1 %v3023_v56 }
 0x194   : > { %v8893_v12 = vadd.f32 %v8892_v5, %v8823_v2  ;;  %v8894_v13 = vpop.f32.mrb[81].mxu0  ;;  %16311 = vmatmul.mubr.f32.vlgmr.msra.gmra.mrb[186].mxu0 %v18028_v33  ;;  %v8964_v14 = vpop.f32.mrb[81].mxu1  ;;  %16381 = vmatmul.mubr.f32.vlgmr.msra.gmra.mrb[186].mxu1 %v2175_v42  ;;  %v3028_v33 = vcombine.high %v480_v21, %v480_v21 }
 0x195   : > { %16387 = vmatpush1.xpose.msra.mxu0 %v474_v41  ;;  %16457 = vmatpush1.xpose.msra.mxu1 %v475_v46  ;;  %v2245_v46 = vcombine.high %v2243_v36, %v2243_v36 }
 0x196   : > { %v8963_v18 = vadd.f32 %v8962_v6, %v8893_v12  ;;  %16450 = vmatprep.mubr.f32.mxu0 %v2193_v0  ;;  %16526 = vmatprep.subr.mxu0 %v3024_v3 }
 0x197   : > { %v9032_v23 = vpop.f32.mrb[82].mxu0  ;;  %v9102_v24 = vpop.f32.mrb[82].mxu1  ;;  %16520 = vmatprep.mubr.f32.mxu1 %v2194_v4  ;;  %16596 = vmatprep.subr.mxu1 %v3025_v7 }
 0x198   : > { %v9033_v28 = vadd.f32 %v9032_v23, %v8963_v18  ;;  %v9034_v29 = vpop.f32.mrb[83].mxu0  ;;  %16451 = vmatmul.mubr.f32.vlgmr.msra.gmra.mrb[188].mxu0 %v18038_v49  ;;  %v9104_v30 = vpop.f32.mrb[83].mxu1  ;;  %16521 = vmatmul.mubr.f32.vlgmr.msra.gmra.mrb[188].mxu1 %v2192_v52 }
 0x199   : > { %16527 = vmatpush1.xpose.msra.mxu0 %v476_v57  ;;  %16597 = vmatpush1.xpose.msra.mxu1 %v477_v62 }
 0x19a   : > { %v9103_v34 = vadd.f32 %v9102_v24, %v9033_v28  ;;  %16590 = vmatprep.mubr.f32.mxu0 %v2210_v16  ;;  %16666 = vmatprep.subr.mxu0 %v3026_v20 }
 0x19b   : > { %v9172_v37 = vpop.f32.mrb[84].mxu0  ;;  %v9242_v38 = vpop.f32.mrb[84].mxu1  ;;  %16660 = vmatprep.mubr.f32.mxu1 %v2211_v25  ;;  %16736 = vmatprep.subr.mxu1 %v3027_v26 }
 0x19c   : > { %v9173_v41 = vadd.f32 %v9172_v37, %v9103_v34  ;;  %v9174_v42 = vpop.f32.mrb[85].mxu0  ;;  %16591 = vmatmul.mubr.f32.vlgmr.msra.gmra.mrb[190].mxu0 %v2202_v1  ;;  %v9244_v43 = vpop.f32.mrb[85].mxu1  ;;  %16661 = vmatmul.mubr.f32.vlgmr.msra.gmra.mrb[190].mxu1 %v2209_v9 }
 0x19d   : > { %16667 = vmatpush1.xpose.msra.mxu0 %v478_v8  ;;  %16737 = vmatpush1.xpose.msra.mxu1 %v479_v15 }
 0x19e   : > { %v9243_v44 = vadd.f32 %v9242_v38, %v9173_v41  ;;  %16730 = vmatprep.mubr.f32.mxu0 %v2227_v32  ;;  %16806 = vmatprep.subr.mxu0 %v3028_v33 }
 0x19f   : > { %v9312_v47 = vpop.f32.mrb[86].mxu0  ;;  %v9382_v19 = vpop.f32.mrb[86].mxu1  ;;  %16800 = vmatprep.mubr.f32.mxu1 %v2228_v39  ;;  %16876 = vmatprep.subr.mxu1 %v3029_v40 }
 0x1a0   : > { %v9313_v48 = vadd.f32 %v9312_v47, %v9243_v44  ;;  %v9314_v49 = vpop.f32.mrb[87].mxu0  ;;  %16731 = vmatmul.mubr.f32.vlgmr.msra.gmra.mrb[192].mxu0 %v2219_v17  ;;  %v9384_v50 = vpop.f32.mrb[87].mxu1  ;;  %16801 = vmatmul.mubr.f32.vlgmr.msra.gmra.mrb[192].mxu1 %v2226_v27 }
 0x1a1   : > { %16807 = vmatpush1.xpose.msra.mxu0 %v480_v21  ;;  %16877 = vmatpush1.xpose.msra.mxu1 %v481_v31 }
 0x1a2   : > { %v9383_v51 = vadd.f32 %v9382_v19, %v9313_v48  ;;  %16870 = vmatprep.mubr.f32.mxu0 %v2244_v45  ;;  %16940 = vmatprep.mubr.f32.mxu1 %v2245_v46 }
 0x1a3   : > { %v9452_v52 = vpop.f32.mrb[88].mxu0  ;;  %v9522_v53 = vpop.f32.mrb[88].mxu1 }
 0x1a4   : > { %v9453_v54 = vadd.f32 %v9452_v52, %v9383_v51  ;;  %v9454_v55 = vpop.f32.mrb[89].mxu0  ;;  %16871 = vmatmul.mubr.f32.vlgmr.msra.gmra.mrb[194].mxu0 %v2236_v35  ;;  %v9524_v56 = vpop.f32.mrb[89].mxu1  ;;  %16941 = vmatmul.mubr.f32.vlgmr.msra.gmra.mrb[194].mxu1 %v2243_v36 }
 0x1a6   : > { %v9523_v57 = vadd.f32 %v9522_v53, %v9453_v54 }
 0x1a7   : > { %v9592_v58 = vpop.f32.mrb[90].mxu0  ;;  %v9662_v59 = vpop.f32.mrb[90].mxu1 }
 0x1a8   : > { %v9593_v60 = vadd.f32 %v9592_v58, %v9523_v57  ;;  %v9594_v61 = vpop.f32.mrb[91].mxu0  ;;  %v9664_v62 = vpop.f32.mrb[91].mxu1 }
 0x1aa   : > { %v9663_v63 = vadd.f32 %v9662_v59, %v9593_v60 }
 0x1ab   : > { %v9732_v0 = vpop.f32.mrb[92].mxu0  ;;  %v9802_v1 = vpop.f32.mrb[92].mxu1 }
 0x1ac   : > { %v9733_v2 = vadd.f32 %v9732_v0, %v9663_v63  ;;  %v9734_v3 = vpop.f32.mrb[93].mxu0  ;;  %v9804_v4 = vpop.f32.mrb[93].mxu1 }
 0x1ae   : > { %v9803_v5 = vadd.f32 %v9802_v1, %v9733_v2 }
 0x1af   : > { %v9872_v6 = vpop.f32.mrb[94].mxu0  ;;  %v9942_v7 = vpop.f32.mrb[94].mxu1 }
 0x1b0   : > { %v9873_v8 = vadd.f32 %v9872_v6, %v9803_v5  ;;  %v9874_v9 = vpop.f32.mrb[95].mxu0  ;;  %v9944_v10 = vpop.f32.mrb[95].mxu1 }
 0x1b2   : > { %v9943_v11 = vadd.f32 %v9942_v7, %v9873_v8 }
 0x1b3   : > { %v10012_v12 = vpop.f32.mrb[96].mxu0  ;;  %v10082_v13 = vpop.f32.mrb[96].mxu1 }
 0x1b4   : > { %v10013_v14 = vadd.f32 %v10012_v12, %v9943_v11  ;;  %v10014_v15 = vpop.f32.mrb[97].mxu0  ;;  %v10084_v16 = vpop.f32.mrb[97].mxu1 }
 0x1b6   : > { %v10083_v17 = vadd.f32 %v10082_v13, %v10013_v14 }
 0x1b7   : > { %v10152_v18 = vpop.f32.mrb[98].mxu0  ;;  %v10222_v20 = vpop.f32.mrb[98].mxu1 }
 0x1b8   : > { %v10153_v21 = vadd.f32 %v10152_v18, %v10083_v17  ;;  %v10154_v22 = vpop.f32.mrb[99].mxu0  ;;  %v10224_v23 = vpop.f32.mrb[99].mxu1 }
 0x1ba   : > { %v10223_v24 = vadd.f32 %v10222_v20, %v10153_v21 }
 0x1bb   : > { %v10292_v25 = vpop.f32.mrb[100].mxu0  ;;  %v10362_v26 = vpop.f32.mrb[100].mxu1 }
 0x1bc   : > { %v10293_v27 = vadd.f32 %v10292_v25, %v10223_v24  ;;  %v10294_v28 = vpop.f32.mrb[101].mxu0  ;;  %v10364_v29 = vpop.f32.mrb[101].mxu1 }
 0x1be   : > { %v10363_v30 = vadd.f32 %v10362_v26, %v10293_v27 }
 0x1bf   : > { %v10432_v31 = vpop.f32.mrb[102].mxu0  ;;  %v10502_v32 = vpop.f32.mrb[102].mxu1 }
 0x1c0   : > { %v10433_v33 = vadd.f32 %v10432_v31, %v10363_v30  ;;  %v10434_v34 = vpop.f32.mrb[103].mxu0  ;;  %v10504_v35 = vpop.f32.mrb[103].mxu1 }
 0x1c2   : > { %v10503_v36 = vadd.f32 %v10502_v32, %v10433_v33 }
 0x1c3   : > { %v10572_v37 = vpop.f32.mrb[104].mxu0  ;;  %v10642_v38 = vpop.f32.mrb[104].mxu1 }
 0x1c4   : > { %v10573_v39 = vadd.f32 %v10572_v37, %v10503_v36  ;;  %v10574_v40 = vpop.f32.mrb[105].mxu0  ;;  %v10644_v41 = vpop.f32.mrb[105].mxu1 }
 0x1c6   : > { %v10643_v42 = vadd.f32 %v10642_v38, %v10573_v39 }
 0x1c7   : > { %v10712_v43 = vpop.f32.mrb[106].mxu0  ;;  %v10782_v44 = vpop.f32.mrb[106].mxu1 }
 0x1c8   : > { %v10713_v45 = vadd.f32 %v10712_v43, %v10643_v42  ;;  %v10714_v46 = vpop.f32.mrb[107].mxu0  ;;  %v10784_v47 = vpop.f32.mrb[107].mxu1 }
 0x1ca   : > { %v10783_v19 = vadd.f32 %v10782_v44, %v10713_v45 }
 0x1cb   : > { %v10852_v48 = vpop.f32.mrb[108].mxu0  ;;  %v10922_v49 = vpop.f32.mrb[108].mxu1 }
 0x1cc   : > { %v10853_v50 = vadd.f32 %v10852_v48, %v10783_v19  ;;  %v10854_v51 = vpop.f32.mrb[109].mxu0  ;;  %v10924_v52 = vpop.f32.mrb[109].mxu1 }
 0x1ce   : > { %v10923_v53 = vadd.f32 %v10922_v49, %v10853_v50 }
 0x1cf   : > { %v10992_v54 = vpop.f32.mrb[110].mxu0  ;;  %v11062_v55 = vpop.f32.mrb[110].mxu1 }
 0x1d0   : > { %v10993_v56 = vadd.f32 %v10992_v54, %v10923_v53  ;;  %v10994_v57 = vpop.f32.mrb[111].mxu0  ;;  %v11064_v58 = vpop.f32.mrb[111].mxu1 }
 0x1d2   : > { %v11063_v59 = vadd.f32 %v11062_v55, %v10993_v56 }
 0x1d3   : > { %v11132_v60 = vpop.f32.mrb[112].mxu0  ;;  %v11202_v61 = vpop.f32.mrb[112].mxu1 }
 0x1d4   : > { %v11133_v62 = vadd.f32 %v11132_v60, %v11063_v59  ;;  %v11134_v63 = vpop.f32.mrb[113].mxu0  ;;  %v11204_v0 = vpop.f32.mrb[113].mxu1 }
 0x1d6   : > { %v11203_v1 = vadd.f32 %v11202_v61, %v11133_v62 }
 0x1d7   : > { %v11272_v2 = vpop.f32.mrb[114].mxu0  ;;  %v11342_v3 = vpop.f32.mrb[114].mxu1 }
 0x1d8   : > { %v11273_v4 = vadd.f32 %v11272_v2, %v11203_v1  ;;  %v11274_v5 = vpop.f32.mrb[115].mxu0  ;;  %v11344_v6 = vpop.f32.mrb[115].mxu1 }
 0x1da   : > { %v11343_v7 = vadd.f32 %v11342_v3, %v11273_v4 }
 0x1db   : > { %v11412_v8 = vpop.f32.mrb[116].mxu0  ;;  %v11482_v9 = vpop.f32.mrb[116].mxu1 }
 0x1dc   : > { %v11413_v10 = vadd.f32 %v11412_v8, %v11343_v7  ;;  %v11414_v11 = vpop.f32.mrb[117].mxu0  ;;  %v11484_v12 = vpop.f32.mrb[117].mxu1 }
 0x1de   : > { %v11483_v13 = vadd.f32 %v11482_v9, %v11413_v10 }
 0x1df   : > { %v11552_v14 = vpop.f32.mrb[118].mxu0  ;;  %v11622_v15 = vpop.f32.mrb[118].mxu1 }
 0x1e0   : > { %v11553_v16 = vadd.f32 %v11552_v14, %v11483_v13  ;;  %v11554_v17 = vpop.f32.mrb[119].mxu0  ;;  %v11624_v18 = vpop.f32.mrb[119].mxu1 }
 0x1e2   : > { %v11623_v20 = vadd.f32 %v11622_v15, %v11553_v16 }
 0x1e3   : > { %v11692_v21 = vpop.f32.mrb[120].mxu0  ;;  %v11762_v22 = vpop.f32.mrb[120].mxu1 }
 0x1e4   : > { %v11693_v23 = vadd.f32 %v11692_v21, %v11623_v20  ;;  %v11694_v24 = vpop.f32.mrb[121].mxu0  ;;  %v11764_v25 = vpop.f32.mrb[121].mxu1 }
 0x1e6   : > { %v11763_v26 = vadd.f32 %v11762_v22, %v11693_v23 }
 0x1e7   : > { %v11832_v27 = vpop.f32.mrb[122].mxu0  ;;  %v11902_v28 = vpop.f32.mrb[122].mxu1 }
 0x1e8   : > { %v11833_v29 = vadd.f32 %v11832_v27, %v11763_v26  ;;  %v11834_v30 = vpop.f32.mrb[123].mxu0  ;;  %v11904_v31 = vpop.f32.mrb[123].mxu1 }
 0x1ea   : > { %v11903_v32 = vadd.f32 %v11902_v28, %v11833_v29 }
 0x1eb   : > { %v11972_v33 = vpop.f32.mrb[124].mxu0  ;;  %v12042_v34 = vpop.f32.mrb[124].mxu1 }
 0x1ec   : > { %v11973_v35 = vadd.f32 %v11972_v33, %v11903_v32  ;;  %v11974_v36 = vpop.f32.mrb[125].mxu0  ;;  %v12044_v37 = vpop.f32.mrb[125].mxu1 }
 0x1ee   : > { %v12043_v38 = vadd.f32 %v12042_v34, %v11973_v35 }
 0x1ef   : > { %v12112_v39 = vpop.f32.mrb[126].mxu0  ;;  %v12182_v40 = vpop.f32.mrb[126].mxu1 }
 0x1f0   : > { %v12113_v41 = vadd.f32 %v12112_v39, %v12043_v38  ;;  %v12114_v42 = vpop.f32.mrb[127].mxu0  ;;  %v12184_v43 = vpop.f32.mrb[127].mxu1 }
 0x1f2   : > { %v12183_v44 = vadd.f32 %v12182_v40, %v12113_v41 }
 0x1f3   : > { %v12252_v45 = vpop.f32.mrb[128].mxu0  ;;  %v12322_v46 = vpop.f32.mrb[128].mxu1 }
 0x1f4   : > { %v12253_v47 = vadd.f32 %v12252_v45, %v12183_v44  ;;  %v12254_v19 = vpop.f32.mrb[129].mxu0  ;;  %v12324_v48 = vpop.f32.mrb[129].mxu1 }
 0x1f6   : > { %v12323_v49 = vadd.f32 %v12322_v46, %v12253_v47 }
 0x1f7   : > { %v12392_v50 = vpop.f32.mrb[130].mxu0  ;;  %v12462_v51 = vpop.f32.mrb[130].mxu1 }
 0x1f8   : > { %v12393_v52 = vadd.f32 %v12392_v50, %v12323_v49  ;;  %v12394_v53 = vpop.f32.mrb[131].mxu0  ;;  %v12464_v54 = vpop.f32.mrb[131].mxu1 }
 0x1fa   : > { %v12463_v55 = vadd.f32 %v12462_v51, %v12393_v52 }
 0x1fb   : > { %v12532_v56 = vpop.f32.mrb[132].mxu0  ;;  %v12602_v57 = vpop.f32.mrb[132].mxu1 }
 0x1fc   : > { %v12533_v58 = vadd.f32 %v12532_v56, %v12463_v55  ;;  %v12534_v59 = vpop.f32.mrb[133].mxu0  ;;  %v12604_v60 = vpop.f32.mrb[133].mxu1 }
 0x1fe   : > { %v12603_v61 = vadd.f32 %v12602_v57, %v12533_v58 }
 0x1ff   : > { %v12672_v62 = vpop.f32.mrb[134].mxu0  ;;  %v12742_v63 = vpop.f32.mrb[134].mxu1 }
 0x200   : > { %v12673_v0 = vadd.f32 %v12672_v62, %v12603_v61  ;;  %v12674_v1 = vpop.f32.mrb[135].mxu0  ;;  %v12744_v2 = vpop.f32.mrb[135].mxu1 }
 0x202   : > { %v12743_v3 = vadd.f32 %v12742_v63, %v12673_v0 }
 0x203   : > { %v12812_v4 = vpop.f32.mrb[136].mxu0  ;;  %v12882_v5 = vpop.f32.mrb[136].mxu1 }
 0x204   : > { %v12813_v6 = vadd.f32 %v12812_v4, %v12743_v3  ;;  %v12814_v7 = vpop.f32.mrb[137].mxu0  ;;  %v12884_v8 = vpop.f32.mrb[137].mxu1 }
 0x206   : > { %v12883_v9 = vadd.f32 %v12882_v5, %v12813_v6 }
 0x207   : > { %v12952_v10 = vpop.f32.mrb[138].mxu0  ;;  %v13022_v11 = vpop.f32.mrb[138].mxu1 }
 0x208   : > { %v12953_v12 = vadd.f32 %v12952_v10, %v12883_v9  ;;  %v12954_v13 = vpop.f32.mrb[139].mxu0  ;;  %v13024_v14 = vpop.f32.mrb[139].mxu1 }
 0x20a   : > { %v13023_v15 = vadd.f32 %v13022_v11, %v12953_v12 }
 0x20b   : > { %v13092_v16 = vpop.f32.mrb[140].mxu0  ;;  %v13162_v17 = vpop.f32.mrb[140].mxu1 }
 0x20c   : > { %v13093_v18 = vadd.f32 %v13092_v16, %v13023_v15  ;;  %v13094_v20 = vpop.f32.mrb[141].mxu0  ;;  %v13164_v21 = vpop.f32.mrb[141].mxu1 }
 0x20e   : > { %v13163_v22 = vadd.f32 %v13162_v17, %v13093_v18 }
 0x20f   : > { %v13232_v23 = vpop.f32.mrb[142].mxu0  ;;  %v13302_v24 = vpop.f32.mrb[142].mxu1 }
 0x210   : > { %v13233_v25 = vadd.f32 %v13232_v23, %v13163_v22  ;;  %v13234_v26 = vpop.f32.mrb[143].mxu0  ;;  %v13304_v27 = vpop.f32.mrb[143].mxu1 }
 0x212   : > { %v13303_v28 = vadd.f32 %v13302_v24, %v13233_v25 }
 0x213   : > { %v13372_v29 = vpop.f32.mrb[144].mxu0  ;;  %v13442_v30 = vpop.f32.mrb[144].mxu1 }
 0x214   : > { %v13373_v31 = vadd.f32 %v13372_v29, %v13303_v28  ;;  %v13374_v32 = vpop.f32.mrb[145].mxu0  ;;  %v13444_v33 = vpop.f32.mrb[145].mxu1 }
 0x216   : > { %v13443_v34 = vadd.f32 %v13442_v30, %v13373_v31 }
 0x217   : > { %v13512_v35 = vpop.f32.mrb[146].mxu0  ;;  %v13582_v36 = vpop.f32.mrb[146].mxu1 }
 0x218   : > { %v13513_v37 = vadd.f32 %v13512_v35, %v13443_v34  ;;  %v13514_v38 = vpop.f32.mrb[147].mxu0  ;;  %v13584_v39 = vpop.f32.mrb[147].mxu1 }
 0x21a   : > { %v13583_v40 = vadd.f32 %v13582_v36, %v13513_v37 }
 0x21b   : > { %v13652_v41 = vpop.f32.mrb[148].mxu0  ;;  %v13722_v42 = vpop.f32.mrb[148].mxu1 }
 0x21c   : > { %v13653_v43 = vadd.f32 %v13652_v41, %v13583_v40  ;;  %v13654_v44 = vpop.f32.mrb[149].mxu0  ;;  %v13724_v45 = vpop.f32.mrb[149].mxu1 }
 0x21e   : > { %v13723_v46 = vadd.f32 %v13722_v42, %v13653_v43 }
 0x21f   : > { %v13792_v47 = vpop.f32.mrb[150].mxu0  ;;  %v13862_v19 = vpop.f32.mrb[150].mxu1 }
 0x220   : > { %v13793_v48 = vadd.f32 %v13792_v47, %v13723_v46  ;;  %v13794_v49 = vpop.f32.mrb[151].mxu0  ;;  %v13864_v50 = vpop.f32.mrb[151].mxu1 }
 0x222   : > { %v13863_v51 = vadd.f32 %v13862_v19, %v13793_v48 }
 0x223   : > { %v13932_v52 = vpop.f32.mrb[152].mxu0  ;;  %v14002_v53 = vpop.f32.mrb[152].mxu1 }
 0x224   : > { %v13933_v54 = vadd.f32 %v13932_v52, %v13863_v51  ;;  %v13934_v55 = vpop.f32.mrb[153].mxu0  ;;  %v14004_v56 = vpop.f32.mrb[153].mxu1 }
 0x226   : > { %v14003_v57 = vadd.f32 %v14002_v53, %v13933_v54 }
 0x227   : > { %v14072_v58 = vpop.f32.mrb[154].mxu0  ;;  %v14142_v59 = vpop.f32.mrb[154].mxu1 }
 0x228   : > { %v14073_v60 = vadd.f32 %v14072_v58, %v14003_v57  ;;  %v14074_v61 = vpop.f32.mrb[155].mxu0  ;;  %v14144_v62 = vpop.f32.mrb[155].mxu1 }
 0x22a   : > { %v14143_v63 = vadd.f32 %v14142_v59, %v14073_v60 }
 0x22b   : > { %v14212_v0 = vpop.f32.mrb[156].mxu0  ;;  %v14282_v1 = vpop.f32.mrb[156].mxu1 }
 0x22c   : > { %v14213_v2 = vadd.f32 %v14212_v0, %v14143_v63  ;;  %v14214_v3 = vpop.f32.mrb[157].mxu0  ;;  %v14284_v4 = vpop.f32.mrb[157].mxu1 }
 0x22e   : > { %v14283_v5 = vadd.f32 %v14282_v1, %v14213_v2 }
 0x22f   : > { %v14352_v6 = vpop.f32.mrb[158].mxu0  ;;  %v14422_v7 = vpop.f32.mrb[158].mxu1 }
 0x230   : > { %v14353_v8 = vadd.f32 %v14352_v6, %v14283_v5  ;;  %v14354_v9 = vpop.f32.mrb[159].mxu0  ;;  %v14424_v10 = vpop.f32.mrb[159].mxu1 }
 0x232   : > { %v14423_v11 = vadd.f32 %v14422_v7, %v14353_v8 }
 0x233   : > { %v14492_v12 = vpop.f32.mrb[160].mxu0  ;;  %v14562_v13 = vpop.f32.mrb[160].mxu1 }
 0x234   : > { %v14493_v14 = vadd.f32 %v14492_v12, %v14423_v11  ;;  %v14494_v15 = vpop.f32.mrb[161].mxu0  ;;  %v14564_v16 = vpop.f32.mrb[161].mxu1 }
 0x236   : > { %v14563_v17 = vadd.f32 %v14562_v13, %v14493_v14 }
 0x237   : > { %v14632_v18 = vpop.f32.mrb[162].mxu0  ;;  %v14702_v20 = vpop.f32.mrb[162].mxu1 }
 0x238   : > { %v14633_v21 = vadd.f32 %v14632_v18, %v14563_v17  ;;  %v14634_v22 = vpop.f32.mrb[163].mxu0  ;;  %v14704_v23 = vpop.f32.mrb[163].mxu1 }
 0x23a   : > { %v14703_v24 = vadd.f32 %v14702_v20, %v14633_v21 }
 0x23b   : > { %v14772_v25 = vpop.f32.mrb[164].mxu0  ;;  %v14842_v26 = vpop.f32.mrb[164].mxu1 }
 0x23c   : > { %v14773_v27 = vadd.f32 %v14772_v25, %v14703_v24  ;;  %v14774_v28 = vpop.f32.mrb[165].mxu0  ;;  %v14844_v29 = vpop.f32.mrb[165].mxu1 }
 0x23e   : > { %v14843_v30 = vadd.f32 %v14842_v26, %v14773_v27 }
 0x23f   : > { %v14912_v31 = vpop.f32.mrb[166].mxu0  ;;  %v14982_v32 = vpop.f32.mrb[166].mxu1 }
 0x240   : > { %v14913_v33 = vadd.f32 %v14912_v31, %v14843_v30  ;;  %v14914_v34 = vpop.f32.mrb[167].mxu0  ;;  %v14984_v35 = vpop.f32.mrb[167].mxu1 }
 0x242   : > { %v14983_v36 = vadd.f32 %v14982_v32, %v14913_v33 }
 0x243   : > { %v15052_v37 = vpop.f32.mrb[168].mxu0  ;;  %v15122_v38 = vpop.f32.mrb[168].mxu1 }
 0x244   : > { %v15053_v39 = vadd.f32 %v15052_v37, %v14983_v36  ;;  %v15054_v40 = vpop.f32.mrb[169].mxu0  ;;  %v15124_v41 = vpop.f32.mrb[169].mxu1 }
 0x246   : > { %v15123_v42 = vadd.f32 %v15122_v38, %v15053_v39 }
 0x247   : > { %v15192_v43 = vpop.f32.mrb[170].mxu0  ;;  %v15262_v44 = vpop.f32.mrb[170].mxu1 }
 0x248   : > { %v15193_v45 = vadd.f32 %v15192_v43, %v15123_v42  ;;  %v15194_v46 = vpop.f32.mrb[171].mxu0  ;;  %v15264_v47 = vpop.f32.mrb[171].mxu1 }
 0x24a   : > { %v15263_v19 = vadd.f32 %v15262_v44, %v15193_v45 }
 0x24b   : > { %v15332_v48 = vpop.f32.mrb[172].mxu0  ;;  %v15402_v49 = vpop.f32.mrb[172].mxu1 }
 0x24c   : > { %v15333_v50 = vadd.f32 %v15332_v48, %v15263_v19  ;;  %v15334_v51 = vpop.f32.mrb[173].mxu0  ;;  %v15404_v52 = vpop.f32.mrb[173].mxu1 }
 0x24e   : > { %v15403_v53 = vadd.f32 %v15402_v49, %v15333_v50 }
 0x24f   : > { %v15472_v54 = vpop.f32.mrb[174].mxu0  ;;  %v15542_v55 = vpop.f32.mrb[174].mxu1 }
 0x250   : > { %v15473_v56 = vadd.f32 %v15472_v54, %v15403_v53  ;;  %v15474_v57 = vpop.f32.mrb[175].mxu0  ;;  %v15544_v58 = vpop.f32.mrb[175].mxu1 }
 0x252   : > { %v15543_v59 = vadd.f32 %v15542_v55, %v15473_v56  ;;  %v187_v55 = vld [vmem:[#allocation2] sm:$0x3] }
 0x253   : > { %v15612_v60 = vpop.f32.mrb[176].mxu0  ;;  %v15682_v61 = vpop.f32.mrb[176].mxu1 }
 0x254   : > { %v15613_v62 = vadd.f32 %v15612_v60, %v15543_v59  ;;  %v15614_v63 = vpop.f32.mrb[177].mxu0  ;;  %v15684_v0 = vpop.f32.mrb[177].mxu1  ;;  %v17029_v59 = vld [vmem:[%s18092_s2] ss:$0 sm:$0xff] (!%p17028_p5) }
 0x256   : > { %v15683_v1 = vadd.f32 %v15682_v61, %v15613_v62 }
 0x257   : > { %v15752_v2 = vpop.f32.mrb[178].mxu0  ;;  %v15822_v3 = vpop.f32.mrb[178].mxu1 }
 0x258   : > { %v15753_v4 = vadd.f32 %v15752_v2, %v15683_v1  ;;  %v15754_v5 = vpop.f32.mrb[179].mxu0  ;;  %v15824_v6 = vpop.f32.mrb[179].mxu1 }
 0x25a   : > { %v15823_v7 = vadd.f32 %v15822_v3, %v15753_v4 }
 0x25b   : > { %v15892_v8 = vpop.f32.mrb[180].mxu0  ;;  %v15962_v9 = vpop.f32.mrb[180].mxu1 }
 0x25c   : > { %v15893_v10 = vadd.f32 %v15892_v8, %v15823_v7  ;;  %v15894_v11 = vpop.f32.mrb[181].mxu0  ;;  %v15964_v12 = vpop.f32.mrb[181].mxu1 }
 0x25e   : > { %v15963_v13 = vadd.f32 %v15962_v9, %v15893_v10 }
 0x25f   : > { %v16032_v14 = vpop.f32.mrb[182].mxu0  ;;  %v16102_v15 = vpop.f32.mrb[182].mxu1 }
 0x260   : > { %v16033_v16 = vadd.f32 %v16032_v14, %v15963_v13  ;;  %v16034_v17 = vpop.f32.mrb[183].mxu0  ;;  %v16104_v18 = vpop.f32.mrb[183].mxu1 }
 0x262   : > { %v16103_v20 = vadd.f32 %v16102_v15, %v16033_v16 }
 0x263   : > { %v16172_v21 = vpop.f32.mrb[184].mxu0  ;;  %v16242_v22 = vpop.f32.mrb[184].mxu1 }
 0x264   : > { %v16173_v23 = vadd.f32 %v16172_v21, %v16103_v20  ;;  %v16174_v24 = vpop.f32.mrb[185].mxu0  ;;  %v16244_v25 = vpop.f32.mrb[185].mxu1 }
 0x266   : > { %v16243_v26 = vadd.f32 %v16242_v22, %v16173_v23 }
 0x267   : > { %v16312_v27 = vpop.f32.mrb[186].mxu0  ;;  %v16382_v28 = vpop.f32.mrb[186].mxu1 }
 0x268   : > { %v16313_v29 = vadd.f32 %v16312_v27, %v16243_v26  ;;  %v16314_v30 = vpop.f32.mrb[187].mxu0  ;;  %v16384_v31 = vpop.f32.mrb[187].mxu1 }
 0x26a   : > { %v16383_v32 = vadd.f32 %v16382_v28, %v16313_v29 }
 0x26b   : > { %v16452_v33 = vpop.f32.mrb[188].mxu0  ;;  %v16522_v34 = vpop.f32.mrb[188].mxu1 }
 0x26c   : > { %v16453_v35 = vadd.f32 %v16452_v33, %v16383_v32  ;;  %v16454_v36 = vpop.f32.mrb[189].mxu0  ;;  %v16524_v37 = vpop.f32.mrb[189].mxu1 }
 0x26e   : > { %v16523_v38 = vadd.f32 %v16522_v34, %v16453_v35 }
 0x26f   : > { %v16592_v39 = vpop.f32.mrb[190].mxu0  ;;  %v16662_v40 = vpop.f32.mrb[190].mxu1 }
 0x270   : > { %v16593_v41 = vadd.f32 %v16592_v39, %v16523_v38  ;;  %v16594_v42 = vpop.f32.mrb[191].mxu0  ;;  %v16664_v43 = vpop.f32.mrb[191].mxu1 }
 0x272   : > { %v16663_v44 = vadd.f32 %v16662_v40, %v16593_v41 }
 0x273   : > { %v16732_v45 = vpop.f32.mrb[192].mxu0  ;;  %v16802_v46 = vpop.f32.mrb[192].mxu1 }
 0x274   : > { %v16733_v47 = vadd.f32 %v16732_v45, %v16663_v44  ;;  %v16734_v19 = vpop.f32.mrb[193].mxu0  ;;  %v16804_v48 = vpop.f32.mrb[193].mxu1 }
 0x276   : > { %v16803_v49 = vadd.f32 %v16802_v46, %v16733_v47 }
 0x277   : > { %v16872_v50 = vpop.f32.mrb[194].mxu0  ;;  %v16942_v51 = vpop.f32.mrb[194].mxu1 }
 0x278   : > { %v16873_v52 = vadd.f32 %v16872_v50, %v16803_v49  ;;  %v16874_v53 = vpop.f32.mrb[195].mxu0  ;;  %v16944_v54 = vpop.f32.mrb[195].mxu1  ;;  %16952 = sbr.rel (%p17028_p5) target bundleno = 649 (0x289), region = 40 }
 0x27a   : > { %v16943_v56 = vadd.f32 %v16942_v51, %v16873_v52 }
 0x27c   : > { %v16946_v57 = vadd.f32 %v16943_v56, %v187_v55 }
 0x27e   : > { %16948 = vst.msk [vmem:[#allocation2] sm:$0x3] %vm16947_vm1, %v16946_v57 }
 0x285   : > { %v16953_v58 = vld [vmem:[#allocation2] sm:$0x3] }
 0x286   : > { %v16961_v60 = vadd.f32 %v17029_v59, %v16953_v58 }
 0x288   : > { %16962 = vst.msk [vmem:[#allocation3] sm:$0x3] %vm16947_vm1, %v16961_v60 }
 0x289 PF: > { %p17038_p6 = scmp.eq.s32.totalorder %s17412_s13, 3  ;;  %s17385_s25 = smov [#allocation3]  }
 0x28a   : > { %s16970_s26 = sshll.u32 %s17385_s25, 4  ;;  %s16971_s26 = int_to_ptr.vmem [resolvable:$true] %s16970_s26 }
 0x28b   : > { %s17345_s27 = scalar_lea.vmem %s16971_s26, 32  ;;  %p17352_p10 = scmp.lt.s32.totalorder %s16971_s26, %s16971_s26 }
 0x28c   : > { %p17346_p7 = scmp.ne.s32.totalorder %s16971_s26, %s17345_s27  ;;  %p17353_p11 = scmp.lt.s32.totalorder %s17345_s27, %s17345_s27 }
 0x28e   : > { %p17347_p8 = pnand %p17346_p7, %p17038_p6  ;;  %p17354_p12 = por %p17353_p11, %p17352_p10 }
 0x290   : > { %p17348_p9 = pneg %p17347_p8 }
 0x292   : > { %p17355_p13 = pnand %p17354_p12, %p17348_p9 }
 0x294   : > { %17358 = shalt.err (!%p17355_p13)
}
 0x295   : > { %s17359_s30 = scalar_lea.hbm %s18093_s3, 32 }
 0x296   : > { %p17360_p0 = scmp.ne.s32.totalorder %s18093_s3, %s17359_s30  ;;  %p17365_p3 = scmp.lt.u32.totalorder %s17359_s30, %s18093_s3 }
 0x298   : > { %p17361_p1 = pnand %p17360_p0, %p17038_p6 }
 0x29a   : > { %p17362_p2 = pneg %p17361_p1 }
 0x29c   : > { %p17367_p4 = pnand %p17365_p3, %p17362_p2 }
 0x29e   : > { %17370 = shalt.err (!%p17367_p4)
}
 0x29f   : > { %17035 = dma.vmem_to_hbm [thread:$0]  (%p17038_p6), %s16971_s26, 32, %s18093_s3, [#allocation4]  }
 0x2a0   : > { %17376 = dma.done.wait (%p17038_p6), [#allocation4], 32  }
 0x2a1   : > { %17378 = vsyncadd (%p17038_p6), [#allocation4], 4294967264 }
 0x2a2 PF: > { %s14_s12 = sadd.s32 1, %s17381_s12  }
 0x2a3   : > { %p11_p5 = scmp.ge.s32.totalorder %s14_s12, 6  }
 0x2a5   :  { %13 = sbr.rel (!%p11_p5) target bundleno = 1 (0x1), region = 70 }
 0x2ac   :  { %16983 = vsyncpa [#allocation4], 1 }
 0x2ad   :  { %16985 = vsyncpa [#allocation4 + $0x1], 1 }

</bundles_post_ra>
